<compile_context>
chip_gen: v7x
topology: tpu7x:2x2x1
jax: 0.10.0
libtpu: 0.0.40
codegen_flags: <defaults>
</compile_context>

<pallas_src>
import functools

import jax
import jax.numpy as jnp
from jax import lax
from jax.experimental import pallas as pl
from jax.experimental.pallas import tpu as pltpu

_VMEM_LIMIT = 48 * 1024 * 1024   # fits v7x (64 MiB/TC), > default on v5e/v6e


def _pick_tile(n, target, granule):
    """Largest tile <= target that divides n and is a multiple of granule."""
    if n <= target:
        return n
    t = max((target // granule) * granule, granule)
    while t > granule and n % t != 0:
        t -= granule
    return t if n % t == 0 else n


def _mvn_stats(x_flat, eps=1e-5):
    """Per-(batch, channel) mean and 1/sqrt(var+eps) over flattened spatial.

    Matches torch .var(dim=2) (unbiased, n-1). Cheap streaming XLA pass;
    the full-spatial reduction cannot live inside a spatially tiled block.
    """
    n = x_flat.shape[1]
    mean = jnp.mean(x_flat, axis=1, keepdims=True)                       # (N,1,C)
    var = jnp.sum(jnp.square(x_flat - mean), axis=1, keepdims=True) / (n - 1.0)
    rstd = lax.rsqrt(var + eps)
    return mean, rstd


# --------------------------------------------------------------------------- #
# Kernel 1: hoisted style projections (G and H), tiled over HWs.
#   s_ref (1, tk, C) f32, stats (1,1,C), weights (C,C) bf16, biases (1,C) f32
#   outputs g_ref/h_ref (1, tk, C) bf16
# --------------------------------------------------------------------------- #
def style_proj_kernel(s_ref, mean_ref, rstd_ref,
                      wg_ref, bg_ref, wh_ref, bh_ref,
                      g_ref, h_ref):
    s = s_ref[0]                                          # (tk, C) f32
    sn = (s - mean_ref[0]) * rstd_ref[0]                  # mean/variance norm
    g = jnp.dot(sn.astype(jnp.bfloat16), wg_ref[...],
                preferred_element_type=jnp.float32) + bg_ref[...]
    h = jnp.dot(s.astype(jnp.bfloat16), wh_ref[...],
                preferred_element_type=jnp.float32) + bh_ref[...]
    g_ref[0] = g.astype(jnp.bfloat16)
    h_ref[0] = h.astype(jnp.bfloat16)


# --------------------------------------------------------------------------- #
# Kernel 2: flash-style SANet attention + out-conv + fused residual add(s).
# Grid (N, q_tiles, kv_tiles); kv innermost ('arbitrary').
# --------------------------------------------------------------------------- #
def sanet_attn_kernel(*refs, has_extra):
    if has_extra:
        (c_ref, e_ref, g_ref, h_ref, cm_ref, cr_ref,
         wf_ref, bf_ref, wo_ref, bo_ref,
         out_ref, fm_sc, m_sc, l_sc, acc_sc) = refs
    else:
        (c_ref, g_ref, h_ref, cm_ref, cr_ref,
         wf_ref, bf_ref, wo_ref, bo_ref,
         out_ref, fm_sc, m_sc, l_sc, acc_sc) = refs
        e_ref = None

    ki = pl.program_id(2)
    nk = pl.num_programs(2)

    @pl.when(ki == 0)
    def _init():
        # content projection F, computed once per q-tile (reused across kv)
        cn = (c_ref[0] - cm_ref[0]) * cr_ref[0]                      # (tq, C) f32
        fm = jnp.dot(cn.astype(jnp.bfloat16), wf_ref[...],
                     preferred_element_type=jnp.float32) + bf_ref[...]
        fm_sc[...] = fm.astype(jnp.bfloat16)
        m_sc[...] = jnp.full_like(m_sc, -jnp.inf)
        l_sc[...] = jnp.zeros_like(l_sc)
        acc_sc[...] = jnp.zeros_like(acc_sc)

    # scores for this kv tile: contract on C directly (no explicit G^T)
    s = lax.dot_general(fm_sc[...], g_ref[0],
                        dimension_numbers=(((1,), (1,)), ((), ())),
                        preferred_element_type=jnp.float32)          # (tq, tk)

    m_new = jnp.maximum(m_sc[...], jnp.max(s, axis=-1, keepdims=True))
    alpha = jnp.exp(m_sc[...] - m_new)
    p = jnp.exp(s - m_new)
    l_sc[...] = alpha * l_sc[...] + jnp.sum(p, axis=-1, keepdims=True)
    acc_sc[...] = alpha * acc_sc[...] + jnp.dot(
        p.astype(jnp.bfloat16), h_ref[0], preferred_element_type=jnp.float32)
    m_sc[...] = m_new

    @pl.when(ki == nk - 1)
    def _finalize():
        o = acc_sc[...] * pl.reciprocal(l_sc[...], approx=True)      # EUP recip
        o = jnp.dot(o.astype(jnp.bfloat16), wo_ref[...],
                    preferred_element_type=jnp.float32) + bo_ref[...]
        o = o + c_ref[0]                                             # residual
        if e_ref is not None:
            o = o + e_ref[0]           # fused "+ upsampled relu5_1" add
        out_ref[0] = o


def sanet_forward_flat(content_flat, style_flat, params, *,
                       q_tile, kv_tile, extra=None):
    """content/style: (N, HW, C) f32 (NHWC flattened). Returns (N, HWc, C) f32.

    If `extra` is given (N, HWc, C), it is added to the output inside the
    kernel finalize (fuses the `cs_r41 + upsample(cs_r51)` add).
    """
    N, HWc, C = content_flat.shape
    HWs = style_flat.shape[1]
    tq = _pick_tile(HWc, q_tile, 8)
    tk = _pick_tile(HWs, kv_tile, 128)
    nq, nk = HWc // tq, HWs // tk

    c_mean, c_rstd = _mvn_stats(content_flat)
    s_mean, s_rstd = _mvn_stats(style_flat)

    wf, bf = params["f"]
    wg, bg = params["g"]
    wh, bh = params["h"]
    wo, bo = params["out"]
    bf16 = jnp.bfloat16
    # conv weights are (Cout, Cin); transpose so kernels do x @ w; bf16 for MXU
    wf_t, wg_t = wf.T.astype(bf16), wg.T.astype(bf16)
    wh_t, wo_t = wh.T.astype(bf16), wo.T.astype(bf16)

    # ---- stage 1: style projections G, H (tiled over HWs, stored bf16) ----
    kv_spec2 = pl.BlockSpec((1, tk, C), lambda n, k: (n, k, 0))
    stat_spec2 = pl.BlockSpec((1, 1, C), lambda n, k: (n, 0, 0))
    w_spec2 = pl.BlockSpec((C, C), lambda n, k: (0, 0))
    b_spec2 = pl.BlockSpec((1, C), lambda n, k: (0, 0))
    gm, hm = pl.pallas_call(
        style_proj_kernel,
        out_shape=(jax.ShapeDtypeStruct((N, HWs, C), bf16),
                   jax.ShapeDtypeStruct((N, HWs, C), bf16)),
        grid=(N, nk),
        in_specs=[kv_spec2, stat_spec2, stat_spec2,
                  w_spec2, b_spec2, w_spec2, b_spec2],
        out_specs=[kv_spec2, kv_spec2],
        compiler_params=pltpu.CompilerParams(
            dimension_semantics=("parallel", "parallel"),
            vmem_limit_bytes=_VMEM_LIMIT),
    )(style_flat, s_mean, s_rstd, wg_t, bg, wh_t, bh)

    # ---- stage 2: tiled attention (online softmax) + out-conv + residual ----
    cs_spec = pl.BlockSpec((1, tq, C), lambda n, qi, ki: (n, qi, 0))
    kv_spec = pl.BlockSpec((1, tk, C), lambda n, qi, ki: (n, ki, 0))
    stat_spec = pl.BlockSpec((1, 1, C), lambda n, qi, ki: (n, 0, 0))
    w_spec = pl.BlockSpec((C, C), lambda n, qi, ki: (0, 0))
    b_spec = pl.BlockSpec((1, C), lambda n, qi, ki: (0, 0))

    in_specs = [cs_spec]
    args = [content_flat]
    if extra is not None:
        in_specs.append(cs_spec)
        args.append(extra)
    in_specs += [kv_spec, kv_spec, stat_spec, stat_spec,
                 w_spec, b_spec, w_spec, b_spec]
    args += [gm, hm, c_mean, c_rstd, wf_t, bf, wo_t, bo]

    out = pl.pallas_call(
        functools.partial(sanet_attn_kernel, has_extra=extra is not None),
        out_shape=jax.ShapeDtypeStruct((N, HWc, C), jnp.float32),
        grid=(N, nq, nk),
        in_specs=in_specs,
        out_specs=cs_spec,
        scratch_shapes=[pltpu.VMEM((tq, C), bf16),          # F (content proj)
                        pltpu.VMEM((tq, 1), jnp.float32),   # m (running max)
                        pltpu.VMEM((tq, 1), jnp.float32),   # l (running sum)
                        pltpu.VMEM((tq, C), jnp.float32)],  # acc
        compiler_params=pltpu.CompilerParams(
            dimension_semantics=("parallel", "parallel", "arbitrary"),
            vmem_limit_bytes=_VMEM_LIMIT),
    )(*args)
    return out


# --------------------------------------------------------------------------- #
# Kernel 3: 3x3 merge conv, one output row per grid step, no im2col in HBM.
# Halo rows come from three row-shifted BlockSpecs over the same padded array.
# --------------------------------------------------------------------------- #
def merge_kernel(r0_ref, r1_ref, r2_ref, w_ref, b_ref, out_ref, *, W):
    rows = (r0_ref, r1_ref, r2_ref)
    Cout = w_ref.shape[2]
    acc = jnp.zeros((W, Cout), jnp.float32)
    for t in range(9):
        ky, kx = divmod(t, 3)
        tap = rows[ky][0, 0, kx:kx + W, :]                       # (W, C) bf16
        acc = acc + jnp.dot(tap, w_ref[t],
                            preferred_element_type=jnp.float32)
    out_ref[0, 0] = acc + b_ref[...]


def merge_conv_forward_nhwc(x_nhwc, w_conv, b_conv):
    """x: (N, H, W, C) f32; w_conv: (Cout, Cin, 3, 3); b_conv: (Cout,)."""
    N, H, W, C = x_nhwc.shape
    Cout = w_conv.shape[0]
    Hp, Wp = H + 2, W + 2

    # ReflectionPad2d((1,1,1,1)); bf16 for the MXU (halves HBM traffic too)
    xpad = jnp.pad(x_nhwc, ((0, 0), (1, 1), (1, 1), (0, 0)),
                   mode="reflect").astype(jnp.bfloat16)
    # weight (Cout, Cin, 3, 3) -> (9, Cin, Cout), tap order ky-major then kx
    w_taps = jnp.transpose(w_conv, (2, 3, 1, 0)).reshape(9, C, Cout)
    w_taps = w_taps.astype(jnp.bfloat16)
    b_row = b_conv.reshape(1, Cout).astype(jnp.float32)

    def row_spec(k):
        return pl.BlockSpec((1, 1, Wp, C), lambda n, y: (n, y + k, 0, 0))

    out = pl.pallas_call(
        functools.partial(merge_kernel, W=W),
        out_shape=jax.ShapeDtypeStruct((N, H, W, Cout), jnp.float32),
        grid=(N, H),
        in_specs=[row_spec(0), row_spec(1), row_spec(2),
                  pl.BlockSpec((9, C, Cout), lambda n, y: (0, 0, 0)),
                  pl.BlockSpec((1, Cout), lambda n, y: (0, 0))],
        out_specs=pl.BlockSpec((1, 1, W, Cout), lambda n, y: (n, y, 0, 0)),
        compiler_params=pltpu.CompilerParams(
            dimension_semantics=("parallel", "parallel"),
            vmem_limit_bytes=_VMEM_LIMIT),
    )(xpad, xpad, xpad, w_taps, b_row)
    return out                                                  # (N, H, W, Cout)


# --------------------------------------------------------------------------- #
# Glue (pure data movement, plain JAX)
# --------------------------------------------------------------------------- #
def _nchw_to_flat(x):
    N, C, H, W = x.shape
    return jnp.transpose(x, (0, 2, 3, 1)).reshape(N, H * W, C)


# --------------------------------------------------------------------------- #
# Parameter initialization (deterministic, synthetic)
# --------------------------------------------------------------------------- #
def make_conv1x1_params(key, c):
    k1, k2 = jax.random.split(key)
    w = jax.random.normal(k1, (c, c), jnp.float32) * (1.0 / jnp.sqrt(c))
    b = jax.random.normal(k2, (1, c), jnp.float32) * 0.05
    return w, b


def make_sanet_params(key, c):
    keys = jax.random.split(key, 4)
    return {"f": make_conv1x1_params(keys[0], c),
            "g": make_conv1x1_params(keys[1], c),
            "h": make_conv1x1_params(keys[2], c),
            "out": make_conv1x1_params(keys[3], c)}


def make_transform_params(key, c):
    k1, k2, k3, k4 = jax.random.split(key, 4)
    w_merge = jax.random.normal(k3, (c, c, 3, 3), jnp.float32) * (1.0 / (3.0 * jnp.sqrt(c)))
    b_merge = jax.random.normal(k4, (c,), jnp.float32) * 0.05
    return {"sanet4_1": make_sanet_params(k1, c),
            "sanet5_1": make_sanet_params(k2, c),
            "merge_w": w_merge,
            "merge_b": b_merge}


# --------------------------------------------------------------------------- #
# Transform forward (Pallas path)
# --------------------------------------------------------------------------- #
@functools.partial(jax.jit, static_argnames=("q_tile", "kv_tile"))
def transform_forward(params, content4_1, style4_1, content5_1, style5_1,
                      q_tile=512, kv_tile=512):
    N, C, H4, W4 = content4_1.shape
    H5, W5 = content5_1.shape[2:]

    # single NCHW -> NHWC-flat conversion per input tensor
    c41, s41 = _nchw_to_flat(content4_1), _nchw_to_flat(style4_1)
    c51, s51 = _nchw_to_flat(content5_1), _nchw_to_flat(style5_1)

    # SANet on relu5_1 features
    cs51 = sanet_forward_flat(c51, s51, params["sanet5_1"],
                              q_tile=q_tile, kv_tile=kv_tile)      # (N, H5*W5, C)

    # nearest 2x upsample (+ nearest resize if needed), kept in NHWC
    up = cs51.reshape(N, H5, W5, C)
    up = jnp.repeat(jnp.repeat(up, 2, axis=1), 2, axis=2)
    if up.shape[1:3] != (H4, W4):
        hi = (jnp.arange(H4) * up.shape[1] // H4).astype(jnp.int32)
        wi = (jnp.arange(W4) * up.shape[2] // W4).astype(jnp.int32)
        up = up[:, hi][:, :, wi]
    up_flat = up.reshape(N, H4 * W4, C)

    # SANet on relu4_1 with the upsampled relu5_1 result fused into the residual
    merged = sanet_forward_flat(c41, s41, params["sanet4_1"],
                                q_tile=q_tile, kv_tile=kv_tile,
                                extra=up_flat)                     # (N, H4*W4, C)

    # reflection-padded 3x3 merge conv (in-kernel accumulation, no im2col)
    out_nhwc = merge_conv_forward_nhwc(merged.reshape(N, H4, W4, C),
                                       params["merge_w"], params["merge_b"])
    return jnp.transpose(out_nhwc, (0, 3, 1, 2))                   # NCHW


# --------------------------------------------------------------------------- #
# Pure-JAX f32 reference (mirrors the PyTorch module) for a tolerance check
# --------------------------------------------------------------------------- #
def _ref_mvn(x):
    N, C = x.shape[:2]
    flat = x.reshape(N, C, -1)
    mean = flat.mean(axis=2).reshape(N, C, 1, 1)
    var = flat.var(axis=2, ddof=1).reshape(N, C, 1, 1)
    return (x - mean) / jnp.sqrt(var + 1e-5)


def _ref_conv1x1(x, w, b):
    return jnp.einsum("nihw,oi->nohw", x, w) + b.reshape(1, -1, 1, 1)


def _ref_sanet(content, style, p):
    wf, bf = p["f"]; wg, bg = p["g"]; wh, bh = p["h"]; wo, bo = p["out"]
    Fq = _ref_conv1x1(_ref_mvn(content), wf, bf)
    G = _ref_conv1x1(_ref_mvn(style), wg, bg)
    Hh = _ref_conv1x1(style, wh, bh)
    b_, c, h, w = Fq.shape
    Fm = Fq.reshape(b_, c, h * w).transpose(0, 2, 1)
    Gm = G.reshape(b_, c, -1)
    S = jax.nn.softmax(jnp.einsum("bqc,bck->bqk", Fm, Gm), axis=-1)
    Hm = Hh.reshape(b_, c, -1)
    O = jnp.einsum("bck,bqk->bcq", Hm, S).reshape(b_, c, h, w)
    return _ref_conv1x1(O, wo, bo) + content


@jax.jit
def transform_reference(params, c41, s41, c51, s51):
    cs41 = _ref_sanet(c41, s41, params["sanet4_1"])
    cs51 = _ref_sanet(c51, s51, params["sanet5_1"])
    up = jnp.repeat(jnp.repeat(cs51, 2, axis=2), 2, axis=3)
    if up.shape != cs41.shape:
        Ht, Wt = cs41.shape[2:]
        hi = (jnp.arange(Ht) * up.shape[2] // Ht).astype(jnp.int32)
        wi = (jnp.arange(Wt) * up.shape[3] // Wt).astype(jnp.int32)
        up = up[:, :, hi][:, :, :, wi]
    x = cs41 + up
    xpad = jnp.pad(x, ((0, 0), (0, 0), (1, 1), (1, 1)), mode="reflect")
    y = lax.conv_general_dilated(xpad, params["merge_w"], (1, 1), "VALID",
                                 dimension_numbers=("NCHW", "OIHW", "NCHW"))
    return y + params["merge_b"].reshape(1, -1, 1, 1)


if __name__ == "__main__":
    key = jax.random.PRNGKey(0)
    kc4, ks4, kc5, ks5, kp = jax.random.split(key, 5)

    N, C = 2, 4
    H4, W4 = 16, 16
    H5, W5 = 8, 8

    content4_1 = jax.random.normal(kc4, (N, C, H4, W4), jnp.float32)
    style4_1 = jax.random.normal(ks4, (N, C, H4, W4), jnp.float32)
    content5_1 = jax.random.normal(kc5, (N, C, H5, W5), jnp.float32)
    style5_1 = jax.random.normal(ks5, (N, C, H5, W5), jnp.float32)

    params = make_transform_params(kp, C)

    # default tiles (single kv tile at this toy size)
    out = transform_forward(params, content4_1, style4_1, content5_1, style5_1)
    out = jax.block_until_ready(out)
    assert out.shape == (N, C, H4, W4), out.shape
    assert bool(jnp.all(jnp.isfinite(out)))

    # small tiles to exercise the multi-step online-softmax (flash) path
    out_tiled = transform_forward(params, content4_1, style4_1,
                                  content5_1, style5_1,
                                  q_tile=128, kv_tile=128)
    out_tiled = jax.block_until_ready(out_tiled)
    assert out_tiled.shape == (N, C, H4, W4)

    # tolerance check against the f32 reference (kernels use bf16 MXU operands)
    ref = transform_reference(params, content4_1, style4_1,
                              content5_1, style5_1)
    scale = float(jnp.max(jnp.abs(ref))) + 1e-6
    err_default = float(jnp.max(jnp.abs(out - ref))) / scale
    err_tiled = float(jnp.max(jnp.abs(out_tiled - ref))) / scale
    assert err_default < 5e-2 and err_tiled < 5e-2, (err_default, err_tiled)

    print("KERNEL_OK")
</pallas_src>

<mosaic_0001>
module attributes {stable_mosaic.version = 11 : i64} {
  func.func @sanet_attn_kernel(%arg0: i32, %arg1: i32, %arg2: i32, %arg3: memref<1x64x4xf32, #tpu.memory_space<vmem>>, %arg4: memref<1x64x4xbf16, #tpu.memory_space<vmem>>, %arg5: memref<1x64x4xbf16, #tpu.memory_space<vmem>>, %arg6: memref<1x1x4xf32, #tpu.memory_space<vmem>>, %arg7: memref<1x1x4xf32, #tpu.memory_space<vmem>>, %arg8: memref<4x4xbf16, #tpu.memory_space<vmem>>, %arg9: memref<1x4xf32, #tpu.memory_space<vmem>>, %arg10: memref<4x4xbf16, #tpu.memory_space<vmem>>, %arg11: memref<1x4xf32, #tpu.memory_space<vmem>>, %arg12: memref<1x64x4xf32, #tpu.memory_space<vmem>>, %arg13: memref<64x4xbf16, #tpu.memory_space<vmem>>, %arg14: memref<64x1xf32, #tpu.memory_space<vmem>>, %arg15: memref<64x1xf32, #tpu.memory_space<vmem>>, %arg16: memref<64x4xf32, #tpu.memory_space<vmem>>) attributes {dimension_semantics = [#tpu.dimension_semantics<parallel>, #tpu.dimension_semantics<parallel>, #tpu.dimension_semantics<arbitrary>], iteration_bounds = array<i64: 2, 1, 1>, scalar_prefetch = 0 : i64, scratch_operands = 4 : i64, tpu.core_type = #tpu.core_type<tc>, window_params = [{transform_indices = @transform_0, window_bounds = array<i64: 1, 64, 4>}, {transform_indices = @transform_1, window_bounds = array<i64: 1, 64, 4>}, {transform_indices = @transform_2, window_bounds = array<i64: 1, 64, 4>}, {transform_indices = @transform_3, window_bounds = array<i64: 1, 1, 4>}, {transform_indices = @transform_4, window_bounds = array<i64: 1, 1, 4>}, {pipeline_mode = #tpu.pipeline_mode<synchronous>, transform_indices = @transform_5, window_bounds = array<i64: 4, 4>}, {pipeline_mode = #tpu.pipeline_mode<synchronous>, transform_indices = @transform_6, window_bounds = array<i64: 1, 4>}, {pipeline_mode = #tpu.pipeline_mode<synchronous>, transform_indices = @transform_7, window_bounds = array<i64: 4, 4>}, {pipeline_mode = #tpu.pipeline_mode<synchronous>, transform_indices = @transform_8, window_bounds = array<i64: 1, 4>}, {transform_indices = @transform_9, window_bounds = array<i64: 1, 64, 4>}]} {
    %c0_i32 = arith.constant 0 : i32
    %0 = arith.cmpi eq, %arg2, %c0_i32 : i32
    %1 = arith.extui %0 : i1 to i32
    %c0_i32_0 = arith.constant 0 : i32
    %2 = arith.cmpi ne, %1, %c0_i32_0 : i32
    scf.if %2 {
      %c0_27 = arith.constant 0 : index
      %c0_28 = arith.constant 0 : index
      %c0_29 = arith.constant 0 : index
      %36 = vector.load %arg3[%c0_27, %c0_28, %c0_29] : memref<1x64x4xf32, #tpu.memory_space<vmem>>, vector<1x64x4xf32>
      %37 = vector.shape_cast %36 : vector<1x64x4xf32> to vector<64x4xf32>
      %c0_30 = arith.constant 0 : index
      %c0_31 = arith.constant 0 : index
      %c0_32 = arith.constant 0 : index
      %38 = vector.load %arg6[%c0_30, %c0_31, %c0_32] : memref<1x1x4xf32, #tpu.memory_space<vmem>>, vector<1x1x4xf32>
      %39 = vector.shape_cast %38 : vector<1x1x4xf32> to vector<1x4xf32>
      %40 = vector.broadcast %39 : vector<1x4xf32> to vector<64x4xf32>
      %41 = arith.subf %37, %40 : vector<64x4xf32>
      %c0_33 = arith.constant 0 : index
      %c0_34 = arith.constant 0 : index
      %c0_35 = arith.constant 0 : index
      %42 = vector.load %arg7[%c0_33, %c0_34, %c0_35] : memref<1x1x4xf32, #tpu.memory_space<vmem>>, vector<1x1x4xf32>
      %43 = vector.shape_cast %42 : vector<1x1x4xf32> to vector<1x4xf32>
      %44 = vector.broadcast %43 : vector<1x4xf32> to vector<64x4xf32>
      %45 = arith.mulf %41, %44 : vector<64x4xf32>
      %46 = arith.truncf %45 : vector<64x4xf32> to vector<64x4xbf16>
      %c0_36 = arith.constant 0 : index
      %c0_37 = arith.constant 0 : index
      %47 = vector.load %arg8[%c0_36, %c0_37] : memref<4x4xbf16, #tpu.memory_space<vmem>>, vector<4x4xbf16>
      %cst_38 = arith.constant dense<0.000000e+00> : vector<64x4xf32>
      %48 = tpu.matmul %46, %47, %cst_38 {dimension_numbers = #tpu.dot_dimension_numbers<[1], [0], [0], [1], [0, 0, 1, 1], [], []>} : vector<64x4xbf16>, vector<4x4xbf16>, vector<64x4xf32> -> vector<64x4xf32>
      %c0_39 = arith.constant 0 : index
      %c0_40 = arith.constant 0 : index
      %49 = vector.load %arg9[%c0_39, %c0_40] : memref<1x4xf32, #tpu.memory_space<vmem>>, vector<1x4xf32>
      %50 = vector.broadcast %49 : vector<1x4xf32> to vector<64x4xf32>
      %51 = arith.addf %48, %50 : vector<64x4xf32>
      %52 = arith.truncf %51 : vector<64x4xf32> to vector<64x4xbf16>
      %c0_41 = arith.constant 0 : index
      %c0_42 = arith.constant 0 : index
      %53 = vector.load %arg13[%c0_41, %c0_42] : memref<64x4xbf16, #tpu.memory_space<vmem>>, vector<64x4xbf16>
      tpu.vector_store %arg13[%c0_41, %c0_42], %52 {strides = array<i32>} : memref<64x4xbf16, #tpu.memory_space<vmem>>, vector<64x4xbf16>,
      %cst_43 = arith.constant 0xFF800000 : f32
      %54 = vector.broadcast %cst_43 : f32 to vector<64x1xf32>
      %c0_44 = arith.constant 0 : index
      %c0_45 = arith.constant 0 : index
      %55 = vector.load %arg14[%c0_44, %c0_45] : memref<64x1xf32, #tpu.memory_space<vmem>>, vector<64x1xf32>
      tpu.vector_store %arg14[%c0_44, %c0_45], %54 {strides = array<i32>} : memref<64x1xf32, #tpu.memory_space<vmem>>, vector<64x1xf32>,
      %cst_46 = arith.constant 0.000000e+00 : f32
      %56 = vector.broadcast %cst_46 : f32 to vector<64x1xf32>
      %c0_47 = arith.constant 0 : index
      %c0_48 = arith.constant 0 : index
      %57 = vector.load %arg15[%c0_47, %c0_48] : memref<64x1xf32, #tpu.memory_space<vmem>>, vector<64x1xf32>
      tpu.vector_store %arg15[%c0_47, %c0_48], %56 {strides = array<i32>} : memref<64x1xf32, #tpu.memory_space<vmem>>, vector<64x1xf32>,
      %cst_49 = arith.constant 0.000000e+00 : f32
      %58 = vector.broadcast %cst_49 : f32 to vector<64x4xf32>
      %c0_50 = arith.constant 0 : index
      %c0_51 = arith.constant 0 : index
      %59 = vector.load %arg16[%c0_50, %c0_51] : memref<64x4xf32, #tpu.memory_space<vmem>>, vector<64x4xf32>
      tpu.vector_store %arg16[%c0_50, %c0_51], %58 {strides = array<i32>} : memref<64x4xf32, #tpu.memory_space<vmem>>, vector<64x4xf32>,
    } else {
    }
    %c0 = arith.constant 0 : index
    %c0_1 = arith.constant 0 : index
    %3 = vector.load %arg13[%c0, %c0_1] : memref<64x4xbf16, #tpu.memory_space<vmem>>, vector<64x4xbf16>
    %c0_2 = arith.constant 0 : index
    %c0_3 = arith.constant 0 : index
    %c0_4 = arith.constant 0 : index
    %4 = vector.load %arg4[%c0_2, %c0_3, %c0_4] : memref<1x64x4xbf16, #tpu.memory_space<vmem>>, vector<1x64x4xbf16>
    %5 = vector.shape_cast %4 : vector<1x64x4xbf16> to vector<64x4xbf16>
    %cst = arith.constant dense<0.000000e+00> : vector<64x64xf32>
    %6 = tpu.matmul %3, %5, %cst {dimension_numbers = #tpu.dot_dimension_numbers<[1], [1], [0], [0], [0, 0, 1, 0], [], []>} : vector<64x4xbf16>, vector<64x4xbf16>, vector<64x64xf32> -> vector<64x64xf32>
    %c0_5 = arith.constant 0 : index
    %c0_6 = arith.constant 0 : index
    %7 = vector.load %arg14[%c0_5, %c0_6] : memref<64x1xf32, #tpu.memory_space<vmem>>, vector<64x1xf32>
    %cst_7 = arith.constant dense<0xFF800000> : vector<64xf32>
    %8 = vector.multi_reduction <maximumf>, %6, %cst_7 [1] : vector<64x64xf32> to vector<64xf32>
    %9 = vector.shape_cast %8 : vector<64xf32> to vector<64x1xf32>
    %10 = arith.maximumf %7, %9 : vector<64x1xf32>
    %c0_8 = arith.constant 0 : index
    %c0_9 = arith.constant 0 : index
    %11 = vector.load %arg14[%c0_8, %c0_9] : memref<64x1xf32, #tpu.memory_space<vmem>>, vector<64x1xf32>
    %12 = arith.subf %11, %10 : vector<64x1xf32>
    %13 = math.exp %12 : vector<64x1xf32>
    %14 = vector.broadcast %10 : vector<64x1xf32> to vector<64x64xf32>
    %15 = arith.subf %6, %14 : vector<64x64xf32>
    %16 = math.exp %15 : vector<64x64xf32>
    %c0_10 = arith.constant 0 : index
    %c0_11 = arith.constant 0 : index
    %17 = vector.load %arg15[%c0_10, %c0_11] : memref<64x1xf32, #tpu.memory_space<vmem>>, vector<64x1xf32>
    %18 = arith.mulf %13, %17 : vector<64x1xf32>
    %cst_12 = arith.constant dense<0.000000e+00> : vector<64xf32>
    %19 = vector.multi_reduction <add>, %16, %cst_12 [1] : vector<64x64xf32> to vector<64xf32>
    %20 = vector.shape_cast %19 : vector<64xf32> to vector<64x1xf32>
    %21 = arith.addf %18, %20 : vector<64x1xf32>
    %c0_13 = arith.constant 0 : index
    %c0_14 = arith.constant 0 : index
    %22 = vector.load %arg15[%c0_13, %c0_14] : memref<64x1xf32, #tpu.memory_space<vmem>>, vector<64x1xf32>
    tpu.vector_store %arg15[%c0_13, %c0_14], %21 {strides = array<i32>} : memref<64x1xf32, #tpu.memory_space<vmem>>, vector<64x1xf32>,
    %c0_15 = arith.constant 0 : index
    %c0_16 = arith.constant 0 : index
    %23 = vector.load %arg16[%c0_15, %c0_16] : memref<64x4xf32, #tpu.memory_space<vmem>>, vector<64x4xf32>
    %24 = vector.broadcast %13 : vector<64x1xf32> to vector<64x4xf32>
    %25 = arith.mulf %24, %23 : vector<64x4xf32>
    %26 = arith.truncf %16 : vector<64x64xf32> to vector<64x64xbf16>
    %c0_17 = arith.constant 0 : index
    %c0_18 = arith.constant 0 : index
    %c0_19 = arith.constant 0 : index
    %27 = vector.load %arg5[%c0_17, %c0_18, %c0_19] : memref<1x64x4xbf16, #tpu.memory_space<vmem>>, vector<1x64x4xbf16>
    %28 = vector.shape_cast %27 : vector<1x64x4xbf16> to vector<64x4xbf16>
    %cst_20 = arith.constant dense<0.000000e+00> : vector<64x4xf32>
    %29 = tpu.matmul %26, %28, %cst_20 {dimension_numbers = #tpu.dot_dimension_numbers<[1], [0], [0], [1], [0, 0, 1, 1], [], []>} : vector<64x64xbf16>, vector<64x4xbf16>, vector<64x4xf32> -> vector<64x4xf32>
    %30 = arith.addf %25, %29 : vector<64x4xf32>
    %c0_21 = arith.constant 0 : index
    %c0_22 = arith.constant 0 : index
    %31 = vector.load %arg16[%c0_21, %c0_22] : memref<64x4xf32, #tpu.memory_space<vmem>>, vector<64x4xf32>
    tpu.vector_store %arg16[%c0_21, %c0_22], %30 {strides = array<i32>} : memref<64x4xf32, #tpu.memory_space<vmem>>, vector<64x4xf32>,
    %c0_23 = arith.constant 0 : index
    %c0_24 = arith.constant 0 : index
    %32 = vector.load %arg14[%c0_23, %c0_24] : memref<64x1xf32, #tpu.memory_space<vmem>>, vector<64x1xf32>
    tpu.vector_store %arg14[%c0_23, %c0_24], %10 {strides = array<i32>} : memref<64x1xf32, #tpu.memory_space<vmem>>, vector<64x1xf32>,
    %c0_i32_25 = arith.constant 0 : i32
    %33 = arith.cmpi eq, %arg2, %c0_i32_25 : i32
    %34 = arith.extui %33 : i1 to i32
    %c0_i32_26 = arith.constant 0 : i32
    %35 = arith.cmpi ne, %34, %c0_i32_26 : i32
    scf.if %35 {
      %c0_27 = arith.constant 0 : index
      %c0_28 = arith.constant 0 : index
      %36 = vector.load %arg16[%c0_27, %c0_28] : memref<64x4xf32, #tpu.memory_space<vmem>>, vector<64x4xf32>
      %c0_29 = arith.constant 0 : index
      %c0_30 = arith.constant 0 : index
      %37 = vector.load %arg15[%c0_29, %c0_30] : memref<64x1xf32, #tpu.memory_space<vmem>>, vector<64x1xf32>
      %38 = tpu.reciprocal %37 {approx = true} : vector<64x1xf32> -> vector<64x1xf32>
      %39 = vector.broadcast %38 : vector<64x1xf32> to vector<64x4xf32>
      %40 = arith.mulf %36, %39 : vector<64x4xf32>
      %41 = arith.truncf %40 : vector<64x4xf32> to vector<64x4xbf16>
      %c0_31 = arith.constant 0 : index
      %c0_32 = arith.constant 0 : index
      %42 = vector.load %arg10[%c0_31, %c0_32] : memref<4x4xbf16, #tpu.memory_space<vmem>>, vector<4x4xbf16>
      %cst_33 = arith.constant dense<0.000000e+00> : vector<64x4xf32>
      %43 = tpu.matmul %41, %42, %cst_33 {dimension_numbers = #tpu.dot_dimension_numbers<[1], [0], [0], [1], [0, 0, 1, 1], [], []>} : vector<64x4xbf16>, vector<4x4xbf16>, vector<64x4xf32> -> vector<64x4xf32>
      %c0_34 = arith.constant 0 : index
      %c0_35 = arith.constant 0 : index
      %44 = vector.load %arg11[%c0_34, %c0_35] : memref<1x4xf32, #tpu.memory_space<vmem>>, vector<1x4xf32>
      %45 = vector.broadcast %44 : vector<1x4xf32> to vector<64x4xf32>
      %46 = arith.addf %43, %45 : vector<64x4xf32>
      %c0_36 = arith.constant 0 : index
      %c0_37 = arith.constant 0 : index
      %c0_38 = arith.constant 0 : index
      %47 = vector.load %arg3[%c0_36, %c0_37, %c0_38] : memref<1x64x4xf32, #tpu.memory_space<vmem>>, vector<1x64x4xf32>
      %48 = vector.shape_cast %47 : vector<1x64x4xf32> to vector<64x4xf32>
      %49 = arith.addf %46, %48 : vector<64x4xf32>
      %c0_39 = arith.constant 0 : index
      %c0_40 = arith.constant 0 : index
      %c0_41 = arith.constant 0 : index
      %50 = vector.load %arg12[%c0_39, %c0_40, %c0_41] : memref<1x64x4xf32, #tpu.memory_space<vmem>>, vector<1x64x4xf32>
      %51 = vector.shape_cast %50 : vector<1x64x4xf32> to vector<64x4xf32>
      %52 = vector.shape_cast %49 : vector<64x4xf32> to vector<1x64x4xf32>
      tpu.vector_store %arg12[%c0_39, %c0_40, %c0_41], %52 {strides = array<i32>} : memref<1x64x4xf32, #tpu.memory_space<vmem>>, vector<1x64x4xf32>,
    } else {
    }
    return
  }
  func.func @transform_0(%arg0: i32, %arg1: i32, %arg2: i32) -> (i32, i32, i32) {
    %c0_i32 = arith.constant 0 : i32
    %c0_i32_0 = arith.constant 0 : i32
    return %arg0, %arg1, %c0_i32 : i32, i32, i32
  }
  func.func @transform_1(%arg0: i32, %arg1: i32, %arg2: i32) -> (i32, i32, i32) {
    %c0_i32 = arith.constant 0 : i32
    %c0_i32_0 = arith.constant 0 : i32
    return %arg0, %arg2, %c0_i32 : i32, i32, i32
  }
  func.func @transform_2(%arg0: i32, %arg1: i32, %arg2: i32) -> (i32, i32, i32) {
    %c0_i32 = arith.constant 0 : i32
    %c0_i32_0 = arith.constant 0 : i32
    return %arg0, %arg2, %c0_i32 : i32, i32, i32
  }
  func.func @transform_3(%arg0: i32, %arg1: i32, %arg2: i32) -> (i32, i32, i32) {
    %c0_i32 = arith.constant 0 : i32
    %c0_i32_0 = arith.constant 0 : i32
    %c0_i32_1 = arith.constant 0 : i32
    return %arg0, %c0_i32, %c0_i32_0 : i32, i32, i32
  }
  func.func @transform_4(%arg0: i32, %arg1: i32, %arg2: i32) -> (i32, i32, i32) {
    %c0_i32 = arith.constant 0 : i32
    %c0_i32_0 = arith.constant 0 : i32
    %c0_i32_1 = arith.constant 0 : i32
    return %arg0, %c0_i32, %c0_i32_0 : i32, i32, i32
  }
  func.func @transform_5(%arg0: i32, %arg1: i32, %arg2: i32) -> (i32, i32) {
    %c0_i32 = arith.constant 0 : i32
    %c0_i32_0 = arith.constant 0 : i32
    %c0_i32_1 = arith.constant 0 : i32
    return %c0_i32, %c0_i32_0 : i32, i32
  }
  func.func @transform_6(%arg0: i32, %arg1: i32, %arg2: i32) -> (i32, i32) {
    %c0_i32 = arith.constant 0 : i32
    %c0_i32_0 = arith.constant 0 : i32
    %c0_i32_1 = arith.constant 0 : i32
    return %c0_i32, %c0_i32_0 : i32, i32
  }
  func.func @transform_7(%arg0: i32, %arg1: i32, %arg2: i32) -> (i32, i32) {
    %c0_i32 = arith.constant 0 : i32
    %c0_i32_0 = arith.constant 0 : i32
    %c0_i32_1 = arith.constant 0 : i32
    return %c0_i32, %c0_i32_0 : i32, i32
  }
  func.func @transform_8(%arg0: i32, %arg1: i32, %arg2: i32) -> (i32, i32) {
    %c0_i32 = arith.constant 0 : i32
    %c0_i32_0 = arith.constant 0 : i32
    %c0_i32_1 = arith.constant 0 : i32
    return %c0_i32, %c0_i32_0 : i32, i32
  }
  func.func @transform_9(%arg0: i32, %arg1: i32, %arg2: i32) -> (i32, i32, i32) {
    %c0_i32 = arith.constant 0 : i32
    %c0_i32_0 = arith.constant 0 : i32
    return %arg0, %arg1, %c0_i32 : i32, i32, i32
  }
}

module attributes {stable_mosaic.version = 11 : i64} {
  func.func @style_proj_kernel(%arg0: i32, %arg1: i32, %arg2: memref<1x64x4xf32, #tpu.memory_space<vmem>>, %arg3: memref<1x1x4xf32, #tpu.memory_space<vmem>>, %arg4: memref<1x1x4xf32, #tpu.memory_space<vmem>>, %arg5: memref<4x4xbf16, #tpu.memory_space<vmem>>, %arg6: memref<1x4xf32, #tpu.memory_space<vmem>>, %arg7: memref<4x4xbf16, #tpu.memory_space<vmem>>, %arg8: memref<1x4xf32, #tpu.memory_space<vmem>>, %arg9: memref<1x64x4xbf16, #tpu.memory_space<vmem>>, %arg10: memref<1x64x4xbf16, #tpu.memory_space<vmem>>) attributes {dimension_semantics = [#tpu.dimension_semantics<parallel>, #tpu.dimension_semantics<parallel>], iteration_bounds = array<i64: 2, 1>, scalar_prefetch = 0 : i64, scratch_operands = 0 : i64, tpu.core_type = #tpu.core_type<tc>, window_params = [{transform_indices = @transform_0, window_bounds = array<i64: 1, 64, 4>}, {transform_indices = @transform_1, window_bounds = array<i64: 1, 1, 4>}, {transform_indices = @transform_2, window_bounds = array<i64: 1, 1, 4>}, {pipeline_mode = #tpu.pipeline_mode<synchronous>, transform_indices = @transform_3, window_bounds = array<i64: 4, 4>}, {pipeline_mode = #tpu.pipeline_mode<synchronous>, transform_indices = @transform_4, window_bounds = array<i64: 1, 4>}, {pipeline_mode = #tpu.pipeline_mode<synchronous>, transform_indices = @transform_5, window_bounds = array<i64: 4, 4>}, {pipeline_mode = #tpu.pipeline_mode<synchronous>, transform_indices = @transform_6, window_bounds = array<i64: 1, 4>}, {transform_indices = @transform_7, window_bounds = array<i64: 1, 64, 4>}, {transform_indices = @transform_8, window_bounds = array<i64: 1, 64, 4>}]} {
    %c0 = arith.constant 0 : index
    %c0_0 = arith.constant 0 : index
    %c0_1 = arith.constant 0 : index
    %0 = vector.load %arg2[%c0, %c0_0, %c0_1] : memref<1x64x4xf32, #tpu.memory_space<vmem>>, vector<1x64x4xf32>
    %1 = vector.shape_cast %0 : vector<1x64x4xf32> to vector<64x4xf32>
    %c0_2 = arith.constant 0 : index
    %c0_3 = arith.constant 0 : index
    %c0_4 = arith.constant 0 : index
    %2 = vector.load %arg3[%c0_2, %c0_3, %c0_4] : memref<1x1x4xf32, #tpu.memory_space<vmem>>, vector<1x1x4xf32>
    %3 = vector.shape_cast %2 : vector<1x1x4xf32> to vector<1x4xf32>
    %4 = vector.broadcast %3 : vector<1x4xf32> to vector<64x4xf32>
    %5 = arith.subf %1, %4 : vector<64x4xf32>
    %c0_5 = arith.constant 0 : index
    %c0_6 = arith.constant 0 : index
    %c0_7 = arith.constant 0 : index
    %6 = vector.load %arg4[%c0_5, %c0_6, %c0_7] : memref<1x1x4xf32, #tpu.memory_space<vmem>>, vector<1x1x4xf32>
    %7 = vector.shape_cast %6 : vector<1x1x4xf32> to vector<1x4xf32>
    %8 = vector.broadcast %7 : vector<1x4xf32> to vector<64x4xf32>
    %9 = arith.mulf %5, %8 : vector<64x4xf32>
    %10 = arith.truncf %9 : vector<64x4xf32> to vector<64x4xbf16>
    %c0_8 = arith.constant 0 : index
    %c0_9 = arith.constant 0 : index
    %11 = vector.load %arg5[%c0_8, %c0_9] : memref<4x4xbf16, #tpu.memory_space<vmem>>, vector<4x4xbf16>
    %cst = arith.constant dense<0.000000e+00> : vector<64x4xf32>
    %12 = tpu.matmul %10, %11, %cst {dimension_numbers = #tpu.dot_dimension_numbers<[1], [0], [0], [1], [0, 0, 1, 1], [], []>} : vector<64x4xbf16>, vector<4x4xbf16>, vector<64x4xf32> -> vector<64x4xf32>
    %c0_10 = arith.constant 0 : index
    %c0_11 = arith.constant 0 : index
    %13 = vector.load %arg6[%c0_10, %c0_11] : memref<1x4xf32, #tpu.memory_space<vmem>>, vector<1x4xf32>
    %14 = vector.broadcast %13 : vector<1x4xf32> to vector<64x4xf32>
    %15 = arith.addf %12, %14 : vector<64x4xf32>
    %16 = arith.truncf %1 : vector<64x4xf32> to vector<64x4xbf16>
    %c0_12 = arith.constant 0 : index
    %c0_13 = arith.constant 0 : index
    %17 = vector.load %arg7[%c0_12, %c0_13] : memref<4x4xbf16, #tpu.memory_space<vmem>>, vector<4x4xbf16>
    %cst_14 = arith.constant dense<0.000000e+00> : vector<64x4xf32>
    %18 = tpu.matmul %16, %17, %cst_14 {dimension_numbers = #tpu.dot_dimension_numbers<[1], [0], [0], [1], [0, 0, 1, 1], [], []>} : vector<64x4xbf16>, vector<4x4xbf16>, vector<64x4xf32> -> vector<64x4xf32>
    %c0_15 = arith.constant 0 : index
    %c0_16 = arith.constant 0 : index
    %19 = vector.load %arg8[%c0_15, %c0_16] : memref<1x4xf32, #tpu.memory_space<vmem>>, vector<1x4xf32>
    %20 = vector.broadcast %19 : vector<1x4xf32> to vector<64x4xf32>
    %21 = arith.addf %18, %20 : vector<64x4xf32>
    %22 = arith.truncf %15 : vector<64x4xf32> to vector<64x4xbf16>
    %c0_17 = arith.constant 0 : index
    %c0_18 = arith.constant 0 : index
    %c0_19 = arith.constant 0 : index
    %23 = vector.load %arg9[%c0_17, %c0_18, %c0_19] : memref<1x64x4xbf16, #tpu.memory_space<vmem>>, vector<1x64x4xbf16>
    %24 = vector.shape_cast %23 : vector<1x64x4xbf16> to vector<64x4xbf16>
    %25 = vector.shape_cast %22 : vector<64x4xbf16> to vector<1x64x4xbf16>
    tpu.vector_store %arg9[%c0_17, %c0_18, %c0_19], %25 {strides = array<i32>} : memref<1x64x4xbf16, #tpu.memory_space<vmem>>, vector<1x64x4xbf16>,
    %26 = arith.truncf %21 : vector<64x4xf32> to vector<64x4xbf16>
    %c0_20 = arith.constant 0 : index
    %c0_21 = arith.constant 0 : index
    %c0_22 = arith.constant 0 : index
    %27 = vector.load %arg10[%c0_20, %c0_21, %c0_22] : memref<1x64x4xbf16, #tpu.memory_space<vmem>>, vector<1x64x4xbf16>
    %28 = vector.shape_cast %27 : vector<1x64x4xbf16> to vector<64x4xbf16>
    %29 = vector.shape_cast %26 : vector<64x4xbf16> to vector<1x64x4xbf16>
    tpu.vector_store %arg10[%c0_20, %c0_21, %c0_22], %29 {strides = array<i32>} : memref<1x64x4xbf16, #tpu.memory_space<vmem>>, vector<1x64x4xbf16>,
    return
  }
  func.func @transform_0(%arg0: i32, %arg1: i32) -> (i32, i32, i32) {
    %c0_i32 = arith.constant 0 : i32
    %c0_i32_0 = arith.constant 0 : i32
    return %arg0, %arg1, %c0_i32 : i32, i32, i32
  }
  func.func @transform_1(%arg0: i32, %arg1: i32) -> (i32, i32, i32) {
    %c0_i32 = arith.constant 0 : i32
    %c0_i32_0 = arith.constant 0 : i32
    %c0_i32_1 = arith.constant 0 : i32
    return %arg0, %c0_i32, %c0_i32_0 : i32, i32, i32
  }
  func.func @transform_2(%arg0: i32, %arg1: i32) -> (i32, i32, i32) {
    %c0_i32 = arith.constant 0 : i32
    %c0_i32_0 = arith.constant 0 : i32
    %c0_i32_1 = arith.constant 0 : i32
    return %arg0, %c0_i32, %c0_i32_0 : i32, i32, i32
  }
  func.func @transform_3(%arg0: i32, %arg1: i32) -> (i32, i32) {
    %c0_i32 = arith.constant 0 : i32
    %c0_i32_0 = arith.constant 0 : i32
    %c0_i32_1 = arith.constant 0 : i32
    return %c0_i32, %c0_i32_0 : i32, i32
  }
  func.func @transform_4(%arg0: i32, %arg1: i32) -> (i32, i32) {
    %c0_i32 = arith.constant 0 : i32
    %c0_i32_0 = arith.constant 0 : i32
    %c0_i32_1 = arith.constant 0 : i32
    return %c0_i32, %c0_i32_0 : i32, i32
  }
  func.func @transform_5(%arg0: i32, %arg1: i32) -> (i32, i32) {
    %c0_i32 = arith.constant 0 : i32
    %c0_i32_0 = arith.constant 0 : i32
    %c0_i32_1 = arith.constant 0 : i32
    return %c0_i32, %c0_i32_0 : i32, i32
  }
  func.func @transform_6(%arg0: i32, %arg1: i32) -> (i32, i32) {
    %c0_i32 = arith.constant 0 : i32
    %c0_i32_0 = arith.constant 0 : i32
    %c0_i32_1 = arith.constant 0 : i32
    return %c0_i32, %c0_i32_0 : i32, i32
  }
  func.func @transform_7(%arg0: i32, %arg1: i32) -> (i32, i32, i32) {
    %c0_i32 = arith.constant 0 : i32
    %c0_i32_0 = arith.constant 0 : i32
    return %arg0, %arg1, %c0_i32 : i32, i32, i32
  }
  func.func @transform_8(%arg0: i32, %arg1: i32) -> (i32, i32, i32) {
    %c0_i32 = arith.constant 0 : i32
    %c0_i32_0 = arith.constant 0 : i32
    return %arg0, %arg1, %c0_i32 : i32, i32, i32
  }
}

module attributes {stable_mosaic.version = 11 : i64} {
  func.func @style_proj_kernel(%arg0: i32, %arg1: i32, %arg2: memref<1x256x4xf32, #tpu.memory_space<vmem>>, %arg3: memref<1x1x4xf32, #tpu.memory_space<vmem>>, %arg4: memref<1x1x4xf32, #tpu.memory_space<vmem>>, %arg5: memref<4x4xbf16, #tpu.memory_space<vmem>>, %arg6: memref<1x4xf32, #tpu.memory_space<vmem>>, %arg7: memref<4x4xbf16, #tpu.memory_space<vmem>>, %arg8: memref<1x4xf32, #tpu.memory_space<vmem>>, %arg9: memref<1x256x4xbf16, #tpu.memory_space<vmem>>, %arg10: memref<1x256x4xbf16, #tpu.memory_space<vmem>>) attributes {dimension_semantics = [#tpu.dimension_semantics<parallel>, #tpu.dimension_semantics<parallel>], iteration_bounds = array<i64: 2, 1>, scalar_prefetch = 0 : i64, scratch_operands = 0 : i64, tpu.core_type = #tpu.core_type<tc>, window_params = [{transform_indices = @transform_0, window_bounds = array<i64: 1, 256, 4>}, {transform_indices = @transform_1, window_bounds = array<i64: 1, 1, 4>}, {transform_indices = @transform_2, window_bounds = array<i64: 1, 1, 4>}, {pipeline_mode = #tpu.pipeline_mode<synchronous>, transform_indices = @transform_3, window_bounds = array<i64: 4, 4>}, {pipeline_mode = #tpu.pipeline_mode<synchronous>, transform_indices = @transform_4, window_bounds = array<i64: 1, 4>}, {pipeline_mode = #tpu.pipeline_mode<synchronous>, transform_indices = @transform_5, window_bounds = array<i64: 4, 4>}, {pipeline_mode = #tpu.pipeline_mode<synchronous>, transform_indices = @transform_6, window_bounds = array<i64: 1, 4>}, {transform_indices = @transform_7, window_bounds = array<i64: 1, 256, 4>}, {transform_indices = @transform_8, window_bounds = array<i64: 1, 256, 4>}]} {
    %c0 = arith.constant 0 : index
    %c0_0 = arith.constant 0 : index
    %c0_1 = arith.constant 0 : index
    %0 = vector.load %arg2[%c0, %c0_0, %c0_1] : memref<1x256x4xf32, #tpu.memory_space<vmem>>, vector<1x256x4xf32>
    %1 = vector.shape_cast %0 : vector<1x256x4xf32> to vector<256x4xf32>
    %c0_2 = arith.constant 0 : index
    %c0_3 = arith.constant 0 : index
    %c0_4 = arith.constant 0 : index
    %2 = vector.load %arg3[%c0_2, %c0_3, %c0_4] : memref<1x1x4xf32, #tpu.memory_space<vmem>>, vector<1x1x4xf32>
    %3 = vector.shape_cast %2 : vector<1x1x4xf32> to vector<1x4xf32>
    %4 = vector.broadcast %3 : vector<1x4xf32> to vector<256x4xf32>
    %5 = arith.subf %1, %4 : vector<256x4xf32>
    %c0_5 = arith.constant 0 : index
    %c0_6 = arith.constant 0 : index
    %c0_7 = arith.constant 0 : index
    %6 = vector.load %arg4[%c0_5, %c0_6, %c0_7] : memref<1x1x4xf32, #tpu.memory_space<vmem>>, vector<1x1x4xf32>
    %7 = vector.shape_cast %6 : vector<1x1x4xf32> to vector<1x4xf32>
    %8 = vector.broadcast %7 : vector<1x4xf32> to vector<256x4xf32>
    %9 = arith.mulf %5, %8 : vector<256x4xf32>
    %10 = arith.truncf %9 : vector<256x4xf32> to vector<256x4xbf16>
    %c0_8 = arith.constant 0 : index
    %c0_9 = arith.constant 0 : index
    %11 = vector.load %arg5[%c0_8, %c0_9] : memref<4x4xbf16, #tpu.memory_space<vmem>>, vector<4x4xbf16>
    %cst = arith.constant dense<0.000000e+00> : vector<256x4xf32>
    %12 = tpu.matmul %10, %11, %cst {dimension_numbers = #tpu.dot_dimension_numbers<[1], [0], [0], [1], [0, 0, 1, 1], [], []>} : vector<256x4xbf16>, vector<4x4xbf16>, vector<256x4xf32> -> vector<256x4xf32>
    %c0_10 = arith.constant 0 : index
    %c0_11 = arith.constant 0 : index
    %13 = vector.load %arg6[%c0_10, %c0_11] : memref<1x4xf32, #tpu.memory_space<vmem>>, vector<1x4xf32>
    %14 = vector.broadcast %13 : vector<1x4xf32> to vector<256x4xf32>
    %15 = arith.addf %12, %14 : vector<256x4xf32>
    %16 = arith.truncf %1 : vector<256x4xf32> to vector<256x4xbf16>
    %c0_12 = arith.constant 0 : index
    %c0_13 = arith.constant 0 : index
    %17 = vector.load %arg7[%c0_12, %c0_13] : memref<4x4xbf16, #tpu.memory_space<vmem>>, vector<4x4xbf16>
    %cst_14 = arith.constant dense<0.000000e+00> : vector<256x4xf32>
    %18 = tpu.matmul %16, %17, %cst_14 {dimension_numbers = #tpu.dot_dimension_numbers<[1], [0], [0], [1], [0, 0, 1, 1], [], []>} : vector<256x4xbf16>, vector<4x4xbf16>, vector<256x4xf32> -> vector<256x4xf32>
    %c0_15 = arith.constant 0 : index
    %c0_16 = arith.constant 0 : index
    %19 = vector.load %arg8[%c0_15, %c0_16] : memref<1x4xf32, #tpu.memory_space<vmem>>, vector<1x4xf32>
    %20 = vector.broadcast %19 : vector<1x4xf32> to vector<256x4xf32>
    %21 = arith.addf %18, %20 : vector<256x4xf32>
    %22 = arith.truncf %15 : vector<256x4xf32> to vector<256x4xbf16>
    %c0_17 = arith.constant 0 : index
    %c0_18 = arith.constant 0 : index
    %c0_19 = arith.constant 0 : index
    %23 = vector.load %arg9[%c0_17, %c0_18, %c0_19] : memref<1x256x4xbf16, #tpu.memory_space<vmem>>, vector<1x256x4xbf16>
    %24 = vector.shape_cast %23 : vector<1x256x4xbf16> to vector<256x4xbf16>
    %25 = vector.shape_cast %22 : vector<256x4xbf16> to vector<1x256x4xbf16>
    tpu.vector_store %arg9[%c0_17, %c0_18, %c0_19], %25 {strides = array<i32>} : memref<1x256x4xbf16, #tpu.memory_space<vmem>>, vector<1x256x4xbf16>,
    %26 = arith.truncf %21 : vector<256x4xf32> to vector<256x4xbf16>
    %c0_20 = arith.constant 0 : index
    %c0_21 = arith.constant 0 : index
    %c0_22 = arith.constant 0 : index
    %27 = vector.load %arg10[%c0_20, %c0_21, %c0_22] : memref<1x256x4xbf16, #tpu.memory_space<vmem>>, vector<1x256x4xbf16>
    %28 = vector.shape_cast %27 : vector<1x256x4xbf16> to vector<256x4xbf16>
    %29 = vector.shape_cast %26 : vector<256x4xbf16> to vector<1x256x4xbf16>
    tpu.vector_store %arg10[%c0_20, %c0_21, %c0_22], %29 {strides = array<i32>} : memref<1x256x4xbf16, #tpu.memory_space<vmem>>, vector<1x256x4xbf16>,
    return
  }
  func.func @transform_0(%arg0: i32, %arg1: i32) -> (i32, i32, i32) {
    %c0_i32 = arith.constant 0 : i32
    %c0_i32_0 = arith.constant 0 : i32
    return %arg0, %arg1, %c0_i32 : i32, i32, i32
  }
  func.func @transform_1(%arg0: i32, %arg1: i32) -> (i32, i32, i32) {
    %c0_i32 = arith.constant 0 : i32
    %c0_i32_0 = arith.constant 0 : i32
    %c0_i32_1 = arith.constant 0 : i32
    return %arg0, %c0_i32, %c0_i32_0 : i32, i32, i32
  }
  func.func @transform_2(%arg0: i32, %arg1: i32) -> (i32, i32, i32) {
    %c0_i32 = arith.constant 0 : i32
    %c0_i32_0 = arith.constant 0 : i32
    %c0_i32_1 = arith.constant 0 : i32
    return %arg0, %c0_i32, %c0_i32_0 : i32, i32, i32
  }
  func.func @transform_3(%arg0: i32, %arg1: i32) -> (i32, i32) {
    %c0_i32 = arith.constant 0 : i32
    %c0_i32_0 = arith.constant 0 : i32
    %c0_i32_1 = arith.constant 0 : i32
    return %c0_i32, %c0_i32_0 : i32, i32
  }
  func.func @transform_4(%arg0: i32, %arg1: i32) -> (i32, i32) {
    %c0_i32 = arith.constant 0 : i32
    %c0_i32_0 = arith.constant 0 : i32
    %c0_i32_1 = arith.constant 0 : i32
    return %c0_i32, %c0_i32_0 : i32, i32
  }
  func.func @transform_5(%arg0: i32, %arg1: i32) -> (i32, i32) {
    %c0_i32 = arith.constant 0 : i32
    %c0_i32_0 = arith.constant 0 : i32
    %c0_i32_1 = arith.constant 0 : i32
    return %c0_i32, %c0_i32_0 : i32, i32
  }
  func.func @transform_6(%arg0: i32, %arg1: i32) -> (i32, i32) {
    %c0_i32 = arith.constant 0 : i32
    %c0_i32_0 = arith.constant 0 : i32
    %c0_i32_1 = arith.constant 0 : i32
    return %c0_i32, %c0_i32_0 : i32, i32
  }
  func.func @transform_7(%arg0: i32, %arg1: i32) -> (i32, i32, i32) {
    %c0_i32 = arith.constant 0 : i32
    %c0_i32_0 = arith.constant 0 : i32
    return %arg0, %arg1, %c0_i32 : i32, i32, i32
  }
  func.func @transform_8(%arg0: i32, %arg1: i32) -> (i32, i32, i32) {
    %c0_i32 = arith.constant 0 : i32
    %c0_i32_0 = arith.constant 0 : i32
    return %arg0, %arg1, %c0_i32 : i32, i32, i32
  }
}

module attributes {stable_mosaic.version = 11 : i64} {
  func.func @sanet_attn_kernel(%arg0: i32, %arg1: i32, %arg2: i32, %arg3: memref<1x256x4xf32, #tpu.memory_space<vmem>>, %arg4: memref<1x256x4xf32, #tpu.memory_space<vmem>>, %arg5: memref<1x256x4xbf16, #tpu.memory_space<vmem>>, %arg6: memref<1x256x4xbf16, #tpu.memory_space<vmem>>, %arg7: memref<1x1x4xf32, #tpu.memory_space<vmem>>, %arg8: memref<1x1x4xf32, #tpu.memory_space<vmem>>, %arg9: memref<4x4xbf16, #tpu.memory_space<vmem>>, %arg10: memref<1x4xf32, #tpu.memory_space<vmem>>, %arg11: memref<4x4xbf16, #tpu.memory_space<vmem>>, %arg12: memref<1x4xf32, #tpu.memory_space<vmem>>, %arg13: memref<1x256x4xf32, #tpu.memory_space<vmem>>, %arg14: memref<256x4xbf16, #tpu.memory_space<vmem>>, %arg15: memref<256x1xf32, #tpu.memory_space<vmem>>, %arg16: memref<256x1xf32, #tpu.memory_space<vmem>>, %arg17: memref<256x4xf32, #tpu.memory_space<vmem>>) attributes {dimension_semantics = [#tpu.dimension_semantics<parallel>, #tpu.dimension_semantics<parallel>, #tpu.dimension_semantics<arbitrary>], iteration_bounds = array<i64: 2, 1, 1>, scalar_prefetch = 0 : i64, scratch_operands = 4 : i64, tpu.core_type = #tpu.core_type<tc>, window_params = [{transform_indices = @transform_0, window_bounds = array<i64: 1, 256, 4>}, {transform_indices = @transform_1, window_bounds = array<i64: 1, 256, 4>}, {transform_indices = @transform_2, window_bounds = array<i64: 1, 256, 4>}, {transform_indices = @transform_3, window_bounds = array<i64: 1, 256, 4>}, {transform_indices = @transform_4, window_bounds = array<i64: 1, 1, 4>}, {transform_indices = @transform_5, window_bounds = array<i64: 1, 1, 4>}, {pipeline_mode = #tpu.pipeline_mode<synchronous>, transform_indices = @transform_6, window_bounds = array<i64: 4, 4>}, {pipeline_mode = #tpu.pipeline_mode<synchronous>, transform_indices = @transform_7, window_bounds = array<i64: 1, 4>}, {pipeline_mode = #tpu.pipeline_mode<synchronous>, transform_indices = @transform_8, window_bounds = array<i64: 4, 4>}, {pipeline_mode = #tpu.pipeline_mode<synchronous>, transform_indices = @transform_9, window_bounds = array<i64: 1, 4>}, {transform_indices = @transform_10, window_bounds = array<i64: 1, 256, 4>}]} {
    %c0_i32 = arith.constant 0 : i32
    %0 = arith.cmpi eq, %arg2, %c0_i32 : i32
    %1 = arith.extui %0 : i1 to i32
    %c0_i32_0 = arith.constant 0 : i32
    %2 = arith.cmpi ne, %1, %c0_i32_0 : i32
    scf.if %2 {
      %c0_27 = arith.constant 0 : index
      %c0_28 = arith.constant 0 : index
      %c0_29 = arith.constant 0 : index
      %36 = vector.load %arg3[%c0_27, %c0_28, %c0_29] : memref<1x256x4xf32, #tpu.memory_space<vmem>>, vector<1x256x4xf32>
      %37 = vector.shape_cast %36 : vector<1x256x4xf32> to vector<256x4xf32>
      %c0_30 = arith.constant 0 : index
      %c0_31 = arith.constant 0 : index
      %c0_32 = arith.constant 0 : index
      %38 = vector.load %arg7[%c0_30, %c0_31, %c0_32] : memref<1x1x4xf32, #tpu.memory_space<vmem>>, vector<1x1x4xf32>
      %39 = vector.shape_cast %38 : vector<1x1x4xf32> to vector<1x4xf32>
      %40 = vector.broadcast %39 : vector<1x4xf32> to vector<256x4xf32>
      %41 = arith.subf %37, %40 : vector<256x4xf32>
      %c0_33 = arith.constant 0 : index
      %c0_34 = arith.constant 0 : index
      %c0_35 = arith.constant 0 : index
      %42 = vector.load %arg8[%c0_33, %c0_34, %c0_35] : memref<1x1x4xf32, #tpu.memory_space<vmem>>, vector<1x1x4xf32>
      %43 = vector.shape_cast %42 : vector<1x1x4xf32> to vector<1x4xf32>
      %44 = vector.broadcast %43 : vector<1x4xf32> to vector<256x4xf32>
      %45 = arith.mulf %41, %44 : vector<256x4xf32>
      %46 = arith.truncf %45 : vector<256x4xf32> to vector<256x4xbf16>
      %c0_36 = arith.constant 0 : index
      %c0_37 = arith.constant 0 : index
      %47 = vector.load %arg9[%c0_36, %c0_37] : memref<4x4xbf16, #tpu.memory_space<vmem>>, vector<4x4xbf16>
      %cst_38 = arith.constant dense<0.000000e+00> : vector<256x4xf32>
      %48 = tpu.matmul %46, %47, %cst_38 {dimension_numbers = #tpu.dot_dimension_numbers<[1], [0], [0], [1], [0, 0, 1, 1], [], []>} : vector<256x4xbf16>, vector<4x4xbf16>, vector<256x4xf32> -> vector<256x4xf32>
      %c0_39 = arith.constant 0 : index
      %c0_40 = arith.constant 0 : index
      %49 = vector.load %arg10[%c0_39, %c0_40] : memref<1x4xf32, #tpu.memory_space<vmem>>, vector<1x4xf32>
      %50 = vector.broadcast %49 : vector<1x4xf32> to vector<256x4xf32>
      %51 = arith.addf %48, %50 : vector<256x4xf32>
      %52 = arith.truncf %51 : vector<256x4xf32> to vector<256x4xbf16>
      %c0_41 = arith.constant 0 : index
      %c0_42 = arith.constant 0 : index
      %53 = vector.load %arg14[%c0_41, %c0_42] : memref<256x4xbf16, #tpu.memory_space<vmem>>, vector<256x4xbf16>
      tpu.vector_store %arg14[%c0_41, %c0_42], %52 {strides = array<i32>} : memref<256x4xbf16, #tpu.memory_space<vmem>>, vector<256x4xbf16>,
      %cst_43 = arith.constant 0xFF800000 : f32
      %54 = vector.broadcast %cst_43 : f32 to vector<256x1xf32>
      %c0_44 = arith.constant 0 : index
      %c0_45 = arith.constant 0 : index
      %55 = vector.load %arg15[%c0_44, %c0_45] : memref<256x1xf32, #tpu.memory_space<vmem>>, vector<256x1xf32>
      tpu.vector_store %arg15[%c0_44, %c0_45], %54 {strides = array<i32>} : memref<256x1xf32, #tpu.memory_space<vmem>>, vector<256x1xf32>,
      %cst_46 = arith.constant 0.000000e+00 : f32
      %56 = vector.broadcast %cst_46 : f32 to vector<256x1xf32>
      %c0_47 = arith.constant 0 : index
      %c0_48 = arith.constant 0 : index
      %57 = vector.load %arg16[%c0_47, %c0_48] : memref<256x1xf32, #tpu.memory_space<vmem>>, vector<256x1xf32>
      tpu.vector_store %arg16[%c0_47, %c0_48], %56 {strides = array<i32>} : memref<256x1xf32, #tpu.memory_space<vmem>>, vector<256x1xf32>,
      %cst_49 = arith.constant 0.000000e+00 : f32
      %58 = vector.broadcast %cst_49 : f32 to vector<256x4xf32>
      %c0_50 = arith.constant 0 : index
      %c0_51 = arith.constant 0 : index
      %59 = vector.load %arg17[%c0_50, %c0_51] : memref<256x4xf32, #tpu.memory_space<vmem>>, vector<256x4xf32>
      tpu.vector_store %arg17[%c0_50, %c0_51], %58 {strides = array<i32>} : memref<256x4xf32, #tpu.memory_space<vmem>>, vector<256x4xf32>,
    } else {
    }
    %c0 = arith.constant 0 : index
    %c0_1 = arith.constant 0 : index
    %3 = vector.load %arg14[%c0, %c0_1] : memref<256x4xbf16, #tpu.memory_space<vmem>>, vector<256x4xbf16>
    %c0_2 = arith.constant 0 : index
    %c0_3 = arith.constant 0 : index
    %c0_4 = arith.constant 0 : index
    %4 = vector.load %arg5[%c0_2, %c0_3, %c0_4] : memref<1x256x4xbf16, #tpu.memory_space<vmem>>, vector<1x256x4xbf16>
    %5 = vector.shape_cast %4 : vector<1x256x4xbf16> to vector<256x4xbf16>
    %cst = arith.constant dense<0.000000e+00> : vector<256x256xf32>
    %6 = tpu.matmul %3, %5, %cst {dimension_numbers = #tpu.dot_dimension_numbers<[1], [1], [0], [0], [0, 0, 1, 0], [], []>} : vector<256x4xbf16>, vector<256x4xbf16>, vector<256x256xf32> -> vector<256x256xf32>
    %c0_5 = arith.constant 0 : index
    %c0_6 = arith.constant 0 : index
    %7 = vector.load %arg15[%c0_5, %c0_6] : memref<256x1xf32, #tpu.memory_space<vmem>>, vector<256x1xf32>
    %cst_7 = arith.constant dense<0xFF800000> : vector<256xf32>
    %8 = vector.multi_reduction <maximumf>, %6, %cst_7 [1] : vector<256x256xf32> to vector<256xf32>
    %9 = vector.shape_cast %8 : vector<256xf32> to vector<256x1xf32>
    %10 = arith.maximumf %7, %9 : vector<256x1xf32>
    %c0_8 = arith.constant 0 : index
    %c0_9 = arith.constant 0 : index
    %11 = vector.load %arg15[%c0_8, %c0_9] : memref<256x1xf32, #tpu.memory_space<vmem>>, vector<256x1xf32>
    %12 = arith.subf %11, %10 : vector<256x1xf32>
    %13 = math.exp %12 : vector<256x1xf32>
    %14 = vector.broadcast %10 : vector<256x1xf32> to vector<256x256xf32>
    %15 = arith.subf %6, %14 : vector<256x256xf32>
    %16 = math.exp %15 : vector<256x256xf32>
    %c0_10 = arith.constant 0 : index
    %c0_11 = arith.constant 0 : index
    %17 = vector.load %arg16[%c0_10, %c0_11] : memref<256x1xf32, #tpu.memory_space<vmem>>, vector<256x1xf32>
    %18 = arith.mulf %13, %17 : vector<256x1xf32>
    %cst_12 = arith.constant dense<0.000000e+00> : vector<256xf32>
    %19 = vector.multi_reduction <add>, %16, %cst_12 [1] : vector<256x256xf32> to vector<256xf32>
    %20 = vector.shape_cast %19 : vector<256xf32> to vector<256x1xf32>
    %21 = arith.addf %18, %20 : vector<256x1xf32>
    %c0_13 = arith.constant 0 : index
    %c0_14 = arith.constant 0 : index
    %22 = vector.load %arg16[%c0_13, %c0_14] : memref<256x1xf32, #tpu.memory_space<vmem>>, vector<256x1xf32>
    tpu.vector_store %arg16[%c0_13, %c0_14], %21 {strides = array<i32>} : memref<256x1xf32, #tpu.memory_space<vmem>>, vector<256x1xf32>,
    %c0_15 = arith.constant 0 : index
    %c0_16 = arith.constant 0 : index
    %23 = vector.load %arg17[%c0_15, %c0_16] : memref<256x4xf32, #tpu.memory_space<vmem>>, vector<256x4xf32>
    %24 = vector.broadcast %13 : vector<256x1xf32> to vector<256x4xf32>
    %25 = arith.mulf %24, %23 : vector<256x4xf32>
    %26 = arith.truncf %16 : vector<256x256xf32> to vector<256x256xbf16>
    %c0_17 = arith.constant 0 : index
    %c0_18 = arith.constant 0 : index
    %c0_19 = arith.constant 0 : index
    %27 = vector.load %arg6[%c0_17, %c0_18, %c0_19] : memref<1x256x4xbf16, #tpu.memory_space<vmem>>, vector<1x256x4xbf16>
    %28 = vector.shape_cast %27 : vector<1x256x4xbf16> to vector<256x4xbf16>
    %cst_20 = arith.constant dense<0.000000e+00> : vector<256x4xf32>
    %29 = tpu.matmul %26, %28, %cst_20 {dimension_numbers = #tpu.dot_dimension_numbers<[1], [0], [0], [1], [0, 0, 1, 1], [], []>} : vector<256x256xbf16>, vector<256x4xbf16>, vector<256x4xf32> -> vector<256x4xf32>
    %30 = arith.addf %25, %29 : vector<256x4xf32>
    %c0_21 = arith.constant 0 : index
    %c0_22 = arith.constant 0 : index
    %31 = vector.load %arg17[%c0_21, %c0_22] : memref<256x4xf32, #tpu.memory_space<vmem>>, vector<256x4xf32>
    tpu.vector_store %arg17[%c0_21, %c0_22], %30 {strides = array<i32>} : memref<256x4xf32, #tpu.memory_space<vmem>>, vector<256x4xf32>,
    %c0_23 = arith.constant 0 : index
    %c0_24 = arith.constant 0 : index
    %32 = vector.load %arg15[%c0_23, %c0_24] : memref<256x1xf32, #tpu.memory_space<vmem>>, vector<256x1xf32>
    tpu.vector_store %arg15[%c0_23, %c0_24], %10 {strides = array<i32>} : memref<256x1xf32, #tpu.memory_space<vmem>>, vector<256x1xf32>,
    %c0_i32_25 = arith.constant 0 : i32
    %33 = arith.cmpi eq, %arg2, %c0_i32_25 : i32
    %34 = arith.extui %33 : i1 to i32
    %c0_i32_26 = arith.constant 0 : i32
    %35 = arith.cmpi ne, %34, %c0_i32_26 : i32
    scf.if %35 {
      %c0_27 = arith.constant 0 : index
      %c0_28 = arith.constant 0 : index
      %36 = vector.load %arg17[%c0_27, %c0_28] : memref<256x4xf32, #tpu.memory_space<vmem>>, vector<256x4xf32>
      %c0_29 = arith.constant 0 : index
      %c0_30 = arith.constant 0 : index
      %37 = vector.load %arg16[%c0_29, %c0_30] : memref<256x1xf32, #tpu.memory_space<vmem>>, vector<256x1xf32>
      %38 = tpu.reciprocal %37 {approx = true} : vector<256x1xf32> -> vector<256x1xf32>
      %39 = vector.broadcast %38 : vector<256x1xf32> to vector<256x4xf32>
      %40 = arith.mulf %36, %39 : vector<256x4xf32>
      %41 = arith.truncf %40 : vector<256x4xf32> to vector<256x4xbf16>
      %c0_31 = arith.constant 0 : index
      %c0_32 = arith.constant 0 : index
      %42 = vector.load %arg11[%c0_31, %c0_32] : memref<4x4xbf16, #tpu.memory_space<vmem>>, vector<4x4xbf16>
      %cst_33 = arith.constant dense<0.000000e+00> : vector<256x4xf32>
      %43 = tpu.matmul %41, %42, %cst_33 {dimension_numbers = #tpu.dot_dimension_numbers<[1], [0], [0], [1], [0, 0, 1, 1], [], []>} : vector<256x4xbf16>, vector<4x4xbf16>, vector<256x4xf32> -> vector<256x4xf32>
      %c0_34 = arith.constant 0 : index
      %c0_35 = arith.constant 0 : index
      %44 = vector.load %arg12[%c0_34, %c0_35] : memref<1x4xf32, #tpu.memory_space<vmem>>, vector<1x4xf32>
      %45 = vector.broadcast %44 : vector<1x4xf32> to vector<256x4xf32>
      %46 = arith.addf %43, %45 : vector<256x4xf32>
      %c0_36 = arith.constant 0 : index
      %c0_37 = arith.constant 0 : index
      %c0_38 = arith.constant 0 : index
      %47 = vector.load %arg3[%c0_36, %c0_37, %c0_38] : memref<1x256x4xf32, #tpu.memory_space<vmem>>, vector<1x256x4xf32>
      %48 = vector.shape_cast %47 : vector<1x256x4xf32> to vector<256x4xf32>
      %49 = arith.addf %46, %48 : vector<256x4xf32>
      %c0_39 = arith.constant 0 : index
      %c0_40 = arith.constant 0 : index
      %c0_41 = arith.constant 0 : index
      %50 = vector.load %arg4[%c0_39, %c0_40, %c0_41] : memref<1x256x4xf32, #tpu.memory_space<vmem>>, vector<1x256x4xf32>
      %51 = vector.shape_cast %50 : vector<1x256x4xf32> to vector<256x4xf32>
      %52 = arith.addf %49, %51 : vector<256x4xf32>
      %c0_42 = arith.constant 0 : index
      %c0_43 = arith.constant 0 : index
      %c0_44 = arith.constant 0 : index
      %53 = vector.load %arg13[%c0_42, %c0_43, %c0_44] : memref<1x256x4xf32, #tpu.memory_space<vmem>>, vector<1x256x4xf32>
      %54 = vector.shape_cast %53 : vector<1x256x4xf32> to vector<256x4xf32>
      %55 = vector.shape_cast %52 : vector<256x4xf32> to vector<1x256x4xf32>
      tpu.vector_store %arg13[%c0_42, %c0_43, %c0_44], %55 {strides = array<i32>} : memref<1x256x4xf32, #tpu.memory_space<vmem>>, vector<1x256x4xf32>,
    } else {
    }
    return
  }
  func.func @transform_0(%arg0: i32, %arg1: i32, %arg2: i32) -> (i32, i32, i32) {
    %c0_i32 = arith.constant 0 : i32
    %c0_i32_0 = arith.constant 0 : i32
    return %arg0, %arg1, %c0_i32 : i32, i32, i32
  }
  func.func @transform_1(%arg0: i32, %arg1: i32, %arg2: i32) -> (i32, i32, i32) {
    %c0_i32 = arith.constant 0 : i32
    %c0_i32_0 = arith.constant 0 : i32
    return %arg0, %arg1, %c0_i32 : i32, i32, i32
  }
  func.func @transform_2(%arg0: i32, %arg1: i32, %arg2: i32) -> (i32, i32, i32) {
    %c0_i32 = arith.constant 0 : i32
    %c0_i32_0 = arith.constant 0 : i32
    return %arg0, %arg2, %c0_i32 : i32, i32, i32
  }
  func.func @transform_3(%arg0: i32, %arg1: i32, %arg2: i32) -> (i32, i32, i32) {
    %c0_i32 = arith.constant 0 : i32
    %c0_i32_0 = arith.constant 0 : i32
    return %arg0, %arg2, %c0_i32 : i32, i32, i32
  }
  func.func @transform_4(%arg0: i32, %arg1: i32, %arg2: i32) -> (i32, i32, i32) {
    %c0_i32 = arith.constant 0 : i32
    %c0_i32_0 = arith.constant 0 : i32
    %c0_i32_1 = arith.constant 0 : i32
    return %arg0, %c0_i32, %c0_i32_0 : i32, i32, i32
  }
  func.func @transform_5(%arg0: i32, %arg1: i32, %arg2: i32) -> (i32, i32, i32) {
    %c0_i32 = arith.constant 0 : i32
    %c0_i32_0 = arith.constant 0 : i32
    %c0_i32_1 = arith.constant 0 : i32
    return %arg0, %c0_i32, %c0_i32_0 : i32, i32, i32
  }
  func.func @transform_6(%arg0: i32, %arg1: i32, %arg2: i32) -> (i32, i32) {
    %c0_i32 = arith.constant 0 : i32
    %c0_i32_0 = arith.constant 0 : i32
    %c0_i32_1 = arith.constant 0 : i32
    return %c0_i32, %c0_i32_0 : i32, i32
  }
  func.func @transform_7(%arg0: i32, %arg1: i32, %arg2: i32) -> (i32, i32) {
    %c0_i32 = arith.constant 0 : i32
    %c0_i32_0 = arith.constant 0 : i32
    %c0_i32_1 = arith.constant 0 : i32
    return %c0_i32, %c0_i32_0 : i32, i32
  }
  func.func @transform_8(%arg0: i32, %arg1: i32, %arg2: i32) -> (i32, i32) {
    %c0_i32 = arith.constant 0 : i32
    %c0_i32_0 = arith.constant 0 : i32
    %c0_i32_1 = arith.constant 0 : i32
    return %c0_i32, %c0_i32_0 : i32, i32
  }
  func.func @transform_9(%arg0: i32, %arg1: i32, %arg2: i32) -> (i32, i32) {
    %c0_i32 = arith.constant 0 : i32
    %c0_i32_0 = arith.constant 0 : i32
    %c0_i32_1 = arith.constant 0 : i32
    return %c0_i32, %c0_i32_0 : i32, i32
  }
  func.func @transform_10(%arg0: i32, %arg1: i32, %arg2: i32) -> (i32, i32, i32) {
    %c0_i32 = arith.constant 0 : i32
    %c0_i32_0 = arith.constant 0 : i32
    return %arg0, %arg1, %c0_i32 : i32, i32, i32
  }
}

module attributes {stable_mosaic.version = 11 : i64} {
  func.func @merge_kernel(%arg0: i32, %arg1: i32, %arg2: memref<1x1x18x4xbf16, #tpu.memory_space<vmem>>, %arg3: memref<1x1x18x4xbf16, #tpu.memory_space<vmem>>, %arg4: memref<1x1x18x4xbf16, #tpu.memory_space<vmem>>, %arg5: memref<9x4x4xbf16, #tpu.memory_space<vmem>>, %arg6: memref<1x4xf32, #tpu.memory_space<vmem>>, %arg7: memref<1x1x16x4xf32, #tpu.memory_space<vmem>>) attributes {dimension_semantics = [#tpu.dimension_semantics<parallel>, #tpu.dimension_semantics<parallel>], iteration_bounds = array<i64: 2, 16>, scalar_prefetch = 0 : i64, scratch_operands = 0 : i64, tpu.core_type = #tpu.core_type<tc>, window_params = [{transform_indices = @transform_0, window_bounds = array<i64: 1, 1, 18, 4>}, {transform_indices = @transform_1, window_bounds = array<i64: 1, 1, 18, 4>}, {transform_indices = @transform_2, window_bounds = array<i64: 1, 1, 18, 4>}, {pipeline_mode = #tpu.pipeline_mode<synchronous>, transform_indices = @transform_3, window_bounds = array<i64: 9, 4, 4>}, {pipeline_mode = #tpu.pipeline_mode<synchronous>, transform_indices = @transform_4, window_bounds = array<i64: 1, 4>}, {transform_indices = @transform_5, window_bounds = array<i64: 1, 1, 16, 4>}]} {
    %cst = arith.constant 0.000000e+00 : f32
    %0 = vector.broadcast %cst : f32 to vector<16x4xf32>
    %c0 = arith.constant 0 : index
    %c0_0 = arith.constant 0 : index
    %c0_1 = arith.constant 0 : index
    %c0_2 = arith.constant 0 : index
    %1 = vector.load %arg2[%c0, %c0_0, %c0_1, %c0_2] : memref<1x1x18x4xbf16, #tpu.memory_space<vmem>>, vector<1x1x16x4xbf16>
    %2 = vector.shape_cast %1 : vector<1x1x16x4xbf16> to vector<16x4xbf16>
    %c0_3 = arith.constant 0 : index
    %c0_4 = arith.constant 0 : index
    %c0_5 = arith.constant 0 : index
    %3 = vector.load %arg5[%c0_3, %c0_4, %c0_5] : memref<9x4x4xbf16, #tpu.memory_space<vmem>>, vector<1x4x4xbf16>
    %4 = vector.shape_cast %3 : vector<1x4x4xbf16> to vector<4x4xbf16>
    %cst_6 = arith.constant dense<0.000000e+00> : vector<16x4xf32>
    %5 = tpu.matmul %2, %4, %cst_6 {dimension_numbers = #tpu.dot_dimension_numbers<[1], [0], [0], [1], [0, 0, 1, 1], [], []>} : vector<16x4xbf16>, vector<4x4xbf16>, vector<16x4xf32> -> vector<16x4xf32>
    %6 = arith.addf %0, %5 : vector<16x4xf32>
    %c0_7 = arith.constant 0 : index
    %c0_8 = arith.constant 0 : index
    %c1 = arith.constant 1 : index
    %c0_9 = arith.constant 0 : index
    %7 = vector.load %arg2[%c0_7, %c0_8, %c1, %c0_9] : memref<1x1x18x4xbf16, #tpu.memory_space<vmem>>, vector<1x1x16x4xbf16>
    %8 = vector.shape_cast %7 : vector<1x1x16x4xbf16> to vector<16x4xbf16>
    %c1_10 = arith.constant 1 : index
    %c0_11 = arith.constant 0 : index
    %c0_12 = arith.constant 0 : index
    %9 = vector.load %arg5[%c1_10, %c0_11, %c0_12] : memref<9x4x4xbf16, #tpu.memory_space<vmem>>, vector<1x4x4xbf16>
    %10 = vector.shape_cast %9 : vector<1x4x4xbf16> to vector<4x4xbf16>
    %cst_13 = arith.constant dense<0.000000e+00> : vector<16x4xf32>
    %11 = tpu.matmul %8, %10, %cst_13 {dimension_numbers = #tpu.dot_dimension_numbers<[1], [0], [0], [1], [0, 0, 1, 1], [], []>} : vector<16x4xbf16>, vector<4x4xbf16>, vector<16x4xf32> -> vector<16x4xf32>
    %12 = arith.addf %6, %11 : vector<16x4xf32>
    %c0_14 = arith.constant 0 : index
    %c0_15 = arith.constant 0 : index
    %c2 = arith.constant 2 : index
    %c0_16 = arith.constant 0 : index
    %13 = vector.load %arg2[%c0_14, %c0_15, %c2, %c0_16] : memref<1x1x18x4xbf16, #tpu.memory_space<vmem>>, vector<1x1x16x4xbf16>
    %14 = vector.shape_cast %13 : vector<1x1x16x4xbf16> to vector<16x4xbf16>
    %c2_17 = arith.constant 2 : index
    %c0_18 = arith.constant 0 : index
    %c0_19 = arith.constant 0 : index
    %15 = vector.load %arg5[%c2_17, %c0_18, %c0_19] : memref<9x4x4xbf16, #tpu.memory_space<vmem>>, vector<1x4x4xbf16>
    %16 = vector.shape_cast %15 : vector<1x4x4xbf16> to vector<4x4xbf16>
    %cst_20 = arith.constant dense<0.000000e+00> : vector<16x4xf32>
    %17 = tpu.matmul %14, %16, %cst_20 {dimension_numbers = #tpu.dot_dimension_numbers<[1], [0], [0], [1], [0, 0, 1, 1], [], []>} : vector<16x4xbf16>, vector<4x4xbf16>, vector<16x4xf32> -> vector<16x4xf32>
    %18 = arith.addf %12, %17 : vector<16x4xf32>
    %c0_21 = arith.constant 0 : index
    %c0_22 = arith.constant 0 : index
    %c0_23 = arith.constant 0 : index
    %c0_24 = arith.constant 0 : index
    %19 = vector.load %arg3[%c0_21, %c0_22, %c0_23, %c0_24] : memref<1x1x18x4xbf16, #tpu.memory_space<vmem>>, vector<1x1x16x4xbf16>
    %20 = vector.shape_cast %19 : vector<1x1x16x4xbf16> to vector<16x4xbf16>
    %c3 = arith.constant 3 : index
    %c0_25 = arith.constant 0 : index
    %c0_26 = arith.constant 0 : index
    %21 = vector.load %arg5[%c3, %c0_25, %c0_26] : memref<9x4x4xbf16, #tpu.memory_space<vmem>>, vector<1x4x4xbf16>
    %22 = vector.shape_cast %21 : vector<1x4x4xbf16> to vector<4x4xbf16>
    %cst_27 = arith.constant dense<0.000000e+00> : vector<16x4xf32>
    %23 = tpu.matmul %20, %22, %cst_27 {dimension_numbers = #tpu.dot_dimension_numbers<[1], [0], [0], [1], [0, 0, 1, 1], [], []>} : vector<16x4xbf16>, vector<4x4xbf16>, vector<16x4xf32> -> vector<16x4xf32>
    %24 = arith.addf %18, %23 : vector<16x4xf32>
    %c0_28 = arith.constant 0 : index
    %c0_29 = arith.constant 0 : index
    %c1_30 = arith.constant 1 : index
    %c0_31 = arith.constant 0 : index
    %25 = vector.load %arg3[%c0_28, %c0_29, %c1_30, %c0_31] : memref<1x1x18x4xbf16, #tpu.memory_space<vmem>>, vector<1x1x16x4xbf16>
    %26 = vector.shape_cast %25 : vector<1x1x16x4xbf16> to vector<16x4xbf16>
    %c4 = arith.constant 4 : index
    %c0_32 = arith.constant 0 : index
    %c0_33 = arith.constant 0 : index
    %27 = vector.load %arg5[%c4, %c0_32, %c0_33] : memref<9x4x4xbf16, #tpu.memory_space<vmem>>, vector<1x4x4xbf16>
    %28 = vector.shape_cast %27 : vector<1x4x4xbf16> to vector<4x4xbf16>
    %cst_34 = arith.constant dense<0.000000e+00> : vector<16x4xf32>
    %29 = tpu.matmul %26, %28, %cst_34 {dimension_numbers = #tpu.dot_dimension_numbers<[1], [0], [0], [1], [0, 0, 1, 1], [], []>} : vector<16x4xbf16>, vector<4x4xbf16>, vector<16x4xf32> -> vector<16x4xf32>
    %30 = arith.addf %24, %29 : vector<16x4xf32>
    %c0_35 = arith.constant 0 : index
    %c0_36 = arith.constant 0 : index
    %c2_37 = arith.constant 2 : index
    %c0_38 = arith.constant 0 : index
    %31 = vector.load %arg3[%c0_35, %c0_36, %c2_37, %c0_38] : memref<1x1x18x4xbf16, #tpu.memory_space<vmem>>, vector<1x1x16x4xbf16>
    %32 = vector.shape_cast %31 : vector<1x1x16x4xbf16> to vector<16x4xbf16>
    %c5 = arith.constant 5 : index
    %c0_39 = arith.constant 0 : index
    %c0_40 = arith.constant 0 : index
    %33 = vector.load %arg5[%c5, %c0_39, %c0_40] : memref<9x4x4xbf16, #tpu.memory_space<vmem>>, vector<1x4x4xbf16>
    %34 = vector.shape_cast %33 : vector<1x4x4xbf16> to vector<4x4xbf16>
    %cst_41 = arith.constant dense<0.000000e+00> : vector<16x4xf32>
    %35 = tpu.matmul %32, %34, %cst_41 {dimension_numbers = #tpu.dot_dimension_numbers<[1], [0], [0], [1], [0, 0, 1, 1], [], []>} : vector<16x4xbf16>, vector<4x4xbf16>, vector<16x4xf32> -> vector<16x4xf32>
    %36 = arith.addf %30, %35 : vector<16x4xf32>
    %c0_42 = arith.constant 0 : index
    %c0_43 = arith.constant 0 : index
    %c0_44 = arith.constant 0 : index
    %c0_45 = arith.constant 0 : index
    %37 = vector.load %arg4[%c0_42, %c0_43, %c0_44, %c0_45] : memref<1x1x18x4xbf16, #tpu.memory_space<vmem>>, vector<1x1x16x4xbf16>
    %38 = vector.shape_cast %37 : vector<1x1x16x4xbf16> to vector<16x4xbf16>
    %c6 = arith.constant 6 : index
    %c0_46 = arith.constant 0 : index
    %c0_47 = arith.constant 0 : index
    %39 = vector.load %arg5[%c6, %c0_46, %c0_47] : memref<9x4x4xbf16, #tpu.memory_space<vmem>>, vector<1x4x4xbf16>
    %40 = vector.shape_cast %39 : vector<1x4x4xbf16> to vector<4x4xbf16>
    %cst_48 = arith.constant dense<0.000000e+00> : vector<16x4xf32>
    %41 = tpu.matmul %38, %40, %cst_48 {dimension_numbers = #tpu.dot_dimension_numbers<[1], [0], [0], [1], [0, 0, 1, 1], [], []>} : vector<16x4xbf16>, vector<4x4xbf16>, vector<16x4xf32> -> vector<16x4xf32>
    %42 = arith.addf %36, %41 : vector<16x4xf32>
    %c0_49 = arith.constant 0 : index
    %c0_50 = arith.constant 0 : index
    %c1_51 = arith.constant 1 : index
    %c0_52 = arith.constant 0 : index
    %43 = vector.load %arg4[%c0_49, %c0_50, %c1_51, %c0_52] : memref<1x1x18x4xbf16, #tpu.memory_space<vmem>>, vector<1x1x16x4xbf16>
    %44 = vector.shape_cast %43 : vector<1x1x16x4xbf16> to vector<16x4xbf16>
    %c7 = arith.constant 7 : index
    %c0_53 = arith.constant 0 : index
    %c0_54 = arith.constant 0 : index
    %45 = vector.load %arg5[%c7, %c0_53, %c0_54] : memref<9x4x4xbf16, #tpu.memory_space<vmem>>, vector<1x4x4xbf16>
    %46 = vector.shape_cast %45 : vector<1x4x4xbf16> to vector<4x4xbf16>
    %cst_55 = arith.constant dense<0.000000e+00> : vector<16x4xf32>
    %47 = tpu.matmul %44, %46, %cst_55 {dimension_numbers = #tpu.dot_dimension_numbers<[1], [0], [0], [1], [0, 0, 1, 1], [], []>} : vector<16x4xbf16>, vector<4x4xbf16>, vector<16x4xf32> -> vector<16x4xf32>
    %48 = arith.addf %42, %47 : vector<16x4xf32>
    %c0_56 = arith.constant 0 : index
    %c0_57 = arith.constant 0 : index
    %c2_58 = arith.constant 2 : index
    %c0_59 = arith.constant 0 : index
    %49 = vector.load %arg4[%c0_56, %c0_57, %c2_58, %c0_59] : memref<1x1x18x4xbf16, #tpu.memory_space<vmem>>, vector<1x1x16x4xbf16>
    %50 = vector.shape_cast %49 : vector<1x1x16x4xbf16> to vector<16x4xbf16>
    %c8 = arith.constant 8 : index
    %c0_60 = arith.constant 0 : index
    %c0_61 = arith.constant 0 : index
    %51 = vector.load %arg5[%c8, %c0_60, %c0_61] : memref<9x4x4xbf16, #tpu.memory_space<vmem>>, vector<1x4x4xbf16>
    %52 = vector.shape_cast %51 : vector<1x4x4xbf16> to vector<4x4xbf16>
    %cst_62 = arith.constant dense<0.000000e+00> : vector<16x4xf32>
    %53 = tpu.matmul %50, %52, %cst_62 {dimension_numbers = #tpu.dot_dimension_numbers<[1], [0], [0], [1], [0, 0, 1, 1], [], []>} : vector<16x4xbf16>, vector<4x4xbf16>, vector<16x4xf32> -> vector<16x4xf32>
    %54 = arith.addf %48, %53 : vector<16x4xf32>
    %c0_63 = arith.constant 0 : index
    %c0_64 = arith.constant 0 : index
    %55 = vector.load %arg6[%c0_63, %c0_64] : memref<1x4xf32, #tpu.memory_space<vmem>>, vector<1x4xf32>
    %56 = vector.broadcast %55 : vector<1x4xf32> to vector<16x4xf32>
    %57 = arith.addf %54, %56 : vector<16x4xf32>
    %c0_65 = arith.constant 0 : index
    %c0_66 = arith.constant 0 : index
    %c0_67 = arith.constant 0 : index
    %c0_68 = arith.constant 0 : index
    %58 = vector.load %arg7[%c0_65, %c0_66, %c0_67, %c0_68] : memref<1x1x16x4xf32, #tpu.memory_space<vmem>>, vector<1x1x16x4xf32>
    %59 = vector.shape_cast %58 : vector<1x1x16x4xf32> to vector<16x4xf32>
    %60 = vector.shape_cast %57 : vector<16x4xf32> to vector<1x1x16x4xf32>
    tpu.vector_store %arg7[%c0_65, %c0_66, %c0_67, %c0_68], %60 {strides = array<i32>} : memref<1x1x16x4xf32, #tpu.memory_space<vmem>>, vector<1x1x16x4xf32>,
    return
  }
  func.func @transform_0(%arg0: i32, %arg1: i32) -> (i32, i32, i32, i32) {
    %c0_i32 = arith.constant 0 : i32
    %0 = arith.addi %arg1, %c0_i32 : i32
    %c0_i32_0 = arith.constant 0 : i32
    %c0_i32_1 = arith.constant 0 : i32
    %c0_i32_2 = arith.constant 0 : i32
    return %arg0, %0, %c0_i32_0, %c0_i32_1 : i32, i32, i32, i32
  }
  func.func @transform_1(%arg0: i32, %arg1: i32) -> (i32, i32, i32, i32) {
    %c1_i32 = arith.constant 1 : i32
    %0 = arith.addi %arg1, %c1_i32 : i32
    %c0_i32 = arith.constant 0 : i32
    %c0_i32_0 = arith.constant 0 : i32
    %c0_i32_1 = arith.constant 0 : i32
    return %arg0, %0, %c0_i32, %c0_i32_0 : i32, i32, i32, i32
  }
  func.func @transform_2(%arg0: i32, %arg1: i32) -> (i32, i32, i32, i32) {
    %c2_i32 = arith.constant 2 : i32
    %0 = arith.addi %arg1, %c2_i32 : i32
    %c0_i32 = arith.constant 0 : i32
    %c0_i32_0 = arith.constant 0 : i32
    %c0_i32_1 = arith.constant 0 : i32
    return %arg0, %0, %c0_i32, %c0_i32_0 : i32, i32, i32, i32
  }
  func.func @transform_3(%arg0: i32, %arg1: i32) -> (i32, i32, i32) {
    %c0_i32 = arith.constant 0 : i32
    %c0_i32_0 = arith.constant 0 : i32
    %c0_i32_1 = arith.constant 0 : i32
    %c0_i32_2 = arith.constant 0 : i32
    return %c0_i32, %c0_i32_0, %c0_i32_1 : i32, i32, i32
  }
  func.func @transform_4(%arg0: i32, %arg1: i32) -> (i32, i32) {
    %c0_i32 = arith.constant 0 : i32
    %c0_i32_0 = arith.constant 0 : i32
    %c0_i32_1 = arith.constant 0 : i32
    return %c0_i32, %c0_i32_0 : i32, i32
  }
  func.func @transform_5(%arg0: i32, %arg1: i32) -> (i32, i32, i32, i32) {
    %c0_i32 = arith.constant 0 : i32
    %c0_i32_0 = arith.constant 0 : i32
    %c0_i32_1 = arith.constant 0 : i32
    return %arg0, %arg1, %c0_i32, %c0_i32_0 : i32, i32, i32, i32
  }
}

</mosaic_0001>

<bundles_post_ra>
// kernel: transform_forward.5
= control target key start
LH: loop header
LB: loop body
LE: loop exit
PB: predicated region body
PF: predicated region fallthrough
CT: control target
= control target key end

     0   :  { %s1043_s27 = smov 0   ;;  %s1045_s28 = smov 0   ;;  %s1147_s0 = inlined_call_operand.vmem [shape: f32[2,64,4], index: 0, kind: input, shape index: {}]   ;;  %s1148_s1 = inlined_call_operand.vmem [shape: f32[2,1,4], index: 1, kind: input, shape index: {}]   ;;  %s1149_s2 = inlined_call_operand.vmem [shape: f32[2,1,4], index: 2, kind: input, shape index: {}]   ;;  %s1150_s3 = inlined_call_operand.vmem [shape: bf16[4,4], index: 3, kind: input, shape index: {}]   ;;  %s1151_s4 = inlined_call_operand.vmem [shape: f32[1,4], index: 4, kind: input, shape index: {}]   ;;  %s1152_s5 = inlined_call_operand.vmem [shape: bf16[4,4], index: 5, kind: input, shape index: {}]   ;;  %s1153_s6 = inlined_call_operand.vmem [shape: f32[1,4], index: 6, kind: input, shape index: {}]   ;;  %s1154_s7 = inlined_call_operand.vmem [shape: bf16[2,64,4], index: 7, kind: output, shape index: {0}]   ;;  %s1155_s8 = inlined_call_operand.vmem [shape: bf16[2,64,4], index: 8, kind: output, shape index: {1}]  }
   0x1   :  { %s1047_s29 = smov 0  }
   0x2 LB: > { %s31_s30 = sadd.s32 1, %s992_s28  ;;  %p862_p0 = scmp.ge.s32.totalorder %s996_s29, 1  ;;  %s996_s29 = sphi %s1047_s29, %s19_s29   ;;  %s992_s28 = sphi %s1045_s28, %s1157_s28   ;;  %s988_s27 = sphi %s1043_s27, %s1156_s27  }
   0x3   : > { %p33_p1 = scmp.ge.s32.totalorder %s31_s30, 2  ;;  %p304_p2 = scmp.lt.s32.totalorder %s996_s29, 3 }
   0x5   : > { %s1159_s30 = smov (%p33_p1, %s31_s30), 0  ;;  %p305_p3 = pnand %p862_p0, %p304_p2 }
   0x6   : > { %vm461_vm0 = vcmask (!%p305_p3), 1041408   ;;  %v534_v0 = vld [vmem:[%s1152_s5] sm:$0x3] (!%p305_p3)  ;;  %p362_p4 = scmp.lt.s32.totalorder (!%p305_p3), %s988_s27, 1  ;;  %vm448_vm1 = vcmask (!%p305_p3), 31744   ;;  %vm654_vm2 = vcmask (!%p305_p3), 27648  }
   0x7   : > { %308 = sbr.rel (%p305_p3) target bundleno = 253 (0xfd), region = 48  ;;  %v440_v1 = vld [vmem:[%s1150_s3] sm:$0x3] (!%p305_p3)  ;;  %949 = vmatprep.subr.msk.bf16.mxu1 (!%p305_p3), %vm461_vm0, %v534_v0  ;;  %v555_v2 = vsel (!%p305_p3), %vm461_vm0, %v534_v0, 0 }
   0x8   : > { %948 = vmatprep.subr.msk.bf16.mxu0 (!%p305_p3), %vm461_vm0, %v440_v1  ;;  %v463_v3 = vsel (!%p305_p3), %vm461_vm0, %v440_v1, 0  ;;  %939 = vmatpush3.bf16.msra.mxu1 (!%p305_p3), %v555_v2  ;;  %v876_v38 = vld [vmem:[%s1153_s6] ss:$0 sm:$0xff] (!%p305_p3) }
   0x9   : > { %929 = vmatpush3.bf16.msra.mxu0 (!%p305_p3), %v463_v3  ;;  %v871_v44 = vld [vmem:[%s1151_s4] ss:$0 sm:$0xff] (!%p305_p3) }
   0xe   : > { %s1161_s27 = smov (!%p362_p4, %s988_s27), 1 }
   0xf   : > { %s899_s13 = sshll.u32 %s1161_s27, 6  ;;  %s373_s16 = scalar_lea.vmem %s1148_s1, %s1161_s27 }
  0x10   : > { %s369_s19 = scalar_lea.vmem %s1147_s0, %s899_s13  ;;  %v869_v4 = vld [vmem:[%s373_s16] ss:$0 sm:$0xff]  ;;  %s376_s22 = scalar_lea.vmem %s1149_s2, %s1161_s27 }
  0x11   : > { %v398_v5 = vld [vmem:[%s369_s19] sm:$0xff]  ;;  %v399_v6 = vld [vmem:[%s369_s19 + $0x8] sm:$0xff]  ;;  %v400_v7 = vld [vmem:[%s369_s19 + $0x10] sm:$0xff]  ;;  %s900_s25 = sshll.u32 %s1161_s27, 5 }
  0x12   : > { %v413_v8 = vsub.f32 %v398_v5, %v869_v4  ;;  %v414_v9 = vsub.f32 %v399_v6, %v869_v4  ;;  %v530_v10 = vpack.c.bf16 %v399_v6, %v398_v5  ;;  %v401_v11 = vld [vmem:[%s369_s19 + $0x18] sm:$0xff]  ;;  %v415_v12 = vsub.f32 %v400_v7, %v869_v4  ;;  %v870_v13 = vld [vmem:[%s376_s22] ss:$0 sm:$0xff]  ;;  %v403_v17 = vld [vmem:[%s369_s19 + $0x28] sm:$0xff]  ;;  %s1096_s10 = scalar_lea.vmem %s1155_s8, %s900_s25  ;;  %s1108_s14 = scalar_lea.vmem %s1154_s7, %s900_s25 }
  0x13   : > { %v402_v14 = vld [vmem:[%s369_s19 + $0x20] sm:$0xff]  ;;  %v416_v15 = vsub.f32 %v401_v11, %v869_v4  ;;  %v531_v16 = vpack.c.bf16 %v401_v11, %v400_v7  ;;  %v404_v19 = vld [vmem:[%s369_s19 + $0x30] sm:$0xff]  ;;  %v405_v20 = vld [vmem:[%s369_s19 + $0x38] sm:$0xff]  ;;  %v418_v24 = vsub.f32 %v403_v17, %v869_v4 }
  0x14   : > { %v417_v18 = vsub.f32 %v402_v14, %v869_v4  ;;  %940 = vmatprep.mubr.msk.bf16.mxu1 %vm448_vm1, %v530_v10  ;;  %v428_v21 = vmul.f32 %v870_v13, %v413_v8  ;;  %v429_v22 = vmul.f32 %v870_v13, %v414_v9  ;;  %v430_v23 = vmul.f32 %v870_v13, %v415_v12 }
  0x15   : > { %941 = vmatmul.mubr.msk.bf16.vlgmr.msra.gmra.mrb[0].mxu1 %vm448_vm1, %v531_v16  ;;  %v431_v25 = vmul.f32 %v870_v13, %v416_v15  ;;  %v532_v26 = vpack.c.bf16 %v403_v17, %v402_v14  ;;  %v419_v27 = vsub.f32 %v404_v19, %v869_v4  ;;  %v420_v28 = vsub.f32 %v405_v20, %v869_v4 }
  0x16   : > { %v436_v29 = vpack.c.bf16 %v429_v22, %v428_v21  ;;  %v432_v30 = vmul.f32 %v870_v13, %v417_v18  ;;  %v433_v31 = vmul.f32 %v870_v13, %v418_v24  ;;  %v533_v34 = vpack.c.bf16 %v405_v20, %v404_v19 }
  0x17   : > { %v437_v32 = vpack.c.bf16 %v431_v25, %v430_v23  ;;  %944 = vmatprep.mubr.msk.bf16.mxu1 %vm448_vm1, %v532_v26  ;;  %v434_v35 = vmul.f32 %v870_v13, %v419_v27  ;;  %v435_v36 = vmul.f32 %v870_v13, %v420_v28 }
  0x18   : > { %930 = vmatprep.mubr.msk.bf16.mxu0 %vm448_vm1, %v436_v29  ;;  %v438_v33 = vpack.c.bf16 %v433_v31, %v432_v30 }
  0x19   : > { %931 = vmatmul.mubr.msk.bf16.vlgmr.msra.gmra.mrb[0].mxu0 %vm448_vm1, %v437_v32  ;;  %v439_v37 = vpack.c.bf16 %v435_v36, %v434_v35 }
  0x1a   : > { %934 = vmatprep.mubr.msk.bf16.mxu0 %vm448_vm1, %v438_v33 }
  0x1d   : > { %945 = vmatmul.mubr.msk.bf16.gmra.mrb[4].mxu1 %vm448_vm1, %v533_v34 }
  0x21   : > { %935 = vmatmul.mubr.msk.bf16.gmra.mrb[4].mxu0 %vm448_vm1, %v439_v37 }
  0xe8   : > { %v942_v39 = vpop.f32.mrb[0].mxu1 }
  0xe9   : > { %v600_v40 = vadd.f32 %v942_v39, %v876_v38  ;;  %v591_v41 = vpop.f32.mrb[1].mxu1 }
  0xea   : > { %v592_v42 = vadd.f32 %v876_v38, %v591_v41  ;;  %v943_v43 = vpop.f32.mrb[2].mxu1 }
  0xeb   : > { %v912_v45 = vpack.c.bf16 %v600_v40, %v600_v40  ;;  %v603_v46 = vadd.f32 %v943_v43, %v876_v38  ;;  %v594_v47 = vpop.f32.mrb[3].mxu1 }
  0xec   : > { %v910_v48 = vpack.c.bf16 %v592_v42, %v592_v42  ;;  %v932_v49 = vpop.f32.mrb[0].mxu0  ;;  %v595_v50 = vadd.f32 %v876_v38, %v594_v47 }
  0xed   : > { %697 = vst.msk [vmem:[%s1096_s10 + $0x8] sm:$0xf] %vm654_vm2, %v912_v45  ;;  %v913_v51 = vpack.c.bf16 %v603_v46, %v603_v46  ;;  %v508_v52 = vadd.f32 %v932_v49, %v871_v44  ;;  %v499_v53 = vpop.f32.mrb[1].mxu0 }
  0xee   : > { %695 = vst.msk [vmem:[%s1096_s10] sm:$0xf] %vm654_vm2, %v910_v48  ;;  %v911_v54 = vpack.c.bf16 %v595_v50, %v595_v50  ;;  %v500_v55 = vadd.f32 %v871_v44, %v499_v53  ;;  %v933_v56 = vpop.f32.mrb[2].mxu0 }
  0xef   : > { %698 = vst.msk [vmem:[%s1096_s10 + $0xc] sm:$0xf] %vm654_vm2, %v913_v51  ;;  %v904_v57 = vpack.c.bf16 %v508_v52, %v508_v52  ;;  %v511_v58 = vadd.f32 %v933_v56, %v871_v44  ;;  %v502_v59 = vpop.f32.mrb[3].mxu0 }
  0xf0   : > { %696 = vst.msk [vmem:[%s1096_s10 + $0x4] sm:$0xf] %vm654_vm2, %v911_v54  ;;  %v902_v60 = vpack.c.bf16 %v500_v55, %v500_v55  ;;  %v503_v61 = vadd.f32 %v871_v44, %v502_v59  ;;  %v946_v62 = vpop.f32.mrb[4].mxu1 }
  0xf1   : > { %657 = vst.msk [vmem:[%s1108_s14 + $0x8] sm:$0xf] %vm654_vm2, %v904_v57  ;;  %v905_v63 = vpack.c.bf16 %v511_v58, %v511_v58  ;;  %v616_v0 = vadd.f32 %v946_v62, %v876_v38  ;;  %v607_v1 = vpop.f32.mrb[5].mxu1 }
  0xf2   : > { %655 = vst.msk [vmem:[%s1108_s14] sm:$0xf] %vm654_vm2, %v902_v60  ;;  %v903_v2 = vpack.c.bf16 %v503_v61, %v503_v61  ;;  %v608_v3 = vadd.f32 %v876_v38, %v607_v1  ;;  %v947_v4 = vpop.f32.mrb[6].mxu1 }
  0xf3   : > { %658 = vst.msk [vmem:[%s1108_s14 + $0xc] sm:$0xf] %vm654_vm2, %v905_v63  ;;  %v916_v5 = vpack.c.bf16 %v616_v0, %v616_v0  ;;  %v619_v6 = vadd.f32 %v947_v4, %v876_v38  ;;  %v610_v7 = vpop.f32.mrb[7].mxu1 }
  0xf4   : > { %656 = vst.msk [vmem:[%s1108_s14 + $0x4] sm:$0xf] %vm654_vm2, %v903_v2  ;;  %v914_v8 = vpack.c.bf16 %v608_v3, %v608_v3  ;;  %v936_v9 = vpop.f32.mrb[4].mxu0  ;;  %v611_v10 = vadd.f32 %v876_v38, %v610_v7 }
  0xf5   : > { %701 = vst.msk [vmem:[%s1096_s10 + $0x18] sm:$0xf] %vm654_vm2, %v916_v5  ;;  %v917_v11 = vpack.c.bf16 %v619_v6, %v619_v6  ;;  %v524_v12 = vadd.f32 %v936_v9, %v871_v44  ;;  %v515_v13 = vpop.f32.mrb[5].mxu0 }
  0xf6   : > { %699 = vst.msk [vmem:[%s1096_s10 + $0x10] sm:$0xf] %vm654_vm2, %v914_v8  ;;  %v915_v14 = vpack.c.bf16 %v611_v10, %v611_v10  ;;  %v516_v15 = vadd.f32 %v871_v44, %v515_v13  ;;  %v937_v16 = vpop.f32.mrb[6].mxu0 }
  0xf7   : > { %702 = vst.msk [vmem:[%s1096_s10 + $0x1c] sm:$0xf] %vm654_vm2, %v917_v11  ;;  %v908_v17 = vpack.c.bf16 %v524_v12, %v524_v12  ;;  %v527_v18 = vadd.f32 %v937_v16, %v871_v44  ;;  %v518_v19 = vpop.f32.mrb[7].mxu0 }
  0xf8   : > { %700 = vst.msk [vmem:[%s1096_s10 + $0x14] sm:$0xf] %vm654_vm2, %v915_v14  ;;  %v906_v20 = vpack.c.bf16 %v516_v15, %v516_v15  ;;  %v519_v21 = vadd.f32 %v871_v44, %v518_v19 }
  0xf9   : > { %661 = vst.msk [vmem:[%s1108_s14 + $0x18] sm:$0xf] %vm654_vm2, %v908_v17  ;;  %v909_v22 = vpack.c.bf16 %v527_v18, %v527_v18 }
  0xfa   : > { %659 = vst.msk [vmem:[%s1108_s14 + $0x10] sm:$0xf] %vm654_vm2, %v906_v20  ;;  %v907_v23 = vpack.c.bf16 %v519_v21, %v519_v21 }
  0xfb   : > { %662 = vst.msk [vmem:[%s1108_s14 + $0x1c] sm:$0xf] %vm654_vm2, %v909_v22 }
  0xfc   : > { %660 = vst.msk [vmem:[%s1108_s14 + $0x14] sm:$0xf] %vm654_vm2, %v907_v23 }
  0xfd PF: > { %s19_s29 = sadd.s32 1, %s996_s29   ;;  %s1156_s27 = smov %s992_s28 }
  0xfe   : > { %p16_p5 = scmp.ge.s32.totalorder %s19_s29, 4   ;;  %s1157_s28 = smov %s1159_s30 }
 0x100   :  { %18 = sbr.rel (!%p16_p5) target bundleno = 2 (0x2), region = 96 }

// kernel: transform_forward.6
= control target key start
LH: loop header
LB: loop body
LE: loop exit
PB: predicated region body
PF: predicated region fallthrough
CT: control target
= control target key end

     0   :  { %s1779_s30 = smov 0   ;;  %s1781_s10 = smov 0   ;;  %s2126_s0 = inlined_call_operand.vmem [shape: f32[2,64,4], index: 0, kind: input, shape index: {}]   ;;  %s2127_s1 = inlined_call_operand.vmem [shape: bf16[2,64,4], index: 1, kind: input, shape index: {}]   ;;  %s2128_s2 = inlined_call_operand.vmem [shape: bf16[2,64,4], index: 2, kind: input, shape index: {}]   ;;  %s2129_s3 = inlined_call_operand.vmem [shape: f32[2,1,4], index: 3, kind: input, shape index: {}]   ;;  %s2130_s4 = inlined_call_operand.vmem [shape: f32[2,1,4], index: 4, kind: input, shape index: {}]   ;;  %s2131_s5 = inlined_call_operand.vmem [shape: bf16[4,4], index: 5, kind: input, shape index: {}]   ;;  %s2132_s6 = inlined_call_operand.vmem [shape: f32[1,4], index: 6, kind: input, shape index: {}]   ;;  %s2133_s7 = inlined_call_operand.vmem [shape: bf16[4,4], index: 7, kind: input, shape index: {}]   ;;  %s2134_s8 = inlined_call_operand.vmem [shape: f32[1,4], index: 8, kind: input, shape index: {}]   ;;  %s2135_s9 = inlined_call_operand.vmem [shape: f32[2,64,4], index: 9, kind: output, shape index: {}]  }
   0x1   :  { %s1783_s11 = smov 0  }
   0x2 LB: > { %s38_s12 = sadd.s32 1, %s1720_s10  ;;  %p1490_p0 = scmp.ge.s32.totalorder %s1724_s11, 1  ;;  %s1724_s11 = sphi %s1783_s11, %s19_s11   ;;  %s1720_s10 = sphi %s1781_s10, %s2137_s10   ;;  %s1716_s30 = sphi %s1779_s30, %s2136_s30  }
   0x3   : > { %p40_p1 = scmp.ge.s32.totalorder %s38_s12, 2  ;;  %p365_p2 = scmp.lt.s32.totalorder %s1724_s11, 3 }
   0x5   : > { %s2139_s12 = smov (%p40_p1, %s38_s12), 0  ;;  %p366_p3 = pnand %p1490_p0, %p365_p2 }
   0x6   : > { %v526_v0 = vld [vmem:[%s2131_s5] sm:$0x3] (!%p366_p3)  ;;  %vm547_vm0 = vcmask (!%p366_p3), 1041408   ;;  %p434_p4 = scmp.lt.s32.totalorder (!%p366_p3), %s1716_s30, 1  ;;  %vm534_vm1 = vcmask (!%p366_p3), 31744   ;;  %vm624_vm2 = vcmask (!%p366_p3), 7168  }
   0x7   : > { %369 = sbr.rel (%p366_p3) target bundleno = 1295 (0x50f), region = 56  ;;  %1611 = vmatprep.subr.msk.bf16.mxu0 (!%p366_p3), %vm547_vm0, %v526_v0  ;;  %v549_v1 = vsel (!%p366_p3), %vm547_vm0, %v526_v0, 0  ;;  %v1501_v41 = vld [vmem:[%s2132_s6] ss:$0 sm:$0xff] (!%p366_p3)  ;;  %vm779_vm3 = vcmask (!%p366_p3), 523264  }
   0x8   : > { %1560 = vmatpush3.bf16.msra.mxu0 (!%p366_p3), %v549_v1  ;;  %v1726_v1 = vmov (!%p366_p3), -inf  }
   0x9   : > { %627 = vst.msk [vmem:[#allocation3 + $0x10] sm:$0xff] (!%p366_p3), %vm624_vm2, %v1726_v1  ;;  %625 = vst.msk [vmem:[#allocation3] sm:$0xff] (!%p366_p3), %vm624_vm2, %v1726_v1 }
   0xa   : > { %626 = vst.msk [vmem:[#allocation3 + $0x8] sm:$0xff] (!%p366_p3), %vm624_vm2, %v1726_v1  ;;  %628 = vst.msk [vmem:[#allocation3 + $0x18] sm:$0xff] (!%p366_p3), %vm624_vm2, %v1726_v1 }
   0xb   : > { %629 = vst.msk [vmem:[#allocation3 + $0x20] sm:$0xff] (!%p366_p3), %vm624_vm2, %v1726_v1  ;;  %630 = vst.msk [vmem:[#allocation3 + $0x28] sm:$0xff] (!%p366_p3), %vm624_vm2, %v1726_v1 }
   0xc   : > { %631 = vst.msk [vmem:[#allocation3 + $0x30] sm:$0xff] (!%p366_p3), %vm624_vm2, %v1726_v1  ;;  %632 = vst.msk [vmem:[#allocation3 + $0x38] sm:$0xff] (!%p366_p3), %vm624_vm2, %v1726_v1 }
   0xe   : > { %s2141_s30 = smov (!%p434_p4, %s1716_s30), 1 }
   0xf   : > { %s1529_s15 = sshll.u32 %s2141_s30, 6  ;;  %s465_s18 = scalar_lea.vmem %s2129_s3, %s2141_s30 }
  0x10   : > { %s441_s21 = scalar_lea.vmem %s2126_s0, %s1529_s15  ;;  %s468_s24 = scalar_lea.vmem %s2130_s4, %s2141_s30  ;;  %v1499_v2 = vld [vmem:[%s465_s18] ss:$0 sm:$0xff] }
  0x11   : > { %v1818_v3 = vld [vmem:[%s441_s21] sm:$0xff]  ;;  %v1820_v4 = vld [vmem:[%s441_s21 + $0x8] sm:$0xff]  ;;  %s1530_s25 = sshll.u32 %s2141_s30, 5  ;;  %v1825_v8 = vld [vmem:[%s441_s21 + $0x10] sm:$0xff] }
  0x12   : > { %v1500_v5 = vld [vmem:[%s468_s24] ss:$0 sm:$0xff]  ;;  %v499_v6 = vsub.f32 %v1818_v3, %v1499_v2  ;;  %v500_v7 = vsub.f32 %v1820_v4, %v1499_v2  ;;  %v1827_v9 = vld [vmem:[%s441_s21 + $0x18] sm:$0xff]  ;;  %s1836_s28 = scalar_lea.vmem %s2127_s1, %s1530_s25  ;;  %v501_v11 = vsub.f32 %v1825_v8, %v1499_v2  ;;  %v1840_v13 = vld [vmem:[%s441_s21 + $0x28] sm:$0xff]  ;;  %s1859_s14 = scalar_lea.vmem %s2128_s2, %s1530_s25 }
  0x13   : > { %v1829_v10 = vld [vmem:[%s441_s21 + $0x20] sm:$0xff]  ;;  %v502_v12 = vsub.f32 %v1827_v9, %v1499_v2  ;;  %v1843_v15 = vld [vmem:[%s441_s21 + $0x30] sm:$0xff]  ;;  %v1845_v16 = vld [vmem:[%s441_s21 + $0x38] sm:$0xff]  ;;  %v504_v19 = vsub.f32 %v1840_v13, %v1499_v2  ;;  %s477_s24 = scalar_lea.vmem %s2135_s9, %s1529_s15 }
  0x14   : > { %v503_v14 = vsub.f32 %v1829_v10, %v1499_v2  ;;  %v514_v17 = vmul.f32 %v1500_v5, %v499_v6  ;;  %v515_v18 = vmul.f32 %v1500_v5, %v500_v7  ;;  %v505_v20 = vsub.f32 %v1843_v15, %v1499_v2  ;;  %v1646_v21 = vld [vmem:[%s1836_s28] sm:$0xff]   ;;  %v1647_v26 = vld [vmem:[%s1836_s28 + $0x8] sm:$0xff]   ;;  %v1648_v36 = vld [vmem:[%s1836_s28 + $0x10] sm:$0xff]  }
  0x15   : > { %v516_v22 = vmul.f32 %v1500_v5, %v501_v11  ;;  %v517_v23 = vmul.f32 %v1500_v5, %v502_v12  ;;  %v506_v25 = vsub.f32 %v1845_v16, %v1499_v2  ;;  %v519_v28 = vmul.f32 %v1500_v5, %v504_v19  ;;  %1612 = vmatprep.subr.msk.bf16.mxu1 %vm534_vm1, %v1646_v21  ;;  %v1649_v38 = vld [vmem:[%s1836_s28 + $0x18] sm:$0xff]  }
  0x16   : > { %v518_v24 = vmul.f32 %v1500_v5, %v503_v14  ;;  %v522_v27 = vpack.c.bf16 %v515_v18, %v514_v17  ;;  %v695_v29 = vsel %vm534_vm1, %v1646_v21, 0  ;;  %v520_v32 = vmul.f32 %v1500_v5, %v505_v20 }
  0x17   : > { %v523_v30 = vpack.c.bf16 %v517_v23, %v516_v22  ;;  %1570 = vmatpush3.bf16.xpose.msra.mxu1 %v695_v29  ;;  %v521_v33 = vmul.f32 %v1500_v5, %v506_v25  ;;  %v698_v34 = vsel %vm534_vm1, %v1647_v26, 0  ;;  %v701_v37 = vsel %vm534_vm1, %v1648_v36, 0  ;;  %v1942_v29 = vld [vmem:[#allocation3] sm:$0xff] }
  0x18   : > { %1561 = vmatprep.mubr.msk.bf16.mxu0 %vm534_vm1, %v522_v27  ;;  %v524_v31 = vpack.c.bf16 %v519_v28, %v518_v24  ;;  %1613 = vmatprep.subr.msk.bf16.mxu1 %vm534_vm1, %v1647_v26  ;;  %v704_v39 = vsel %vm534_vm1, %v1649_v38, 0  ;;  %v1727_v26 = vmov 0   ;;  %v1728_v27 = vmov 0.0   ;;  %v1940_v28 = vld [vmem:[#allocation3 + $0x10] sm:$0xff] }
  0x19   : > { %1562 = vmatmul.mubr.msk.bf16.vlgmr.msra.gmra.mrb[0].mxu0 %vm534_vm1, %v523_v30  ;;  %v525_v35 = vpack.c.bf16 %v521_v33, %v520_v32  ;;  %1644 = vset.pattern.permute.xlu0 %v1727_v26  ;;  %633 = vst.msk [vmem:[#allocation4] sm:$0xff] %vm624_vm2, %v1728_v27  ;;  %634 = vst.msk [vmem:[#allocation4 + $0x8] sm:$0xff] %vm624_vm2, %v1728_v27 }
  0x1a   : > { %1565 = vmatprep.mubr.msk.bf16.mxu0 %vm534_vm1, %v524_v31  ;;  %1645 = vset.pattern.permute.xlu1 %v1727_v26  ;;  %635 = vst.msk [vmem:[#allocation4 + $0x10] sm:$0xff] %vm624_vm2, %v1728_v27  ;;  %636 = vst.msk [vmem:[#allocation4 + $0x18] sm:$0xff] %vm624_vm2, %v1728_v27 }
  0x1b   : > { %637 = vst.msk [vmem:[#allocation4 + $0x20] sm:$0xff] %vm624_vm2, %v1728_v27  ;;  %638 = vst.msk [vmem:[#allocation4 + $0x28] sm:$0xff] %vm624_vm2, %v1728_v27 }
  0x1c   : > { %639 = vst.msk [vmem:[#allocation4 + $0x30] sm:$0xff] %vm624_vm2, %v1728_v27  ;;  %640 = vst.msk [vmem:[#allocation4 + $0x38] sm:$0xff] %vm624_vm2, %v1728_v27 }
  0x1d   : > { %641 = vst.msk [vmem:[#allocation5] sm:$0xff] %vm534_vm1, %v1728_v27  ;;  %642 = vst.msk [vmem:[#allocation5 + $0x8] sm:$0xff] %vm534_vm1, %v1728_v27 }
  0x1e   : > { %643 = vst.msk [vmem:[#allocation5 + $0x10] sm:$0xff] %vm534_vm1, %v1728_v27  ;;  %644 = vst.msk [vmem:[#allocation5 + $0x18] sm:$0xff] %vm534_vm1, %v1728_v27 }
  0x1f   : > { %1572 = vmatpush3.bf16.xpose.msra.mxu1 %v698_v34  ;;  %645 = vst.msk [vmem:[#allocation5 + $0x20] sm:$0xff] %vm534_vm1, %v1728_v27  ;;  %646 = vst.msk [vmem:[#allocation5 + $0x28] sm:$0xff] %vm534_vm1, %v1728_v27  ;;  %v1950_v34 = vld [vmem:[#allocation3 + $0x18] sm:$0xff] }
  0x20   : > { %1614 = vmatprep.subr.msk.bf16.mxu1 %vm534_vm1, %v1648_v36  ;;  %647 = vst.msk [vmem:[#allocation5 + $0x30] sm:$0xff] %vm534_vm1, %v1728_v27  ;;  %648 = vst.msk [vmem:[#allocation5 + $0x38] sm:$0xff] %vm534_vm1, %v1728_v27  ;;  %v1957_v36 = vld [vmem:[#allocation3 + $0x8] sm:$0xff] }
  0x21   : > { %1566 = vmatmul.mubr.msk.bf16.gmra.mrb[4].mxu0 %vm534_vm1, %v525_v35 }
  0x27   : > { %1574 = vmatpush3.bf16.xpose.msra.mxu1 %v701_v37 }
  0x28   : > { %1615 = vmatprep.subr.msk.bf16.mxu1 %vm534_vm1, %v1649_v38 }
  0x2f   : > { %1576 = vmatpush3.bf16.xpose.msra.mxu1 %v704_v39 }
  0xec   : > { %v1563_v40 = vpop.f32.mrb[0].mxu0 }
  0xed   : > { %v585_v42 = vpop.f32.mrb[1].mxu0  ;;  %v594_v44 = vadd.f32 %v1563_v40, %v1501_v41 }
  0xee   : > { %v1564_v43 = vpop.f32.mrb[2].mxu0  ;;  %v586_v47 = vadd.f32 %v1501_v41, %v585_v42 }
  0xef   : > { %v597_v45 = vadd.f32 %v1564_v43, %v1501_v41  ;;  %v588_v46 = vpop.f32.mrb[3].mxu0  ;;  %v1975_v43 = vld [vmem:[#allocation3 + $0x20] sm:$0xff] }
  0xf0   : > { %v589_v48 = vadd.f32 %v1501_v41, %v588_v46  ;;  %v1981_v46 = vld [vmem:[#allocation3 + $0x28] sm:$0xff] }
  0xf1   : > { %v617_v49 = vpack.c.bf16 %v597_v45, %v594_v44 }
  0xf2   : > { %v616_v50 = vpack.c.bf16 %v589_v48, %v586_v47 }
  0xf3   : > { %621 = vst.msk [vmem:[#allocation2 + $0x8] sm:$0xff] %vm534_vm1, %v617_v49  ;;  %v1987_v49 = vld [vmem:[#allocation3 + $0x30] sm:$0xff] }
  0xf4   : > { %620 = vst.msk [vmem:[#allocation2] sm:$0xff] %vm534_vm1, %v616_v50  ;;  %v1567_v51 = vpop.f32.mrb[4].mxu0  ;;  %v1650_v50 = vld [vmem:[%s1859_s14] sm:$0xff]  }
  0xf5   : > { %v601_v52 = vpop.f32.mrb[5].mxu0  ;;  %v610_v54 = vadd.f32 %v1567_v51, %v1501_v41  ;;  %1585 = vmatprep.subr.bf16.mxu0 %v1650_v50 }
  0xf6   : > { %v1568_v53 = vpop.f32.mrb[6].mxu0  ;;  %v602_v57 = vadd.f32 %v1501_v41, %v601_v52  ;;  %1586 = vmatpush3.bf16.msra.mxu0 %v1650_v50 }
  0xf7   : > { %v613_v55 = vadd.f32 %v1568_v53, %v1501_v41  ;;  %v604_v56 = vpop.f32.mrb[7].mxu0 }
  0xf8   : > { %v605_v58 = vadd.f32 %v1501_v41, %v604_v56 }
  0xf9   : > { %v619_v59 = vpack.c.bf16 %v613_v55, %v610_v54  ;;  %v1997_v54 = vld [vmem:[#allocation3 + $0x38] sm:$0xff] }
  0xfa   : > { %v618_v60 = vpack.c.bf16 %v605_v58, %v602_v57  ;;  %v650_v62 = vld [vmem:[#allocation2 + $0x8] sm:$0xff] }
  0xfb   : > { %623 = vst.msk [vmem:[#allocation2 + $0x18] sm:$0xff] %vm534_vm1, %v619_v59  ;;  %v649_v61 = vld [vmem:[#allocation2] sm:$0xff]  ;;  %v1651_v58 = vld [vmem:[%s1859_s14 + $0x8] sm:$0xff]  }
  0xfc   : > { %622 = vst.msk [vmem:[#allocation2 + $0x10] sm:$0xff] %vm534_vm1, %v618_v60  ;;  %1577 = vmatprep.mubr.msk.bf16.mxu1 %vm534_vm1, %v649_v61  ;;  %1587 = vmatprep.subr.bf16.mxu0 %v1651_v58 }
  0xfd   : > { %1578 = vmatmul.mubr.msk.bf16.vlgmr.msra.gmra.mrb[0].mxu1 %vm534_vm1, %v650_v62  ;;  %1588 = vmatpush3.bf16.msra.mxu0 %v1651_v58  ;;  %v1652_v62 = vld [vmem:[%s1859_s14 + $0x10] sm:$0xff]  }
  0xfe   : > { %1589 = vmatprep.subr.bf16.mxu0 %v1652_v62 }
 0x101   : > { %1590 = vmatpush3.bf16.msra.mxu0 %v1652_v62 }
 0x102   : > { %v652_v0 = vld [vmem:[#allocation2 + $0x18] sm:$0xff] }
 0x103   : > { %v651_v63 = vld [vmem:[#allocation2 + $0x10] sm:$0xff] }
 0x104   : > { %1581 = vmatprep.mubr.msk.bf16.mxu1 %vm534_vm1, %v651_v63  ;;  %v1653_v63 = vld [vmem:[%s1859_s14 + $0x18] sm:$0xff]  }
 0x105   : > { %1582 = vmatmul.mubr.msk.bf16.gmra.mrb[4].mxu1 %vm534_vm1, %v652_v0  ;;  %1591 = vmatprep.subr.bf16.mxu0 %v1653_v63 }
 0x106   : > { %1592 = vmatpush3.bf16.msra.mxu0 %v1653_v63 }
 0x1d0   : > { %v1892_v2 = vpop.f32.mrb[0].mxu1 }
 0x1d1   : > { %v1894_v5 = vpop.f32.mrb[1].mxu1  ;;  %v786_v6 = vsel %vm779_vm3, %v1892_v2, -inf }
 0x1d2   : > { %787 = vmax.xlane.f32.xlu1 %v786_v6  ;;  %v1898_v7 = vpop.f32.mrb[2].mxu1  ;;  %v780_v11 = vsel %vm779_vm3, %v1894_v5, -inf }
 0x1d3   : > { %781 = vmax.xlane.f32.xlu0 %v780_v11  ;;  %v1902_v12 = vpop.f32.mrb[3].mxu1  ;;  %v789_v14 = vsel %vm779_vm3, %v1898_v7, -inf }
 0x1d4   : > { %v783_v17 = vsel %vm779_vm3, %v1902_v12, -inf }
 0x1d6   : > { %790 = vmax.xlane.f32.xlu1 %v789_v14 }
 0x1d7   : > { %784 = vmax.xlane.f32.xlu0 %v783_v17 }
 0x1d8   : > { %v1908_v18 = vpop.f32.mrb[4].mxu1 }
 0x1d9   : > { %v1910_v19 = vpop.f32.mrb[5].mxu1  ;;  %v798_v24 = vsel %vm779_vm3, %v1908_v18, -inf }
 0x1da   : > { %v1912_v20 = vpop.f32.mrb[6].mxu1  ;;  %v792_v21 = vsel %vm779_vm3, %v1910_v19, -inf }
 0x1db   : > { %793 = vmax.xlane.f32.xlu0 %v792_v21  ;;  %v1916_v22 = vpop.f32.mrb[7].mxu1  ;;  %v801_v25 = vsel %vm779_vm3, %v1912_v20, -inf }
 0x1dc   : > { %v795_v23 = vsel %vm779_vm3, %v1916_v22, -inf }
 0x1dd   : > { %796 = vmax.xlane.f32.xlu1 %v795_v23 }
 0x1df   : > { %799 = vmax.xlane.f32.xlu0 %v798_v24 }
 0x1e1   : > { %802 = vmax.xlane.f32.xlu1 %v801_v25 }
 0x25f   : > { %v788_v30 = vpop.xlane.xlu1 %787 }
 0x260   : > { %v1945_v31 = vmax.f32 %v1940_v28, %v788_v30  ;;  %v782_v32 = vpop.xlane.xlu0 %781 }
 0x261   : > { %v1948_v33 = vmax.f32 %v1942_v29, %v782_v32 }
 0x262   : > { %v814_v35 = vsub.f32 %v1940_v28, %v1945_v31  ;;  %1144 = vst.msk [vmem:[#allocation3 + $0x10] sm:$0xff] %vm624_vm2, %v1945_v31  ;;  %848 = vperm.xlu1 %1645, %v1945_v31  }
 0x263   : > { %v812_v37 = vsub.f32 %v1942_v29, %v1948_v33  ;;  %1142 = vst.msk [vmem:[#allocation3] sm:$0xff] %vm624_vm2, %v1948_v33  ;;  %v791_v38 = vpop.xlane.xlu1 %790  ;;  %838 = vperm.xlu0 %1644, %v1948_v33  }
 0x264   : > { %v1965_v39 = vmax.f32 %v1950_v34, %v791_v38  ;;  %v785_v40 = vpop.xlane.xlu0 %784 }
 0x265   : > { %v1968_v41 = vmax.f32 %v1957_v36, %v785_v40 }
 0x266   : > { %v815_v42 = vsub.f32 %v1950_v34, %v1965_v39  ;;  %1145 = vst.msk [vmem:[#allocation3 + $0x18] sm:$0xff] %vm624_vm2, %v1965_v39  ;;  %853 = vperm.xlu1 %1645, %v1965_v39  }
 0x267   : > { %v813_v44 = vsub.f32 %v1957_v36, %v1968_v41  ;;  %1143 = vst.msk [vmem:[#allocation3 + $0x8] sm:$0xff] %vm624_vm2, %v1968_v41 }
 0x268   : > { %v794_v45 = vpop.xlane.xlu0 %793 }
 0x269   : > { %v1984_v47 = vmax.f32 %v1975_v43, %v794_v45 }
 0x26a   : > { %843 = vperm.xlu1 %1645, %v1968_v41   ;;  %v797_v48 = vpop.xlane.xlu1 %796 }
 0x26b   : > { %v816_v51 = vsub.f32 %v1975_v43, %v1984_v47  ;;  %1146 = vst.msk [vmem:[#allocation3 + $0x20] sm:$0xff] %vm624_vm2, %v1984_v47  ;;  %v1995_v52 = vmax.f32 %v1981_v46, %v797_v48 }
 0x26c   : > { %v800_v53 = vpop.xlane.xlu0 %799 }
 0x26d   : > { %v817_v55 = vsub.f32 %v1981_v46, %v1995_v52  ;;  %1147 = vst.msk [vmem:[#allocation3 + $0x28] sm:$0xff] %vm624_vm2, %v1995_v52  ;;  %v2004_v56 = vmax.f32 %v1987_v49, %v800_v53  ;;  %v828_v36 = vmul.f32 1.442695, %v816_v51 }
 0x26e   : > { %v803_v57 = vpop.xlane.xlu1 %802 }
 0x26f   : > { %v818_v59 = vsub.f32 %v1987_v49, %v2004_v56  ;;  %1148 = vst.msk [vmem:[#allocation3 + $0x30] sm:$0xff] %vm624_vm2, %v2004_v56  ;;  %v2012_v60 = vmax.f32 %v1997_v54, %v803_v57  ;;  %868 = vperm.xlu1 %1645, %v2004_v56   ;;  %v830_v29 = vmul.f32 1.442695, %v817_v55  ;;  %v903_v49 = vld [vmem:[#allocation4 + $0x18] sm:$0xff] }
 0x271   : > { %v819_v61 = vsub.f32 %v1997_v54, %v2012_v60  ;;  %1149 = vst.msk [vmem:[#allocation3 + $0x38] sm:$0xff] %vm624_vm2, %v2012_v60  ;;  %v832_v28 = vmul.f32 1.442695, %v818_v59  ;;  %v901_v54 = vld [vmem:[#allocation4 + $0x8] sm:$0xff] }
 0x273   : > { %858 = vperm.xlu1 %1645, %v1984_v47   ;;  %v834_v31 = vmul.f32 1.442695, %v819_v61  ;;  %v902_v61 = vld [vmem:[#allocation4 + $0x10] sm:$0xff] }
 0x277   : > { %863 = vperm.xlu1 %1645, %v1995_v52  }
 0x27b   : > { %873 = vperm.xlu1 %1645, %v2012_v60  }
 0x2e1   : > { %v849_v0 = vpop.permute.xlu1 %848 }
 0x2e2   : > { %v878_v1 = vsub.f32 %v1892_v2, %v849_v0  ;;  %v839_v6 = vpop.permute.xlu0 %838 }
 0x2e3   : > { %v876_v11 = vsub.f32 %v1894_v5, %v839_v6 }
 0x2e4   : > { %v888_v14 = vmul.f32 1.442695, %v878_v1 }
 0x2e5   : > { %v884_v17 = vmul.f32 1.442695, %v876_v11  ;;  %v854_v21 = vpop.permute.xlu1 %853 }
 0x2e6   : > { %v879_v23 = vsub.f32 %v1898_v7, %v854_v21 }
 0x2e7   : > { %1654 = vpow2.f32 %v884_v17 }
 0x2e8   : > { %v890_v24 = vmul.f32 1.442695, %v879_v23  ;;  %1656 = vpow2.f32 %v888_v14 }
 0x2e9   : > { %v844_v25 = vpop.permute.xlu1 %843 }
 0x2ea   : > { %1658 = vpow2.f32 %v890_v24  ;;  %v877_v26 = vsub.f32 %v1902_v12, %v844_v25 }
 0x2ec   : > { %v886_v27 = vmul.f32 1.442695, %v877_v26 }
 0x2ee   : > { %1660 = vpow2.f32 %v886_v27  ;;  %v869_v30 = vpop.permute.xlu1 %868 }
 0x2ef   : > { %v882_v2 = vsub.f32 %v1908_v18, %v869_v30  ;;  %v822_v30 = vmul.f32 1.442695, %v813_v44  ;;  %v900_v44 = vld [vmem:[#allocation4] sm:$0xff] }
 0x2f1   : > { %v1655_v32 = vpop.eup %1654  ;;  %v896_v50 = vmul.f32 1.442695, %v882_v2  ;;  %v824_v2 = vmul.f32 1.442695, %v814_v35 }
 0x2f2   : > { %v859_v38 = vpop.permute.xlu1 %858  ;;  %v916_v5 = vsel %vm779_vm3, %v1655_v32, 0.0  ;;  %v1657_v40 = vpop.eup %1656 }
 0x2f3   : > { %v880_v45 = vsub.f32 %v1910_v19, %v859_v38  ;;  %917 = vadd.xlane.f32.xlu1 %v916_v5  ;;  %v922_v11 = vsel %vm779_vm3, %v1657_v40, 0.0  ;;  %v826_v38 = vmul.f32 1.442695, %v815_v42 }
 0x2f4   : > { %v1659_v7 = vpop.eup %1658 }
 0x2f5   : > { %v1014_v48 = vpack.c.bf16 %v1659_v7, %v1657_v40  ;;  %v892_v53 = vmul.f32 1.442695, %v880_v45  ;;  %v925_v57 = vsel %vm779_vm3, %v1659_v7, 0.0 }
 0x2f6   : > { %v864_v12 = vpop.permute.xlu1 %863 }
 0x2f7   : > { %1662 = vpow2.f32 %v892_v53  ;;  %v881_v58 = vsub.f32 %v1916_v22, %v864_v12  ;;  %926 = vadd.xlane.f32.xlu1 %v925_v57  ;;  %v906_v12 = vld [vmem:[#allocation4 + $0x30] sm:$0xff] }
 0x2f8   : > { %v1661_v62 = vpop.eup %1660  ;;  %1664 = vpow2.f32 %v896_v50  ;;  %v904_v50 = vld [vmem:[#allocation4 + $0x20] sm:$0xff] }
 0x2f9   : > { %v894_v18 = vmul.f32 1.442695, %v881_v58  ;;  %v919_v63 = vsel %vm779_vm3, %v1661_v62, 0.0  ;;  %v1013_v0 = vpack.c.bf16 %v1661_v62, %v1655_v32  ;;  %v820_v32 = vmul.f32 1.442695, %v812_v37  ;;  %v905_v58 = vld [vmem:[#allocation4 + $0x28] sm:$0xff] }
 0x2fa   : > { %920 = vadd.xlane.f32.xlu0 %v919_v63  ;;  %v874_v19 = vpop.permute.xlu1 %873 }
 0x2fb   : > { %1666 = vpow2.f32 %v894_v18  ;;  %v883_v1 = vsub.f32 %v1912_v20, %v874_v19  ;;  %1593 = vmatprep.mubr.msk.bf16.mxu0 %vm779_vm3, %v1013_v0 }
 0x2fc   : > { %1594 = vmatmul.mubr.msk.bf16.vlgmr.msra.gmra.mrb[8].mxu0 %vm779_vm3, %v1014_v48 }
 0x2fd   : > { %v898_v6 = vmul.f32 1.442695, %v883_v1 }
 0x2fe   : > { %923 = vadd.xlane.f32.xlu0 %v922_v11  ;;  %v907_v11 = vld [vmem:[#allocation4 + $0x38] sm:$0xff] }
 0x2ff   : > { %1668 = vpow2.f32 %v898_v6 }
 0x300   : > { %1670 = vpow2.f32 %v822_v30 }
 0x301   : > { %v1663_v22 = vpop.eup %1662  ;;  %1672 = vpow2.f32 %v820_v32 }
 0x302   : > { %v928_v14 = vsel %vm779_vm3, %v1663_v22, 0.0  ;;  %v1665_v17 = vpop.eup %1664  ;;  %1674 = vpow2.f32 %v824_v2 }
 0x303   : > { %929 = vadd.xlane.f32.xlu0 %v928_v14  ;;  %v934_v23 = vsel %vm779_vm3, %v1665_v17, 0.0  ;;  %1676 = vpow2.f32 %v826_v38 }
 0x304   : > { %1678 = vpow2.f32 %v828_v36 }
 0x305   : > { %v1667_v21 = vpop.eup %1666  ;;  %1680 = vpow2.f32 %v830_v29 }
 0x306   : > { %v931_v24 = vsel %vm779_vm3, %v1667_v21, 0.0  ;;  %v1015_v20 = vpack.c.bf16 %v1667_v21, %v1663_v22  ;;  %1682 = vpow2.f32 %v832_v28 }
 0x307   : > { %935 = vadd.xlane.f32.xlu0 %v934_v23  ;;  %932 = vadd.xlane.f32.xlu1 %v931_v24  ;;  %1684 = vpow2.f32 %v834_v31  ;;  %v1229_v23 = vld [vmem:[%s2133_s7] sm:$0x3] }
 0x308   : > { %1597 = vmatprep.mubr.msk.bf16.mxu0 %vm779_vm3, %v1015_v20  ;;  %1616 = vmatprep.subr.msk.bf16.mxu0 %vm547_vm0, %v1229_v23  ;;  %v1251_v20 = vsel %vm547_vm0, %v1229_v23, 0 }
 0x309   : > { %v1669_v25 = vpop.eup %1668  ;;  %1602 = vmatpush3.bf16.msra.mxu0 %v1251_v20 }
 0x30a   : > { %v937_v26 = vsel %vm779_vm3, %v1669_v25, 0.0  ;;  %v1016_v27 = vpack.c.bf16 %v1669_v25, %v1665_v17  ;;  %v1671_v33 = vpop.eup %1670 }
 0x30b   : > { %938 = vadd.xlane.f32.xlu1 %v937_v26  ;;  %v1673_v34 = vpop.eup %1672  ;;  %v909_v59 = vmul.f32 %v1671_v33, %v901_v54 }
 0x30c   : > { %1598 = vmatmul.mubr.msk.bf16.gmra.mrb[12].mxu0 %vm779_vm3, %v1016_v27  ;;  %v1675_v35 = vpop.eup %1674  ;;  %v908_v46 = vmul.f32 %v1673_v34, %v900_v44 }
 0x30d   : > { %v1677_v37 = vpop.eup %1676  ;;  %v910_v40 = vmul.f32 %v1675_v35, %v902_v61 }
 0x30e   : > { %v1679_v39 = vpop.eup %1678  ;;  %v911_v52 = vmul.f32 %v1677_v37, %v903_v49 }
 0x30f   : > { %v1681_v41 = vpop.eup %1680  ;;  %v912_v53 = vmul.f32 %v1679_v39, %v904_v50 }
 0x310   : > { %v1683_v42 = vpop.eup %1682  ;;  %v913_v19 = vmul.f32 %v1681_v41, %v905_v58  ;;  %v962_v58 = vld [vmem:[#allocation5 + $0x28] sm:$0xff] }
 0x311   : > { %v1685_v43 = vpop.eup %1684  ;;  %v914_v0 = vmul.f32 %v1683_v42, %v906_v12 }
 0x312   : > { %v915_v24 = vmul.f32 %v1685_v43, %v907_v11 }
 0x31c   : > { %972 = vperm.xlu1 %1645, %v1671_v33  }
 0x31d   : > { %967 = vperm.xlu0 %1644, %v1673_v34  }
 0x320   : > { %977 = vperm.xlu1 %1645, %v1675_v35  }
 0x321   : > { %982 = vperm.xlu0 %1644, %v1677_v37  }
 0x324   : > { %987 = vperm.xlu1 %1645, %v1679_v39   ;;  %v959_v39 = vld [vmem:[#allocation5 + $0x10] sm:$0xff] }
 0x325   : > { %992 = vperm.xlu0 %1644, %v1681_v41  }
 0x328   : > { %997 = vperm.xlu1 %1645, %v1683_v42   ;;  %v957_v42 = vld [vmem:[#allocation5] sm:$0xff] }
 0x329   : > { %1002 = vperm.xlu0 %1644, %v1685_v43   ;;  %v960_v43 = vld [vmem:[#allocation5 + $0x18] sm:$0xff] }
 0x380   : > { %v918_v47 = vpop.xlane.xlu1 %917 }
 0x381   : > { %v940_v51 = vadd.f32 %v918_v47, %v908_v46  ;;  %v958_v46 = vld [vmem:[#allocation5 + $0x8] sm:$0xff] }
 0x383   : > { %949 = vst.msk [vmem:[#allocation4] sm:$0xff] %vm624_vm2, %v940_v51 }
 0x384   : > { %v927_v55 = vpop.xlane.xlu1 %926 }
 0x385   : > { %v943_v56 = vadd.f32 %v927_v55, %v911_v52 }
 0x387   : > { %952 = vst.msk [vmem:[#allocation4 + $0x18] sm:$0xff] %vm624_vm2, %v943_v56  ;;  %v921_v60 = vpop.xlane.xlu0 %920 }
 0x388   : > { %v941_v5 = vadd.f32 %v921_v60, %v909_v59 }
 0x38a   : > { %950 = vst.msk [vmem:[#allocation4 + $0x8] sm:$0xff] %vm624_vm2, %v941_v5  ;;  %v1161_v45 = vld [vmem:[#allocation4] sm:$0xff] }
 0x38b   : > { %v924_v7 = vpop.xlane.xlu0 %923  ;;  %1686 = vrcp.f32 %v1161_v45 }
 0x38c   : > { %v942_v48 = vadd.f32 %v924_v7, %v910_v40 }
 0x38e   : > { %951 = vst.msk [vmem:[#allocation4 + $0x10] sm:$0xff] %vm624_vm2, %v942_v48  ;;  %v1164_v63 = vld [vmem:[#allocation4 + $0x18] sm:$0xff]  ;;  %v963_v48 = vld [vmem:[#allocation5 + $0x30] sm:$0xff] }
 0x390   : > { %v930_v57 = vpop.xlane.xlu0 %929 }
 0x391   : > { %v944_v62 = vadd.f32 %v930_v57, %v912_v53  ;;  %v1162_v18 = vld [vmem:[#allocation4 + $0x8] sm:$0xff]  ;;  %v961_v53 = vld [vmem:[#allocation5 + $0x20] sm:$0xff]  ;;  %v964_v57 = vld [vmem:[#allocation5 + $0x38] sm:$0xff] }
 0x392   : > { %1688 = vrcp.f32 %v1162_v18 }
 0x393   : > { %953 = vst.msk [vmem:[#allocation4 + $0x20] sm:$0xff] %vm624_vm2, %v944_v62  ;;  %1690 = vrcp.f32 %v1164_v63 }
 0x394   : > { %v936_v1 = vpop.xlane.xlu0 %935  ;;  %v933_v6 = vpop.xlane.xlu1 %932 }
 0x395   : > { %v1687_v22 = vpop.eup %1686  ;;  %v946_v14 = vadd.f32 %v936_v1, %v914_v0  ;;  %v945_v17 = vadd.f32 %v933_v6, %v913_v19  ;;  %v1163_v21 = vld [vmem:[#allocation4 + $0x10] sm:$0xff] }
 0x396   : > { %1179 = vperm.xlu1 %1645, %v1687_v22   ;;  %1692 = vrcp.f32 %v1163_v21 }
 0x397   : > { %955 = vst.msk [vmem:[#allocation4 + $0x30] sm:$0xff] %vm624_vm2, %v946_v14  ;;  %954 = vst.msk [vmem:[#allocation4 + $0x28] sm:$0xff] %vm624_vm2, %v945_v17 }
 0x398   : > { %v939_v25 = vpop.xlane.xlu1 %938 }
 0x399   : > { %v947_v26 = vadd.f32 %v939_v25, %v915_v24 }
 0x39a   : > { %v1165_v27 = vld [vmem:[#allocation4 + $0x20] sm:$0xff] }
 0x39b   : > { %956 = vst.msk [vmem:[#allocation4 + $0x38] sm:$0xff] %vm624_vm2, %v947_v26  ;;  %1694 = vrcp.f32 %v1165_v27 }
 0x39c   : > { %v1689_v30 = vpop.eup %1688  ;;  %v973_v35 = vpop.permute.xlu1 %972 }
 0x39d   : > { %1184 = vperm.xlu0 %1644, %v1689_v30   ;;  %v1691_v38 = vpop.eup %1690  ;;  %v968_v37 = vpop.permute.xlu0 %967  ;;  %v1006_v56 = vmul.f32 %v973_v35, %v958_v46 }
 0x39e   : > { %v1167_v32 = vld [vmem:[#allocation4 + $0x30] sm:$0xff]  ;;  %v1166_v2 = vld [vmem:[#allocation4 + $0x28] sm:$0xff]  ;;  %v1005_v49 = vmul.f32 %v968_v37, %v957_v42 }
 0x39f   : > { %1696 = vrcp.f32 %v1167_v32 }
 0x3a0   : > { %v1693_v36 = vpop.eup %1692  ;;  %1698 = vrcp.f32 %v1166_v2  ;;  %v978_v41 = vpop.permute.xlu1 %977 }
 0x3a1   : > { %1189 = vperm.xlu1 %1645, %v1693_v36   ;;  %1194 = vperm.xlu0 %1644, %v1691_v38   ;;  %v983_v44 = vpop.permute.xlu0 %982  ;;  %v1007_v47 = vmul.f32 %v978_v41, %v959_v39 }
 0x3a2   : > { %v1168_v29 = vld [vmem:[#allocation4 + $0x38] sm:$0xff]  ;;  %v1008_v52 = vmul.f32 %v983_v44, %v960_v43 }
 0x3a3   : > { %1700 = vrcp.f32 %v1168_v29 }
 0x3a4   : > { %v988_v45 = vpop.permute.xlu1 %987 }
 0x3a5   : > { %v1695_v28 = vpop.eup %1694  ;;  %v993_v7 = vpop.permute.xlu0 %992  ;;  %v1009_v18 = vmul.f32 %v988_v45, %v961_v53 }
 0x3a6   : > { %1199 = vperm.xlu1 %1645, %v1695_v28   ;;  %v1010_v6 = vmul.f32 %v993_v7, %v962_v58 }
 0x3a8   : > { %v998_v50 = vpop.permute.xlu1 %997 }
 0x3a9   : > { %v1697_v31 = vpop.eup %1696  ;;  %v1003_v12 = vpop.permute.xlu0 %1002  ;;  %v1011_v62 = vmul.f32 %v998_v50, %v963_v48 }
 0x3aa   : > { %v1699_v33 = vpop.eup %1698  ;;  %1209 = vperm.xlu1 %1645, %v1697_v31   ;;  %v1012_v0 = vmul.f32 %v1003_v12, %v964_v57 }
 0x3ab   : > { %1204 = vperm.xlu0 %1644, %v1699_v33  }
 0x3ad   : > { %v1701_v34 = vpop.eup %1700 }
 0x3af   : > { %1214 = vperm.xlu0 %1644, %v1701_v34  }
 0x3cf   : > { %v1595_v51 = vpop.f32.mrb[8].mxu0 }
 0x3d0   : > { %v1128_v54 = vadd.f32 %v1595_v51, %v1007_v47  ;;  %v1095_v55 = vpop.f32.mrb[9].mxu0 }
 0x3d1   : > { %v1126_v59 = vadd.f32 %v1095_v55, %v1005_v49  ;;  %v1596_v60 = vpop.f32.mrb[10].mxu0 }
 0x3d2   : > { %1136 = vst.msk [vmem:[#allocation5 + $0x10] sm:$0xff] %vm534_vm1, %v1128_v54  ;;  %v1129_v61 = vadd.f32 %v1596_v60, %v1008_v52  ;;  %v1098_v5 = vpop.f32.mrb[11].mxu0  ;;  %v1522_v54 = vld [vmem:[%s2134_s8] ss:$0 sm:$0xff] }
 0x3d3   : > { %1134 = vst.msk [vmem:[#allocation5] sm:$0xff] %vm534_vm1, %v1126_v59  ;;  %v1127_v40 = vadd.f32 %v1098_v5, %v1006_v56 }
 0x3d4   : > { %1137 = vst.msk [vmem:[#allocation5 + $0x18] sm:$0xff] %vm534_vm1, %v1129_v61 }
 0x3d5   : > { %1135 = vst.msk [vmem:[#allocation5 + $0x8] sm:$0xff] %vm534_vm1, %v1127_v40 }
 0x3d9   : > { %v1155_v38 = vld [vmem:[#allocation5 + $0x10] sm:$0xff] }
 0x3da   : > { %v1153_v24 = vld [vmem:[#allocation5] sm:$0xff] }
 0x3db   : > { %v1156_v32 = vld [vmem:[#allocation5 + $0x18] sm:$0xff] }
 0x3dc   : > { %v1154_v25 = vld [vmem:[#allocation5 + $0x8] sm:$0xff] }
 0x3df   : > { %v1599_v63 = vpop.f32.mrb[12].mxu0 }
 0x3e0   : > { %v1132_v19 = vadd.f32 %v1599_v63, %v1011_v62  ;;  %v1111_v1 = vpop.f32.mrb[13].mxu0 }
 0x3e1   : > { %v1130_v11 = vadd.f32 %v1111_v1, %v1009_v18  ;;  %v1600_v22 = vpop.f32.mrb[14].mxu0 }
 0x3e2   : > { %1140 = vst.msk [vmem:[#allocation5 + $0x30] sm:$0xff] %vm534_vm1, %v1132_v19  ;;  %v1133_v14 = vadd.f32 %v1600_v22, %v1012_v0  ;;  %v1114_v17 = vpop.f32.mrb[15].mxu0 }
 0x3e3   : > { %1138 = vst.msk [vmem:[#allocation5 + $0x20] sm:$0xff] %vm534_vm1, %v1130_v11  ;;  %v1131_v21 = vadd.f32 %v1114_v17, %v1010_v6 }
 0x3e4   : > { %1141 = vst.msk [vmem:[#allocation5 + $0x38] sm:$0xff] %vm534_vm1, %v1133_v14 }
 0x3e5   : > { %1139 = vst.msk [vmem:[#allocation5 + $0x28] sm:$0xff] %vm534_vm1, %v1131_v21 }
 0x3e9   : > { %v1159_v44 = vld [vmem:[#allocation5 + $0x30] sm:$0xff] }
 0x3ea   : > { %v1157_v34 = vld [vmem:[#allocation5 + $0x20] sm:$0xff] }
 0x3eb   : > { %v1160_v46 = vld [vmem:[#allocation5 + $0x38] sm:$0xff] }
 0x3ec   : > { %v1158_v35 = vld [vmem:[#allocation5 + $0x28] sm:$0xff] }
 0x415   : > { %v1180_v23 = vpop.permute.xlu1 %1179 }
 0x416   : > { %v1217_v26 = vmul.f32 %v1180_v23, %v1153_v24 }
 0x41c   : > { %v1185_v20 = vpop.permute.xlu0 %1184 }
 0x41d   : > { %v1218_v27 = vmul.f32 %v1185_v20, %v1154_v25 }
 0x41f   : > { %v1225_v30 = vpack.c.bf16 %v1218_v27, %v1217_v26 }
 0x420   : > { %v1195_v2 = vpop.permute.xlu0 %1194  ;;  %v1190_v36 = vpop.permute.xlu1 %1189 }
 0x421   : > { %v1220_v29 = vmul.f32 %v1195_v2, %v1156_v32  ;;  %v1219_v28 = vmul.f32 %v1190_v36, %v1155_v38  ;;  %1603 = vmatprep.mubr.msk.bf16.mxu0 %vm534_vm1, %v1225_v30 }
 0x423   : > { %v1226_v31 = vpack.c.bf16 %v1220_v29, %v1219_v28 }
 0x425   : > { %1604 = vmatmul.mubr.msk.bf16.vlgmr.msra.gmra.mrb[16].mxu0 %vm534_vm1, %v1226_v31  ;;  %v1200_v33 = vpop.permute.xlu1 %1199 }
 0x426   : > { %v1221_v39 = vmul.f32 %v1200_v33, %v1157_v34 }
 0x429   : > { %v1210_v42 = vpop.permute.xlu1 %1209 }
 0x42a   : > { %v1205_v37 = vpop.permute.xlu0 %1204  ;;  %v1223_v49 = vmul.f32 %v1210_v42, %v1159_v44 }
 0x42b   : > { %v1222_v41 = vmul.f32 %v1205_v37, %v1158_v35 }
 0x42d   : > { %v1227_v43 = vpack.c.bf16 %v1222_v41, %v1221_v39 }
 0x42e   : > { %v1215_v47 = vpop.permute.xlu0 %1214 }
 0x42f   : > { %v1224_v51 = vmul.f32 %v1215_v47, %v1160_v46  ;;  %1607 = vmatprep.mubr.msk.bf16.mxu0 %vm534_vm1, %v1227_v43 }
 0x431   : > { %v1228_v52 = vpack.c.bf16 %v1224_v51, %v1223_v49 }
 0x433   : > { %1608 = vmatmul.mubr.msk.bf16.gmra.mrb[20].mxu0 %vm534_vm1, %v1228_v52 }
 0x4f8   : > { %v1605_v55 = vpop.f32.mrb[16].mxu0 }
 0x4f9   : > { %v1296_v56 = vadd.f32 %v1605_v55, %v1522_v54  ;;  %v1287_v59 = vpop.f32.mrb[17].mxu0 }
 0x4fa   : > { %v1288_v60 = vadd.f32 %v1522_v54, %v1287_v59  ;;  %v1606_v61 = vpop.f32.mrb[18].mxu0 }
 0x4fb   : > { %v1328_v5 = vadd.f32 %v1296_v56, %v1825_v8  ;;  %v1299_v40 = vadd.f32 %v1606_v61, %v1522_v54  ;;  %v1290_v45 = vpop.f32.mrb[19].mxu0 }
 0x4fc   : > { %v1326_v7 = vadd.f32 %v1288_v60, %v1818_v3  ;;  %v1291_v48 = vadd.f32 %v1522_v54, %v1290_v45 }
 0x4fd   : > { %1336 = vst.msk [vmem:[%s477_s24 + $0x10] sm:$0xff] %vm534_vm1, %v1328_v5  ;;  %v1329_v50 = vadd.f32 %v1299_v40, %v1827_v9 }
 0x4fe   : > { %1334 = vst.msk [vmem:[%s477_s24] sm:$0xff] %vm534_vm1, %v1326_v7  ;;  %v1327_v53 = vadd.f32 %v1291_v48, %v1820_v4 }
 0x4ff   : > { %1337 = vst.msk [vmem:[%s477_s24 + $0x18] sm:$0xff] %vm534_vm1, %v1329_v50 }
 0x500   : > { %1335 = vst.msk [vmem:[%s477_s24 + $0x8] sm:$0xff] %vm534_vm1, %v1327_v53 }
 0x506   : > { %v1609_v57 = vpop.f32.mrb[20].mxu0 }
 0x507   : > { %v1312_v12 = vadd.f32 %v1609_v57, %v1522_v54  ;;  %v1303_v8 = vpop.f32.mrb[21].mxu0 }
 0x508   : > { %v1304_v58 = vadd.f32 %v1522_v54, %v1303_v8  ;;  %v1610_v62 = vpop.f32.mrb[22].mxu0 }
 0x509   : > { %v1332_v3 = vadd.f32 %v1312_v12, %v1843_v15  ;;  %v1315_v18 = vadd.f32 %v1610_v62, %v1522_v54  ;;  %v1306_v63 = vpop.f32.mrb[23].mxu0 }
 0x50a   : > { %v1330_v0 = vadd.f32 %v1304_v58, %v1829_v10  ;;  %v1307_v9 = vadd.f32 %v1522_v54, %v1306_v63 }
 0x50b   : > { %1340 = vst.msk [vmem:[%s477_s24 + $0x30] sm:$0xff] %vm534_vm1, %v1332_v3  ;;  %v1333_v4 = vadd.f32 %v1315_v18, %v1845_v16 }
 0x50c   : > { %1338 = vst.msk [vmem:[%s477_s24 + $0x20] sm:$0xff] %vm534_vm1, %v1330_v0  ;;  %v1331_v19 = vadd.f32 %v1307_v9, %v1840_v13 }
 0x50d   : > { %1341 = vst.msk [vmem:[%s477_s24 + $0x38] sm:$0xff] %vm534_vm1, %v1333_v4 }
 0x50e   : > { %1339 = vst.msk [vmem:[%s477_s24 + $0x28] sm:$0xff] %vm534_vm1, %v1331_v19 }
 0x50f PF: > { %s19_s11 = sadd.s32 1, %s1724_s11   ;;  %s2136_s30 = smov %s1720_s10 }
 0x510   : > { %p16_p5 = scmp.ge.s32.totalorder %s19_s11, 4   ;;  %s2137_s10 = smov %s2139_s12 }
 0x512   :  { %18 = sbr.rel (!%p16_p5) target bundleno = 2 (0x2), region = 106 }

// kernel: transform_forward.7
= control target key start
LH: loop header
LB: loop body
LE: loop exit
PB: predicated region body
PF: predicated region fallthrough
CT: control target
= control target key end

     0   :  { %s1835_s27 = smov 0   ;;  %s1837_s28 = smov 0   ;;  %s2229_s0 = inlined_call_operand.vmem [shape: f32[2,256,4], index: 0, kind: input, shape index: {}]   ;;  %s2230_s1 = inlined_call_operand.vmem [shape: f32[2,1,4], index: 1, kind: input, shape index: {}]   ;;  %s2231_s2 = inlined_call_operand.vmem [shape: f32[2,1,4], index: 2, kind: input, shape index: {}]   ;;  %s2232_s3 = inlined_call_operand.vmem [shape: bf16[4,4], index: 3, kind: input, shape index: {}]   ;;  %s2233_s4 = inlined_call_operand.vmem [shape: f32[1,4], index: 4, kind: input, shape index: {}]   ;;  %s2234_s5 = inlined_call_operand.vmem [shape: bf16[4,4], index: 5, kind: input, shape index: {}]   ;;  %s2235_s6 = inlined_call_operand.vmem [shape: f32[1,4], index: 6, kind: input, shape index: {}]   ;;  %s2236_s7 = inlined_call_operand.vmem [shape: bf16[2,256,4], index: 7, kind: output, shape index: {0}]   ;;  %s2237_s8 = inlined_call_operand.vmem [shape: bf16[2,256,4], index: 8, kind: output, shape index: {1}]  }
   0x1   :  { %s1839_s29 = smov 0  }
   0x2 LB: > { %s31_s30 = sadd.s32 1, %s1784_s28  ;;  %p1462_p0 = scmp.ge.s32.totalorder %s1788_s29, 1  ;;  %s1788_s29 = sphi %s1839_s29, %s19_s29   ;;  %s1784_s28 = sphi %s1837_s28, %s2239_s28   ;;  %s1780_s27 = sphi %s1835_s27, %s2238_s27  }
   0x3   : > { %p33_p1 = scmp.ge.s32.totalorder %s31_s30, 2  ;;  %p304_p2 = scmp.lt.s32.totalorder %s1788_s29, 3 }
   0x5   : > { %s2241_s30 = smov (%p33_p1, %s31_s30), 0  ;;  %p305_p3 = pnand %p1462_p0, %p304_p2 }
   0x6   : > { %vm581_vm0 = vcmask (!%p305_p3), 1041408   ;;  %v762_v0 = vld [vmem:[%s2234_s5] sm:$0x3] (!%p305_p3)  ;;  %p362_p4 = scmp.lt.s32.totalorder (!%p305_p3), %s1780_s27, 1  ;;  %vm532_vm1 = vcmask (!%p305_p3), 31744   ;;  %vm1110_vm2 = vcmask (!%p305_p3), 27648  }
   0x7   : > { %308 = sbr.rel (%p305_p3) target bundleno = 301 (0x12d), region = 48  ;;  %v524_v1 = vld [vmem:[%s2232_s3] sm:$0x3] (!%p305_p3)  ;;  %1741 = vmatprep.subr.msk.bf16.mxu1 (!%p305_p3), %vm581_vm0, %v762_v0  ;;  %v819_v2 = vsel (!%p305_p3), %vm581_vm0, %v762_v0, 0 }
   0x8   : > { %1740 = vmatprep.subr.msk.bf16.mxu0 (!%p305_p3), %vm581_vm0, %v524_v1  ;;  %v583_v3 = vsel (!%p305_p3), %vm581_vm0, %v524_v1, 0  ;;  %1707 = vmatpush3.bf16.msra.mxu1 (!%p305_p3), %v819_v2 }
   0x9   : > { %1673 = vmatpush3.bf16.msra.mxu0 (!%p305_p3), %v583_v3 }
   0xe   : > { %s2243_s27 = smov (!%p362_p4, %s1780_s27), 1 }
   0xf   : > { %s1571_s13 = sshll.u32 %s2243_s27, 8  ;;  %s373_s16 = scalar_lea.vmem %s2230_s1, %s2243_s27 }
  0x10   : > { %s1869_s19 = scalar_lea.vmem %s2229_s0, %s1571_s13  ;;  %v1871_v4 = vld [vmem:[%s373_s16] ss:$0 sm:$0xff]  ;;  %s376_s22 = scalar_lea.vmem %s2231_s2, %s2243_s27 }
  0x11   : > { %v398_v5 = vld [vmem:[%s1869_s19] sm:$0xff]  ;;  %v399_v6 = vld [vmem:[%s1869_s19 + $0x8] sm:$0xff]  ;;  %v400_v7 = vld [vmem:[%s1869_s19 + $0x10] sm:$0xff]  ;;  %s1572_s25 = sshll.u32 %s2243_s27, 7 }
  0x12   : > { %v437_v8 = vsub.f32 %v398_v5, %v1871_v4  ;;  %v438_v9 = vsub.f32 %v399_v6, %v1871_v4  ;;  %v746_v10 = vpack.c.bf16 %v399_v6, %v398_v5  ;;  %v401_v11 = vld [vmem:[%s1869_s19 + $0x18] sm:$0xff]  ;;  %v439_v12 = vsub.f32 %v400_v7, %v1871_v4  ;;  %v1884_v13 = vld [vmem:[%s376_s22] ss:$0 sm:$0xff]  ;;  %v403_v17 = vld [vmem:[%s1869_s19 + $0x28] sm:$0xff]  ;;  %s2017_s10 = scalar_lea.vmem %s2237_s8, %s1572_s25  ;;  %s2035_s14 = scalar_lea.vmem %s2236_s7, %s1572_s25 }
  0x13   : > { %v402_v14 = vld [vmem:[%s1869_s19 + $0x20] sm:$0xff]  ;;  %v440_v15 = vsub.f32 %v401_v11, %v1871_v4  ;;  %v747_v16 = vpack.c.bf16 %v401_v11, %v400_v7  ;;  %v404_v19 = vld [vmem:[%s1869_s19 + $0x30] sm:$0xff]  ;;  %v405_v20 = vld [vmem:[%s1869_s19 + $0x38] sm:$0xff]  ;;  %v442_v24 = vsub.f32 %v403_v17, %v1871_v4 }
  0x14   : > { %v441_v18 = vsub.f32 %v402_v14, %v1871_v4  ;;  %1708 = vmatprep.mubr.msk.bf16.mxu1 %vm532_vm1, %v746_v10  ;;  %v476_v21 = vmul.f32 %v1884_v13, %v437_v8  ;;  %v477_v22 = vmul.f32 %v1884_v13, %v438_v9  ;;  %v478_v23 = vmul.f32 %v1884_v13, %v439_v12  ;;  %v406_v25 = vld [vmem:[%s1869_s19 + $0x40] sm:$0xff]  ;;  %v407_v30 = vld [vmem:[%s1869_s19 + $0x48] sm:$0xff]  ;;  %v408_v42 = vld [vmem:[%s1869_s19 + $0x50] sm:$0xff] }
  0x15   : > { %1709 = vmatmul.mubr.msk.bf16.vlgmr.msra.gmra.mrb[0].mxu1 %vm532_vm1, %v747_v16  ;;  %v479_v26 = vmul.f32 %v1884_v13, %v440_v15  ;;  %v748_v27 = vpack.c.bf16 %v403_v17, %v402_v14  ;;  %v443_v28 = vsub.f32 %v404_v19, %v1871_v4  ;;  %v444_v29 = vsub.f32 %v405_v20, %v1871_v4  ;;  %v409_v43 = vld [vmem:[%s1869_s19 + $0x58] sm:$0xff]  ;;  %v410_v46 = vld [vmem:[%s1869_s19 + $0x60] sm:$0xff]  ;;  %v411_v47 = vld [vmem:[%s1869_s19 + $0x68] sm:$0xff] }
  0x16   : > { %v508_v31 = vpack.c.bf16 %v477_v22, %v476_v21  ;;  %v480_v32 = vmul.f32 %v1884_v13, %v441_v18  ;;  %v481_v33 = vmul.f32 %v1884_v13, %v442_v24  ;;  %v445_v35 = vsub.f32 %v406_v25, %v1871_v4  ;;  %v412_v58 = vld [vmem:[%s1869_s19 + $0x70] sm:$0xff]  ;;  %v413_v59 = vld [vmem:[%s1869_s19 + $0x78] sm:$0xff]  ;;  %v414_v62 = vld [vmem:[%s1869_s19 + $0x80] sm:$0xff] }
  0x17   : > { %v509_v34 = vpack.c.bf16 %v479_v26, %v478_v23  ;;  %1712 = vmatprep.mubr.msk.bf16.mxu1 %vm532_vm1, %v748_v27  ;;  %v446_v37 = vsub.f32 %v407_v30, %v1871_v4  ;;  %v749_v38 = vpack.c.bf16 %v405_v20, %v404_v19  ;;  %v482_v39 = vmul.f32 %v1884_v13, %v443_v28  ;;  %v415_v63 = vld [vmem:[%s1869_s19 + $0x88] sm:$0xff]  ;;  %v416_v11 = vld [vmem:[%s1869_s19 + $0x90] sm:$0xff]  ;;  %v417_v12 = vld [vmem:[%s1869_s19 + $0x98] sm:$0xff] }
  0x18   : > { %1674 = vmatprep.mubr.msk.bf16.mxu0 %vm532_vm1, %v508_v31  ;;  %v510_v36 = vpack.c.bf16 %v481_v33, %v480_v32  ;;  %v483_v40 = vmul.f32 %v1884_v13, %v444_v29  ;;  %v750_v41 = vpack.c.bf16 %v407_v30, %v406_v25  ;;  %v484_v44 = vmul.f32 %v1884_v13, %v445_v35  ;;  %v418_v16 = vld [vmem:[%s1869_s19 + $0xa0] sm:$0xff]  ;;  %v419_v17 = vld [vmem:[%s1869_s19 + $0xa8] sm:$0xff]  ;;  %v420_v28 = vld [vmem:[%s1869_s19 + $0xb0] sm:$0xff] }
  0x19   : > { %1675 = vmatmul.mubr.msk.bf16.vlgmr.msra.gmra.mrb[0].mxu0 %vm532_vm1, %v509_v34  ;;  %v485_v45 = vmul.f32 %v1884_v13, %v446_v37  ;;  %v447_v49 = vsub.f32 %v408_v42, %v1871_v4  ;;  %v448_v50 = vsub.f32 %v409_v43, %v1871_v4  ;;  %v449_v52 = vsub.f32 %v410_v46, %v1871_v4  ;;  %v421_v29 = vld [vmem:[%s1869_s19 + $0xb8] sm:$0xff]  ;;  %v422_v32 = vld [vmem:[%s1869_s19 + $0xc0] sm:$0xff]  ;;  %v423_v33 = vld [vmem:[%s1869_s19 + $0xc8] sm:$0xff] }
  0x1a   : > { %1678 = vmatprep.mubr.msk.bf16.mxu0 %vm532_vm1, %v510_v36  ;;  %v511_v48 = vpack.c.bf16 %v483_v40, %v482_v39  ;;  %v450_v53 = vsub.f32 %v411_v47, %v1871_v4  ;;  %v751_v54 = vpack.c.bf16 %v409_v43, %v408_v42  ;;  %v752_v57 = vpack.c.bf16 %v411_v47, %v410_v46 }
  0x1b   : > { %v512_v51 = vpack.c.bf16 %v485_v45, %v484_v44  ;;  %v486_v55 = vmul.f32 %v1884_v13, %v447_v49  ;;  %v487_v56 = vmul.f32 %v1884_v13, %v448_v50  ;;  %v488_v60 = vmul.f32 %v1884_v13, %v449_v52  ;;  %v424_v44 = vld [vmem:[%s1869_s19 + $0xd0] sm:$0xff]  ;;  %v425_v45 = vld [vmem:[%s1869_s19 + $0xd8] sm:$0xff]  ;;  %v427_v49 = vld [vmem:[%s1869_s19 + $0xe8] sm:$0xff] }
  0x1c   : > { %v489_v61 = vmul.f32 %v1884_v13, %v450_v53  ;;  %v451_v1 = vsub.f32 %v412_v58, %v1871_v4  ;;  %v452_v2 = vsub.f32 %v413_v59, %v1871_v4  ;;  %v453_v5 = vsub.f32 %v414_v62, %v1871_v4 }
  0x1d   : > { %1713 = vmatmul.mubr.msk.bf16.gmra.mrb[4].mxu1 %vm532_vm1, %v749_v38  ;;  %v513_v0 = vpack.c.bf16 %v487_v56, %v486_v55  ;;  %v454_v6 = vsub.f32 %v415_v63, %v1871_v4  ;;  %v753_v7 = vpack.c.bf16 %v413_v59, %v412_v58  ;;  %v754_v10 = vpack.c.bf16 %v415_v63, %v414_v62 }
  0x1e   : > { %1716 = vmatprep.mubr.msk.bf16.mxu1 %vm532_vm1, %v750_v41  ;;  %v514_v3 = vpack.c.bf16 %v489_v61, %v488_v60  ;;  %v490_v8 = vmul.f32 %v1884_v13, %v451_v1  ;;  %v491_v9 = vmul.f32 %v1884_v13, %v452_v2  ;;  %v492_v14 = vmul.f32 %v1884_v13, %v453_v5  ;;  %v428_v60 = vld [vmem:[%s1869_s19 + $0xf0] sm:$0xff]  ;;  %v429_v61 = vld [vmem:[%s1869_s19 + $0xf8] sm:$0xff] }
  0x1f   : > { %v493_v15 = vmul.f32 %v1884_v13, %v454_v6  ;;  %v455_v19 = vsub.f32 %v416_v11, %v1871_v4  ;;  %v456_v20 = vsub.f32 %v417_v12, %v1871_v4  ;;  %v457_v22 = vsub.f32 %v418_v16, %v1871_v4 }
  0x20   : > { %v515_v18 = vpack.c.bf16 %v491_v9, %v490_v8  ;;  %v458_v23 = vsub.f32 %v419_v17, %v1871_v4  ;;  %v755_v24 = vpack.c.bf16 %v417_v12, %v416_v11  ;;  %v756_v27 = vpack.c.bf16 %v419_v17, %v418_v16 }
  0x21   : > { %1679 = vmatmul.mubr.msk.bf16.gmra.mrb[4].mxu0 %vm532_vm1, %v511_v48  ;;  %v516_v21 = vpack.c.bf16 %v493_v15, %v492_v14  ;;  %v494_v25 = vmul.f32 %v1884_v13, %v455_v19  ;;  %v495_v26 = vmul.f32 %v1884_v13, %v456_v20  ;;  %v496_v30 = vmul.f32 %v1884_v13, %v457_v22  ;;  %v426_v48 = vld [vmem:[%s1869_s19 + $0xe0] sm:$0xff] }
  0x22   : > { %1682 = vmatprep.mubr.msk.bf16.mxu0 %vm532_vm1, %v512_v51  ;;  %v497_v31 = vmul.f32 %v1884_v13, %v458_v23  ;;  %v459_v35 = vsub.f32 %v420_v28, %v1871_v4  ;;  %v460_v36 = vsub.f32 %v421_v29, %v1871_v4  ;;  %v461_v38 = vsub.f32 %v422_v32, %v1871_v4  ;;  %v2023_v14 = vld [vmem:[%s2233_s4] ss:$0 sm:$0xff] }
  0x23   : > { %v517_v34 = vpack.c.bf16 %v495_v26, %v494_v25  ;;  %v462_v39 = vsub.f32 %v423_v33, %v1871_v4  ;;  %v757_v40 = vpack.c.bf16 %v421_v29, %v420_v28  ;;  %v758_v43 = vpack.c.bf16 %v423_v33, %v422_v32 }
  0x24   : > { %v518_v37 = vpack.c.bf16 %v497_v31, %v496_v30  ;;  %v498_v41 = vmul.f32 %v1884_v13, %v459_v35  ;;  %v499_v42 = vmul.f32 %v1884_v13, %v460_v36  ;;  %v500_v46 = vmul.f32 %v1884_v13, %v461_v38 }
  0x25   : > { %1717 = vmatmul.mubr.msk.bf16.gmra.mrb[8].mxu1 %vm532_vm1, %v751_v54  ;;  %v501_v47 = vmul.f32 %v1884_v13, %v462_v39  ;;  %v463_v51 = vsub.f32 %v424_v44, %v1871_v4  ;;  %v464_v52 = vsub.f32 %v425_v45, %v1871_v4  ;;  %v465_v54 = vsub.f32 %v426_v48, %v1871_v4 }
  0x26   : > { %1720 = vmatprep.mubr.msk.bf16.mxu1 %vm532_vm1, %v752_v57  ;;  %v519_v50 = vpack.c.bf16 %v499_v42, %v498_v41  ;;  %v466_v55 = vsub.f32 %v427_v49, %v1871_v4  ;;  %v759_v56 = vpack.c.bf16 %v425_v45, %v424_v44  ;;  %v760_v59 = vpack.c.bf16 %v427_v49, %v426_v48 }
  0x27   : > { %v520_v53 = vpack.c.bf16 %v501_v47, %v500_v46  ;;  %v502_v57 = vmul.f32 %v1884_v13, %v463_v51  ;;  %v503_v58 = vmul.f32 %v1884_v13, %v464_v52  ;;  %v504_v62 = vmul.f32 %v1884_v13, %v465_v54 }
  0x28   : > { %v505_v63 = vmul.f32 %v1884_v13, %v466_v55  ;;  %v467_v1 = vsub.f32 %v428_v60, %v1871_v4  ;;  %v468_v2 = vsub.f32 %v429_v61, %v1871_v4  ;;  %v761_v5 = vpack.c.bf16 %v429_v61, %v428_v60  ;;  %v2010_v4 = vld [vmem:[%s2235_s6] ss:$0 sm:$0xff] }
  0x29   : > { %1683 = vmatmul.mubr.msk.bf16.gmra.mrb[8].mxu0 %vm532_vm1, %v513_v0  ;;  %v521_v0 = vpack.c.bf16 %v503_v58, %v502_v57 }
  0x2a   : > { %1686 = vmatprep.mubr.msk.bf16.mxu0 %vm532_vm1, %v514_v3  ;;  %v522_v3 = vpack.c.bf16 %v505_v63, %v504_v62  ;;  %v506_v6 = vmul.f32 %v1884_v13, %v467_v1 }
  0x2d   : > { %1721 = vmatmul.mubr.msk.bf16.gmra.mrb[12].mxu1 %vm532_vm1, %v753_v7  ;;  %v507_v7 = vmul.f32 %v1884_v13, %v468_v2 }
  0x2e   : > { %1724 = vmatprep.mubr.msk.bf16.mxu1 %vm532_vm1, %v754_v10 }
  0x2f   : > { %v523_v8 = vpack.c.bf16 %v507_v7, %v506_v6 }
  0x31   : > { %1687 = vmatmul.mubr.msk.bf16.gmra.mrb[12].mxu0 %vm532_vm1, %v515_v18 }
  0x32   : > { %1690 = vmatprep.mubr.msk.bf16.mxu0 %vm532_vm1, %v516_v21 }
  0x35   : > { %1725 = vmatmul.mubr.msk.bf16.gmra.mrb[16].mxu1 %vm532_vm1, %v755_v24 }
  0x36   : > { %1728 = vmatprep.mubr.msk.bf16.mxu1 %vm532_vm1, %v756_v27 }
  0x39   : > { %1691 = vmatmul.mubr.msk.bf16.gmra.mrb[16].mxu0 %vm532_vm1, %v517_v34 }
  0x3a   : > { %1694 = vmatprep.mubr.msk.bf16.mxu0 %vm532_vm1, %v518_v37 }
  0x3d   : > { %1729 = vmatmul.mubr.msk.bf16.gmra.mrb[20].mxu1 %vm532_vm1, %v757_v40 }
  0x3e   : > { %1732 = vmatprep.mubr.msk.bf16.mxu1 %vm532_vm1, %v758_v43 }
  0x41   : > { %1695 = vmatmul.mubr.msk.bf16.gmra.mrb[20].mxu0 %vm532_vm1, %v519_v50 }
  0x42   : > { %1698 = vmatprep.mubr.msk.bf16.mxu0 %vm532_vm1, %v520_v53 }
  0x45   : > { %1733 = vmatmul.mubr.msk.bf16.gmra.mrb[24].mxu1 %vm532_vm1, %v759_v56 }
  0x46   : > { %1736 = vmatprep.mubr.msk.bf16.mxu1 %vm532_vm1, %v760_v59 }
  0x49   : > { %1699 = vmatmul.mubr.msk.bf16.gmra.mrb[24].mxu0 %vm532_vm1, %v521_v0 }
  0x4a   : > { %1702 = vmatprep.mubr.msk.bf16.mxu0 %vm532_vm1, %v522_v3 }
  0x4d   : > { %1737 = vmatmul.mubr.msk.bf16.gmra.mrb[28].mxu1 %vm532_vm1, %v761_v5 }
  0x51   : > { %1703 = vmatmul.mubr.msk.bf16.gmra.mrb[28].mxu0 %vm532_vm1, %v523_v8 }
  0xe8   : > { %v1710_v9 = vpop.f32.mrb[0].mxu1 }
  0xe9   : > { %v864_v10 = vadd.f32 %v1710_v9, %v2010_v4  ;;  %v855_v11 = vpop.f32.mrb[1].mxu1 }
  0xea   : > { %v856_v13 = vadd.f32 %v2010_v4, %v855_v11  ;;  %v1711_v12 = vpop.f32.mrb[2].mxu1 }
  0xeb   : > { %v1608_v15 = vpack.c.bf16 %v864_v10, %v864_v10  ;;  %v867_v16 = vadd.f32 %v1711_v12, %v2010_v4  ;;  %v858_v17 = vpop.f32.mrb[3].mxu1 }
  0xec   : > { %v1606_v18 = vpack.c.bf16 %v856_v13, %v856_v13  ;;  %v1676_v19 = vpop.f32.mrb[0].mxu0  ;;  %v859_v20 = vadd.f32 %v2010_v4, %v858_v17 }
  0xed   : > { %1273 = vst.msk [vmem:[%s2017_s10 + $0x8] sm:$0xf] %vm1110_vm2, %v1608_v15  ;;  %v1609_v21 = vpack.c.bf16 %v867_v16, %v867_v16  ;;  %v628_v22 = vadd.f32 %v1676_v19, %v2023_v14  ;;  %v619_v23 = vpop.f32.mrb[1].mxu0 }
  0xee   : > { %1271 = vst.msk [vmem:[%s2017_s10] sm:$0xf] %vm1110_vm2, %v1606_v18  ;;  %v1607_v24 = vpack.c.bf16 %v859_v20, %v859_v20  ;;  %v620_v25 = vadd.f32 %v2023_v14, %v619_v23  ;;  %v1677_v26 = vpop.f32.mrb[2].mxu0 }
  0xef   : > { %1274 = vst.msk [vmem:[%s2017_s10 + $0xc] sm:$0xf] %vm1110_vm2, %v1609_v21  ;;  %v1576_v27 = vpack.c.bf16 %v628_v22, %v628_v22  ;;  %v631_v28 = vadd.f32 %v1677_v26, %v2023_v14  ;;  %v622_v29 = vpop.f32.mrb[3].mxu0 }
  0xf0   : > { %1272 = vst.msk [vmem:[%s2017_s10 + $0x4] sm:$0xf] %vm1110_vm2, %v1607_v24  ;;  %v1574_v30 = vpack.c.bf16 %v620_v25, %v620_v25  ;;  %v623_v31 = vadd.f32 %v2023_v14, %v622_v29  ;;  %v1714_v32 = vpop.f32.mrb[4].mxu1 }
  0xf1   : > { %1113 = vst.msk [vmem:[%s2035_s14 + $0x8] sm:$0xf] %vm1110_vm2, %v1576_v27  ;;  %v1577_v33 = vpack.c.bf16 %v631_v28, %v631_v28  ;;  %v880_v34 = vadd.f32 %v1714_v32, %v2010_v4  ;;  %v871_v35 = vpop.f32.mrb[5].mxu1 }
  0xf2   : > { %1111 = vst.msk [vmem:[%s2035_s14] sm:$0xf] %vm1110_vm2, %v1574_v30  ;;  %v1575_v36 = vpack.c.bf16 %v623_v31, %v623_v31  ;;  %v872_v37 = vadd.f32 %v2010_v4, %v871_v35  ;;  %v1715_v38 = vpop.f32.mrb[6].mxu1 }
  0xf3   : > { %1114 = vst.msk [vmem:[%s2035_s14 + $0xc] sm:$0xf] %vm1110_vm2, %v1577_v33  ;;  %v1612_v39 = vpack.c.bf16 %v880_v34, %v880_v34  ;;  %v883_v40 = vadd.f32 %v1715_v38, %v2010_v4  ;;  %v874_v41 = vpop.f32.mrb[7].mxu1 }
  0xf4   : > { %1112 = vst.msk [vmem:[%s2035_s14 + $0x4] sm:$0xf] %vm1110_vm2, %v1575_v36  ;;  %v1610_v42 = vpack.c.bf16 %v872_v37, %v872_v37  ;;  %v1680_v43 = vpop.f32.mrb[4].mxu0  ;;  %v875_v44 = vadd.f32 %v2010_v4, %v874_v41 }
  0xf5   : > { %1277 = vst.msk [vmem:[%s2017_s10 + $0x18] sm:$0xf] %vm1110_vm2, %v1612_v39  ;;  %v1613_v45 = vpack.c.bf16 %v883_v40, %v883_v40  ;;  %v644_v46 = vadd.f32 %v1680_v43, %v2023_v14  ;;  %v635_v47 = vpop.f32.mrb[5].mxu0 }
  0xf6   : > { %1275 = vst.msk [vmem:[%s2017_s10 + $0x10] sm:$0xf] %vm1110_vm2, %v1610_v42  ;;  %v1611_v48 = vpack.c.bf16 %v875_v44, %v875_v44  ;;  %v636_v49 = vadd.f32 %v2023_v14, %v635_v47  ;;  %v1681_v50 = vpop.f32.mrb[6].mxu0 }
  0xf7   : > { %1278 = vst.msk [vmem:[%s2017_s10 + $0x1c] sm:$0xf] %vm1110_vm2, %v1613_v45  ;;  %v1580_v51 = vpack.c.bf16 %v644_v46, %v644_v46  ;;  %v647_v52 = vadd.f32 %v1681_v50, %v2023_v14  ;;  %v638_v53 = vpop.f32.mrb[7].mxu0 }
  0xf8   : > { %1276 = vst.msk [vmem:[%s2017_s10 + $0x14] sm:$0xf] %vm1110_vm2, %v1611_v48  ;;  %v1578_v54 = vpack.c.bf16 %v636_v49, %v636_v49  ;;  %v639_v55 = vadd.f32 %v2023_v14, %v638_v53  ;;  %v1718_v56 = vpop.f32.mrb[8].mxu1 }
  0xf9   : > { %1117 = vst.msk [vmem:[%s2035_s14 + $0x18] sm:$0xf] %vm1110_vm2, %v1580_v51  ;;  %v1581_v57 = vpack.c.bf16 %v647_v52, %v647_v52  ;;  %v896_v58 = vadd.f32 %v1718_v56, %v2010_v4  ;;  %v887_v59 = vpop.f32.mrb[9].mxu1 }
  0xfa   : > { %1115 = vst.msk [vmem:[%s2035_s14 + $0x10] sm:$0xf] %vm1110_vm2, %v1578_v54  ;;  %v1579_v60 = vpack.c.bf16 %v639_v55, %v639_v55  ;;  %v888_v61 = vadd.f32 %v2010_v4, %v887_v59  ;;  %v1719_v62 = vpop.f32.mrb[10].mxu1 }
  0xfb   : > { %1118 = vst.msk [vmem:[%s2035_s14 + $0x1c] sm:$0xf] %vm1110_vm2, %v1581_v57  ;;  %v1616_v63 = vpack.c.bf16 %v896_v58, %v896_v58  ;;  %v899_v0 = vadd.f32 %v1719_v62, %v2010_v4  ;;  %v890_v1 = vpop.f32.mrb[11].mxu1 }
  0xfc   : > { %1116 = vst.msk [vmem:[%s2035_s14 + $0x14] sm:$0xf] %vm1110_vm2, %v1579_v60  ;;  %v1614_v2 = vpack.c.bf16 %v888_v61, %v888_v61  ;;  %v1684_v3 = vpop.f32.mrb[8].mxu0  ;;  %v891_v5 = vadd.f32 %v2010_v4, %v890_v1 }
  0xfd   : > { %1281 = vst.msk [vmem:[%s2017_s10 + $0x28] sm:$0xf] %vm1110_vm2, %v1616_v63  ;;  %v1617_v6 = vpack.c.bf16 %v899_v0, %v899_v0  ;;  %v660_v7 = vadd.f32 %v1684_v3, %v2023_v14  ;;  %v651_v8 = vpop.f32.mrb[9].mxu0 }
  0xfe   : > { %1279 = vst.msk [vmem:[%s2017_s10 + $0x20] sm:$0xf] %vm1110_vm2, %v1614_v2  ;;  %v1615_v9 = vpack.c.bf16 %v891_v5, %v891_v5  ;;  %v652_v10 = vadd.f32 %v2023_v14, %v651_v8  ;;  %v1685_v11 = vpop.f32.mrb[10].mxu0 }
  0xff   : > { %1282 = vst.msk [vmem:[%s2017_s10 + $0x2c] sm:$0xf] %vm1110_vm2, %v1617_v6  ;;  %v1584_v13 = vpack.c.bf16 %v660_v7, %v660_v7  ;;  %v663_v12 = vadd.f32 %v1685_v11, %v2023_v14  ;;  %v654_v15 = vpop.f32.mrb[11].mxu0 }
 0x100   : > { %1280 = vst.msk [vmem:[%s2017_s10 + $0x24] sm:$0xf] %vm1110_vm2, %v1615_v9  ;;  %v1582_v16 = vpack.c.bf16 %v652_v10, %v652_v10  ;;  %v655_v17 = vadd.f32 %v2023_v14, %v654_v15  ;;  %v1722_v18 = vpop.f32.mrb[12].mxu1 }
 0x101   : > { %1121 = vst.msk [vmem:[%s2035_s14 + $0x28] sm:$0xf] %vm1110_vm2, %v1584_v13  ;;  %v1585_v19 = vpack.c.bf16 %v663_v12, %v663_v12  ;;  %v912_v20 = vadd.f32 %v1722_v18, %v2010_v4  ;;  %v903_v21 = vpop.f32.mrb[13].mxu1 }
 0x102   : > { %1119 = vst.msk [vmem:[%s2035_s14 + $0x20] sm:$0xf] %vm1110_vm2, %v1582_v16  ;;  %v1583_v22 = vpack.c.bf16 %v655_v17, %v655_v17  ;;  %v904_v23 = vadd.f32 %v2010_v4, %v903_v21  ;;  %v1723_v24 = vpop.f32.mrb[14].mxu1 }
 0x103   : > { %1122 = vst.msk [vmem:[%s2035_s14 + $0x2c] sm:$0xf] %vm1110_vm2, %v1585_v19  ;;  %v1620_v25 = vpack.c.bf16 %v912_v20, %v912_v20  ;;  %v915_v26 = vadd.f32 %v1723_v24, %v2010_v4  ;;  %v906_v27 = vpop.f32.mrb[15].mxu1 }
 0x104   : > { %1120 = vst.msk [vmem:[%s2035_s14 + $0x24] sm:$0xf] %vm1110_vm2, %v1583_v22  ;;  %v1618_v28 = vpack.c.bf16 %v904_v23, %v904_v23  ;;  %v1688_v29 = vpop.f32.mrb[12].mxu0  ;;  %v907_v30 = vadd.f32 %v2010_v4, %v906_v27 }
 0x105   : > { %1285 = vst.msk [vmem:[%s2017_s10 + $0x38] sm:$0xf] %vm1110_vm2, %v1620_v25  ;;  %v1621_v31 = vpack.c.bf16 %v915_v26, %v915_v26  ;;  %v676_v32 = vadd.f32 %v1688_v29, %v2023_v14  ;;  %v667_v33 = vpop.f32.mrb[13].mxu0 }
 0x106   : > { %1283 = vst.msk [vmem:[%s2017_s10 + $0x30] sm:$0xf] %vm1110_vm2, %v1618_v28  ;;  %v1619_v34 = vpack.c.bf16 %v907_v30, %v907_v30  ;;  %v668_v35 = vadd.f32 %v2023_v14, %v667_v33  ;;  %v1689_v36 = vpop.f32.mrb[14].mxu0 }
 0x107   : > { %1286 = vst.msk [vmem:[%s2017_s10 + $0x3c] sm:$0xf] %vm1110_vm2, %v1621_v31  ;;  %v1588_v37 = vpack.c.bf16 %v676_v32, %v676_v32  ;;  %v679_v38 = vadd.f32 %v1689_v36, %v2023_v14  ;;  %v670_v39 = vpop.f32.mrb[15].mxu0 }
 0x108   : > { %1284 = vst.msk [vmem:[%s2017_s10 + $0x34] sm:$0xf] %vm1110_vm2, %v1619_v34  ;;  %v1586_v40 = vpack.c.bf16 %v668_v35, %v668_v35  ;;  %v671_v41 = vadd.f32 %v2023_v14, %v670_v39  ;;  %v1726_v42 = vpop.f32.mrb[16].mxu1 }
 0x109   : > { %1125 = vst.msk [vmem:[%s2035_s14 + $0x38] sm:$0xf] %vm1110_vm2, %v1588_v37  ;;  %v1589_v43 = vpack.c.bf16 %v679_v38, %v679_v38  ;;  %v928_v44 = vadd.f32 %v1726_v42, %v2010_v4  ;;  %v919_v45 = vpop.f32.mrb[17].mxu1 }
 0x10a   : > { %1123 = vst.msk [vmem:[%s2035_s14 + $0x30] sm:$0xf] %vm1110_vm2, %v1586_v40  ;;  %v1587_v46 = vpack.c.bf16 %v671_v41, %v671_v41  ;;  %v920_v47 = vadd.f32 %v2010_v4, %v919_v45  ;;  %v1727_v48 = vpop.f32.mrb[18].mxu1 }
 0x10b   : > { %1126 = vst.msk [vmem:[%s2035_s14 + $0x3c] sm:$0xf] %vm1110_vm2, %v1589_v43  ;;  %v1624_v49 = vpack.c.bf16 %v928_v44, %v928_v44  ;;  %v931_v50 = vadd.f32 %v1727_v48, %v2010_v4  ;;  %v922_v51 = vpop.f32.mrb[19].mxu1 }
 0x10c   : > { %1124 = vst.msk [vmem:[%s2035_s14 + $0x34] sm:$0xf] %vm1110_vm2, %v1587_v46  ;;  %v1622_v52 = vpack.c.bf16 %v920_v47, %v920_v47  ;;  %v1692_v53 = vpop.f32.mrb[16].mxu0  ;;  %v923_v54 = vadd.f32 %v2010_v4, %v922_v51 }
 0x10d   : > { %1289 = vst.msk [vmem:[%s2017_s10 + $0x48] sm:$0xf] %vm1110_vm2, %v1624_v49  ;;  %v1625_v55 = vpack.c.bf16 %v931_v50, %v931_v50  ;;  %v692_v56 = vadd.f32 %v1692_v53, %v2023_v14  ;;  %v683_v57 = vpop.f32.mrb[17].mxu0 }
 0x10e   : > { %1287 = vst.msk [vmem:[%s2017_s10 + $0x40] sm:$0xf] %vm1110_vm2, %v1622_v52  ;;  %v1623_v58 = vpack.c.bf16 %v923_v54, %v923_v54  ;;  %v684_v59 = vadd.f32 %v2023_v14, %v683_v57  ;;  %v1693_v60 = vpop.f32.mrb[18].mxu0 }
 0x10f   : > { %1290 = vst.msk [vmem:[%s2017_s10 + $0x4c] sm:$0xf] %vm1110_vm2, %v1625_v55  ;;  %v1592_v61 = vpack.c.bf16 %v692_v56, %v692_v56  ;;  %v695_v62 = vadd.f32 %v1693_v60, %v2023_v14  ;;  %v686_v63 = vpop.f32.mrb[19].mxu0 }
 0x110   : > { %1288 = vst.msk [vmem:[%s2017_s10 + $0x44] sm:$0xf] %vm1110_vm2, %v1623_v58  ;;  %v1590_v0 = vpack.c.bf16 %v684_v59, %v684_v59  ;;  %v687_v1 = vadd.f32 %v2023_v14, %v686_v63  ;;  %v1730_v2 = vpop.f32.mrb[20].mxu1 }
 0x111   : > { %1129 = vst.msk [vmem:[%s2035_s14 + $0x48] sm:$0xf] %vm1110_vm2, %v1592_v61  ;;  %v1593_v3 = vpack.c.bf16 %v695_v62, %v695_v62  ;;  %v944_v5 = vadd.f32 %v1730_v2, %v2010_v4  ;;  %v935_v6 = vpop.f32.mrb[21].mxu1 }
 0x112   : > { %1127 = vst.msk [vmem:[%s2035_s14 + $0x40] sm:$0xf] %vm1110_vm2, %v1590_v0  ;;  %v1591_v7 = vpack.c.bf16 %v687_v1, %v687_v1  ;;  %v936_v8 = vadd.f32 %v2010_v4, %v935_v6  ;;  %v1731_v9 = vpop.f32.mrb[22].mxu1 }
 0x113   : > { %1130 = vst.msk [vmem:[%s2035_s14 + $0x4c] sm:$0xf] %vm1110_vm2, %v1593_v3  ;;  %v1628_v10 = vpack.c.bf16 %v944_v5, %v944_v5  ;;  %v947_v11 = vadd.f32 %v1731_v9, %v2010_v4  ;;  %v938_v13 = vpop.f32.mrb[23].mxu1 }
 0x114   : > { %1128 = vst.msk [vmem:[%s2035_s14 + $0x44] sm:$0xf] %vm1110_vm2, %v1591_v7  ;;  %v1626_v12 = vpack.c.bf16 %v936_v8, %v936_v8  ;;  %v1696_v15 = vpop.f32.mrb[20].mxu0  ;;  %v939_v16 = vadd.f32 %v2010_v4, %v938_v13 }
 0x115   : > { %1293 = vst.msk [vmem:[%s2017_s10 + $0x58] sm:$0xf] %vm1110_vm2, %v1628_v10  ;;  %v1629_v17 = vpack.c.bf16 %v947_v11, %v947_v11  ;;  %v708_v18 = vadd.f32 %v1696_v15, %v2023_v14  ;;  %v699_v19 = vpop.f32.mrb[21].mxu0 }
 0x116   : > { %1291 = vst.msk [vmem:[%s2017_s10 + $0x50] sm:$0xf] %vm1110_vm2, %v1626_v12  ;;  %v1627_v20 = vpack.c.bf16 %v939_v16, %v939_v16  ;;  %v700_v21 = vadd.f32 %v2023_v14, %v699_v19  ;;  %v1697_v22 = vpop.f32.mrb[22].mxu0 }
 0x117   : > { %1294 = vst.msk [vmem:[%s2017_s10 + $0x5c] sm:$0xf] %vm1110_vm2, %v1629_v17  ;;  %v1596_v23 = vpack.c.bf16 %v708_v18, %v708_v18  ;;  %v711_v24 = vadd.f32 %v1697_v22, %v2023_v14  ;;  %v702_v25 = vpop.f32.mrb[23].mxu0 }
 0x118   : > { %1292 = vst.msk [vmem:[%s2017_s10 + $0x54] sm:$0xf] %vm1110_vm2, %v1627_v20  ;;  %v1594_v26 = vpack.c.bf16 %v700_v21, %v700_v21  ;;  %v703_v27 = vadd.f32 %v2023_v14, %v702_v25  ;;  %v1734_v28 = vpop.f32.mrb[24].mxu1 }
 0x119   : > { %1133 = vst.msk [vmem:[%s2035_s14 + $0x58] sm:$0xf] %vm1110_vm2, %v1596_v23  ;;  %v1597_v29 = vpack.c.bf16 %v711_v24, %v711_v24  ;;  %v960_v30 = vadd.f32 %v1734_v28, %v2010_v4  ;;  %v951_v31 = vpop.f32.mrb[25].mxu1 }
 0x11a   : > { %1131 = vst.msk [vmem:[%s2035_s14 + $0x50] sm:$0xf] %vm1110_vm2, %v1594_v26  ;;  %v1595_v32 = vpack.c.bf16 %v703_v27, %v703_v27  ;;  %v952_v33 = vadd.f32 %v2010_v4, %v951_v31  ;;  %v1735_v34 = vpop.f32.mrb[26].mxu1 }
 0x11b   : > { %1134 = vst.msk [vmem:[%s2035_s14 + $0x5c] sm:$0xf] %vm1110_vm2, %v1597_v29  ;;  %v1632_v35 = vpack.c.bf16 %v960_v30, %v960_v30  ;;  %v963_v36 = vadd.f32 %v1735_v34, %v2010_v4  ;;  %v954_v37 = vpop.f32.mrb[27].mxu1 }
 0x11c   : > { %1132 = vst.msk [vmem:[%s2035_s14 + $0x54] sm:$0xf] %vm1110_vm2, %v1595_v32  ;;  %v1630_v38 = vpack.c.bf16 %v952_v33, %v952_v33  ;;  %v1700_v39 = vpop.f32.mrb[24].mxu0  ;;  %v955_v40 = vadd.f32 %v2010_v4, %v954_v37 }
 0x11d   : > { %1297 = vst.msk [vmem:[%s2017_s10 + $0x68] sm:$0xf] %vm1110_vm2, %v1632_v35  ;;  %v1633_v41 = vpack.c.bf16 %v963_v36, %v963_v36  ;;  %v724_v42 = vadd.f32 %v1700_v39, %v2023_v14  ;;  %v715_v43 = vpop.f32.mrb[25].mxu0 }
 0x11e   : > { %1295 = vst.msk [vmem:[%s2017_s10 + $0x60] sm:$0xf] %vm1110_vm2, %v1630_v38  ;;  %v1631_v44 = vpack.c.bf16 %v955_v40, %v955_v40  ;;  %v716_v45 = vadd.f32 %v2023_v14, %v715_v43  ;;  %v1701_v46 = vpop.f32.mrb[26].mxu0 }
 0x11f   : > { %1298 = vst.msk [vmem:[%s2017_s10 + $0x6c] sm:$0xf] %vm1110_vm2, %v1633_v41  ;;  %v1600_v47 = vpack.c.bf16 %v724_v42, %v724_v42  ;;  %v727_v48 = vadd.f32 %v1701_v46, %v2023_v14  ;;  %v718_v49 = vpop.f32.mrb[27].mxu0 }
 0x120   : > { %1296 = vst.msk [vmem:[%s2017_s10 + $0x64] sm:$0xf] %vm1110_vm2, %v1631_v44  ;;  %v1598_v50 = vpack.c.bf16 %v716_v45, %v716_v45  ;;  %v719_v51 = vadd.f32 %v2023_v14, %v718_v49  ;;  %v1738_v52 = vpop.f32.mrb[28].mxu1 }
 0x121   : > { %1137 = vst.msk [vmem:[%s2035_s14 + $0x68] sm:$0xf] %vm1110_vm2, %v1600_v47  ;;  %v1601_v53 = vpack.c.bf16 %v727_v48, %v727_v48  ;;  %v976_v54 = vadd.f32 %v1738_v52, %v2010_v4  ;;  %v967_v55 = vpop.f32.mrb[29].mxu1 }
 0x122   : > { %1135 = vst.msk [vmem:[%s2035_s14 + $0x60] sm:$0xf] %vm1110_vm2, %v1598_v50  ;;  %v1599_v56 = vpack.c.bf16 %v719_v51, %v719_v51  ;;  %v968_v57 = vadd.f32 %v2010_v4, %v967_v55  ;;  %v1739_v58 = vpop.f32.mrb[30].mxu1 }
 0x123   : > { %1138 = vst.msk [vmem:[%s2035_s14 + $0x6c] sm:$0xf] %vm1110_vm2, %v1601_v53  ;;  %v1636_v59 = vpack.c.bf16 %v976_v54, %v976_v54  ;;  %v979_v60 = vadd.f32 %v1739_v58, %v2010_v4  ;;  %v970_v61 = vpop.f32.mrb[31].mxu1 }
 0x124   : > { %1136 = vst.msk [vmem:[%s2035_s14 + $0x64] sm:$0xf] %vm1110_vm2, %v1599_v56  ;;  %v1634_v62 = vpack.c.bf16 %v968_v57, %v968_v57  ;;  %v1704_v63 = vpop.f32.mrb[28].mxu0  ;;  %v971_v0 = vadd.f32 %v2010_v4, %v970_v61 }
 0x125   : > { %1301 = vst.msk [vmem:[%s2017_s10 + $0x78] sm:$0xf] %vm1110_vm2, %v1636_v59  ;;  %v1637_v1 = vpack.c.bf16 %v979_v60, %v979_v60  ;;  %v740_v2 = vadd.f32 %v1704_v63, %v2023_v14  ;;  %v731_v3 = vpop.f32.mrb[29].mxu0 }
 0x126   : > { %1299 = vst.msk [vmem:[%s2017_s10 + $0x70] sm:$0xf] %vm1110_vm2, %v1634_v62  ;;  %v1635_v5 = vpack.c.bf16 %v971_v0, %v971_v0  ;;  %v732_v6 = vadd.f32 %v2023_v14, %v731_v3  ;;  %v1705_v7 = vpop.f32.mrb[30].mxu0 }
 0x127   : > { %1302 = vst.msk [vmem:[%s2017_s10 + $0x7c] sm:$0xf] %vm1110_vm2, %v1637_v1  ;;  %v1604_v8 = vpack.c.bf16 %v740_v2, %v740_v2  ;;  %v743_v4 = vadd.f32 %v1705_v7, %v2023_v14  ;;  %v734_v9 = vpop.f32.mrb[31].mxu0 }
 0x128   : > { %1300 = vst.msk [vmem:[%s2017_s10 + $0x74] sm:$0xf] %vm1110_vm2, %v1635_v5  ;;  %v1602_v10 = vpack.c.bf16 %v732_v6, %v732_v6  ;;  %v735_v11 = vadd.f32 %v2023_v14, %v734_v9 }
 0x129   : > { %1141 = vst.msk [vmem:[%s2035_s14 + $0x78] sm:$0xf] %vm1110_vm2, %v1604_v8  ;;  %v1605_v13 = vpack.c.bf16 %v743_v4, %v743_v4 }
 0x12a   : > { %1139 = vst.msk [vmem:[%s2035_s14 + $0x70] sm:$0xf] %vm1110_vm2, %v1602_v10  ;;  %v1603_v12 = vpack.c.bf16 %v735_v11, %v735_v11 }
 0x12b   : > { %1142 = vst.msk [vmem:[%s2035_s14 + $0x7c] sm:$0xf] %vm1110_vm2, %v1605_v13 }
 0x12c   : > { %1140 = vst.msk [vmem:[%s2035_s14 + $0x74] sm:$0xf] %vm1110_vm2, %v1603_v12 }
 0x12d PF: > { %s19_s29 = sadd.s32 1, %s1788_s29   ;;  %s2238_s27 = smov %s1784_s28 }
 0x12e   : > { %p16_p5 = scmp.ge.s32.totalorder %s19_s29, 4   ;;  %s2239_s28 = smov %s2241_s30 }
 0x130   :  { %18 = sbr.rel (!%p16_p5) target bundleno = 2 (0x2), region = 96 }

// kernel: transform_forward.8
= control target key start
LH: loop header
LB: loop body
LE: loop exit
PB: predicated region body
PF: predicated region fallthrough
CT: control target
= control target key end

     0   :  { %s4546_s13 = smov 0   ;;  %s4548_s14 = smov 0   ;;  %s6277_s0 = inlined_call_operand.vmem [shape: f32[2,256,4], index: 0, kind: input, shape index: {}]   ;;  %s6278_s1 = inlined_call_operand.vmem [shape: f32[2,256,4], index: 1, kind: input, shape index: {}]   ;;  %s6279_s2 = inlined_call_operand.vmem [shape: bf16[2,256,4], index: 2, kind: input, shape index: {}]   ;;  %s6280_s3 = inlined_call_operand.vmem [shape: bf16[2,256,4], index: 3, kind: input, shape index: {}]   ;;  %s6281_s4 = inlined_call_operand.vmem [shape: f32[2,1,4], index: 4, kind: input, shape index: {}]   ;;  %s6282_s5 = inlined_call_operand.vmem [shape: f32[2,1,4], index: 5, kind: input, shape index: {}]   ;;  %s6283_s6 = inlined_call_operand.vmem [shape: bf16[4,4], index: 6, kind: input, shape index: {}]   ;;  %s6284_s7 = inlined_call_operand.vmem [shape: f32[1,4], index: 7, kind: input, shape index: {}]   ;;  %s6285_s8 = inlined_call_operand.vmem [shape: bf16[4,4], index: 8, kind: input, shape index: {}]   ;;  %s6286_s9 = inlined_call_operand.vmem [shape: f32[1,4], index: 9, kind: input, shape index: {}]   ;;  %s6287_s10 = inlined_call_operand.vmem [shape: f32[2,256,4], index: 10, kind: output, shape index: {}]  }
   0x1   :  { %s4550_s15 = smov 0  }
   0x2 LB: > { %s39_s16 = sadd.s32 1, %s4482_s14  ;;  %p3770_p0 = scmp.ge.s32.totalorder %s4486_s15, 1  ;;  %s4486_s15 = sphi %s4550_s15, %s20_s15   ;;  %s4482_s14 = sphi %s4548_s14, %s6590_s14   ;;  %s4478_s13 = sphi %s4546_s13, %s6589_s13  }
   0x3   : > { %p41_p1 = scmp.ge.s32.totalorder %s39_s16, 2  ;;  %p407_p2 = scmp.lt.s32.totalorder %s4486_s15, 3 }
   0x5   : > { %s6592_s16 = smov (%p41_p1, %s39_s16), 0  ;;  %p408_p3 = pnand %p3770_p0, %p407_p2 }
   0x7   : > { %411 = sbr.rel (%p408_p3) target bundleno = 1507 (0x5e3), region = 60 }
   0xe   : > { %v673_v0 = vld [vmem:[%s6283_s6] sm:$0x3]  ;;  %vm730_vm0 = vcmask 1041408   ;;  %p487_p4 = scmp.lt.s32.totalorder %s4478_s13, 1  ;;  %vm681_vm1 = vcmask 31744   ;;  %vm927_vm2 = vcmask 7168  }
   0xf   : > { %4136 = vmatprep.subr.msk.bf16.mxu0 %vm730_vm0, %v673_v0  ;;  %v732_v1 = vsel %vm730_vm0, %v673_v0, 0 }
  0x10   : > { %4067 = vmatpush3.bf16.msra.mxu0 %v732_v1  ;;  %s6594_s13 = smov (!%p487_p4, %s4478_s13), 1 }
  0x11   : > { %s4572_s19 = sshll.u32 %s6594_s13, 8  ;;  %s528_s22 = scalar_lea.vmem %s6281_s4, %s6594_s13 }
  0x12   : > { %s4582_s25 = scalar_lea.vmem %s6277_s0, %s4572_s19  ;;  %s531_s28 = scalar_lea.vmem %s6282_s5, %s6594_s13  ;;  %v4588_v2 = vld [vmem:[%s528_s22] ss:$0 sm:$0xff] }
  0x13   : > { %v547_v3 = vld [vmem:[%s4582_s25] sm:$0xff]  ;;  %v548_v4 = vld [vmem:[%s4582_s25 + $0x8] sm:$0xff]  ;;  %v549_v8 = vld [vmem:[%s4582_s25 + $0x10] sm:$0xff]  ;;  %s3869_s29 = sshll.u32 %s6594_s13, 7 }
  0x14   : > { %v4592_v5 = vld [vmem:[%s531_s28] ss:$0 sm:$0xff]  ;;  %v586_v6 = vsub.f32 %v547_v3, %v4588_v2  ;;  %v587_v7 = vsub.f32 %v548_v4, %v4588_v2  ;;  %v550_v9 = vld [vmem:[%s4582_s25 + $0x18] sm:$0xff]  ;;  %v588_v11 = vsub.f32 %v549_v8, %v4588_v2  ;;  %v552_v13 = vld [vmem:[%s4582_s25 + $0x28] sm:$0xff]  ;;  %s4628_s12 = scalar_lea.vmem %s6279_s2, %s3869_s29  ;;  %s4679_s20 = scalar_lea.vmem %s6280_s3, %s3869_s29 }
  0x15   : > { %v551_v10 = vld [vmem:[%s4582_s25 + $0x20] sm:$0xff]  ;;  %v589_v12 = vsub.f32 %v550_v9, %v4588_v2  ;;  %v553_v15 = vld [vmem:[%s4582_s25 + $0x30] sm:$0xff]  ;;  %v554_v16 = vld [vmem:[%s4582_s25 + $0x38] sm:$0xff]  ;;  %v591_v19 = vsub.f32 %v552_v13, %v4588_v2  ;;  %s6100_s29 = scalar_lea.vmem %s6278_s1, %s4572_s19 }
  0x16   : > { %v590_v14 = vsub.f32 %v551_v10, %v4588_v2  ;;  %v625_v17 = vmul.f32 %v4592_v5, %v586_v6  ;;  %v626_v18 = vmul.f32 %v4592_v5, %v587_v7  ;;  %v592_v20 = vsub.f32 %v553_v15, %v4588_v2  ;;  %v555_v21 = vld [vmem:[%s4582_s25 + $0x40] sm:$0xff]  ;;  %v556_v22 = vld [vmem:[%s4582_s25 + $0x48] sm:$0xff]  ;;  %v557_v37 = vld [vmem:[%s4582_s25 + $0x50] sm:$0xff] }
  0x17   : > { %v627_v23 = vmul.f32 %v4592_v5, %v588_v11  ;;  %v628_v24 = vmul.f32 %v4592_v5, %v589_v12  ;;  %v593_v26 = vsub.f32 %v554_v16, %v4588_v2  ;;  %v630_v28 = vmul.f32 %v4592_v5, %v591_v19  ;;  %v558_v38 = vld [vmem:[%s4582_s25 + $0x58] sm:$0xff]  ;;  %v559_v39 = vld [vmem:[%s4582_s25 + $0x60] sm:$0xff]  ;;  %v560_v40 = vld [vmem:[%s4582_s25 + $0x68] sm:$0xff] }
  0x18   : > { %v629_v25 = vmul.f32 %v4592_v5, %v590_v14  ;;  %v657_v27 = vpack.c.bf16 %v626_v18, %v625_v17  ;;  %v594_v29 = vsub.f32 %v555_v21, %v4588_v2  ;;  %v595_v31 = vsub.f32 %v556_v22, %v4588_v2  ;;  %v4176_v41 = vld [vmem:[%s4628_s12 + $0x40] sm:$0xff]   ;;  %v561_v48 = vld [vmem:[%s4582_s25 + $0x70] sm:$0xff]  ;;  %v562_v49 = vld [vmem:[%s4582_s25 + $0x78] sm:$0xff] }
  0x19   : > { %v658_v30 = vpack.c.bf16 %v628_v24, %v627_v23  ;;  %v631_v33 = vmul.f32 %v4592_v5, %v592_v20  ;;  %v632_v34 = vmul.f32 %v4592_v5, %v593_v26  ;;  %v596_v43 = vsub.f32 %v557_v37, %v4588_v2  ;;  %4137 = vmatprep.subr.msk.bf16.mxu1 %vm681_vm1, %v4176_v41  ;;  %v563_v52 = vld [vmem:[%s4582_s25 + $0x80] sm:$0xff]  ;;  %v564_v56 = vld [vmem:[%s4582_s25 + $0x88] sm:$0xff]  ;;  %v4181_v3 = vld [vmem:[%s4628_s12 + $0x10] sm:$0xff]  }
  0x1a   : > { %4068 = vmatprep.mubr.msk.bf16.mxu0 %vm681_vm1, %v657_v27  ;;  %v659_v32 = vpack.c.bf16 %v630_v28, %v629_v25  ;;  %v633_v35 = vmul.f32 %v4592_v5, %v594_v29  ;;  %v634_v36 = vmul.f32 %v4592_v5, %v595_v31  ;;  %v597_v44 = vsub.f32 %v558_v38, %v4588_v2  ;;  %v4177_v53 = vld [vmem:[%s4628_s12] sm:$0xff]   ;;  %v4178_v57 = vld [vmem:[%s4628_s12 + $0x48] sm:$0xff]   ;;  %v565_v4 = vld [vmem:[%s4582_s25 + $0x90] sm:$0xff] }
  0x1b   : > { %4069 = vmatmul.mubr.msk.bf16.vlgmr.msra.gmra.mrb[0].mxu0 %vm681_vm1, %v658_v30  ;;  %v660_v42 = vpack.c.bf16 %v632_v34, %v631_v33  ;;  %v598_v46 = vsub.f32 %v559_v39, %v4588_v2  ;;  %v599_v47 = vsub.f32 %v560_v40, %v4588_v2  ;;  %v635_v50 = vmul.f32 %v4592_v5, %v596_v43  ;;  %v4179_v62 = vld [vmem:[%s4628_s12 + $0x8] sm:$0xff]   ;;  %v566_v6 = vld [vmem:[%s4582_s25 + $0x98] sm:$0xff]  ;;  %v567_v9 = vld [vmem:[%s4582_s25 + $0xa0] sm:$0xff] }
  0x1c   : > { %4072 = vmatprep.mubr.msk.bf16.mxu0 %vm681_vm1, %v659_v32  ;;  %v661_v45 = vpack.c.bf16 %v634_v36, %v633_v35  ;;  %v636_v51 = vmul.f32 %v4592_v5, %v597_v44  ;;  %v600_v59 = vsub.f32 %v561_v48, %v4588_v2  ;;  %v601_v60 = vsub.f32 %v562_v49, %v4588_v2  ;;  %v568_v10 = vld [vmem:[%s4582_s25 + $0xa8] sm:$0xff]  ;;  %v4180_v11 = vld [vmem:[%s4628_s12 + $0x50] sm:$0xff]   ;;  %v570_v23 = vld [vmem:[%s4582_s25 + $0xb8] sm:$0xff] }
  0x1d   : > { %v637_v54 = vmul.f32 %v4592_v5, %v598_v46  ;;  %v638_v55 = vmul.f32 %v4592_v5, %v599_v47  ;;  %v1202_v61 = vsel %vm681_vm1, %v4177_v53, 0  ;;  %v602_v0 = vsub.f32 %v563_v52, %v4588_v2  ;;  %v569_v22 = vld [vmem:[%s4582_s25 + $0xb0] sm:$0xff]  ;;  %v571_v26 = vld [vmem:[%s4582_s25 + $0xc0] sm:$0xff]  ;;  %v572_v27 = vld [vmem:[%s4582_s25 + $0xc8] sm:$0xff] }
  0x1e   : > { %v662_v58 = vpack.c.bf16 %v636_v51, %v635_v50  ;;  %v603_v1 = vsub.f32 %v564_v56, %v4588_v2  ;;  %3890 = vmatpush3.bf16.xpose.msra.mxu1 %v1202_v61  ;;  %v639_v7 = vmul.f32 %v4592_v5, %v600_v59  ;;  %v640_v8 = vmul.f32 %v4592_v5, %v601_v60  ;;  %v4182_v28 = vld [vmem:[%s4628_s12 + $0x58] sm:$0xff]   ;;  %v575_v44 = vld [vmem:[%s4582_s25 + $0xe0] sm:$0xff]  ;;  %v577_v59 = vld [vmem:[%s4582_s25 + $0xf0] sm:$0xff] }
  0x1f   : > { %v663_v63 = vpack.c.bf16 %v638_v55, %v637_v54  ;;  %4138 = vmatprep.subr.msk.bf16.mxu1 %vm681_vm1, %v4178_v57  ;;  %v641_v12 = vmul.f32 %v4592_v5, %v602_v0  ;;  %v1205_v14 = vsel %vm681_vm1, %v4179_v62, 0  ;;  %v1208_v15 = vsel %vm681_vm1, %v4181_v3, 0  ;;  %v4183_v37 = vld [vmem:[%s4628_s12 + $0x18] sm:$0xff]   ;;  %v4184_v47 = vld [vmem:[%s4628_s12 + $0x60] sm:$0xff]   ;;  %v4186_v62 = vld [vmem:[%s4628_s12 + $0x68] sm:$0xff]  }
  0x20   : > { %v642_v13 = vmul.f32 %v4592_v5, %v603_v1  ;;  %v664_v16 = vpack.c.bf16 %v640_v8, %v639_v7  ;;  %v604_v17 = vsub.f32 %v565_v4, %v4588_v2  ;;  %v605_v18 = vsub.f32 %v566_v6, %v4588_v2  ;;  %v574_v43 = vld [vmem:[%s4582_s25 + $0xd8] sm:$0xff]  ;;  %v4185_v54 = vld [vmem:[%s4628_s12 + $0x20] sm:$0xff]   ;;  %v4187_v4 = vld [vmem:[%s4628_s12 + $0x28] sm:$0xff]  }
  0x21   : > { %v606_v20 = vsub.f32 %v567_v9, %v4588_v2  ;;  %v607_v21 = vsub.f32 %v568_v10, %v4588_v2  ;;  %v608_v32 = vsub.f32 %v569_v22, %v4588_v2  ;;  %v609_v33 = vsub.f32 %v570_v23, %v4588_v2  ;;  %v578_v60 = vld [vmem:[%s4582_s25 + $0xf8] sm:$0xff]  ;;  %v4189_v10 = vld [vmem:[%s4628_s12 + $0x30] sm:$0xff]  }
  0x22   : > { %v665_v19 = vpack.c.bf16 %v642_v13, %v641_v12  ;;  %v643_v24 = vmul.f32 %v4592_v5, %v604_v17  ;;  %v644_v25 = vmul.f32 %v4592_v5, %v605_v18  ;;  %v610_v35 = vsub.f32 %v571_v26, %v4588_v2  ;;  %v4190_v12 = vld [vmem:[%s4628_s12 + $0x78] sm:$0xff]  }
  0x23   : > { %4073 = vmatmul.mubr.msk.bf16.gmra.mrb[4].mxu0 %vm681_vm1, %v660_v42  ;;  %v645_v29 = vmul.f32 %v4592_v5, %v606_v20  ;;  %v646_v30 = vmul.f32 %v4592_v5, %v607_v21  ;;  %v611_v36 = vsub.f32 %v572_v27, %v4588_v2  ;;  %v647_v38 = vmul.f32 %v4592_v5, %v608_v32  ;;  %v573_v42 = vld [vmem:[%s4582_s25 + $0xd0] sm:$0xff]  ;;  %v4191_v13 = vld [vmem:[%s4628_s12 + $0x38] sm:$0xff]  }
  0x24   : > { %4076 = vmatprep.mubr.msk.bf16.mxu0 %vm681_vm1, %v661_v45  ;;  %v666_v31 = vpack.c.bf16 %v644_v25, %v643_v24  ;;  %v648_v39 = vmul.f32 %v4592_v5, %v609_v33  ;;  %v649_v40 = vmul.f32 %v4592_v5, %v610_v35  ;;  %v576_v45 = vld [vmem:[%s4582_s25 + $0xe8] sm:$0xff]  ;;  %v1211_v46 = vsel %vm681_vm1, %v4183_v37, 0 }
  0x25   : > { %v667_v34 = vpack.c.bf16 %v646_v30, %v645_v29  ;;  %v650_v41 = vmul.f32 %v4592_v5, %v611_v36  ;;  %v612_v49 = vsub.f32 %v573_v42, %v4588_v2  ;;  %v613_v50 = vsub.f32 %v574_v43, %v4588_v2 }
  0x26   : > { %3892 = vmatpush3.bf16.xpose.msra.mxu1 %v1205_v14  ;;  %v668_v48 = vpack.c.bf16 %v648_v39, %v647_v38  ;;  %v614_v52 = vsub.f32 %v575_v44, %v4588_v2  ;;  %v615_v53 = vsub.f32 %v576_v45, %v4588_v2  ;;  %v1214_v61 = vsel %vm681_vm1, %v4185_v54, 0 }
  0x27   : > { %4139 = vmatprep.subr.msk.bf16.mxu1 %vm681_vm1, %v4180_v11  ;;  %v669_v51 = vpack.c.bf16 %v650_v41, %v649_v40  ;;  %v651_v55 = vmul.f32 %v4592_v5, %v612_v49  ;;  %v652_v56 = vmul.f32 %v4592_v5, %v613_v50  ;;  %v616_v0 = vsub.f32 %v577_v59, %v4588_v2 }
  0x28   : > { %v653_v57 = vmul.f32 %v4592_v5, %v614_v52  ;;  %v617_v1 = vsub.f32 %v578_v60, %v4588_v2  ;;  %v1217_v8 = vsel %vm681_vm1, %v4187_v4, 0  ;;  %v4188_v2 = vld [vmem:[%s4628_s12 + $0x70] sm:$0xff]   ;;  %v1220_v11 = vsel %vm681_vm1, %v4189_v10, 0  ;;  %s6115_s12 = scalar_lea.vmem %s6287_s10, %s4572_s19 }
  0x29   : > { %v655_v6 = vmul.f32 %v4592_v5, %v616_v0 }
  0x2a   : > { %v656_v7 = vmul.f32 %v4592_v5, %v617_v1 }
  0x2b   : > { %4077 = vmatmul.mubr.msk.bf16.gmra.mrb[8].mxu0 %vm681_vm1, %v662_v58  ;;  %v654_v58 = vmul.f32 %v4592_v5, %v615_v53  ;;  %v1223_v5 = vsel %vm681_vm1, %v4191_v13, 0 }
  0x2c   : > { %4080 = vmatprep.mubr.msk.bf16.mxu0 %vm681_vm1, %v663_v63  ;;  %v670_v63 = vpack.c.bf16 %v652_v56, %v651_v55  ;;  %v672_v9 = vpack.c.bf16 %v656_v7, %v655_v6 }
  0x2d   : > { %v671_v3 = vpack.c.bf16 %v654_v58, %v653_v57 }
  0x2e   : > { %3894 = vmatpush3.bf16.xpose.msra.mxu1 %v1208_v15  ;;  %v4754_v15 = vld [vmem:[%s6284_s7] ss:$0 sm:$0xff] }
  0x2f   : > { %4140 = vmatprep.subr.msk.bf16.mxu1 %vm681_vm1, %v4182_v28 }
  0x33   : > { %4081 = vmatmul.mubr.msk.bf16.gmra.mrb[12].mxu0 %vm681_vm1, %v664_v16 }
  0x34   : > { %4084 = vmatprep.mubr.msk.bf16.mxu0 %vm681_vm1, %v665_v19 }
  0x36   : > { %3896 = vmatpush3.bf16.xpose.msra.mxu1 %v1211_v46 }
  0x37   : > { %4141 = vmatprep.subr.msk.bf16.mxu1 %vm681_vm1, %v4184_v47 }
  0x3b   : > { %4085 = vmatmul.mubr.msk.bf16.gmra.mrb[16].mxu0 %vm681_vm1, %v666_v31 }
  0x3c   : > { %4088 = vmatprep.mubr.msk.bf16.mxu0 %vm681_vm1, %v667_v34 }
  0x3e   : > { %3898 = vmatpush3.bf16.xpose.msra.mxu1 %v1214_v61 }
  0x3f   : > { %4142 = vmatprep.subr.msk.bf16.mxu1 %vm681_vm1, %v4186_v62 }
  0x43   : > { %4089 = vmatmul.mubr.msk.bf16.gmra.mrb[20].mxu0 %vm681_vm1, %v668_v48 }
  0x44   : > { %4092 = vmatprep.mubr.msk.bf16.mxu0 %vm681_vm1, %v669_v51 }
  0x46   : > { %3900 = vmatpush3.bf16.xpose.msra.mxu1 %v1217_v8 }
  0x47   : > { %4143 = vmatprep.subr.msk.bf16.mxu1 %vm681_vm1, %v4188_v2 }
  0x4b   : > { %4093 = vmatmul.mubr.msk.bf16.gmra.mrb[24].mxu0 %vm681_vm1, %v670_v63 }
  0x4c   : > { %4096 = vmatprep.mubr.msk.bf16.mxu0 %vm681_vm1, %v671_v3 }
  0x4e   : > { %3902 = vmatpush3.bf16.xpose.msra.mxu1 %v1220_v11 }
  0x4f   : > { %4144 = vmatprep.subr.msk.bf16.mxu1 %vm681_vm1, %v4190_v12 }
  0x53   : > { %4097 = vmatmul.mubr.msk.bf16.gmra.mrb[28].mxu0 %vm681_vm1, %v672_v9 }
  0x56   : > { %3904 = vmatpush3.bf16.xpose.msra.mxu1 %v1223_v5 }
  0xee   : > { %v4070_v14 = vpop.f32.mrb[0].mxu0 }
  0xef   : > { %v768_v16 = vpop.f32.mrb[1].mxu0  ;;  %v777_v18 = vadd.f32 %v4070_v14, %v4754_v15 }
  0xf0   : > { %v4071_v17 = vpop.f32.mrb[2].mxu0  ;;  %v769_v21 = vadd.f32 %v4754_v15, %v768_v16 }
  0xf1   : > { %v780_v19 = vadd.f32 %v4071_v17, %v4754_v15  ;;  %v771_v20 = vpop.f32.mrb[3].mxu0 }
  0xf2   : > { %v772_v22 = vadd.f32 %v4754_v15, %v771_v20 }
  0xf3   : > { %v896_v23 = vpack.c.bf16 %v780_v19, %v777_v18 }
  0xf4   : > { %v895_v24 = vpack.c.bf16 %v772_v22, %v769_v21 }
  0xf5   : > { %912 = vst.msk [vmem:[#allocation2 + $0x8] sm:$0xff] %vm681_vm1, %v896_v23 }
  0xf6   : > { %911 = vst.msk [vmem:[#allocation2] sm:$0xff] %vm681_vm1, %v895_v24  ;;  %v4074_v25 = vpop.f32.mrb[4].mxu0 }
  0xf7   : > { %v793_v26 = vadd.f32 %v4074_v25, %v4754_v15  ;;  %v784_v27 = vpop.f32.mrb[5].mxu0 }
  0xf8   : > { %v785_v28 = vadd.f32 %v4754_v15, %v784_v27  ;;  %v4075_v29 = vpop.f32.mrb[6].mxu0 }
  0xf9   : > { %v796_v30 = vadd.f32 %v4075_v29, %v4754_v15  ;;  %v787_v31 = vpop.f32.mrb[7].mxu0 }
  0xfa   : > { %v788_v32 = vadd.f32 %v4754_v15, %v787_v31 }
  0xfb   : > { %v898_v33 = vpack.c.bf16 %v796_v30, %v793_v26 }
  0xfc   : > { %v897_v34 = vpack.c.bf16 %v788_v32, %v785_v28  ;;  %v1025_v37 = vld [vmem:[#allocation2 + $0x8] sm:$0xff] }
  0xfd   : > { %914 = vst.msk [vmem:[#allocation2 + $0x18] sm:$0xff] %vm681_vm1, %v898_v33  ;;  %v1024_v35 = vld [vmem:[#allocation2] sm:$0xff] }
  0xfe   : > { %913 = vst.msk [vmem:[#allocation2 + $0x10] sm:$0xff] %vm681_vm1, %v897_v34  ;;  %3905 = vmatprep.mubr.msk.bf16.mxu1 %vm681_vm1, %v1024_v35  ;;  %v4078_v36 = vpop.f32.mrb[8].mxu0 }
  0xff   : > { %3906 = vmatmul.mubr.msk.bf16.vlgmr.msra.gmra.mrb[0].mxu1 %vm681_vm1, %v1024_v35  ;;  %v809_v38 = vadd.f32 %v4078_v36, %v4754_v15  ;;  %v800_v39 = vpop.f32.mrb[9].mxu0 }
 0x100   : > { %3907 = vmatprep.mubr.msk.bf16.mxu1 %vm681_vm1, %v1025_v37  ;;  %v801_v40 = vadd.f32 %v4754_v15, %v800_v39  ;;  %v4079_v41 = vpop.f32.mrb[10].mxu0 }
 0x101   : > { %v812_v42 = vadd.f32 %v4079_v41, %v4754_v15  ;;  %v803_v43 = vpop.f32.mrb[11].mxu0 }
 0x102   : > { %v804_v44 = vadd.f32 %v4754_v15, %v803_v43 }
 0x103   : > { %v900_v45 = vpack.c.bf16 %v812_v42, %v809_v38 }
 0x104   : > { %v899_v46 = vpack.c.bf16 %v804_v44, %v801_v40  ;;  %v1027_v59 = vld [vmem:[#allocation2 + $0x18] sm:$0xff] }
 0x105   : > { %v1026_v47 = vld [vmem:[#allocation2 + $0x10] sm:$0xff]  ;;  %916 = vst.msk [vmem:[#allocation2 + $0x28] sm:$0xff] %vm681_vm1, %v900_v45 }
 0x106   : > { %915 = vst.msk [vmem:[#allocation2 + $0x20] sm:$0xff] %vm681_vm1, %v899_v46  ;;  %v4082_v48 = vpop.f32.mrb[12].mxu0 }
 0x107   : > { %3908 = vmatmul.mubr.msk.bf16.gmra.mrb[4].mxu1 %vm681_vm1, %v1025_v37  ;;  %v825_v49 = vadd.f32 %v4082_v48, %v4754_v15  ;;  %v816_v50 = vpop.f32.mrb[13].mxu0 }
 0x108   : > { %3909 = vmatprep.mubr.msk.bf16.mxu1 %vm681_vm1, %v1026_v47  ;;  %v817_v51 = vadd.f32 %v4754_v15, %v816_v50  ;;  %v4083_v52 = vpop.f32.mrb[14].mxu0 }
 0x109   : > { %v828_v53 = vadd.f32 %v4083_v52, %v4754_v15  ;;  %v819_v54 = vpop.f32.mrb[15].mxu0 }
 0x10a   : > { %v820_v55 = vadd.f32 %v4754_v15, %v819_v54 }
 0x10b   : > { %v902_v56 = vpack.c.bf16 %v828_v53, %v825_v49 }
 0x10c   : > { %v901_v57 = vpack.c.bf16 %v820_v55, %v817_v51  ;;  %v1029_v18 = vld [vmem:[#allocation2 + $0x28] sm:$0xff] }
 0x10d   : > { %918 = vst.msk [vmem:[#allocation2 + $0x38] sm:$0xff] %vm681_vm1, %v902_v56  ;;  %v1028_v7 = vld [vmem:[#allocation2 + $0x20] sm:$0xff] }
 0x10e   : > { %917 = vst.msk [vmem:[#allocation2 + $0x30] sm:$0xff] %vm681_vm1, %v901_v57  ;;  %v4086_v58 = vpop.f32.mrb[16].mxu0 }
 0x10f   : > { %3910 = vmatmul.mubr.msk.bf16.gmra.mrb[8].mxu1 %vm681_vm1, %v1026_v47  ;;  %v841_v60 = vadd.f32 %v4086_v58, %v4754_v15  ;;  %v832_v61 = vpop.f32.mrb[17].mxu0  ;;  %v4488_v47 = vmov -inf  }
 0x110   : > { %3911 = vmatprep.mubr.msk.bf16.mxu1 %vm681_vm1, %v1027_v59  ;;  %v833_v62 = vadd.f32 %v4754_v15, %v832_v61  ;;  %v4087_v63 = vpop.f32.mrb[18].mxu0  ;;  %928 = vst.msk [vmem:[#allocation3] sm:$0xff] %vm927_vm2, %v4488_v47  ;;  %929 = vst.msk [vmem:[#allocation3 + $0x8] sm:$0xff] %vm927_vm2, %v4488_v47 }
 0x111   : > { %v844_v0 = vadd.f32 %v4087_v63, %v4754_v15  ;;  %v835_v1 = vpop.f32.mrb[19].mxu0  ;;  %930 = vst.msk [vmem:[#allocation3 + $0x10] sm:$0xff] %vm927_vm2, %v4488_v47  ;;  %931 = vst.msk [vmem:[#allocation3 + $0x18] sm:$0xff] %vm927_vm2, %v4488_v47 }
 0x112   : > { %v836_v3 = vadd.f32 %v4754_v15, %v835_v1  ;;  %932 = vst.msk [vmem:[#allocation3 + $0x20] sm:$0xff] %vm927_vm2, %v4488_v47  ;;  %933 = vst.msk [vmem:[#allocation3 + $0x28] sm:$0xff] %vm927_vm2, %v4488_v47  ;;  %v4489_v1 = vmov 0  }
 0x113   : > { %v904_v4 = vpack.c.bf16 %v844_v0, %v841_v60  ;;  %934 = vst.msk [vmem:[#allocation3 + $0x30] sm:$0xff] %vm927_vm2, %v4488_v47  ;;  %935 = vst.msk [vmem:[#allocation3 + $0x38] sm:$0xff] %vm927_vm2, %v4488_v47  ;;  %4174 = vset.pattern.permute.xlu0 %v4489_v1  ;;  %4175 = vset.pattern.permute.xlu1 %v4489_v1 }
 0x114   : > { %v903_v6 = vpack.c.bf16 %v836_v3, %v833_v62  ;;  %v1031_v39 = vld [vmem:[#allocation2 + $0x38] sm:$0xff]  ;;  %936 = vst.msk [vmem:[#allocation3 + $0x40] sm:$0xff] %vm927_vm2, %v4488_v47  ;;  %937 = vst.msk [vmem:[#allocation3 + $0x48] sm:$0xff] %vm927_vm2, %v4488_v47 }
 0x115   : > { %920 = vst.msk [vmem:[#allocation2 + $0x48] sm:$0xff] %vm681_vm1, %v904_v4  ;;  %v1030_v28 = vld [vmem:[#allocation2 + $0x30] sm:$0xff] }
 0x116   : > { %919 = vst.msk [vmem:[#allocation2 + $0x40] sm:$0xff] %vm681_vm1, %v903_v6  ;;  %v4090_v8 = vpop.f32.mrb[20].mxu0 }
 0x117   : > { %3912 = vmatmul.mubr.msk.bf16.gmra.mrb[12].mxu1 %vm681_vm1, %v1027_v59  ;;  %v857_v9 = vadd.f32 %v4090_v8, %v4754_v15  ;;  %v848_v2 = vpop.f32.mrb[21].mxu0  ;;  %938 = vst.msk [vmem:[#allocation3 + $0x50] sm:$0xff] %vm927_vm2, %v4488_v47  ;;  %939 = vst.msk [vmem:[#allocation3 + $0x58] sm:$0xff] %vm927_vm2, %v4488_v47 }
 0x118   : > { %3913 = vmatprep.mubr.msk.bf16.mxu1 %vm681_vm1, %v1028_v7  ;;  %v849_v10 = vadd.f32 %v4754_v15, %v848_v2  ;;  %v4091_v11 = vpop.f32.mrb[22].mxu0  ;;  %940 = vst.msk [vmem:[#allocation3 + $0x60] sm:$0xff] %vm927_vm2, %v4488_v47  ;;  %941 = vst.msk [vmem:[#allocation3 + $0x68] sm:$0xff] %vm927_vm2, %v4488_v47 }
 0x119   : > { %v860_v12 = vadd.f32 %v4091_v11, %v4754_v15  ;;  %v851_v13 = vpop.f32.mrb[23].mxu0  ;;  %942 = vst.msk [vmem:[#allocation3 + $0x70] sm:$0xff] %vm927_vm2, %v4488_v47  ;;  %943 = vst.msk [vmem:[#allocation3 + $0x78] sm:$0xff] %vm927_vm2, %v4488_v47 }
 0x11a   : > { %v852_v5 = vadd.f32 %v4754_v15, %v851_v13  ;;  %944 = vst.msk [vmem:[#allocation3 + $0x80] sm:$0xff] %vm927_vm2, %v4488_v47  ;;  %945 = vst.msk [vmem:[#allocation3 + $0x88] sm:$0xff] %vm927_vm2, %v4488_v47 }
 0x11b   : > { %v906_v14 = vpack.c.bf16 %v860_v12, %v857_v9  ;;  %946 = vst.msk [vmem:[#allocation3 + $0x90] sm:$0xff] %vm927_vm2, %v4488_v47  ;;  %947 = vst.msk [vmem:[#allocation3 + $0x98] sm:$0xff] %vm927_vm2, %v4488_v47 }
 0x11c   : > { %v905_v16 = vpack.c.bf16 %v852_v5, %v849_v10  ;;  %v1033_v41 = vld [vmem:[#allocation2 + $0x48] sm:$0xff]  ;;  %948 = vst.msk [vmem:[#allocation3 + $0xa0] sm:$0xff] %vm927_vm2, %v4488_v47  ;;  %949 = vst.msk [vmem:[#allocation3 + $0xa8] sm:$0xff] %vm927_vm2, %v4488_v47  ;;  %v4490_v10 = vmov 0.0  }
 0x11d   : > { %922 = vst.msk [vmem:[#allocation2 + $0x58] sm:$0xff] %vm681_vm1, %v906_v14  ;;  %v1032_v40 = vld [vmem:[#allocation2 + $0x40] sm:$0xff]  ;;  %1004 = vst.msk [vmem:[#allocation5 + $0x60] sm:$0xff] %vm681_vm1, %v4490_v10 }
 0x11e   : > { %921 = vst.msk [vmem:[#allocation2 + $0x50] sm:$0xff] %vm681_vm1, %v905_v16  ;;  %v4094_v17 = vpop.f32.mrb[24].mxu0  ;;  %992 = vst.msk [vmem:[#allocation5] sm:$0xff] %vm681_vm1, %v4490_v10 }
 0x11f   : > { %3914 = vmatmul.mubr.msk.bf16.gmra.mrb[16].mxu1 %vm681_vm1, %v1028_v7  ;;  %v873_v19 = vadd.f32 %v4094_v17, %v4754_v15  ;;  %v864_v20 = vpop.f32.mrb[25].mxu0  ;;  %950 = vst.msk [vmem:[#allocation3 + $0xb0] sm:$0xff] %vm927_vm2, %v4488_v47  ;;  %951 = vst.msk [vmem:[#allocation3 + $0xb8] sm:$0xff] %vm927_vm2, %v4488_v47 }
 0x120   : > { %3915 = vmatprep.mubr.msk.bf16.mxu1 %vm681_vm1, %v1029_v18  ;;  %v865_v21 = vadd.f32 %v4754_v15, %v864_v20  ;;  %v4095_v22 = vpop.f32.mrb[26].mxu0  ;;  %952 = vst.msk [vmem:[#allocation3 + $0xc0] sm:$0xff] %vm927_vm2, %v4488_v47  ;;  %953 = vst.msk [vmem:[#allocation3 + $0xc8] sm:$0xff] %vm927_vm2, %v4488_v47 }
 0x121   : > { %v876_v23 = vadd.f32 %v4095_v22, %v4754_v15  ;;  %v867_v24 = vpop.f32.mrb[27].mxu0  ;;  %954 = vst.msk [vmem:[#allocation3 + $0xd0] sm:$0xff] %vm927_vm2, %v4488_v47  ;;  %955 = vst.msk [vmem:[#allocation3 + $0xd8] sm:$0xff] %vm927_vm2, %v4488_v47 }
 0x122   : > { %v868_v25 = vadd.f32 %v4754_v15, %v867_v24  ;;  %956 = vst.msk [vmem:[#allocation3 + $0xe0] sm:$0xff] %vm927_vm2, %v4488_v47  ;;  %957 = vst.msk [vmem:[#allocation3 + $0xe8] sm:$0xff] %vm927_vm2, %v4488_v47 }
 0x123   : > { %v908_v26 = vpack.c.bf16 %v876_v23, %v873_v19  ;;  %958 = vst.msk [vmem:[#allocation3 + $0xf0] sm:$0xff] %vm927_vm2, %v4488_v47  ;;  %959 = vst.msk [vmem:[#allocation3 + $0xf8] sm:$0xff] %vm927_vm2, %v4488_v47 }
 0x124   : > { %v907_v27 = vpack.c.bf16 %v868_v25, %v865_v21  ;;  %v1035_v42 = vld [vmem:[#allocation2 + $0x58] sm:$0xff]  ;;  %960 = vst.msk [vmem:[#allocation4] sm:$0xff] %vm927_vm2, %v4490_v10  ;;  %961 = vst.msk [vmem:[#allocation4 + $0x8] sm:$0xff] %vm927_vm2, %v4490_v10 }
 0x125   : > { %924 = vst.msk [vmem:[#allocation2 + $0x68] sm:$0xff] %vm681_vm1, %v908_v26  ;;  %993 = vst.msk [vmem:[#allocation5 + $0x8] sm:$0xff] %vm681_vm1, %v4490_v10 }
 0x126   : > { %923 = vst.msk [vmem:[#allocation2 + $0x60] sm:$0xff] %vm681_vm1, %v907_v27  ;;  %v4098_v29 = vpop.f32.mrb[28].mxu0  ;;  %994 = vst.msk [vmem:[#allocation5 + $0x10] sm:$0xff] %vm681_vm1, %v4490_v10 }
 0x127   : > { %3916 = vmatmul.mubr.msk.bf16.gmra.mrb[20].mxu1 %vm681_vm1, %v1029_v18  ;;  %v889_v30 = vadd.f32 %v4098_v29, %v4754_v15  ;;  %v880_v31 = vpop.f32.mrb[29].mxu0  ;;  %962 = vst.msk [vmem:[#allocation4 + $0x10] sm:$0xff] %vm927_vm2, %v4490_v10  ;;  %963 = vst.msk [vmem:[#allocation4 + $0x18] sm:$0xff] %vm927_vm2, %v4490_v10 }
 0x128   : > { %3917 = vmatprep.mubr.msk.bf16.mxu1 %vm681_vm1, %v1030_v28  ;;  %v881_v32 = vadd.f32 %v4754_v15, %v880_v31  ;;  %v4099_v33 = vpop.f32.mrb[30].mxu0  ;;  %964 = vst.msk [vmem:[#allocation4 + $0x20] sm:$0xff] %vm927_vm2, %v4490_v10  ;;  %965 = vst.msk [vmem:[#allocation4 + $0x28] sm:$0xff] %vm927_vm2, %v4490_v10 }
 0x129   : > { %v892_v34 = vadd.f32 %v4099_v33, %v4754_v15  ;;  %v883_v35 = vpop.f32.mrb[31].mxu0  ;;  %966 = vst.msk [vmem:[#allocation4 + $0x30] sm:$0xff] %vm927_vm2, %v4490_v10  ;;  %967 = vst.msk [vmem:[#allocation4 + $0x38] sm:$0xff] %vm927_vm2, %v4490_v10 }
 0x12a   : > { %v884_v36 = vadd.f32 %v4754_v15, %v883_v35  ;;  %v1034_v15 = vld [vmem:[#allocation2 + $0x50] sm:$0xff]  ;;  %968 = vst.msk [vmem:[#allocation4 + $0x40] sm:$0xff] %vm927_vm2, %v4490_v10  ;;  %969 = vst.msk [vmem:[#allocation4 + $0x48] sm:$0xff] %vm927_vm2, %v4490_v10 }
 0x12b   : > { %v910_v37 = vpack.c.bf16 %v892_v34, %v889_v30  ;;  %970 = vst.msk [vmem:[#allocation4 + $0x50] sm:$0xff] %vm927_vm2, %v4490_v10  ;;  %971 = vst.msk [vmem:[#allocation4 + $0x58] sm:$0xff] %vm927_vm2, %v4490_v10 }
 0x12c   : > { %v909_v38 = vpack.c.bf16 %v884_v36, %v881_v32  ;;  %v1037_v44 = vld [vmem:[#allocation2 + $0x68] sm:$0xff]  ;;  %972 = vst.msk [vmem:[#allocation4 + $0x60] sm:$0xff] %vm927_vm2, %v4490_v10  ;;  %973 = vst.msk [vmem:[#allocation4 + $0x68] sm:$0xff] %vm927_vm2, %v4490_v10 }
 0x12d   : > { %926 = vst.msk [vmem:[#allocation2 + $0x78] sm:$0xff] %vm681_vm1, %v910_v37  ;;  %v1036_v43 = vld [vmem:[#allocation2 + $0x60] sm:$0xff]  ;;  %995 = vst.msk [vmem:[#allocation5 + $0x18] sm:$0xff] %vm681_vm1, %v4490_v10 }
 0x12e   : > { %925 = vst.msk [vmem:[#allocation2 + $0x70] sm:$0xff] %vm681_vm1, %v909_v38  ;;  %996 = vst.msk [vmem:[#allocation5 + $0x20] sm:$0xff] %vm681_vm1, %v4490_v10 }
 0x12f   : > { %3918 = vmatmul.mubr.msk.bf16.gmra.mrb[24].mxu1 %vm681_vm1, %v1030_v28  ;;  %974 = vst.msk [vmem:[#allocation4 + $0x70] sm:$0xff] %vm927_vm2, %v4490_v10  ;;  %975 = vst.msk [vmem:[#allocation4 + $0x78] sm:$0xff] %vm927_vm2, %v4490_v10 }
 0x130   : > { %3919 = vmatprep.mubr.msk.bf16.mxu1 %vm681_vm1, %v1031_v39  ;;  %976 = vst.msk [vmem:[#allocation4 + $0x80] sm:$0xff] %vm927_vm2, %v4490_v10  ;;  %977 = vst.msk [vmem:[#allocation4 + $0x88] sm:$0xff] %vm927_vm2, %v4490_v10 }
 0x131   : > { %978 = vst.msk [vmem:[#allocation4 + $0x90] sm:$0xff] %vm927_vm2, %v4490_v10  ;;  %979 = vst.msk [vmem:[#allocation4 + $0x98] sm:$0xff] %vm927_vm2, %v4490_v10 }
 0x132   : > { %980 = vst.msk [vmem:[#allocation4 + $0xa0] sm:$0xff] %vm927_vm2, %v4490_v10  ;;  %981 = vst.msk [vmem:[#allocation4 + $0xa8] sm:$0xff] %vm927_vm2, %v4490_v10 }
 0x133   : > { %982 = vst.msk [vmem:[#allocation4 + $0xb0] sm:$0xff] %vm927_vm2, %v4490_v10  ;;  %983 = vst.msk [vmem:[#allocation4 + $0xb8] sm:$0xff] %vm927_vm2, %v4490_v10 }
 0x134   : > { %v1039_v46 = vld [vmem:[#allocation2 + $0x78] sm:$0xff]  ;;  %984 = vst.msk [vmem:[#allocation4 + $0xc0] sm:$0xff] %vm927_vm2, %v4490_v10  ;;  %985 = vst.msk [vmem:[#allocation4 + $0xc8] sm:$0xff] %vm927_vm2, %v4490_v10 }
 0x135   : > { %v1038_v45 = vld [vmem:[#allocation2 + $0x70] sm:$0xff]  ;;  %986 = vst.msk [vmem:[#allocation4 + $0xd0] sm:$0xff] %vm927_vm2, %v4490_v10  ;;  %987 = vst.msk [vmem:[#allocation4 + $0xd8] sm:$0xff] %vm927_vm2, %v4490_v10 }
 0x136   : > { %988 = vst.msk [vmem:[#allocation4 + $0xe0] sm:$0xff] %vm927_vm2, %v4490_v10  ;;  %989 = vst.msk [vmem:[#allocation4 + $0xe8] sm:$0xff] %vm927_vm2, %v4490_v10 }
 0x137   : > { %3920 = vmatmul.mubr.msk.bf16.gmra.mrb[28].mxu1 %vm681_vm1, %v1031_v39  ;;  %990 = vst.msk [vmem:[#allocation4 + $0xf0] sm:$0xff] %vm927_vm2, %v4490_v10  ;;  %991 = vst.msk [vmem:[#allocation4 + $0xf8] sm:$0xff] %vm927_vm2, %v4490_v10 }
 0x138   : > { %3921 = vmatprep.mubr.msk.bf16.mxu1 %vm681_vm1, %v1032_v40  ;;  %997 = vst.msk [vmem:[#allocation5 + $0x28] sm:$0xff] %vm681_vm1, %v4490_v10  ;;  %998 = vst.msk [vmem:[#allocation5 + $0x30] sm:$0xff] %vm681_vm1, %v4490_v10 }
 0x139   : > { %999 = vst.msk [vmem:[#allocation5 + $0x38] sm:$0xff] %vm681_vm1, %v4490_v10  ;;  %1000 = vst.msk [vmem:[#allocation5 + $0x40] sm:$0xff] %vm681_vm1, %v4490_v10 }
 0x13a   : > { %1001 = vst.msk [vmem:[#allocation5 + $0x48] sm:$0xff] %vm681_vm1, %v4490_v10  ;;  %1002 = vst.msk [vmem:[#allocation5 + $0x50] sm:$0xff] %vm681_vm1, %v4490_v10 }
 0x13b   : > { %1003 = vst.msk [vmem:[#allocation5 + $0x58] sm:$0xff] %vm681_vm1, %v4490_v10  ;;  %1005 = vst.msk [vmem:[#allocation5 + $0x68] sm:$0xff] %vm681_vm1, %v4490_v10 }
 0x13c   : > { %1006 = vst.msk [vmem:[#allocation5 + $0x70] sm:$0xff] %vm681_vm1, %v4490_v10  ;;  %1007 = vst.msk [vmem:[#allocation5 + $0x78] sm:$0xff] %vm681_vm1, %v4490_v10 }
 0x13d   : > { %1008 = vst.msk [vmem:[#allocation5 + $0x80] sm:$0xff] %vm681_vm1, %v4490_v10  ;;  %1009 = vst.msk [vmem:[#allocation5 + $0x88] sm:$0xff] %vm681_vm1, %v4490_v10 }
 0x13e   : > { %1010 = vst.msk [vmem:[#allocation5 + $0x90] sm:$0xff] %vm681_vm1, %v4490_v10  ;;  %1011 = vst.msk [vmem:[#allocation5 + $0x98] sm:$0xff] %vm681_vm1, %v4490_v10 }
 0x13f   : > { %3922 = vmatmul.mubr.msk.bf16.gmra.mrb[32].mxu1 %vm681_vm1, %v1032_v40  ;;  %1012 = vst.msk [vmem:[#allocation5 + $0xa0] sm:$0xff] %vm681_vm1, %v4490_v10  ;;  %1013 = vst.msk [vmem:[#allocation5 + $0xa8] sm:$0xff] %vm681_vm1, %v4490_v10 }
 0x140   : > { %3923 = vmatprep.mubr.msk.bf16.mxu1 %vm681_vm1, %v1033_v41  ;;  %1014 = vst.msk [vmem:[#allocation5 + $0xb0] sm:$0xff] %vm681_vm1, %v4490_v10  ;;  %1015 = vst.msk [vmem:[#allocation5 + $0xb8] sm:$0xff] %vm681_vm1, %v4490_v10 }
 0x141   : > { %1016 = vst.msk [vmem:[#allocation5 + $0xc0] sm:$0xff] %vm681_vm1, %v4490_v10  ;;  %1017 = vst.msk [vmem:[#allocation5 + $0xc8] sm:$0xff] %vm681_vm1, %v4490_v10 }
 0x142   : > { %1018 = vst.msk [vmem:[#allocation5 + $0xd0] sm:$0xff] %vm681_vm1, %v4490_v10  ;;  %1019 = vst.msk [vmem:[#allocation5 + $0xd8] sm:$0xff] %vm681_vm1, %v4490_v10 }
 0x143   : > { %1020 = vst.msk [vmem:[#allocation5 + $0xe0] sm:$0xff] %vm681_vm1, %v4490_v10  ;;  %1021 = vst.msk [vmem:[#allocation5 + $0xe8] sm:$0xff] %vm681_vm1, %v4490_v10 }
 0x144   : > { %1022 = vst.msk [vmem:[#allocation5 + $0xf0] sm:$0xff] %vm681_vm1, %v4490_v10  ;;  %1023 = vst.msk [vmem:[#allocation5 + $0xf8] sm:$0xff] %vm681_vm1, %v4490_v10 }
 0x147   : > { %3924 = vmatmul.mubr.msk.bf16.gmra.mrb[36].mxu1 %vm681_vm1, %v1033_v41 }
 0x148   : > { %3925 = vmatprep.mubr.msk.bf16.mxu1 %vm681_vm1, %v1034_v15 }
 0x14f   : > { %3926 = vmatmul.mubr.msk.bf16.gmra.mrb[40].mxu1 %vm681_vm1, %v1034_v15 }
 0x150   : > { %3927 = vmatprep.mubr.msk.bf16.mxu1 %vm681_vm1, %v1035_v42 }
 0x157   : > { %3928 = vmatmul.mubr.msk.bf16.gmra.mrb[44].mxu1 %vm681_vm1, %v1035_v42 }
 0x158   : > { %3929 = vmatprep.mubr.msk.bf16.mxu1 %vm681_vm1, %v1036_v43 }
 0x15f   : > { %3930 = vmatmul.mubr.msk.bf16.gmra.mrb[48].mxu1 %vm681_vm1, %v1036_v43 }
 0x160   : > { %3931 = vmatprep.mubr.msk.bf16.mxu1 %vm681_vm1, %v1037_v44 }
 0x167   : > { %3932 = vmatmul.mubr.msk.bf16.gmra.mrb[52].mxu1 %vm681_vm1, %v1037_v44 }
 0x168   : > { %3933 = vmatprep.mubr.msk.bf16.mxu1 %vm681_vm1, %v1038_v45 }
 0x16f   : > { %3934 = vmatmul.mubr.msk.bf16.gmra.mrb[56].mxu1 %vm681_vm1, %v1038_v45 }
 0x170   : > { %3935 = vmatprep.mubr.msk.bf16.mxu1 %vm681_vm1, %v1039_v46 }
 0x177   : > { %3936 = vmatmul.mubr.msk.bf16.gmra.mrb[60].mxu1 %vm681_vm1, %v1039_v46 }
 0x1d2   : > { %v4868_v48 = vpop.f32.mrb[0].mxu1 }
 0x1d3   : > { %v4870_v49 = vpop.f32.mrb[1].mxu1 }
 0x1d4   : > { %v4872_v50 = vpop.f32.mrb[2].mxu1  ;;  %v1474_v51 = vmax.f32 %v4868_v48, %v4870_v49 }
 0x1d5   : > { %v4876_v52 = vpop.f32.mrb[3].mxu1 }
 0x1d6   : > { %1475 = vmax.xlane.f32.xlu0 %v1474_v51  ;;  %v1477_v53 = vmax.f32 %v4872_v50, %v4876_v52 }
 0x1da   : > { %1478 = vmax.xlane.f32.xlu0 %v1477_v53  ;;  %v4880_v54 = vpop.f32.mrb[4].mxu1 }
 0x1db   : > { %v4882_v55 = vpop.f32.mrb[5].mxu1 }
 0x1dc   : > { %v4884_v56 = vpop.f32.mrb[6].mxu1  ;;  %v1480_v57 = vmax.f32 %v4880_v54, %v4882_v55 }
 0x1dd   : > { %v4888_v58 = vpop.f32.mrb[7].mxu1 }
 0x1de   : > { %1481 = vmax.xlane.f32.xlu1 %v1480_v57  ;;  %v1483_v59 = vmax.f32 %v4884_v56, %v4888_v58 }
 0x1e2   : > { %1484 = vmax.xlane.f32.xlu1 %v1483_v59  ;;  %v4892_v60 = vpop.f32.mrb[8].mxu1 }
 0x1e3   : > { %v4894_v61 = vpop.f32.mrb[9].mxu1 }
 0x1e4   : > { %v4896_v62 = vpop.f32.mrb[10].mxu1  ;;  %v1486_v63 = vmax.f32 %v4892_v60, %v4894_v61 }
 0x1e5   : > { %v4900_v0 = vpop.f32.mrb[11].mxu1 }
 0x1e6   : > { %1487 = vmax.xlane.f32.xlu0 %v1486_v63  ;;  %v1489_v3 = vmax.f32 %v4896_v62, %v4900_v0 }
 0x1e8   : > { %1490 = vmax.xlane.f32.xlu1 %v1489_v3 }
 0x1ea   : > { %v4904_v4 = vpop.f32.mrb[12].mxu1 }
 0x1eb   : > { %v4906_v6 = vpop.f32.mrb[13].mxu1 }
 0x1ec   : > { %v4908_v7 = vpop.f32.mrb[14].mxu1  ;;  %v1492_v8 = vmax.f32 %v4904_v4, %v4906_v6 }
 0x1ed   : > { %v4912_v9 = vpop.f32.mrb[15].mxu1 }
 0x1ee   : > { %1493 = vmax.xlane.f32.xlu0 %v1492_v8  ;;  %v1495_v2 = vmax.f32 %v4908_v7, %v4912_v9 }
 0x1f0   : > { %1496 = vmax.xlane.f32.xlu1 %v1495_v2 }
 0x1f2   : > { %v5047_v11 = vpop.f32.mrb[16].mxu1 }
 0x1f3   : > { %v5049_v12 = vpop.f32.mrb[17].mxu1 }
 0x1f4   : > { %v5051_v13 = vpop.f32.mrb[18].mxu1  ;;  %v1498_v5 = vmax.f32 %v5047_v11, %v5049_v12 }
 0x1f5   : > { %v5055_v14 = vpop.f32.mrb[19].mxu1 }
 0x1f6   : > { %1499 = vmax.xlane.f32.xlu0 %v1498_v5  ;;  %v1501_v16 = vmax.f32 %v5051_v13, %v5055_v14 }
 0x1f8   : > { %1502 = vmax.xlane.f32.xlu1 %v1501_v16 }
 0x1fa   : > { %v5059_v17 = vpop.f32.mrb[20].mxu1 }
 0x1fb   : > { %v5061_v18 = vpop.f32.mrb[21].mxu1 }
 0x1fc   : > { %v5063_v19 = vpop.f32.mrb[22].mxu1  ;;  %v1504_v20 = vmax.f32 %v5059_v17, %v5061_v18 }
 0x1fd   : > { %v5067_v21 = vpop.f32.mrb[23].mxu1 }
 0x1fe   : > { %1505 = vmax.xlane.f32.xlu0 %v1504_v20  ;;  %v1507_v22 = vmax.f32 %v5063_v19, %v5067_v21 }
 0x200   : > { %1508 = vmax.xlane.f32.xlu1 %v1507_v22 }
 0x202   : > { %v5071_v23 = vpop.f32.mrb[24].mxu1 }
 0x203   : > { %6377 = vst [vmem:[#allocation6_spill] sm:$0xff] %v5071_v23  ;;  %v5073_v24 = vpop.f32.mrb[25].mxu1 }
 0x204   : > { %6378 = vst [vmem:[#allocation7_spill] sm:$0xff] %v5073_v24  ;;  %v5075_v25 = vpop.f32.mrb[26].mxu1  ;;  %v1510_v26 = vmax.f32 %v5071_v23, %v5073_v24  ;;  %v5384_v24 = vld [vmem:[#allocation3 + $0x90] sm:$0xff] }
 0x205   : > { %6379 = vst [vmem:[#allocation8_spill] sm:$0xff] %v5075_v25  ;;  %v5079_v27 = vpop.f32.mrb[27].mxu1  ;;  %6430 = vst [vmem:[#allocation58_spill] sm:$0xff] %v5384_v24 }
 0x206   : > { %6380 = vst [vmem:[#allocation9_spill] sm:$0xff] %v5079_v27  ;;  %1511 = vmax.xlane.f32.xlu0 %v1510_v26  ;;  %v1513_v28 = vmax.f32 %v5075_v25, %v5079_v27  ;;  %v5386_v25 = vld [vmem:[#allocation3 + $0x98] sm:$0xff] }
 0x207   : > { %6431 = vst [vmem:[#allocation59_spill] sm:$0xff] %v5386_v25 }
 0x208   : > { %1514 = vmax.xlane.f32.xlu1 %v1513_v28 }
 0x20a   : > { %v5083_v29 = vpop.f32.mrb[28].mxu1 }
 0x20b   : > { %6381 = vst [vmem:[#allocation10_spill] sm:$0xff] %v5083_v29  ;;  %v5085_v30 = vpop.f32.mrb[29].mxu1 }
 0x20c   : > { %6382 = vst [vmem:[#allocation11_spill] sm:$0xff] %v5085_v30  ;;  %v5087_v31 = vpop.f32.mrb[30].mxu1  ;;  %v1516_v32 = vmax.f32 %v5083_v29, %v5085_v30  ;;  %v5363_v30 = vld [vmem:[#allocation3 + $0x80] sm:$0xff]  ;;  %v5365_v29 = vld [vmem:[#allocation3 + $0x88] sm:$0xff] }
 0x20d   : > { %6383 = vst [vmem:[#allocation12_spill] sm:$0xff] %v5087_v31  ;;  %v5091_v33 = vpop.f32.mrb[31].mxu1  ;;  %6426 = vst [vmem:[#allocation55_spill] sm:$0xff] %v5363_v30 }
 0x20e   : > { %6384 = vst [vmem:[#allocation13_spill] sm:$0xff] %v5091_v33  ;;  %1517 = vmax.xlane.f32.xlu0 %v1516_v32  ;;  %v1519_v34 = vmax.f32 %v5087_v31, %v5091_v33  ;;  %v5329_v33 = vld [vmem:[#allocation3 + $0x68] sm:$0xff]  ;;  %v5347_v31 = vld [vmem:[#allocation3 + $0x78] sm:$0xff]  ;;  %6427 = vst [vmem:[#allocation56_spill] sm:$0xff] %v5365_v29 }
 0x20f   : > { %6423 = vst [vmem:[#allocation52_spill] sm:$0xff] %v5329_v33  ;;  %6425 = vst [vmem:[#allocation54_spill] sm:$0xff] %v5347_v31 }
 0x210   : > { %1520 = vmax.xlane.f32.xlu1 %v1519_v34 }
 0x212   : > { %v5095_v35 = vpop.f32.mrb[32].mxu1 }
 0x213   : > { %6385 = vst [vmem:[#allocation14_spill] sm:$0xff] %v5095_v35  ;;  %v5097_v36 = vpop.f32.mrb[33].mxu1 }
 0x214   : > { %6386 = vst [vmem:[#allocation15_spill] sm:$0xff] %v5097_v36  ;;  %v5099_v37 = vpop.f32.mrb[34].mxu1  ;;  %v1522_v38 = vmax.f32 %v5095_v35, %v5097_v36 }
 0x215   : > { %6387 = vst [vmem:[#allocation16_spill] sm:$0xff] %v5099_v37  ;;  %v5103_v39 = vpop.f32.mrb[35].mxu1 }
 0x216   : > { %6388 = vst [vmem:[#allocation17_spill] sm:$0xff] %v5103_v39  ;;  %1523 = vmax.xlane.f32.xlu0 %v1522_v38  ;;  %v1525_v40 = vmax.f32 %v5099_v37, %v5103_v39  ;;  %v5309_v39 = vld [vmem:[#allocation3 + $0x58] sm:$0xff] }
 0x217   : > { %6420 = vst [vmem:[#allocation49_spill] sm:$0xff] %v5309_v39 }
 0x218   : > { %1526 = vmax.xlane.f32.xlu1 %v1525_v40 }
 0x21a   : > { %v5107_v41 = vpop.f32.mrb[36].mxu1 }
 0x21b   : > { %6389 = vst [vmem:[#allocation18_spill] sm:$0xff] %v5107_v41  ;;  %v5109_v15 = vpop.f32.mrb[37].mxu1 }
 0x21c   : > { %6390 = vst [vmem:[#allocation19_spill] sm:$0xff] %v5109_v15  ;;  %v5111_v42 = vpop.f32.mrb[38].mxu1  ;;  %v1528_v43 = vmax.f32 %v5107_v41, %v5109_v15  ;;  %v5266_v15 = vld [vmem:[#allocation3 + $0x30] sm:$0xff] }
 0x21d   : > { %6391 = vst [vmem:[#allocation20_spill] sm:$0xff] %v5111_v42  ;;  %v5115_v44 = vpop.f32.mrb[39].mxu1 }
 0x21e   : > { %6392 = vst [vmem:[#allocation21_spill] sm:$0xff] %v5115_v44  ;;  %1529 = vmax.xlane.f32.xlu0 %v1528_v43  ;;  %v1531_v45 = vmax.f32 %v5111_v42, %v5115_v44  ;;  %v5238_v44 = vld [vmem:[#allocation3 + $0x20] sm:$0xff] }
 0x220   : > { %1532 = vmax.xlane.f32.xlu1 %v1531_v45 }
 0x222   : > { %v5119_v46 = vpop.f32.mrb[40].mxu1 }
 0x223   : > { %6393 = vst [vmem:[#allocation22_spill] sm:$0xff] %v5119_v46  ;;  %v5121_v47 = vpop.f32.mrb[41].mxu1 }
 0x224   : > { %6394 = vst [vmem:[#allocation23_spill] sm:$0xff] %v5121_v47  ;;  %v5123_v51 = vpop.f32.mrb[42].mxu1  ;;  %v1534_v53 = vmax.f32 %v5119_v46, %v5121_v47  ;;  %v4200_v47 = vld [vmem:[%s4679_s20 + $0x60] sm:$0xff]  }
 0x225   : > { %6395 = vst [vmem:[#allocation24_spill] sm:$0xff] %v5123_v51  ;;  %v5127_v57 = vpop.f32.mrb[43].mxu1  ;;  %v4201_v46 = vld [vmem:[%s4679_s20 + $0x20] sm:$0xff]  }
 0x226   : > { %6396 = vst [vmem:[#allocation25_spill] sm:$0xff] %v5127_v57  ;;  %1535 = vmax.xlane.f32.xlu1 %v1534_v53  ;;  %v1537_v59 = vmax.f32 %v5123_v51, %v5127_v57 }
 0x228   : > { %1538 = vmax.xlane.f32.xlu0 %v1537_v59 }
 0x22a   : > { %v5131_v63 = vpop.f32.mrb[44].mxu1 }
 0x22b   : > { %6397 = vst [vmem:[#allocation26_spill] sm:$0xff] %v5131_v63  ;;  %v5133_v1 = vpop.f32.mrb[45].mxu1 }
 0x22c   : > { %6398 = vst [vmem:[#allocation27_spill] sm:$0xff] %v5133_v1  ;;  %v5135_v3 = vpop.f32.mrb[46].mxu1  ;;  %v1540_v8 = vmax.f32 %v5131_v63, %v5133_v1  ;;  %v5195_v1 = vld [vmem:[#allocation3] sm:$0xff]  ;;  %v4196_v63 = vld [vmem:[%s4679_s20 + $0x50] sm:$0xff]  }
 0x22d   : > { %6399 = vst [vmem:[#allocation28_spill] sm:$0xff] %v5135_v3  ;;  %v5139_v2 = vpop.f32.mrb[47].mxu1 }
 0x22e   : > { %6400 = vst [vmem:[#allocation29_spill] sm:$0xff] %v5139_v2  ;;  %1541 = vmax.xlane.f32.xlu1 %v1540_v8  ;;  %v1543_v10 = vmax.f32 %v5135_v3, %v5139_v2 }
 0x230   : > { %1544 = vmax.xlane.f32.xlu0 %v1543_v10 }
 0x232   : > { %v5143_v5 = vpop.f32.mrb[48].mxu1 }
 0x233   : > { %6401 = vst [vmem:[#allocation30_spill] sm:$0xff] %v5143_v5  ;;  %v5145_v16 = vpop.f32.mrb[49].mxu1 }
 0x234   : > { %6402 = vst [vmem:[#allocation31_spill] sm:$0xff] %v5145_v16  ;;  %v5147_v20 = vpop.f32.mrb[50].mxu1  ;;  %v1546_v22 = vmax.f32 %v5143_v5, %v5145_v16  ;;  %v4192_v16 = vld [vmem:[%s4679_s20 + $0x40] sm:$0xff]  }
 0x235   : > { %6403 = vst [vmem:[#allocation32_spill] sm:$0xff] %v5147_v20  ;;  %v5151_v26 = vpop.f32.mrb[51].mxu1  ;;  %v4193_v5 = vld [vmem:[%s4679_s20] sm:$0xff]   ;;  %3937 = vmatprep.subr.bf16.mxu0 %v4192_v16 }
 0x236   : > { %6404 = vst [vmem:[#allocation33_spill] sm:$0xff] %v5151_v26  ;;  %1547 = vmax.xlane.f32.xlu0 %v1546_v22  ;;  %v1549_v28 = vmax.f32 %v5147_v20, %v5151_v26  ;;  %3938 = vmatpush3.bf16.msra.mxu0 %v4193_v5  ;;  %v4205_v26 = vld [vmem:[%s4679_s20 + $0x30] sm:$0xff]  }
 0x238   : > { %1550 = vmax.xlane.f32.xlu1 %v1549_v28 }
 0x23a   : > { %v5155_v32 = vpop.f32.mrb[52].mxu1 }
 0x23b   : > { %6405 = vst [vmem:[#allocation34_spill] sm:$0xff] %v5155_v32  ;;  %v5157_v34 = vpop.f32.mrb[53].mxu1 }
 0x23c   : > { %6406 = vst [vmem:[#allocation35_spill] sm:$0xff] %v5157_v34  ;;  %v5159_v38 = vpop.f32.mrb[54].mxu1  ;;  %v1552_v40 = vmax.f32 %v5155_v32, %v5157_v34  ;;  %v4197_v32 = vld [vmem:[%s4679_s20 + $0x10] sm:$0xff]  }
 0x23d   : > { %6407 = vst [vmem:[#allocation36_spill] sm:$0xff] %v5159_v38  ;;  %v5163_v43 = vpop.f32.mrb[55].mxu1 }
 0x23e   : > { %6408 = vst [vmem:[#allocation37_spill] sm:$0xff] %v5163_v43  ;;  %1553 = vmax.xlane.f32.xlu1 %v1552_v40  ;;  %v1555_v45 = vmax.f32 %v5159_v38, %v5163_v43  ;;  %v5226_v43 = vld [vmem:[#allocation3 + $0x18] sm:$0xff]  ;;  %v4203_v38 = vld [vmem:[%s4679_s20 + $0x28] sm:$0xff]  }
 0x240   : > { %1556 = vmax.xlane.f32.xlu0 %v1555_v45 }
 0x242   : > { %v5167_v53 = vpop.f32.mrb[56].mxu1 }
 0x243   : > { %6409 = vst [vmem:[#allocation38_spill] sm:$0xff] %v5167_v53  ;;  %v5169_v59 = vpop.f32.mrb[57].mxu1 }
 0x244   : > { %6410 = vst [vmem:[#allocation39_spill] sm:$0xff] %v5169_v59  ;;  %v5171_v8 = vpop.f32.mrb[58].mxu1  ;;  %v1558_v10 = vmax.f32 %v5167_v53, %v5169_v59  ;;  %v5202_v53 = vld [vmem:[#allocation3 + $0x8] sm:$0xff] }
 0x245   : > { %6411 = vst [vmem:[#allocation40_spill] sm:$0xff] %v5171_v8  ;;  %v5175_v22 = vpop.f32.mrb[59].mxu1 }
 0x246   : > { %6412 = vst [vmem:[#allocation41_spill] sm:$0xff] %v5175_v22  ;;  %v1561_v28 = vmax.f32 %v5171_v8, %v5175_v22  ;;  %1559 = vmax.xlane.f32.xlu0 %v1558_v10  ;;  %v4194_v10 = vld [vmem:[%s4679_s20 + $0x48] sm:$0xff]  }
 0x247   : > { %3939 = vmatprep.subr.bf16.mxu0 %v4194_v10  ;;  %v4198_v10 = vld [vmem:[%s4679_s20 + $0x58] sm:$0xff]  }
 0x248   : > { %1562 = vmax.xlane.f32.xlu1 %v1561_v28  ;;  %v4195_v28 = vld [vmem:[%s4679_s20 + $0x8] sm:$0xff]  }
 0x249   : > { %3940 = vmatpush3.bf16.msra.mxu0 %v4195_v28 }
 0x24a   : > { %v5179_v40 = vpop.f32.mrb[60].mxu1  ;;  %3941 = vmatprep.subr.bf16.mxu0 %v4196_v63  ;;  %v5214_v63 = vld [vmem:[#allocation3 + $0x10] sm:$0xff] }
 0x24b   : > { %6413 = vst [vmem:[#allocation42_spill] sm:$0xff] %v5179_v40  ;;  %v5181_v45 = vpop.f32.mrb[61].mxu1 }
 0x24c   : > { %6414 = vst [vmem:[#allocation43_spill] sm:$0xff] %v5181_v45  ;;  %v5183_v34 = vpop.f32.mrb[62].mxu1 }
 0x24d   : > { %6415 = vst [vmem:[#allocation44_spill] sm:$0xff] %v5183_v34  ;;  %v5187_v59 = vpop.f32.mrb[63].mxu1  ;;  %3942 = vmatpush3.bf16.msra.mxu0 %v4197_v32  ;;  %v4202_v32 = vld [vmem:[%s4679_s20 + $0x68] sm:$0xff]  }
 0x24e   : > { %6416 = vst [vmem:[#allocation45_spill] sm:$0xff] %v5187_v59  ;;  %3943 = vmatprep.subr.bf16.mxu0 %v4198_v10  ;;  %v5245_v10 = vld [vmem:[#allocation3 + $0x28] sm:$0xff] }
 0x263   : > { %v1476_v22 = vpop.xlane.xlu0 %1475 }
 0x264   : > { %v5200_v8 = vmax.f32 %v5195_v1, %v1476_v22  ;;  %v4199_v22 = vld [vmem:[%s4679_s20 + $0x18] sm:$0xff]  }
 0x265   : > { %3944 = vmatpush3.bf16.msra.mxu0 %v4199_v22 }
 0x266   : > { %2884 = vst.msk [vmem:[#allocation3] sm:$0xff] %vm927_vm2, %v5200_v8  ;;  %1700 = vperm.xlu0 %4174, %v5200_v8   ;;  %3945 = vmatprep.subr.bf16.mxu0 %v4200_v47 }
 0x267   : > { %v1479_v16 = vpop.xlane.xlu0 %1478 }
 0x268   : > { %v5211_v28 = vmax.f32 %v5202_v53, %v1479_v16 }
 0x269   : > { %3946 = vmatpush3.bf16.msra.mxu0 %v4201_v46 }
 0x26a   : > { %2885 = vst.msk [vmem:[#allocation3 + $0x8] sm:$0xff] %vm927_vm2, %v5211_v28  ;;  %1705 = vperm.xlu1 %4175, %v5211_v28   ;;  %3947 = vmatprep.subr.bf16.mxu0 %v4202_v32 }
 0x26b   : > { %v1482_v5 = vpop.xlane.xlu1 %1481 }
 0x26c   : > { %v5223_v16 = vmax.f32 %v5214_v63, %v1482_v5 }
 0x26d   : > { %3948 = vmatpush3.bf16.msra.mxu0 %v4203_v38  ;;  %v4206_v38 = vld [vmem:[%s4679_s20 + $0x78] sm:$0xff]  }
 0x26e   : > { %2886 = vst.msk [vmem:[#allocation3 + $0x10] sm:$0xff] %vm927_vm2, %v5223_v16  ;;  %1710 = vperm.xlu1 %4175, %v5223_v16  }
 0x26f   : > { %v1485_v22 = vpop.xlane.xlu1 %1484 }
 0x270   : > { %v5235_v5 = vmax.f32 %v5226_v43, %v1485_v22  ;;  %v4204_v22 = vld [vmem:[%s4679_s20 + $0x70] sm:$0xff]  }
 0x271   : > { %3949 = vmatprep.subr.bf16.mxu0 %v4204_v22  ;;  %v4207_v22 = vld [vmem:[%s4679_s20 + $0x38] sm:$0xff]  }
 0x272   : > { %2887 = vst.msk [vmem:[#allocation3 + $0x18] sm:$0xff] %vm927_vm2, %v5235_v5  ;;  %1715 = vperm.xlu1 %4175, %v5235_v5   ;;  %3950 = vmatpush3.bf16.msra.mxu0 %v4205_v26 }
 0x273   : > { %v1488_v46 = vpop.xlane.xlu0 %1487  ;;  %3951 = vmatprep.subr.bf16.mxu0 %v4206_v38 }
 0x274   : > { %v5249_v42 = vmax.f32 %v5238_v44, %v1488_v46  ;;  %v5289_v46 = vld [vmem:[#allocation3 + $0x48] sm:$0xff] }
 0x275   : > { %v1491_v32 = vpop.xlane.xlu1 %1490  ;;  %6417 = vst [vmem:[#allocation46_spill] sm:$0xff] %v5289_v46 }
 0x276   : > { %2888 = vst.msk [vmem:[#allocation3 + $0x20] sm:$0xff] %vm927_vm2, %v5249_v42  ;;  %v5257_v20 = vmax.f32 %v5245_v10, %v1491_v32  ;;  %1720 = vperm.xlu0 %4174, %v5249_v42   ;;  %3952 = vmatpush3.bf16.msra.mxu0 %v4207_v22  ;;  %v5269_v32 = vld [vmem:[#allocation3 + $0x38] sm:$0xff] }
 0x278   : > { %2889 = vst.msk [vmem:[#allocation3 + $0x28] sm:$0xff] %vm927_vm2, %v5257_v20 }
 0x27a   : > { %1725 = vperm.xlu0 %4174, %v5257_v20  }
 0x27b   : > { %v1494_v47 = vpop.xlane.xlu0 %1493 }
 0x27c   : > { %v5272_v41 = vmax.f32 %v5266_v15, %v1494_v47  ;;  %v5286_v47 = vld [vmem:[#allocation3 + $0x40] sm:$0xff] }
 0x27d   : > { %v1497_v26 = vpop.xlane.xlu1 %1496 }
 0x27e   : > { %2890 = vst.msk [vmem:[#allocation3 + $0x30] sm:$0xff] %vm927_vm2, %v5272_v41  ;;  %v5279_v2 = vmax.f32 %v5269_v32, %v1497_v26  ;;  %1730 = vperm.xlu1 %4175, %v5272_v41  }
 0x280   : > { %2891 = vst.msk [vmem:[#allocation3 + $0x38] sm:$0xff] %vm927_vm2, %v5279_v2 }
 0x282   : > { %1735 = vperm.xlu1 %4175, %v5279_v2  }
 0x283   : > { %v1500_v22 = vpop.xlane.xlu0 %1499 }
 0x284   : > { %v5292_v3 = vmax.f32 %v5286_v47, %v1500_v22  ;;  %v5306_v22 = vld [vmem:[#allocation3 + $0x50] sm:$0xff] }
 0x285   : > { %v1503_v26 = vpop.xlane.xlu1 %1502  ;;  %6419 = vst [vmem:[#allocation48_spill] sm:$0xff] %v5306_v22 }
 0x286   : > { %2892 = vst.msk [vmem:[#allocation3 + $0x40] sm:$0xff] %vm927_vm2, %v5292_v3  ;;  %v5299_v38 = vmax.f32 %v5289_v46, %v1503_v26  ;;  %1740 = vperm.xlu0 %4174, %v5292_v3  }
 0x288   : > { %6418 = vst [vmem:[#allocation47_spill] sm:$0xff] %v5299_v38  ;;  %2893 = vst.msk [vmem:[#allocation3 + $0x48] sm:$0xff] %vm927_vm2, %v5299_v38 }
 0x28a   : > { %1745 = vperm.xlu0 %4174, %v5299_v38  }
 0x28b   : > { %v1506_v57 = vpop.xlane.xlu0 %1505 }
 0x28c   : > { %v5312_v51 = vmax.f32 %v5306_v22, %v1506_v57  ;;  %v5326_v57 = vld [vmem:[#allocation3 + $0x60] sm:$0xff] }
 0x28d   : > { %v1509_v26 = vpop.xlane.xlu1 %1508 }
 0x28e   : > { %6421 = vst [vmem:[#allocation50_spill] sm:$0xff] %v5312_v51  ;;  %2894 = vst.msk [vmem:[#allocation3 + $0x50] sm:$0xff] %vm927_vm2, %v5312_v51  ;;  %v5319_v37 = vmax.f32 %v5309_v39, %v1509_v26  ;;  %1750 = vperm.xlu1 %4175, %v5312_v51  }
 0x290   : > { %6422 = vst [vmem:[#allocation51_spill] sm:$0xff] %v5319_v37  ;;  %2895 = vst.msk [vmem:[#allocation3 + $0x58] sm:$0xff] %vm927_vm2, %v5319_v37 }
 0x292   : > { %1755 = vperm.xlu1 %4175, %v5319_v37   ;;  %v5345_v37 = vld [vmem:[#allocation3 + $0x70] sm:$0xff] }
 0x293   : > { %v1512_v46 = vpop.xlane.xlu0 %1511 }
 0x294   : > { %v5332_v22 = vmax.f32 %v5326_v57, %v1512_v46 }
 0x295   : > { %v1515_v26 = vpop.xlane.xlu1 %1514 }
 0x296   : > { %2896 = vst.msk [vmem:[#allocation3 + $0x60] sm:$0xff] %vm927_vm2, %v5332_v22  ;;  %v5339_v38 = vmax.f32 %v5329_v33, %v1515_v26 }
 0x298   : > { %6424 = vst [vmem:[#allocation53_spill] sm:$0xff] %v5339_v38  ;;  %2897 = vst.msk [vmem:[#allocation3 + $0x68] sm:$0xff] %vm927_vm2, %v5339_v38 }
 0x29b   : > { %v1518_v46 = vpop.xlane.xlu0 %1517 }
 0x29c   : > { %v5350_v36 = vmax.f32 %v5345_v37, %v1518_v46 }
 0x29d   : > { %v1521_v51 = vpop.xlane.xlu1 %1520 }
 0x29e   : > { %2898 = vst.msk [vmem:[#allocation3 + $0x70] sm:$0xff] %vm927_vm2, %v5350_v36  ;;  %v5357_v26 = vmax.f32 %v5347_v31, %v1521_v51 }
 0x2a0   : > { %2899 = vst.msk [vmem:[#allocation3 + $0x78] sm:$0xff] %vm927_vm2, %v5357_v26 }
 0x2a3   : > { %v1524_v46 = vpop.xlane.xlu0 %1523 }
 0x2a4   : > { %v5368_v27 = vmax.f32 %v5363_v30, %v1524_v46  ;;  %v6429_v46 = vmax.f32 %v5183_v34, %v5187_v59  ;;  %v5402_v59 = vld [vmem:[#allocation3 + $0xa0] sm:$0xff]  ;;  %v5404_v34 = vld [vmem:[#allocation3 + $0xa8] sm:$0xff] }
 0x2a5   : > { %v1527_v35 = vpop.xlane.xlu1 %1526  ;;  %6432 = vst [vmem:[#allocation60_spill] sm:$0xff] %v5402_v59  ;;  %6433 = vst [vmem:[#allocation61_spill] sm:$0xff] %v5404_v34 }
 0x2a6   : > { %6428 = vst [vmem:[#allocation57_spill] sm:$0xff] %v5368_v27  ;;  %2900 = vst.msk [vmem:[#allocation3 + $0x80] sm:$0xff] %vm927_vm2, %v5368_v27  ;;  %v5375_v51 = vmax.f32 %v5365_v29, %v1527_v35 }
 0x2a8   : > { %2901 = vst.msk [vmem:[#allocation3 + $0x88] sm:$0xff] %vm927_vm2, %v5375_v51 }
 0x2a9   : > { %1568 = vmax.xlane.f32.xlu0 %v6429_v46 }
 0x2ab   : > { %v1530_v23 = vpop.xlane.xlu0 %1529 }
 0x2ac   : > { %v5389_v30 = vmax.f32 %v5384_v24, %v1530_v23  ;;  %v6434_v24 = vmax.f32 %v5179_v40, %v5181_v45  ;;  %v5425_v45 = vld [vmem:[#allocation3 + $0xb8] sm:$0xff]  ;;  %v5445_v40 = vld [vmem:[#allocation3 + $0xc8] sm:$0xff] }
 0x2ad   : > { %v1533_v35 = vpop.xlane.xlu1 %1532  ;;  %6437 = vst [vmem:[#allocation64_spill] sm:$0xff] %v5425_v45  ;;  %6441 = vst [vmem:[#allocation68_spill] sm:$0xff] %v5445_v40 }
 0x2ae   : > { %2902 = vst.msk [vmem:[#allocation3 + $0x90] sm:$0xff] %vm927_vm2, %v5389_v30  ;;  %v5396_v39 = vmax.f32 %v5386_v25, %v1533_v35 }
 0x2b0   : > { %2903 = vst.msk [vmem:[#allocation3 + $0x98] sm:$0xff] %vm927_vm2, %v5396_v39 }
 0x2b3   : > { %v1536_v23 = vpop.xlane.xlu1 %1535 }
 0x2b4   : > { %v5407_v29 = vmax.f32 %v5402_v59, %v1536_v23  ;;  %v5423_v23 = vld [vmem:[#allocation3 + $0xb0] sm:$0xff] }
 0x2b5   : > { %v1539_v33 = vpop.xlane.xlu0 %1538  ;;  %6436 = vst [vmem:[#allocation63_spill] sm:$0xff] %v5423_v23 }
 0x2b6   : > { %1565 = vmax.xlane.f32.xlu1 %v6434_v24  ;;  %2904 = vst.msk [vmem:[#allocation3 + $0xa0] sm:$0xff] %vm927_vm2, %v5407_v29  ;;  %v5417_v46 = vmax.f32 %v5404_v34, %v1539_v33 }
 0x2b8   : > { %6435 = vst [vmem:[#allocation62_spill] sm:$0xff] %v5417_v46  ;;  %2905 = vst.msk [vmem:[#allocation3 + $0xa8] sm:$0xff] %vm927_vm2, %v5417_v46 }
 0x2bb   : > { %v1542_v31 = vpop.xlane.xlu1 %1541 }
 0x2bc   : > { %v5428_v24 = vmax.f32 %v5423_v23, %v1542_v31  ;;  %v5442_v31 = vld [vmem:[#allocation3 + $0xc0] sm:$0xff] }
 0x2bd   : > { %v1545_v35 = vpop.xlane.xlu0 %1544  ;;  %6440 = vst [vmem:[#allocation67_spill] sm:$0xff] %v5442_v31 }
 0x2be   : > { %6438 = vst [vmem:[#allocation65_spill] sm:$0xff] %v5428_v24  ;;  %2906 = vst.msk [vmem:[#allocation3 + $0xb0] sm:$0xff] %vm927_vm2, %v5428_v24  ;;  %v5435_v33 = vmax.f32 %v5425_v45, %v1545_v35 }
 0x2bf   : > { %1760 = vperm.xlu0 %4174, %v5332_v22  }
 0x2c0   : > { %6439 = vst [vmem:[#allocation66_spill] sm:$0xff] %v5435_v33  ;;  %2907 = vst.msk [vmem:[#allocation3 + $0xb8] sm:$0xff] %vm927_vm2, %v5435_v33 }
 0x2c3   : > { %1765 = vperm.xlu0 %4174, %v5339_v38   ;;  %v1548_v34 = vpop.xlane.xlu0 %1547  ;;  %v5489_v38 = vld [vmem:[#allocation3 + $0xe8] sm:$0xff] }
 0x2c4   : > { %v5448_v23 = vmax.f32 %v5442_v31, %v1548_v34  ;;  %v5463_v34 = vld [vmem:[#allocation3 + $0xd0] sm:$0xff]  ;;  %v5467_v31 = vld [vmem:[#allocation3 + $0xd8] sm:$0xff]  ;;  %6448 = vst [vmem:[#allocation75_spill] sm:$0xff] %v5489_v38 }
 0x2c5   : > { %v1551_v35 = vpop.xlane.xlu1 %1550  ;;  %6444 = vst [vmem:[#allocation71_spill] sm:$0xff] %v5463_v34  ;;  %6445 = vst [vmem:[#allocation72_spill] sm:$0xff] %v5467_v31 }
 0x2c6   : > { %6442 = vst [vmem:[#allocation69_spill] sm:$0xff] %v5448_v23  ;;  %2908 = vst.msk [vmem:[#allocation3 + $0xc0] sm:$0xff] %vm927_vm2, %v5448_v23  ;;  %v5455_v25 = vmax.f32 %v5445_v40, %v1551_v35 }
 0x2c7   : > { %1780 = vperm.xlu1 %4175, %v5368_v27   ;;  %1770 = vperm.xlu0 %4174, %v5350_v36  }
 0x2c8   : > { %6443 = vst [vmem:[#allocation70_spill] sm:$0xff] %v5455_v25  ;;  %2909 = vst.msk [vmem:[#allocation3 + $0xc8] sm:$0xff] %vm927_vm2, %v5455_v25 }
 0x2cb   : > { %1805 = vperm.xlu1 %4175, %v5417_v46   ;;  %1775 = vperm.xlu0 %4174, %v5357_v26   ;;  %v1554_v59 = vpop.xlane.xlu1 %1553 }
 0x2cc   : > { %v5470_v35 = vmax.f32 %v5463_v34, %v1554_v59  ;;  %v5485_v59 = vld [vmem:[#allocation3 + $0xe0] sm:$0xff] }
 0x2cd   : > { %v1557_v27 = vpop.xlane.xlu0 %1556  ;;  %6447 = vst [vmem:[#allocation74_spill] sm:$0xff] %v5485_v59 }
 0x2ce   : > { %2910 = vst.msk [vmem:[#allocation3 + $0xd0] sm:$0xff] %vm927_vm2, %v5470_v35  ;;  %v5477_v45 = vmax.f32 %v5467_v31, %v1557_v27 }
 0x2cf   : > { %1815 = vperm.xlu1 %4175, %v5435_v33   ;;  %1785 = vperm.xlu0 %4174, %v5375_v51  }
 0x2d0   : > { %6446 = vst [vmem:[#allocation73_spill] sm:$0xff] %v5477_v45  ;;  %2911 = vst.msk [vmem:[#allocation3 + $0xd8] sm:$0xff] %vm927_vm2, %v5477_v45 }
 0x2d3   : > { %1825 = vperm.xlu1 %4175, %v5455_v25   ;;  %1790 = vperm.xlu0 %4174, %v5389_v30   ;;  %v1560_v27 = vpop.xlane.xlu0 %1559 }
 0x2d4   : > { %v5492_v34 = vmax.f32 %v5485_v59, %v1560_v27 }
 0x2d5   : > { %v1563_v33 = vpop.xlane.xlu1 %1562 }
 0x2d6   : > { %v5495_v46 = vmax.f32 %v5489_v38, %v1563_v33  ;;  %2912 = vst.msk [vmem:[#allocation3 + $0xe0] sm:$0xff] %vm927_vm2, %v5492_v34 }
 0x2d7   : > { %1835 = vperm.xlu1 %4175, %v5477_v45   ;;  %1795 = vperm.xlu0 %4174, %v5396_v39  }
 0x2d8   : > { %6449 = vst [vmem:[#allocation76_spill] sm:$0xff] %v5495_v46  ;;  %2913 = vst.msk [vmem:[#allocation3 + $0xe8] sm:$0xff] %vm927_vm2, %v5495_v46 }
 0x2db   : > { %1845 = vperm.xlu1 %4175, %v5495_v46   ;;  %1800 = vperm.xlu0 %4174, %v5407_v29  }
 0x2df   : > { %1810 = vperm.xlu0 %4174, %v5428_v24  }
 0x2e3   : > { %1820 = vperm.xlu0 %4174, %v5448_v23  }
 0x2e5   : > { %v1701_v33 = vpop.permute.xlu0 %1700 }
 0x2e6   : > { %v1858_v27 = vsub.f32 %v4868_v48, %v1701_v33  ;;  %v1859_v40 = vsub.f32 %v4870_v49, %v1701_v33 }
 0x2e7   : > { %1830 = vperm.xlu0 %4174, %v5470_v35  }
 0x2e8   : > { %v1922_v59 = vmul.f32 1.442695, %v1858_v27  ;;  %v1924_v31 = vmul.f32 1.442695, %v1859_v40 }
 0x2e9   : > { %v1706_v38 = vpop.permute.xlu1 %1705 }
 0x2ea   : > { %4208 = vpow2.f32 %v1922_v59  ;;  %v1860_v45 = vsub.f32 %v4872_v50, %v1706_v38  ;;  %v1861_v46 = vsub.f32 %v4876_v52, %v1706_v38 }
 0x2eb   : > { %4210 = vpow2.f32 %v1924_v31  ;;  %1840 = vperm.xlu0 %4174, %v5492_v34  }
 0x2ec   : > { %v1926_v25 = vmul.f32 1.442695, %v1860_v45  ;;  %v1928_v23 = vmul.f32 1.442695, %v1861_v46 }
 0x2ed   : > { %v1711_v24 = vpop.permute.xlu1 %1710 }
 0x2ee   : > { %4212 = vpow2.f32 %v1926_v25  ;;  %v1862_v48 = vsub.f32 %v4880_v54, %v1711_v24  ;;  %v1863_v49 = vsub.f32 %v4882_v55, %v1711_v24 }
 0x2ef   : > { %4214 = vpow2.f32 %v1928_v23 }
 0x2f0   : > { %v1930_v33 = vmul.f32 1.442695, %v1862_v48  ;;  %v1932_v40 = vmul.f32 1.442695, %v1863_v49 }
 0x2f1   : > { %v1716_v27 = vpop.permute.xlu1 %1715 }
 0x2f2   : > { %4216 = vpow2.f32 %v1930_v33  ;;  %v1864_v50 = vsub.f32 %v4884_v56, %v1716_v27  ;;  %v1865_v52 = vsub.f32 %v4888_v58, %v1716_v27 }
 0x2f3   : > { %4218 = vpow2.f32 %v1932_v40 }
 0x2f4   : > { %v4209_v38 = vpop.eup %4208  ;;  %v1934_v31 = vmul.f32 1.442695, %v1864_v50  ;;  %v1936_v45 = vmul.f32 1.442695, %v1865_v52 }
 0x2f5   : > { %v4211_v46 = vpop.eup %4210  ;;  %v1721_v59 = vpop.permute.xlu0 %1720 }
 0x2f6   : > { %4220 = vpow2.f32 %v1934_v31  ;;  %v1866_v54 = vsub.f32 %v4892_v60, %v1721_v59  ;;  %v1867_v55 = vsub.f32 %v4894_v61, %v1721_v59  ;;  %v5523_v25 = vadd.f32 %v4211_v46, %v4209_v38 }
 0x2f7   : > { %4222 = vpow2.f32 %v1936_v45 }
 0x2f8   : > { %v4213_v23 = vpop.eup %4212  ;;  %v1938_v24 = vmul.f32 1.442695, %v1866_v54  ;;  %v1940_v48 = vmul.f32 1.442695, %v1867_v55 }
 0x2f9   : > { %v4215_v56 = vpop.eup %4214  ;;  %v1726_v49 = vpop.permute.xlu0 %1725  ;;  %v2499_v58 = vpack.c.bf16 %v4213_v23, %v4209_v38 }
 0x2fa   : > { %4224 = vpow2.f32 %v1938_v24  ;;  %v1868_v33 = vsub.f32 %v4896_v62, %v1726_v49  ;;  %v1869_v40 = vsub.f32 %v4900_v0, %v1726_v49  ;;  %v2500_v27 = vpack.c.bf16 %v4215_v56, %v4211_v46 }
 0x2fb   : > { %4226 = vpow2.f32 %v1940_v48  ;;  %v5527_v50 = vadd.f32 %v4215_v56, %v4213_v23 }
 0x2fc   : > { %v4217_v60 = vpop.eup %4216  ;;  %v1942_v61 = vmul.f32 1.442695, %v1868_v33  ;;  %v1944_v52 = vmul.f32 1.442695, %v1869_v40  ;;  %2691 = vmatprep.mubr.bf16.mxu0 %v2500_v27 }
 0x2fd   : > { %v4219_v31 = vpop.eup %4218  ;;  %2692 = vmatmul.mubr.bf16.vlgmr.msra.gmra.mrb[32].mxu0 %v2499_v58  ;;  %v1731_v45 = vpop.permute.xlu1 %1730 }
 0x2fe   : > { %4228 = vpow2.f32 %v1942_v61  ;;  %v1870_v59 = vsub.f32 %v4904_v4, %v1731_v45  ;;  %v1871_v38 = vsub.f32 %v4906_v6, %v1731_v45  ;;  %v5531_v54 = vadd.f32 %v4219_v31, %v4217_v60 }
 0x2ff   : > { %4230 = vpow2.f32 %v1944_v52 }
 0x300   : > { %v4221_v62 = vpop.eup %4220  ;;  %v1946_v0 = vmul.f32 1.442695, %v1870_v59  ;;  %v1948_v46 = vmul.f32 1.442695, %v1871_v38 }
 0x301   : > { %v4223_v55 = vpop.eup %4222  ;;  %v1736_v23 = vpop.permute.xlu1 %1735  ;;  %v2501_v24 = vpack.c.bf16 %v4221_v62, %v4217_v60 }
 0x302   : > { %4232 = vpow2.f32 %v1946_v0  ;;  %v1872_v48 = vsub.f32 %v4908_v7, %v1736_v23  ;;  %v1873_v56 = vsub.f32 %v4912_v9, %v1736_v23  ;;  %v2502_v49 = vpack.c.bf16 %v4223_v55, %v4219_v31 }
 0x303   : > { %4234 = vpow2.f32 %v1948_v46  ;;  %v5535_v58 = vadd.f32 %v4223_v55, %v4221_v62 }
 0x304   : > { %v4225_v4 = vpop.eup %4224  ;;  %v1950_v6 = vmul.f32 1.442695, %v1872_v48  ;;  %v1952_v33 = vmul.f32 1.442695, %v1873_v56  ;;  %2699 = vmatprep.mubr.bf16.mxu0 %v2502_v49 }
 0x305   : > { %v4227_v40 = vpop.eup %4226  ;;  %2700 = vmatmul.mubr.bf16.gmra.mrb[36].mxu0 %v2501_v24  ;;  %v1741_v27 = vpop.permute.xlu0 %1740 }
 0x306   : > { %4236 = vpow2.f32 %v1950_v6  ;;  %v1874_v61 = vsub.f32 %v5047_v11, %v1741_v27  ;;  %v1875_v60 = vsub.f32 %v5049_v12, %v1741_v27  ;;  %v5539_v52 = vadd.f32 %v4227_v40, %v4225_v4 }
 0x307   : > { %4238 = vpow2.f32 %v1952_v33 }
 0x308   : > { %v4229_v7 = vpop.eup %4228  ;;  %v1954_v9 = vmul.f32 1.442695, %v1874_v61  ;;  %v1956_v31 = vmul.f32 1.442695, %v1875_v60 }
 0x309   : > { %v4231_v45 = vpop.eup %4230  ;;  %v1746_v59 = vpop.permute.xlu0 %1745  ;;  %v2503_v38 = vpack.c.bf16 %v4229_v7, %v4225_v4 }
 0x30a   : > { %4240 = vpow2.f32 %v1954_v9  ;;  %v1876_v62 = vsub.f32 %v5051_v13, %v1746_v59  ;;  %v1877_v0 = vsub.f32 %v5055_v14, %v1746_v59  ;;  %v2504_v46 = vpack.c.bf16 %v4231_v45, %v4227_v40 }
 0x30b   : > { %4242 = vpow2.f32 %v1956_v31  ;;  %v5543_v55 = vadd.f32 %v4231_v45, %v4229_v7 }
 0x30c   : > { %v4233_v11 = vpop.eup %4232  ;;  %v1958_v12 = vmul.f32 1.442695, %v1876_v62  ;;  %v1960_v23 = vmul.f32 1.442695, %v1877_v0  ;;  %2707 = vmatprep.mubr.bf16.mxu0 %v2504_v46 }
 0x30d   : > { %v4235_v24 = vpop.eup %4234  ;;  %2708 = vmatmul.mubr.bf16.gmra.mrb[40].mxu0 %v2503_v38  ;;  %v1751_v48 = vpop.permute.xlu1 %1750 }
 0x30e   : > { %4244 = vpow2.f32 %v1958_v12  ;;  %v1878_v56 = vsub.f32 %v5059_v17, %v1751_v48  ;;  %v1879_v49 = vsub.f32 %v5061_v18, %v1751_v48  ;;  %v5547_v4 = vadd.f32 %v4235_v24, %v4233_v11 }
 0x30f   : > { %4246 = vpow2.f32 %v1960_v23 }
 0x310   : > { %v4237_v13 = vpop.eup %4236  ;;  %v1962_v14 = vmul.f32 1.442695, %v1878_v56  ;;  %v1964_v6 = vmul.f32 1.442695, %v1879_v49 }
 0x311   : > { %v4239_v33 = vpop.eup %4238  ;;  %v1756_v40 = vpop.permute.xlu1 %1755  ;;  %v2505_v27 = vpack.c.bf16 %v4237_v13, %v4233_v11 }
 0x312   : > { %4248 = vpow2.f32 %v1962_v14  ;;  %v1880_v61 = vsub.f32 %v5063_v19, %v1756_v40  ;;  %v1881_v60 = vsub.f32 %v5067_v21, %v1756_v40  ;;  %v2506_v7 = vpack.c.bf16 %v4239_v33, %v4235_v24 }
 0x313   : > { %4250 = vpow2.f32 %v1964_v6  ;;  %v5551_v9 = vadd.f32 %v4239_v33, %v4237_v13  ;;  %v6450_v13 = vsub.f32 %v5195_v1, %v5200_v8  ;;  %v6451_v6 = vsub.f32 %v5202_v53, %v5211_v28 }
 0x314   : > { %v4241_v17 = vpop.eup %4240  ;;  %v1966_v18 = vmul.f32 1.442695, %v1880_v61  ;;  %v1968_v31 = vmul.f32 1.442695, %v1881_v60  ;;  %2715 = vmatprep.mubr.bf16.mxu0 %v2506_v7  ;;  %v6452_v40 = vsub.f32 %v5214_v63, %v5223_v16  ;;  %v6453_v61 = vsub.f32 %v5326_v57, %v5332_v22  ;;  %v5591_v22 = vld [vmem:[#allocation3 + $0xf8] sm:$0xff] }
 0x315   : > { %v4243_v45 = vpop.eup %4242  ;;  %2716 = vmatmul.mubr.bf16.gmra.mrb[44].mxu0 %v2505_v27  ;;  %v1634_v14 = vmul.f32 1.442695, %v6450_v13  ;;  %v1636_v33 = vmul.f32 1.442695, %v6451_v6  ;;  %v6454_v7 = vsub.f32 %v5226_v43, %v5235_v5  ;;  %v6455_v1 = vsub.f32 %v5238_v44, %v5249_v42 }
 0x316   : > { %4252 = vpow2.f32 %v1966_v18  ;;  %v5553_v59 = vadd.f32 %v4243_v45, %v4241_v17  ;;  %v1638_v27 = vmul.f32 1.442695, %v6452_v40  ;;  %v1658_v60 = vmul.f32 1.442695, %v6453_v61 }
 0x317   : > { %4254 = vpow2.f32 %v1968_v31  ;;  %v1642_v8 = vmul.f32 1.442695, %v6455_v1  ;;  %v6456_v53 = vsub.f32 %v5245_v10, %v5257_v20  ;;  %v6457_v63 = vsub.f32 %v5345_v37, %v5350_v36  ;;  %v6461_v36 = vld [vmem:[#allocation54_spill] sm:$0xff] }
 0x318   : > { %v4245_v38 = vpop.eup %4244  ;;  %4256 = vpow2.f32 %v1634_v14  ;;  %v6458_v43 = vsub.f32 %v5266_v15, %v5272_v41  ;;  %v6459_v42 = vsub.f32 %v5269_v32, %v5279_v2  ;;  %v6460_v20 = vsub.f32 %v5286_v47, %v5292_v3  ;;  %v6463_v41 = vld [vmem:[#allocation52_spill] sm:$0xff]  ;;  %v6464_v15 = vld [vmem:[#allocation53_spill] sm:$0xff]  ;;  %v6466_v32 = vld [vmem:[#allocation55_spill] sm:$0xff] }
 0x319   : > { %v4247_v62 = vpop.eup %4246  ;;  %v2507_v0 = vpack.c.bf16 %v4245_v38, %v4241_v17  ;;  %v1640_v17 = vmul.f32 1.442695, %v6454_v7  ;;  %4258 = vpow2.f32 %v1636_v33  ;;  %v1644_v28 = vmul.f32 1.442695, %v6456_v53  ;;  %v6477_v33 = vld [vmem:[#allocation60_spill] sm:$0xff] }
 0x31a   : > { %v2508_v19 = vpack.c.bf16 %v4247_v62, %v4243_v45  ;;  %v5555_v46 = vadd.f32 %v4247_v62, %v4245_v38  ;;  %4260 = vpow2.f32 %v1638_v27  ;;  %v1662_v16 = vmul.f32 1.442695, %v6457_v63  ;;  %v6467_v38 = vld [vmem:[#allocation57_spill] sm:$0xff] }
 0x31b   : > { %4262 = vpow2.f32 %v1658_v60  ;;  %v1646_v5 = vmul.f32 1.442695, %v6458_v43  ;;  %v1648_v44 = vmul.f32 1.442695, %v6459_v42  ;;  %v1650_v10 = vmul.f32 1.442695, %v6460_v20 }
 0x31c   : > { %v4249_v21 = vpop.eup %4248  ;;  %2723 = vmatprep.mubr.bf16.mxu0 %v2508_v19  ;;  %4264 = vpow2.f32 %v1640_v17  ;;  %v6462_v37 = vsub.f32 %v6461_v36, %v5357_v26  ;;  %v6465_v31 = vsub.f32 %v6463_v41, %v6464_v15  ;;  %v6468_v62 = vsub.f32 %v6466_v32, %v6467_v38  ;;  %v6480_v60 = vld [vmem:[#allocation61_spill] sm:$0xff]  ;;  %v6491_v20 = vld [vmem:[#allocation64_spill] sm:$0xff] }
 0x31d   : > { %v4251_v11 = vpop.eup %4250  ;;  %2724 = vmatmul.mubr.bf16.gmra.mrb[48].mxu0 %v2507_v0  ;;  %4266 = vpow2.f32 %v1642_v8  ;;  %v6469_v0 = vld [vmem:[#allocation56_spill] sm:$0xff]  ;;  %v6478_v40 = vsub.f32 %v6477_v33, %v5407_v29  ;;  %v6485_v8 = vld [vmem:[#allocation65_spill] sm:$0xff]  ;;  %v6488_v29 = vld [vmem:[#allocation6_spill] sm:$0xff] }
 0x31e   : > { %v5557_v12 = vadd.f32 %v4251_v11, %v4249_v21  ;;  %4268 = vpow2.f32 %v1644_v28  ;;  %v1664_v57 = vmul.f32 1.442695, %v6462_v37  ;;  %v1660_v45 = vmul.f32 1.442695, %v6465_v31  ;;  %v5656_v15 = vld [vmem:[#allocation3 + $0xf0] sm:$0xff]  ;;  %v6496_v32 = vld [vmem:[#allocation69_spill] sm:$0xff] }
 0x31f   : > { %4270 = vpow2.f32 %v1662_v16  ;;  %v1666_v3 = vmul.f32 1.442695, %v6468_v62  ;;  %v6470_v26 = vsub.f32 %v6469_v0, %v5375_v51  ;;  %v6474_v51 = vld [vmem:[#allocation59_spill] sm:$0xff]  ;;  %v1674_v27 = vmul.f32 1.442695, %v6478_v40  ;;  %v6502_v33 = vld [vmem:[#allocation68_spill] sm:$0xff] }
 0x320   : > { %v4253_v23 = vpop.eup %4252  ;;  %4272 = vpow2.f32 %v1646_v5  ;;  %v6475_v13 = vsub.f32 %v6474_v51, %v5396_v39  ;;  %v6484_v39 = vld [vmem:[#allocation63_spill] sm:$0xff]  ;;  %v6503_v40 = vld [vmem:[#allocation70_spill] sm:$0xff] }
 0x321   : > { %v4255_v24 = vpop.eup %4254  ;;  %v2509_v48 = vpack.c.bf16 %v4253_v23, %v4249_v21  ;;  %4274 = vpow2.f32 %v1648_v44  ;;  %v1668_v19 = vmul.f32 1.442695, %v6470_v26  ;;  %v6486_v53 = vsub.f32 %v6484_v39, %v6485_v8  ;;  %v6489_v5 = vld [vmem:[#allocation7_spill] sm:$0xff]  ;;  %v6498_v26 = vld [vmem:[#allocation8_spill] sm:$0xff]  ;;  %v6507_v8 = vld [vmem:[#allocation73_spill] sm:$0xff] }
 0x322   : > { %v2510_v56 = vpack.c.bf16 %v4255_v24, %v4251_v11  ;;  %v5559_v49 = vadd.f32 %v4255_v24, %v4253_v23  ;;  %v5608_v47 = vpop.eup %4256  ;;  %4276 = vpow2.f32 %v1650_v10  ;;  %v6471_v23 = vld [vmem:[#allocation58_spill] sm:$0xff]  ;;  %v1672_v14 = vmul.f32 1.442695, %v6475_v13  ;;  %v6506_v39 = vld [vmem:[#allocation72_spill] sm:$0xff] }
 0x323   : > { %v5618_v11 = vpop.eup %4258  ;;  %4278 = vpow2.f32 %v1664_v57  ;;  %v6472_v24 = vsub.f32 %v6471_v23, %v5389_v30  ;;  %v6481_v30 = vld [vmem:[#allocation62_spill] sm:$0xff]  ;;  %v1678_v28 = vmul.f32 1.442695, %v6486_v53  ;;  %v6499_v23 = vld [vmem:[#allocation9_spill] sm:$0xff]  ;;  %v6508_v53 = vsub.f32 %v6506_v39, %v6507_v8  ;;  %v6521_v39 = vld [vmem:[#allocation24_spill] sm:$0xff] }
 0x324   : > { %2731 = vmatprep.mubr.bf16.mxu0 %v2510_v56  ;;  %v5623_v56 = vpop.eup %4260  ;;  %4280 = vpow2.f32 %v1660_v45  ;;  %v6482_v7 = vsub.f32 %v6480_v60, %v6481_v30  ;;  %v6492_v10 = vld [vmem:[#allocation66_spill] sm:$0xff]  ;;  %v6495_v45 = vld [vmem:[#allocation67_spill] sm:$0xff] }
 0x325   : > { %2732 = vmatmul.mubr.bf16.gmra.mrb[52].mxu0 %v2509_v48  ;;  %v1670_v48 = vmul.f32 1.442695, %v6472_v24  ;;  %6473 = vst [vmem:[#allocation54_spill] sm:$0xff] %v5623_v56  ;;  %v5628_v6 = vpop.eup %4262  ;;  %4282 = vpow2.f32 %v1666_v3  ;;  %v6493_v36 = vsub.f32 %v6491_v20, %v6492_v10  ;;  %v6497_v38 = vsub.f32 %v6495_v45, %v6496_v32  ;;  %v6511_v20 = vld [vmem:[#allocation11_spill] sm:$0xff] }
 0x326   : > { %6476 = vst [vmem:[#allocation52_spill] sm:$0xff] %v5628_v6  ;;  %v5633_v61 = vpop.eup %4264  ;;  %4284 = vpow2.f32 %v1668_v19  ;;  %v1676_v17 = vmul.f32 1.442695, %v6482_v7  ;;  %v6514_v45 = vld [vmem:[#allocation15_spill] sm:$0xff] }
 0x327   : > { %6479 = vst [vmem:[#allocation53_spill] sm:$0xff] %v5633_v61  ;;  %v5639_v1 = vpop.eup %4266  ;;  %4286 = vpow2.f32 %v1670_v48  ;;  %v1680_v37 = vmul.f32 1.442695, %v6493_v36  ;;  %v1682_v62 = vmul.f32 1.442695, %v6497_v38 }
 0x328   : > { %6483 = vst [vmem:[#allocation55_spill] sm:$0xff] %v5639_v1  ;;  %v5644_v16 = vpop.eup %4268  ;;  %4288 = vpow2.f32 %v1672_v14 }
 0x329   : > { %6487 = vst [vmem:[#allocation57_spill] sm:$0xff] %v5644_v16  ;;  %v5648_v44 = vpop.eup %4270  ;;  %4290 = vpow2.f32 %v1674_v27  ;;  %v6504_v27 = vsub.f32 %v6502_v33, %v6503_v40  ;;  %v6518_v33 = vld [vmem:[#allocation12_spill] sm:$0xff] }
 0x32a   : > { %6490 = vst [vmem:[#allocation56_spill] sm:$0xff] %v5648_v44  ;;  %v5653_v57 = vpop.eup %4272  ;;  %4292 = vpow2.f32 %v1676_v17 }
 0x32b   : > { %v5658_v31 = vpop.eup %4274  ;;  %4294 = vpow2.f32 %v1678_v28  ;;  %v1684_v60 = vmul.f32 1.442695, %v6504_v27  ;;  %v1688_v28 = vmul.f32 1.442695, %v6508_v53  ;;  %v6519_v27 = vld [vmem:[#allocation13_spill] sm:$0xff] }
 0x32c   : > { %6494 = vst [vmem:[#allocation58_spill] sm:$0xff] %v5658_v31  ;;  %v5663_v0 = vpop.eup %4276  ;;  %v6522_v53 = vld [vmem:[#allocation25_spill] sm:$0xff] }
 0x32d   : > { %v5667_v51 = vpop.eup %4278 }
 0x32e   : > { %6500 = vst [vmem:[#allocation59_spill] sm:$0xff] %v5667_v51  ;;  %v5672_v14 = vpop.eup %4280 }
 0x32f   : > { %6501 = vst [vmem:[#allocation60_spill] sm:$0xff] %v5672_v14  ;;  %v5678_v17 = vpop.eup %4282 }
 0x330   : > { %6505 = vst [vmem:[#allocation61_spill] sm:$0xff] %v5678_v17 }
 0x336   : > { %v1569_v18 = vpop.xlane.xlu0 %1568 }
 0x337   : > { %v5603_v2 = vmax.f32 %v5591_v22, %v1569_v18 }
 0x339   : > { %2915 = vst.msk [vmem:[#allocation3 + $0xf8] sm:$0xff] %vm927_vm2, %v5603_v2  ;;  %1855 = vperm.xlu1 %4175, %v5603_v2  }
 0x33d   : > { %2369 = vperm.xlu1 %4175, %v5628_v6  }
 0x33e   : > { %v1761_v63 = vpop.permute.xlu0 %1760 }
 0x33f   : > { %v1882_v43 = vsub.f32 %v6488_v29, %v1761_v63  ;;  %v1883_v42 = vsub.f32 %v6489_v5, %v1761_v63  ;;  %v6510_v5 = vld [vmem:[#allocation10_spill] sm:$0xff]  ;;  %v6531_v63 = vld [vmem:[#allocation32_spill] sm:$0xff] }
 0x341   : > { %v1970_v18 = vmul.f32 1.442695, %v1882_v43  ;;  %v1972_v41 = vmul.f32 1.442695, %v1883_v42  ;;  %2379 = vperm.xlu1 %4175, %v5648_v44   ;;  %v5688_v43 = vpop.eup %4284  ;;  %v6539_v44 = vld [vmem:[#allocation40_spill] sm:$0xff] }
 0x342   : > { %v1766_v3 = vpop.permute.xlu0 %1765  ;;  %6509 = vst [vmem:[#allocation62_spill] sm:$0xff] %v5688_v43 }
 0x343   : > { %4296 = vpow2.f32 %v1970_v18  ;;  %v1884_v19 = vsub.f32 %v6498_v26, %v1766_v3  ;;  %v1885_v24 = vsub.f32 %v6499_v23, %v1766_v3  ;;  %v1566_v48 = vpop.xlane.xlu1 %1565  ;;  %v6513_v18 = vld [vmem:[#allocation14_spill] sm:$0xff] }
 0x344   : > { %4298 = vpow2.f32 %v1972_v41  ;;  %v5670_v13 = vmax.f32 %v5656_v15, %v1566_v48 }
 0x345   : > { %4300 = vpow2.f32 %v1680_v37  ;;  %v1974_v30 = vmul.f32 1.442695, %v1884_v19  ;;  %v1976_v7 = vmul.f32 1.442695, %v1885_v24  ;;  %2384 = vperm.xlu1 %4175, %v5667_v51   ;;  %v5692_v37 = vpop.eup %4286 }
 0x346   : > { %4302 = vpow2.f32 %v1682_v62  ;;  %2914 = vst.msk [vmem:[#allocation3 + $0xf0] sm:$0xff] %vm927_vm2, %v5670_v13  ;;  %1850 = vperm.xlu0 %4174, %v5670_v13   ;;  %v1771_v29 = vpop.permute.xlu0 %1770  ;;  %6512 = vst [vmem:[#allocation63_spill] sm:$0xff] %v5692_v37  ;;  %v5696_v38 = vpop.eup %4288 }
 0x347   : > { %4304 = vpow2.f32 %v1974_v30  ;;  %v1886_v42 = vsub.f32 %v6510_v5, %v1771_v29  ;;  %v1887_v10 = vsub.f32 %v6511_v20, %v1771_v29  ;;  %v1781_v36 = vpop.permute.xlu1 %1780  ;;  %6515 = vst [vmem:[#allocation65_spill] sm:$0xff] %v5696_v38  ;;  %v5699_v26 = vpop.eup %4290 }
 0x348   : > { %4306 = vpow2.f32 %v1976_v7  ;;  %v1890_v41 = vsub.f32 %v6513_v18, %v1781_v36  ;;  %v1891_v32 = vsub.f32 %v6514_v45, %v1781_v36  ;;  %6516 = vst [vmem:[#allocation6_spill] sm:$0xff] %v5699_v26  ;;  %v5702_v48 = vpop.eup %4292  ;;  %v6524_v45 = vld [vmem:[#allocation16_spill] sm:$0xff] }
 0x349   : > { %4308 = vpow2.f32 %v1684_v60  ;;  %v1978_v62 = vmul.f32 1.442695, %v1886_v42  ;;  %v1980_v3 = vmul.f32 1.442695, %v1887_v10  ;;  %2394 = vperm.xlu1 %4175, %v5688_v43   ;;  %6517 = vst [vmem:[#allocation7_spill] sm:$0xff] %v5702_v48  ;;  %v5706_v7 = vpop.eup %4294 }
 0x34a   : > { %4310 = vpow2.f32 %v1688_v28  ;;  %v1986_v19 = vmul.f32 1.442695, %v1890_v41  ;;  %v1988_v23 = vmul.f32 1.442695, %v1891_v32  ;;  %2374 = vperm.xlu0 %4174, %v5672_v14   ;;  %v1776_v24 = vpop.permute.xlu0 %1775  ;;  %6520 = vst [vmem:[#allocation64_spill] sm:$0xff] %v5706_v7 }
 0x34b   : > { %4312 = vpow2.f32 %v1978_v62  ;;  %v1888_v40 = vsub.f32 %v6518_v33, %v1776_v24  ;;  %v1889_v30 = vsub.f32 %v6519_v27, %v1776_v24  ;;  %v1806_v60 = vpop.permute.xlu1 %1805  ;;  %v6525_v62 = vld [vmem:[#allocation17_spill] sm:$0xff] }
 0x34c   : > { %4314 = vpow2.f32 %v1980_v3  ;;  %v1900_v8 = vsub.f32 %v6521_v39, %v1806_v60  ;;  %v1901_v28 = vsub.f32 %v6522_v53, %v1806_v60  ;;  %v6527_v27 = vld [vmem:[#allocation29_spill] sm:$0xff] }
 0x34d   : > { %v4297_v29 = vpop.eup %4296  ;;  %4316 = vpow2.f32 %v1986_v19  ;;  %v1982_v5 = vmul.f32 1.442695, %v1888_v40  ;;  %v1984_v42 = vmul.f32 1.442695, %v1889_v30  ;;  %2404 = vperm.xlu1 %4175, %v5696_v38   ;;  %v6526_v40 = vld [vmem:[#allocation28_spill] sm:$0xff] }
 0x34e   : > { %v4299_v20 = vpop.eup %4298  ;;  %4318 = vpow2.f32 %v1988_v23  ;;  %v2006_v10 = vmul.f32 1.442695, %v1900_v8  ;;  %v2008_v36 = vmul.f32 1.442695, %v1901_v28  ;;  %2389 = vperm.xlu0 %4174, %v5678_v17   ;;  %v1786_v18 = vpop.permute.xlu0 %1785 }
 0x34f   : > { %v5712_v41 = vpop.eup %4300  ;;  %4320 = vpow2.f32 %v1982_v5  ;;  %v1892_v32 = vsub.f32 %v6524_v45, %v1786_v18  ;;  %v1893_v3 = vsub.f32 %v6525_v62, %v1786_v18  ;;  %v1816_v24 = vpop.permute.xlu1 %1815  ;;  %v5716_v19 = vadd.f32 %v4299_v20, %v4297_v29 }
 0x350   : > { %6523 = vst [vmem:[#allocation66_spill] sm:$0xff] %v5712_v41  ;;  %v5718_v33 = vpop.eup %4302  ;;  %4322 = vpow2.f32 %v1984_v42  ;;  %v1904_v23 = vsub.f32 %v6526_v40, %v1816_v24  ;;  %v1905_v30 = vsub.f32 %v6527_v27, %v1816_v24  ;;  %v6529_v42 = vld [vmem:[#allocation18_spill] sm:$0xff]  ;;  %v6530_v24 = vld [vmem:[#allocation19_spill] sm:$0xff] }
 0x351   : > { %v4305_v60 = vpop.eup %4304  ;;  %4324 = vpow2.f32 %v2006_v10  ;;  %v1990_v39 = vmul.f32 1.442695, %v1892_v32  ;;  %v1992_v8 = vmul.f32 1.442695, %v1893_v3  ;;  %2314 = vperm.xlu1 %4175, %v5618_v11  }
 0x352   : > { %v4307_v53 = vpop.eup %4306  ;;  %4326 = vpow2.f32 %v2008_v36  ;;  %v2014_v28 = vmul.f32 1.442695, %v1904_v23  ;;  %v2016_v5 = vmul.f32 1.442695, %v1905_v30  ;;  %2399 = vperm.xlu0 %4174, %v5692_v37   ;;  %v1791_v18 = vpop.permute.xlu0 %1790  ;;  %v2511_v45 = vpack.c.bf16 %v4305_v60, %v4297_v29  ;;  %v6532_v23 = vld [vmem:[#allocation33_spill] sm:$0xff] }
 0x353   : > { %v5724_v62 = vpop.eup %4308  ;;  %4328 = vpow2.f32 %v1990_v39  ;;  %v1894_v40 = vsub.f32 %v6529_v42, %v1791_v18  ;;  %v1895_v27 = vsub.f32 %v6530_v24, %v1791_v18  ;;  %v1826_v10 = vpop.permute.xlu1 %1825  ;;  %v2512_v32 = vpack.c.bf16 %v4307_v53, %v4299_v20  ;;  %v6534_v42 = vld [vmem:[#allocation21_spill] sm:$0xff] }
 0x354   : > { %6528 = vst [vmem:[#allocation67_spill] sm:$0xff] %v5724_v62  ;;  %v5728_v3 = vpop.eup %4310  ;;  %4330 = vpow2.f32 %v1992_v8  ;;  %v1908_v36 = vsub.f32 %v6531_v63, %v1826_v10  ;;  %v1909_v30 = vsub.f32 %v6532_v23, %v1826_v10  ;;  %v5732_v21 = vadd.f32 %v4307_v53, %v4305_v60  ;;  %v6533_v60 = vld [vmem:[#allocation20_spill] sm:$0xff] }
 0x355   : > { %v4313_v38 = vpop.eup %4312  ;;  %4332 = vpow2.f32 %v2014_v28  ;;  %v1994_v29 = vmul.f32 1.442695, %v1894_v40  ;;  %v1996_v43 = vmul.f32 1.442695, %v1895_v27  ;;  %2739 = vmatprep.mubr.bf16.mxu0 %v2512_v32  ;;  %2414 = vperm.xlu1 %4175, %v5702_v48   ;;  %v6535_v10 = vld [vmem:[#allocation36_spill] sm:$0xff]  ;;  %v6536_v32 = vld [vmem:[#allocation37_spill] sm:$0xff] }
 0x356   : > { %v4315_v39 = vpop.eup %4314  ;;  %4334 = vpow2.f32 %v2016_v5  ;;  %v2022_v18 = vmul.f32 1.442695, %v1908_v36  ;;  %v2024_v20 = vmul.f32 1.442695, %v1909_v30  ;;  %2740 = vmatmul.mubr.bf16.gmra.mrb[56].mxu0 %v2511_v45  ;;  %2309 = vperm.xlu0 %4174, %v5608_v47   ;;  %v1796_v8 = vpop.permute.xlu0 %1795 }
 0x357   : > { %v5736_v63 = vpop.eup %4316  ;;  %4336 = vpow2.f32 %v1994_v29  ;;  %v1896_v53 = vsub.f32 %v6533_v60, %v1796_v8  ;;  %v1897_v28 = vsub.f32 %v6534_v42, %v1796_v8  ;;  %v1836_v40 = vpop.permute.xlu1 %1835  ;;  %v5740_v24 = vadd.f32 %v4315_v39, %v4313_v38 }
 0x358   : > { %v4319_v27 = vpop.eup %4318  ;;  %4338 = vpow2.f32 %v1996_v43  ;;  %v1912_v5 = vsub.f32 %v6535_v10, %v1836_v40  ;;  %v1913_v36 = vsub.f32 %v6536_v32, %v1836_v40  ;;  %v6537_v40 = vld [vmem:[#allocation22_spill] sm:$0xff] }
 0x359   : > { %v4321_v45 = vpop.eup %4320  ;;  %4340 = vpow2.f32 %v2022_v18  ;;  %v1998_v23 = vmul.f32 1.442695, %v1896_v53  ;;  %v2000_v30 = vmul.f32 1.442695, %v1897_v28  ;;  %2324 = vperm.xlu1 %4175, %v5633_v61   ;;  %v5746_v29 = vadd.f32 %v4319_v27, %v5736_v63  ;;  %v6538_v53 = vld [vmem:[#allocation23_spill] sm:$0xff] }
 0x35a   : > { %v4323_v60 = vpop.eup %4322  ;;  %4342 = vpow2.f32 %v2024_v20  ;;  %v2030_v8 = vmul.f32 1.442695, %v1912_v5  ;;  %v2032_v42 = vmul.f32 1.442695, %v1913_v36  ;;  %2409 = vperm.xlu0 %4174, %v5699_v26   ;;  %v1801_v43 = vpop.permute.xlu0 %1800  ;;  %v2513_v48 = vpack.c.bf16 %v4321_v45, %v4313_v38  ;;  %v6540_v5 = vld [vmem:[#allocation41_spill] sm:$0xff] }
 0x35b   : > { %v5749_v10 = vpop.eup %4324  ;;  %4344 = vpow2.f32 %v1998_v23  ;;  %v1898_v18 = vsub.f32 %v6537_v40, %v1801_v43  ;;  %v1899_v28 = vsub.f32 %v6538_v53, %v1801_v43  ;;  %v1846_v32 = vpop.permute.xlu1 %1845  ;;  %v2514_v51 = vpack.c.bf16 %v4323_v60, %v4315_v39  ;;  %v6542_v40 = vld [vmem:[#allocation27_spill] sm:$0xff] }
 0x35c   : > { %v5753_v37 = vpop.eup %4326  ;;  %4346 = vpow2.f32 %v2000_v30  ;;  %v1916_v20 = vsub.f32 %v6539_v44, %v1846_v32  ;;  %v1917_v36 = vsub.f32 %v6540_v5, %v1846_v32  ;;  %v5757_v17 = vadd.f32 %v4323_v60, %v4321_v45  ;;  %v6543_v32 = vld [vmem:[#allocation46_spill] sm:$0xff] }
 0x35d   : > { %v4329_v26 = vpop.eup %4328  ;;  %4348 = vpow2.f32 %v2030_v8  ;;  %v2002_v38 = vmul.f32 1.442695, %v1898_v18  ;;  %v2004_v6 = vmul.f32 1.442695, %v1899_v28  ;;  %2747 = vmatprep.mubr.bf16.mxu0 %v2514_v51  ;;  %2424 = vperm.xlu1 %4175, %v5712_v41   ;;  %v5762_v23 = vadd.f32 %v5753_v37, %v5749_v10  ;;  %v6541_v51 = vld [vmem:[#allocation26_spill] sm:$0xff] }
 0x35e   : > { %v4331_v39 = vpop.eup %4330  ;;  %4350 = vpow2.f32 %v2032_v42  ;;  %v2038_v30 = vmul.f32 1.442695, %v1916_v20  ;;  %v2040_v43 = vmul.f32 1.442695, %v1917_v36  ;;  %2748 = vmatmul.mubr.bf16.gmra.mrb[60].mxu0 %v2513_v48  ;;  %2319 = vperm.xlu0 %4174, %v5623_v56   ;;  %v1811_v44 = vpop.permute.xlu0 %1810  ;;  %v2515_v45 = vpack.c.bf16 %v4329_v26, %v5736_v63  ;;  %v6544_v42 = vld [vmem:[#allocation47_spill] sm:$0xff] }
 0x35f   : > { %v5766_v60 = vpop.eup %4332  ;;  %4352 = vpow2.f32 %v2002_v38  ;;  %v1902_v8 = vsub.f32 %v6541_v51, %v1811_v44  ;;  %v1903_v18 = vsub.f32 %v6542_v40, %v1811_v44  ;;  %v2516_v53 = vpack.c.bf16 %v4331_v39, %v4319_v27  ;;  %v6546_v44 = vld [vmem:[#allocation71_spill] sm:$0xff] }
 0x360   : > { %v5770_v28 = vpop.eup %4334  ;;  %v6545_v20 = vsub.f32 %v6543_v32, %v6544_v42  ;;  %4354 = vpow2.f32 %v2004_v6  ;;  %v5775_v48 = vadd.f32 %v4331_v39, %v4329_v26  ;;  %v6547_v51 = vsub.f32 %v6546_v44, %v5470_v35  ;;  %v6548_v39 = vld [vmem:[#allocation30_spill] sm:$0xff]  ;;  %v6550_v44 = vld [vmem:[#allocation49_spill] sm:$0xff] }
 0x361   : > { %v5777_v36 = vpop.eup %4336  ;;  %4356 = vpow2.f32 %v2038_v30  ;;  %v2010_v63 = vmul.f32 1.442695, %v1902_v8  ;;  %v2012_v41 = vmul.f32 1.442695, %v1903_v18  ;;  %2755 = vmatprep.mubr.bf16.mxu0 %v2516_v53  ;;  %2334 = vperm.xlu1 %4175, %v5644_v16   ;;  %v5782_v27 = vadd.f32 %v5770_v28, %v5766_v60  ;;  %v6549_v8 = vld [vmem:[#allocation31_spill] sm:$0xff] }
 0x362   : > { %v1652_v5 = vmul.f32 1.442695, %v6545_v20  ;;  %v4339_v38 = vpop.eup %4338  ;;  %v1686_v40 = vmul.f32 1.442695, %v6547_v51  ;;  %4358 = vpow2.f32 %v2040_v43  ;;  %2419 = vperm.xlu0 %4174, %v5706_v7   ;;  %v1821_v6 = vpop.permute.xlu0 %1820  ;;  %v6551_v51 = vld [vmem:[#allocation51_spill] sm:$0xff] }
 0x363   : > { %v5788_v26 = vpop.eup %4340  ;;  %4360 = vpow2.f32 %v2010_v63  ;;  %v1906_v30 = vsub.f32 %v6548_v39, %v1821_v6  ;;  %v1907_v18 = vsub.f32 %v6549_v8, %v1821_v6  ;;  %v5793_v53 = vadd.f32 %v4339_v38, %v5777_v36  ;;  %v6553_v8 = vld [vmem:[#allocation34_spill] sm:$0xff] }
 0x364   : > { %v5795_v32 = vpop.eup %4342  ;;  %4362 = vpow2.f32 %v2012_v41  ;;  %v6552_v6 = vsub.f32 %v6550_v44, %v6551_v51  ;;  %v6556_v51 = vld [vmem:[#allocation50_spill] sm:$0xff] }
 0x365   : > { %v4345_v42 = vpop.eup %4344  ;;  %4364 = vpow2.f32 %v1652_v5  ;;  %v2018_v35 = vmul.f32 1.442695, %v1906_v30  ;;  %v2020_v43 = vmul.f32 1.442695, %v1907_v18  ;;  %2434 = vperm.xlu1 %4175, %v5724_v62   ;;  %v5800_v20 = vadd.f32 %v5795_v32, %v5788_v26  ;;  %v6554_v62 = vld [vmem:[#allocation35_spill] sm:$0xff] }
 0x366   : > { %v4347_v63 = vpop.eup %4346  ;;  %v1656_v39 = vmul.f32 1.442695, %v6552_v6  ;;  %4366 = vpow2.f32 %v1686_v40  ;;  %2756 = vmatmul.mubr.bf16.gmra.mrb[64].mxu0 %v2515_v45  ;;  %2329 = vperm.xlu0 %4174, %v5639_v1   ;;  %v1831_v41 = vpop.permute.xlu0 %1830  ;;  %v2517_v5 = vpack.c.bf16 %v4345_v42, %v5777_v36  ;;  %v6555_v45 = vld [vmem:[#allocation48_spill] sm:$0xff] }
 0x367   : > { %v5807_v30 = vpop.eup %4348  ;;  %4368 = vpow2.f32 %v2018_v35  ;;  %v1910_v18 = vsub.f32 %v6553_v8, %v1831_v41  ;;  %v1911_v7 = vsub.f32 %v6554_v62, %v1831_v41  ;;  %v2518_v14 = vpack.c.bf16 %v4347_v63, %v4339_v38  ;;  %v6558_v38 = vld [vmem:[#allocation75_spill] sm:$0xff] }
 0x368   : > { %v5811_v16 = vpop.eup %4350  ;;  %4370 = vpow2.f32 %v2020_v43  ;;  %v5813_v44 = vadd.f32 %v4347_v63, %v4345_v42  ;;  %v6557_v6 = vsub.f32 %v6555_v45, %v6556_v51  ;;  %v6559_v43 = vld [vmem:[#allocation76_spill] sm:$0xff]  ;;  %v6562_v45 = vld [vmem:[#allocation39_spill] sm:$0xff] }
 0x369   : > { %v4353_v40 = vpop.eup %4352  ;;  %v2026_v61 = vmul.f32 1.442695, %v1910_v18  ;;  %v2028_v36 = vmul.f32 1.442695, %v1911_v7  ;;  %2763 = vmatprep.mubr.bf16.mxu0 %v2518_v14  ;;  %2344 = vperm.xlu1 %4175, %v5658_v31   ;;  %v5821_v35 = vadd.f32 %v5811_v16, %v5807_v30  ;;  %4372 = vpow2.f32 %v1656_v39  ;;  %v6561_v14 = vld [vmem:[#allocation38_spill] sm:$0xff] }
 0x36a   : > { %v1654_v1 = vmul.f32 1.442695, %v6557_v6  ;;  %v4355_v62 = vpop.eup %4354  ;;  %v6560_v42 = vsub.f32 %v6558_v38, %v6559_v43  ;;  %2429 = vperm.xlu0 %4174, %v5718_v33   ;;  %v1841_v41 = vpop.permute.xlu0 %1840  ;;  %v2519_v8 = vpack.c.bf16 %v5749_v10, %v4353_v40 }
 0x36b   : > { %v4357_v18 = vpop.eup %4356  ;;  %4374 = vpow2.f32 %v2026_v61  ;;  %v1914_v7 = vsub.f32 %v6561_v14, %v1841_v41  ;;  %v1915_v51 = vsub.f32 %v6562_v45, %v1841_v41  ;;  %v2520_v6 = vpack.c.bf16 %v5753_v37, %v4355_v62 }
 0x36c   : > { %v1692_v63 = vmul.f32 1.442695, %v6560_v42  ;;  %v4359_v31 = vpop.eup %4358  ;;  %4376 = vpow2.f32 %v2028_v36  ;;  %v5831_v39 = vadd.f32 %v4355_v62, %v4353_v40  ;;  %v6563_v36 = vld [vmem:[#allocation74_spill] sm:$0xff] }
 0x36d   : > { %v4361_v56 = vpop.eup %4360  ;;  %4378 = vpow2.f32 %v1654_v1  ;;  %v2034_v38 = vmul.f32 1.442695, %v1914_v7  ;;  %v2036_v43 = vmul.f32 1.442695, %v1915_v51  ;;  %2444 = vperm.xlu1 %4175, %v5728_v3   ;;  %v5834_v42 = vadd.f32 %v4359_v31, %v4357_v18 }
 0x36e   : > { %v4363_v10 = vpop.eup %4362  ;;  %4380 = vpow2.f32 %v1692_v63  ;;  %2764 = vmatmul.mubr.bf16.gmra.mrb[68].mxu0 %v2517_v5  ;;  %2339 = vperm.xlu0 %4174, %v5653_v57   ;;  %v2521_v61 = vpack.c.bf16 %v5766_v60, %v4361_v56  ;;  %v6564_v40 = vsub.f32 %v6563_v36, %v5492_v34 }
 0x36f   : > { %v5838_v37 = vpop.eup %4364  ;;  %4382 = vpow2.f32 %v2034_v38  ;;  %2771 = vmatprep.mubr.bf16.mxu0 %v2520_v6  ;;  %v2522_v1 = vpack.c.bf16 %v5770_v28, %v4363_v10  ;;  %v5844_v41 = vadd.f32 %v4363_v10, %v4361_v56 }
 0x370   : > { %v1690_v62 = vmul.f32 1.442695, %v6564_v40  ;;  %v5846_v14 = vpop.eup %4366  ;;  %4384 = vpow2.f32 %v2036_v43 }
 0x371   : > { %v4369_v5 = vpop.eup %4368  ;;  %2354 = vperm.xlu1 %4175, %v5838_v37  }
 0x372   : > { %v4371_v63 = vpop.eup %4370  ;;  %2439 = vperm.xlu0 %4174, %v5846_v14   ;;  %v2523_v60 = vpack.c.bf16 %v5788_v26, %v4369_v5  ;;  %4386 = vpow2.f32 %v1690_v62 }
 0x373   : > { %v2524_v34 = vpack.c.bf16 %v5795_v32, %v4371_v63  ;;  %v5852_v7 = vadd.f32 %v4371_v63, %v4369_v5  ;;  %v5854_v45 = vpop.eup %4372 }
 0x375   : > { %v4375_v56 = vpop.eup %4374  ;;  %2364 = vperm.xlu1 %4175, %v5854_v45  }
 0x376   : > { %v4377_v28 = vpop.eup %4376  ;;  %2772 = vmatmul.mubr.bf16.gmra.mrb[72].mxu0 %v2519_v8  ;;  %2349 = vperm.xlu0 %4174, %v5663_v0   ;;  %v2525_v51 = vpack.c.bf16 %v5807_v30, %v4375_v56 }
 0x377   : > { %v5859_v6 = vpop.eup %4378  ;;  %2779 = vmatprep.mubr.bf16.mxu0 %v2522_v1  ;;  %v2526_v26 = vpack.c.bf16 %v5811_v16, %v4377_v28  ;;  %v5862_v38 = vadd.f32 %v4377_v28, %v4375_v56  ;;  %v6568_v16 = vld [vmem:[#allocation43_spill] sm:$0xff] }
 0x378   : > { %v5864_v32 = vpop.eup %4380 }
 0x379   : > { %v4383_v43 = vpop.eup %4382  ;;  %2454 = vperm.xlu1 %4175, %v5864_v32  }
 0x37a   : > { %v4385_v10 = vpop.eup %4384  ;;  %2359 = vperm.xlu0 %4174, %v5859_v6   ;;  %v2527_v8 = vpack.c.bf16 %v4357_v18, %v4383_v43 }
 0x37b   : > { %v2528_v36 = vpack.c.bf16 %v4359_v31, %v4385_v10  ;;  %v5868_v40 = vadd.f32 %v4385_v10, %v4383_v43 }
 0x37c   : > { %v5870_v30 = vpop.eup %4386 }
 0x37e   : > { %2780 = vmatmul.mubr.bf16.gmra.mrb[76].mxu0 %v2521_v61  ;;  %2449 = vperm.xlu0 %4174, %v5870_v30  }
 0x37f   : > { %2787 = vmatprep.mubr.bf16.mxu0 %v2524_v34  ;;  %v2275_v34 = vld [vmem:[#allocation5] sm:$0xff] }
 0x386   : > { %2788 = vmatmul.mubr.bf16.gmra.mrb[80].mxu0 %v2523_v60 }
 0x387   : > { %2795 = vmatprep.mubr.bf16.mxu0 %v2526_v26 }
 0x38e   : > { %2796 = vmatmul.mubr.bf16.gmra.mrb[84].mxu0 %v2525_v51 }
 0x38f   : > { %2803 = vmatprep.mubr.bf16.mxu0 %v2528_v36 }
 0x396   : > { %2804 = vmatmul.mubr.bf16.gmra.mrb[88].mxu0 %v2527_v8 }
 0x39d   : > { %2118 = vadd.xlane.f32.xlu0 %v5527_v50  ;;  %2115 = vadd.xlane.f32.xlu1 %v5523_v25  ;;  %v6565_v50 = vld [vmem:[#allocation44_spill] sm:$0xff] }
 0x3a1   : > { %2124 = vadd.xlane.f32.xlu0 %v5535_v58  ;;  %2121 = vadd.xlane.f32.xlu1 %v5531_v54  ;;  %v6566_v58 = vld [vmem:[#allocation45_spill] sm:$0xff] }
 0x3a5   : > { %2130 = vadd.xlane.f32.xlu0 %v5543_v55  ;;  %2127 = vadd.xlane.f32.xlu1 %v5539_v52 }
 0x3a9   : > { %2136 = vadd.xlane.f32.xlu0 %v5551_v9  ;;  %2133 = vadd.xlane.f32.xlu1 %v5547_v4 }
 0x3ad   : > { %2142 = vadd.xlane.f32.xlu0 %v5555_v46  ;;  %2139 = vadd.xlane.f32.xlu1 %v5553_v59 }
 0x3b1   : > { %2148 = vadd.xlane.f32.xlu0 %v5559_v49  ;;  %2145 = vadd.xlane.f32.xlu1 %v5557_v12  ;;  %v6567_v49 = vld [vmem:[#allocation42_spill] sm:$0xff] }
 0x3b5   : > { %2151 = vadd.xlane.f32.xlu0 %v5716_v19  ;;  %2154 = vadd.xlane.f32.xlu1 %v5732_v21 }
 0x3b8   : > { %v1856_v25 = vpop.permute.xlu1 %1855 }
 0x3b9   : > { %v1920_v54 = vsub.f32 %v6565_v50, %v1856_v25  ;;  %v1921_v52 = vsub.f32 %v6566_v58, %v1856_v25  ;;  %2163 = vadd.xlane.f32.xlu1 %v5746_v29  ;;  %2157 = vadd.xlane.f32.xlu0 %v5740_v24 }
 0x3bb   : > { %v2046_v55 = vmul.f32 1.442695, %v1920_v54  ;;  %v2048_v4 = vmul.f32 1.442695, %v1921_v52  ;;  %v2278_v54 = vld [vmem:[#allocation5 + $0x18] sm:$0xff] }
 0x3bc   : > { %v5891_v9 = vpop.permute.xlu1 %2369 }
 0x3bd   : > { %4388 = vpow2.f32 %v2046_v55  ;;  %2160 = vadd.xlane.f32.xlu0 %v5757_v17  ;;  %2169 = vadd.xlane.f32.xlu1 %v5793_v53 }
 0x3be   : > { %4390 = vpow2.f32 %v2048_v4 }
 0x3c0   : > { %v5895_v59 = vpop.permute.xlu1 %2379 }
 0x3c1   : > { %2166 = vadd.xlane.f32.xlu0 %v5775_v48  ;;  %2175 = vadd.xlane.f32.xlu1 %v5831_v39 }
 0x3c4   : > { %v5899_v46 = vpop.permute.xlu1 %2384 }
 0x3c5   : > { %2172 = vadd.xlane.f32.xlu0 %v5813_v44  ;;  %2181 = vadd.xlane.f32.xlu1 %v5844_v41  ;;  %v1851_v12 = vpop.permute.xlu0 %1850  ;;  %v2276_v41 = vld [vmem:[#allocation5 + $0x8] sm:$0xff] }
 0x3c6   : > { %v1918_v21 = vsub.f32 %v6567_v49, %v1851_v12  ;;  %v1919_v31 = vsub.f32 %v6568_v16, %v1851_v12  ;;  %v2277_v49 = vld [vmem:[#allocation5 + $0x10] sm:$0xff] }
 0x3c7   : > { %v4389_v17 = vpop.eup %4388 }
 0x3c8   : > { %v4391_v19 = vpop.eup %4390  ;;  %v2042_v24 = vmul.f32 1.442695, %v1918_v21  ;;  %v2044_v29 = vmul.f32 1.442695, %v1919_v31  ;;  %v5905_v53 = vpop.permute.xlu1 %2394 }
 0x3c9   : > { %2178 = vadd.xlane.f32.xlu0 %v5762_v23  ;;  %2187 = vadd.xlane.f32.xlu1 %v5852_v7  ;;  %v5909_v48 = vpop.permute.xlu0 %2374  ;;  %v2207_v44 = vadd.f32 %v4391_v19, %v4389_v17 }
 0x3ca   : > { %4392 = vpow2.f32 %v2042_v24 }
 0x3cb   : > { %4394 = vpow2.f32 %v2044_v29 }
 0x3cc   : > { %v5911_v18 = vpop.permute.xlu1 %2404 }
 0x3cd   : > { %2184 = vadd.xlane.f32.xlu0 %v5782_v27  ;;  %2193 = vadd.xlane.f32.xlu1 %v5862_v38  ;;  %v5915_v39 = vpop.permute.xlu0 %2389 }
 0x3d0   : > { %v3953_v61 = vpop.f32.mrb[32].mxu0  ;;  %v2315_v62 = vpop.permute.xlu1 %2314 }
 0x3d1   : > { %v3954_v1 = vpop.f32.mrb[33].mxu0  ;;  %2190 = vadd.xlane.f32.xlu0 %v5800_v20  ;;  %2199 = vadd.xlane.f32.xlu1 %v5868_v40  ;;  %v5919_v23 = vpop.permute.xlu0 %2399  ;;  %v2468_v27 = vmul.f32 %v2315_v62, %v2276_v41 }
 0x3d2   : > { %v3955_v5 = vadd.f32 %v3954_v1, %v3953_v61  ;;  %v3956_v63 = vpop.f32.mrb[34].mxu0  ;;  %v2280_v61 = vld [vmem:[#allocation5 + $0x28] sm:$0xff] }
 0x3d3   : > { %v3957_v60 = vpop.f32.mrb[35].mxu0 }
 0x3d4   : > { %v4393_v7 = vpop.eup %4392  ;;  %v3958_v56 = vadd.f32 %v3957_v60, %v3956_v63  ;;  %v5921_v28 = vpop.permute.xlu1 %2414  ;;  %v2279_v63 = vld [vmem:[#allocation5 + $0x20] sm:$0xff] }
 0x3d5   : > { %v4395_v51 = vpop.eup %4394  ;;  %2196 = vadd.xlane.f32.xlu0 %v5821_v35  ;;  %v2310_v26 = vpop.permute.xlu0 %2309  ;;  %v2529_v38 = vpack.c.bf16 %v4389_v17, %v4393_v7  ;;  %v6569_v35 = vsub.f32 %v5591_v22, %v5603_v2 }
 0x3d6   : > { %v2821_v43 = vadd.f32 %v3958_v56, %v2468_v27  ;;  %v2467_v20 = vmul.f32 %v2310_v26, %v2275_v34  ;;  %v2530_v10 = vpack.c.bf16 %v4391_v19, %v4395_v51  ;;  %v2204_v8 = vadd.f32 %v4395_v51, %v4393_v7 }
 0x3d7   : > { %v1696_v52 = vmul.f32 1.442695, %v6569_v35 }
 0x3d8   : > { %2853 = vst.msk [vmem:[#allocation5 + $0x8] sm:$0xff] %vm681_vm1, %v2821_v43  ;;  %v2820_v36 = vadd.f32 %v3955_v5, %v2467_v20  ;;  %v3959_v40 = vpop.f32.mrb[36].mxu0  ;;  %2811 = vmatprep.mubr.bf16.mxu0 %v2530_v10  ;;  %2205 = vadd.xlane.f32.xlu1 %v2204_v8  ;;  %v2325_v25 = vpop.permute.xlu1 %2324 }
 0x3d9   : > { %v3960_v50 = vpop.f32.mrb[37].mxu0  ;;  %2812 = vmatmul.mubr.bf16.gmra.mrb[92].mxu0 %v2529_v38  ;;  %2202 = vadd.xlane.f32.xlu0 %v5834_v42  ;;  %v5926_v58 = vpop.permute.xlu0 %2409  ;;  %v2470_v21 = vmul.f32 %v2325_v25, %v2278_v54  ;;  %4396 = vpow2.f32 %v1696_v52 }
 0x3da   : > { %2852 = vst.msk [vmem:[#allocation5] sm:$0xff] %vm681_vm1, %v2820_v36  ;;  %v3961_v55 = vadd.f32 %v3960_v50, %v3959_v40  ;;  %v3962_v4 = vpop.f32.mrb[38].mxu0  ;;  %v2282_v36 = vld [vmem:[#allocation5 + $0x38] sm:$0xff]  ;;  %v2281_v50 = vld [vmem:[#allocation5 + $0x30] sm:$0xff] }
 0x3db   : > { %v3963_v12 = vpop.f32.mrb[39].mxu0 }
 0x3dc   : > { %v3964_v16 = vadd.f32 %v3963_v12, %v3962_v4  ;;  %v5932_v31 = vpop.permute.xlu1 %2424 }
 0x3dd   : > { %2208 = vadd.xlane.f32.xlu0 %v2207_v44  ;;  %v2320_v17 = vpop.permute.xlu0 %2319  ;;  %v6570_v44 = vsub.f32 %v5656_v15, %v5670_v13 }
 0x3de   : > { %v2823_v42 = vadd.f32 %v3964_v16, %v2470_v21  ;;  %v2469_v19 = vmul.f32 %v2320_v17, %v2277_v49  ;;  %v3223_v49 = vld [vmem:[%s6285_s8] sm:$0x3] }
 0x3df   : > { %v1694_v60 = vmul.f32 1.442695, %v6570_v44  ;;  %4146 = vmatprep.subr.msk.bf16.mxu1 %vm730_vm0, %v3223_v49  ;;  %v3281_v21 = vsel %vm730_vm0, %v3223_v49, 0  ;;  %4145 = vmatprep.subr.msk.bf16.mxu0 %vm730_vm0, %v3223_v49  ;;  %v2051_v49 = vld [vmem:[#allocation4 + $0x8] sm:$0xff] }
 0x3e0   : > { %2855 = vst.msk [vmem:[#allocation5 + $0x18] sm:$0xff] %vm681_vm1, %v2823_v42  ;;  %v2822_v24 = vadd.f32 %v3961_v55, %v2469_v19  ;;  %v3965_v22 = vpop.f32.mrb[40].mxu0  ;;  %v2335_v2 = vpop.permute.xlu1 %2334  ;;  %4135 = vmatpush3.bf16.msra.mxu1 %v3281_v21  ;;  %4101 = vmatpush3.bf16.msra.mxu0 %v3281_v21  ;;  %v2287_v21 = vld [vmem:[#allocation5 + $0x60] sm:$0xff] }
 0x3e1   : > { %v3966_v29 = vpop.f32.mrb[41].mxu0  ;;  %v5935_v62 = vpop.permute.xlu0 %2419  ;;  %v2472_v34 = vmul.f32 %v2335_v2, %v2280_v61  ;;  %4398 = vpow2.f32 %v1694_v60 }
 0x3e2   : > { %2854 = vst.msk [vmem:[#allocation5 + $0x10] sm:$0xff] %vm681_vm1, %v2822_v24  ;;  %v3967_v1 = vadd.f32 %v3966_v29, %v3965_v22  ;;  %v3968_v41 = vpop.f32.mrb[42].mxu0  ;;  %v2284_v24 = vld [vmem:[#allocation5 + $0x48] sm:$0xff] }
 0x3e3   : > { %v3969_v5 = vpop.f32.mrb[43].mxu0  ;;  %v5943_v38 = vpop.eup %4396 }
 0x3e4   : > { %v3970_v7 = vadd.f32 %v3969_v5, %v3968_v41  ;;  %v5941_v27 = vpop.permute.xlu1 %2434  ;;  %v2283_v41 = vld [vmem:[#allocation5 + $0x40] sm:$0xff] }
 0x3e5   : > { %v2330_v56 = vpop.permute.xlu0 %2329 }
 0x3e6   : > { %v2825_v51 = vadd.f32 %v3970_v7, %v2472_v34  ;;  %v2471_v26 = vmul.f32 %v2330_v56, %v2279_v63  ;;  %v2285_v7 = vld [vmem:[#allocation5 + $0x50] sm:$0xff] }
 0x3e8   : > { %2857 = vst.msk [vmem:[#allocation5 + $0x28] sm:$0xff] %vm681_vm1, %v2825_v51  ;;  %v2824_v43 = vadd.f32 %v3967_v1, %v2471_v26  ;;  %v3971_v20 = vpop.f32.mrb[44].mxu0  ;;  %v2345_v10 = vpop.permute.xlu1 %2344 }
 0x3e9   : > { %v3972_v8 = vpop.f32.mrb[45].mxu0  ;;  %2464 = vperm.xlu1 %4175, %v5943_v38   ;;  %v5947_v15 = vpop.permute.xlu0 %2429  ;;  %v2474_v54 = vmul.f32 %v2345_v10, %v2282_v36 }
 0x3ea   : > { %2856 = vst.msk [vmem:[#allocation5 + $0x20] sm:$0xff] %vm681_vm1, %v2824_v43  ;;  %v3973_v13 = vadd.f32 %v3972_v8, %v3971_v20  ;;  %v3974_v40 = vpop.f32.mrb[46].mxu0  ;;  %v2286_v43 = vld [vmem:[#allocation5 + $0x58] sm:$0xff] }
 0x3eb   : > { %v3975_v25 = vpop.f32.mrb[47].mxu0  ;;  %v5961_v2 = vpop.eup %4398 }
 0x3ec   : > { %v3976_v35 = vadd.f32 %v3975_v25, %v3974_v40  ;;  %v5950_v52 = vpop.permute.xlu1 %2444 }
 0x3ed   : > { %v2340_v55 = vpop.permute.xlu0 %2339 }
 0x3ee   : > { %v2827_v4 = vadd.f32 %v3976_v35, %v2474_v54  ;;  %v2473_v12 = vmul.f32 %v2340_v55, %v2281_v50 }
 0x3f0   : > { %2859 = vst.msk [vmem:[#allocation5 + $0x38] sm:$0xff] %vm681_vm1, %v2827_v4  ;;  %v2826_v16 = vadd.f32 %v3973_v13, %v2473_v12  ;;  %v3977_v17 = vpop.f32.mrb[48].mxu0  ;;  %v2355_v42 = vpop.permute.xlu1 %2354  ;;  %v2050_v4 = vld [vmem:[#allocation4] sm:$0xff] }
 0x3f1   : > { %v3978_v19 = vpop.f32.mrb[49].mxu0  ;;  %v5959_v22 = vpop.permute.xlu0 %2439  ;;  %v2476_v5 = vmul.f32 %v2355_v42, %v2284_v24  ;;  %v2288_v42 = vld [vmem:[#allocation5 + $0x68] sm:$0xff] }
 0x3f2   : > { %2858 = vst.msk [vmem:[#allocation5 + $0x30] sm:$0xff] %vm681_vm1, %v2826_v16  ;;  %v3979_v29 = vadd.f32 %v3978_v19, %v3977_v17  ;;  %v3980_v61 = vpop.f32.mrb[50].mxu0  ;;  %v2082_v17 = vmul.f32 %v5608_v47, %v2050_v4  ;;  %v2056_v4 = vld [vmem:[#allocation4 + $0x30] sm:$0xff] }
 0x3f3   : > { %v3981_v1 = vpop.f32.mrb[51].mxu0  ;;  %2459 = vperm.xlu0 %4174, %v5961_v2  }
 0x3f4   : > { %v3982_v63 = vadd.f32 %v3981_v1, %v3980_v61  ;;  %v2365_v56 = vpop.permute.xlu1 %2364  ;;  %v2052_v61 = vld [vmem:[#allocation4 + $0x10] sm:$0xff]  ;;  %v2479_v1 = vmul.f32 %v5891_v9, %v2287_v21 }
 0x3f5   : > { %v2350_v44 = vpop.permute.xlu0 %2349  ;;  %v2478_v25 = vmul.f32 %v2365_v56, %v2286_v43  ;;  %v2480_v56 = vmul.f32 %v5909_v48, %v2288_v42 }
 0x3f6   : > { %v2829_v60 = vadd.f32 %v3982_v63, %v2476_v5  ;;  %v2475_v34 = vmul.f32 %v2350_v44, %v2283_v41 }
 0x3f8   : > { %2861 = vst.msk [vmem:[#allocation5 + $0x48] sm:$0xff] %vm681_vm1, %v2829_v60  ;;  %v2828_v51 = vadd.f32 %v3979_v29, %v2475_v34  ;;  %v3983_v26 = vpop.f32.mrb[52].mxu0  ;;  %v5969_v55 = vpop.permute.xlu1 %2454  ;;  %v2083_v29 = vmul.f32 %v5618_v11, %v2051_v49  ;;  %v2053_v60 = vld [vmem:[#allocation4 + $0x18] sm:$0xff] }
 0x3f9   : > { %v3984_v20 = vpop.f32.mrb[53].mxu0  ;;  %v2360_v10 = vpop.permute.xlu0 %2359  ;;  %v2290_v49 = vld [vmem:[#allocation5 + $0x78] sm:$0xff] }
 0x3fa   : > { %2860 = vst.msk [vmem:[#allocation5 + $0x40] sm:$0xff] %vm681_vm1, %v2828_v51  ;;  %v3985_v8 = vadd.f32 %v3984_v20, %v3983_v26  ;;  %v3986_v36 = vpop.f32.mrb[54].mxu0  ;;  %v2477_v13 = vmul.f32 %v2360_v10, %v2285_v7  ;;  %v6571_v26 = vld [vmem:[#allocation54_spill] sm:$0xff]  ;;  %v6572_v20 = vld [vmem:[#allocation53_spill] sm:$0xff] }
 0x3fb   : > { %v3987_v40 = vpop.f32.mrb[55].mxu0  ;;  %v2084_v43 = vmul.f32 %v6571_v26, %v2052_v61  ;;  %v2085_v9 = vmul.f32 %v6572_v20, %v2053_v60  ;;  %v2054_v10 = vld [vmem:[#allocation4 + $0x20] sm:$0xff]  ;;  %v2088_v60 = vmul.f32 %v5653_v57, %v2056_v4 }
 0x3fc   : > { %v2830_v50 = vadd.f32 %v3985_v8, %v2477_v13  ;;  %v3988_v54 = vadd.f32 %v3987_v40, %v3986_v36  ;;  %v2055_v40 = vld [vmem:[#allocation4 + $0x28] sm:$0xff] }
 0x3fd   : > { %v5971_v12 = vpop.permute.xlu0 %2449 }
 0x3fe   : > { %2862 = vst.msk [vmem:[#allocation5 + $0x50] sm:$0xff] %vm681_vm1, %v2830_v50  ;;  %v2831_v35 = vadd.f32 %v3988_v54, %v2478_v25  ;;  %v2289_v25 = vld [vmem:[#allocation5 + $0x70] sm:$0xff]  ;;  %v6573_v54 = vld [vmem:[#allocation55_spill] sm:$0xff] }
 0x400   : > { %2863 = vst.msk [vmem:[#allocation5 + $0x58] sm:$0xff] %vm681_vm1, %v2831_v35  ;;  %v2086_v35 = vmul.f32 %v6573_v54, %v2054_v10 }
 0x429   : > { %v3989_v16 = vpop.f32.mrb[56].mxu0 }
 0x42a   : > { %v3990_v19 = vpop.f32.mrb[57].mxu0  ;;  %v2116_v24 = vpop.xlane.xlu1 %2115 }
 0x42b   : > { %v3991_v41 = vadd.f32 %v3990_v19, %v3989_v16  ;;  %v2210_v5 = vadd.f32 %v2116_v24, %v2082_v17  ;;  %v3992_v63 = vpop.f32.mrb[58].mxu0  ;;  %v2119_v44 = vpop.xlane.xlu0 %2118  ;;  %v6574_v17 = vld [vmem:[#allocation57_spill] sm:$0xff]  ;;  %v2481_v19 = vmul.f32 %v5895_v59, %v2289_v25  ;;  %v2060_v25 = vld [vmem:[#allocation4 + $0x50] sm:$0xff] }
 0x42c   : > { %v2211_v34 = vadd.f32 %v2119_v44, %v2083_v29  ;;  %v3993_v7 = vpop.f32.mrb[59].mxu0  ;;  %v2087_v42 = vmul.f32 %v6574_v17, %v2055_v40 }
 0x42d   : > { %v2832_v51 = vadd.f32 %v3991_v41, %v2479_v1  ;;  %2243 = vst.msk [vmem:[#allocation4] sm:$0xff] %vm927_vm2, %v2210_v5  ;;  %v3994_v47 = vadd.f32 %v3993_v7, %v3992_v63  ;;  %v2057_v41 = vld [vmem:[#allocation4 + $0x38] sm:$0xff] }
 0x42e   : > { %2244 = vst.msk [vmem:[#allocation4 + $0x8] sm:$0xff] %vm927_vm2, %v2211_v34  ;;  %v2122_v11 = vpop.xlane.xlu1 %2121  ;;  %v2482_v34 = vmul.f32 %v5899_v46, %v2290_v49  ;;  %v2291_v46 = vld [vmem:[#allocation5 + $0x80] sm:$0xff] }
 0x42f   : > { %2864 = vst.msk [vmem:[#allocation5 + $0x60] sm:$0xff] %vm681_vm1, %v2832_v51  ;;  %v2833_v8 = vadd.f32 %v3994_v47, %v2480_v56  ;;  %v2212_v36 = vadd.f32 %v2122_v11, %v2084_v43  ;;  %v2125_v13 = vpop.xlane.xlu0 %2124  ;;  %v6575_v47 = vld [vmem:[#allocation58_spill] sm:$0xff]  ;;  %v2483_v4 = vmul.f32 %v5915_v39, %v2291_v46  ;;  %v6577_v46 = vld [vmem:[#allocation52_spill] sm:$0xff] }
 0x430   : > { %v2213_v48 = vadd.f32 %v2125_v13, %v2085_v9  ;;  %v2089_v26 = vmul.f32 %v6575_v47, %v2057_v41  ;;  %v2058_v43 = vld [vmem:[#allocation4 + $0x40] sm:$0xff]  ;;  %v2059_v9 = vld [vmem:[#allocation4 + $0x48] sm:$0xff] }
 0x431   : > { %2865 = vst.msk [vmem:[#allocation5 + $0x68] sm:$0xff] %vm681_vm1, %v2833_v8  ;;  %v3995_v50 = vpop.f32.mrb[60].mxu0  ;;  %v2090_v40 = vmul.f32 %v5663_v0, %v2058_v43  ;;  %v2092_v0 = vmul.f32 %v5859_v6, %v2060_v25 }
 0x432   : > { %2245 = vst.msk [vmem:[#allocation4 + $0x10] sm:$0xff] %vm927_vm2, %v2212_v36  ;;  %2246 = vst.msk [vmem:[#allocation4 + $0x18] sm:$0xff] %vm927_vm2, %v2213_v48  ;;  %v3996_v21 = vpop.f32.mrb[61].mxu0  ;;  %v2128_v16 = vpop.xlane.xlu1 %2127  ;;  %v2292_v48 = vld [vmem:[#allocation5 + $0x88] sm:$0xff] }
 0x433   : > { %v3997_v24 = vadd.f32 %v3996_v21, %v3995_v50  ;;  %v2214_v29 = vadd.f32 %v2128_v16, %v2086_v35  ;;  %v3998_v61 = vpop.f32.mrb[62].mxu0  ;;  %v2131_v1 = vpop.xlane.xlu0 %2130  ;;  %v2091_v35 = vmul.f32 %v5838_v37, %v2059_v9 }
 0x434   : > { %v2951_v5 = vld [vmem:[#allocation4] sm:$0xff]  ;;  %v2215_v63 = vadd.f32 %v2131_v1, %v2087_v42  ;;  %v3999_v44 = vpop.f32.mrb[63].mxu0  ;;  %v2061_v42 = vld [vmem:[#allocation4 + $0x58] sm:$0xff] }
 0x435   : > { %4400 = vrcp.f32 %v2951_v5  ;;  %v2952_v7 = vld [vmem:[#allocation4 + $0x8] sm:$0xff]  ;;  %v2834_v56 = vadd.f32 %v3997_v24, %v2481_v19  ;;  %2247 = vst.msk [vmem:[#allocation4 + $0x20] sm:$0xff] %vm927_vm2, %v2214_v29  ;;  %v4000_v51 = vadd.f32 %v3999_v44, %v3998_v61  ;;  %v2484_v61 = vmul.f32 %v5905_v53, %v2292_v48  ;;  %v2062_v53 = vld [vmem:[#allocation4 + $0x60] sm:$0xff] }
 0x436   : > { %4402 = vrcp.f32 %v2952_v7  ;;  %2248 = vst.msk [vmem:[#allocation4 + $0x28] sm:$0xff] %vm927_vm2, %v2215_v63  ;;  %v2134_v59 = vpop.xlane.xlu1 %2133  ;;  %v2093_v5 = vmul.f32 %v5854_v45, %v2061_v42  ;;  %v2063_v63 = vld [vmem:[#allocation4 + $0x68] sm:$0xff] }
 0x437   : > { %2866 = vst.msk [vmem:[#allocation5 + $0x70] sm:$0xff] %vm681_vm1, %v2834_v56  ;;  %v2835_v11 = vadd.f32 %v4000_v51, %v2482_v34  ;;  %v2216_v20 = vadd.f32 %v2134_v59, %v2088_v60  ;;  %v2137_v57 = vpop.xlane.xlu0 %2136  ;;  %v2293_v56 = vld [vmem:[#allocation5 + $0x90] sm:$0xff] }
 0x438   : > { %v2217_v8 = vadd.f32 %v2137_v57, %v2089_v26  ;;  %v6576_v26 = vld [vmem:[#allocation60_spill] sm:$0xff] }
 0x439   : > { %v2953_v10 = vld [vmem:[#allocation4 + $0x10] sm:$0xff]  ;;  %v2954_v36 = vld [vmem:[#allocation4 + $0x18] sm:$0xff]  ;;  %2867 = vst.msk [vmem:[#allocation5 + $0x78] sm:$0xff] %vm681_vm1, %v2835_v11  ;;  %v4001_v13 = vpop.f32.mrb[64].mxu0  ;;  %v2095_v43 = vmul.f32 %v6576_v26, %v2063_v63  ;;  %v2066_v11 = vld [vmem:[#allocation4 + $0x80] sm:$0xff] }
 0x43a   : > { %4404 = vrcp.f32 %v2953_v10  ;;  %2249 = vst.msk [vmem:[#allocation4 + $0x30] sm:$0xff] %vm927_vm2, %v2216_v20  ;;  %2250 = vst.msk [vmem:[#allocation4 + $0x38] sm:$0xff] %vm927_vm2, %v2217_v8  ;;  %v4002_v50 = vpop.f32.mrb[65].mxu0  ;;  %v2140_v54 = vpop.xlane.xlu1 %2139  ;;  %v2294_v20 = vld [vmem:[#allocation5 + $0x98] sm:$0xff]  ;;  %v2094_v10 = vmul.f32 %v6577_v46, %v2062_v53  ;;  %v2295_v63 = vld [vmem:[#allocation5 + $0xa0] sm:$0xff] }
 0x43b   : > { %4406 = vrcp.f32 %v2954_v36  ;;  %v4003_v49 = vadd.f32 %v4002_v50, %v4001_v13  ;;  %v2218_v21 = vadd.f32 %v2140_v54, %v2090_v40  ;;  %v4004_v16 = vpop.f32.mrb[66].mxu0  ;;  %v2143_v17 = vpop.xlane.xlu0 %2142  ;;  %v2485_v36 = vmul.f32 %v5919_v23, %v2293_v56  ;;  %v2064_v50 = vld [vmem:[#allocation4 + $0x70] sm:$0xff]  ;;  %v6580_v53 = vld [vmem:[#allocation63_spill] sm:$0xff]  ;;  %v2070_v56 = vld [vmem:[#allocation4 + $0xa0] sm:$0xff] }
 0x43c   : > { %v2955_v19 = vld [vmem:[#allocation4 + $0x20] sm:$0xff]  ;;  %v2219_v24 = vadd.f32 %v2143_v17, %v2091_v35  ;;  %v4005_v29 = vpop.f32.mrb[67].mxu0  ;;  %v2486_v17 = vmul.f32 %v5911_v18, %v2294_v20 }
 0x43d   : > { %4408 = vrcp.f32 %v2955_v19  ;;  %v2956_v1 = vld [vmem:[#allocation4 + $0x28] sm:$0xff]  ;;  %v2836_v41 = vadd.f32 %v4003_v49, %v2483_v4  ;;  %2251 = vst.msk [vmem:[#allocation4 + $0x40] sm:$0xff] %vm927_vm2, %v2218_v21  ;;  %v4006_v37 = vadd.f32 %v4005_v29, %v4004_v16  ;;  %v6578_v21 = vld [vmem:[#allocation61_spill] sm:$0xff]  ;;  %v6579_v29 = vld [vmem:[#allocation56_spill] sm:$0xff] }
 0x43e   : > { %4410 = vrcp.f32 %v2956_v1  ;;  %2252 = vst.msk [vmem:[#allocation4 + $0x48] sm:$0xff] %vm927_vm2, %v2219_v24  ;;  %v2146_v39 = vpop.xlane.xlu1 %2145  ;;  %v2098_v16 = vmul.f32 %v6578_v21, %v2066_v11  ;;  %v2487_v11 = vmul.f32 %v5926_v58, %v2295_v63 }
 0x43f   : > { %v4401_v44 = vpop.eup %4400  ;;  %2868 = vst.msk [vmem:[#allocation5 + $0x80] sm:$0xff] %vm681_vm1, %v2836_v41  ;;  %v2837_v60 = vadd.f32 %v4006_v37, %v2484_v61  ;;  %v2220_v6 = vadd.f32 %v2146_v39, %v2092_v0  ;;  %v2149_v34 = vpop.xlane.xlu0 %2148  ;;  %v2096_v0 = vmul.f32 %v6579_v29, %v2064_v50  ;;  %v2068_v61 = vld [vmem:[#allocation4 + $0x90] sm:$0xff]  ;;  %v2065_v39 = vld [vmem:[#allocation4 + $0x78] sm:$0xff] }
 0x440   : > { %v4403_v7 = vpop.eup %4402  ;;  %v2221_v59 = vadd.f32 %v2149_v34, %v2093_v5  ;;  %3017 = vperm.xlu0 %4174, %v4401_v44   ;;  %v2297_v29 = vld [vmem:[#allocation5 + $0xb0] sm:$0xff] }
 0x441   : > { %v2957_v51 = vld [vmem:[#allocation4 + $0x30] sm:$0xff]  ;;  %v2958_v47 = vld [vmem:[#allocation4 + $0x38] sm:$0xff]  ;;  %2869 = vst.msk [vmem:[#allocation5 + $0x88] sm:$0xff] %vm681_vm1, %v2837_v60  ;;  %v4007_v45 = vpop.f32.mrb[68].mxu0  ;;  %3022 = vperm.xlu1 %4175, %v4403_v7   ;;  %v2100_v7 = vmul.f32 %v6580_v53, %v2068_v61  ;;  %v2489_v53 = vmul.f32 %v5935_v62, %v2297_v29 }
 0x442   : > { %4412 = vrcp.f32 %v2957_v51  ;;  %2253 = vst.msk [vmem:[#allocation4 + $0x50] sm:$0xff] %vm927_vm2, %v2220_v6  ;;  %2254 = vst.msk [vmem:[#allocation4 + $0x58] sm:$0xff] %vm927_vm2, %v2221_v59  ;;  %v4008_v57 = vpop.f32.mrb[69].mxu0  ;;  %v2155_v9 = vpop.xlane.xlu1 %2154  ;;  %v2296_v51 = vld [vmem:[#allocation5 + $0xa8] sm:$0xff] }
 0x443   : > { %4414 = vrcp.f32 %v2958_v47  ;;  %v4009_v13 = vadd.f32 %v4008_v57, %v4007_v45  ;;  %v2223_v40 = vadd.f32 %v2155_v9, %v2095_v43  ;;  %v4010_v25 = vpop.f32.mrb[70].mxu0  ;;  %v2152_v48 = vpop.xlane.xlu0 %2151  ;;  %v6581_v45 = vld [vmem:[#allocation59_spill] sm:$0xff]  ;;  %v2488_v50 = vmul.f32 %v5921_v28, %v2296_v51 }
 0x444   : > { %v4405_v8 = vpop.eup %4404  ;;  %v2959_v35 = vld [vmem:[#allocation4 + $0x40] sm:$0xff]  ;;  %v2222_v4 = vadd.f32 %v2152_v48, %v2094_v10  ;;  %v4011_v49 = vpop.f32.mrb[71].mxu0  ;;  %v2097_v26 = vmul.f32 %v6581_v45, %v2065_v39  ;;  %v2067_v10 = vld [vmem:[#allocation4 + $0x88] sm:$0xff]  ;;  %v2298_v39 = vld [vmem:[#allocation5 + $0xb8] sm:$0xff] }
 0x445   : > { %v4407_v54 = vpop.eup %4406  ;;  %3027 = vperm.xlu0 %4174, %v4405_v8   ;;  %4416 = vrcp.f32 %v2959_v35  ;;  %v2960_v42 = vld [vmem:[#allocation4 + $0x48] sm:$0xff]  ;;  %v2838_v19 = vadd.f32 %v4009_v13, %v2485_v36  ;;  %2256 = vst.msk [vmem:[#allocation4 + $0x68] sm:$0xff] %vm927_vm2, %v2223_v40  ;;  %v4012_v23 = vadd.f32 %v4011_v49, %v4010_v25  ;;  %v6582_v25 = vld [vmem:[#allocation6_spill] sm:$0xff] }
 0x446   : > { %3032 = vperm.xlu1 %4175, %v4407_v54   ;;  %4418 = vrcp.f32 %v2960_v42  ;;  %2255 = vst.msk [vmem:[#allocation4 + $0x60] sm:$0xff] %vm927_vm2, %v2222_v4  ;;  %v2164_v24 = vpop.xlane.xlu1 %2163  ;;  %v2102_v48 = vmul.f32 %v6582_v25, %v2070_v56  ;;  %v6583_v49 = vld [vmem:[#allocation62_spill] sm:$0xff] }
 0x447   : > { %v4409_v1 = vpop.eup %4408  ;;  %2870 = vst.msk [vmem:[#allocation5 + $0x90] sm:$0xff] %vm681_vm1, %v2838_v19  ;;  %v2839_v41 = vadd.f32 %v4012_v23, %v2486_v17  ;;  %v2226_v37 = vadd.f32 %v2164_v24, %v2098_v16  ;;  %v2158_v18 = vpop.xlane.xlu0 %2157  ;;  %v2099_v21 = vmul.f32 %v6583_v49, %v2067_v10  ;;  %v2072_v16 = vld [vmem:[#allocation4 + $0xb0] sm:$0xff]  ;;  %v2069_v23 = vld [vmem:[#allocation4 + $0x98] sm:$0xff] }
 0x448   : > { %v4411_v5 = vpop.eup %4410  ;;  %v2224_v60 = vadd.f32 %v2158_v18, %v2096_v0  ;;  %v2074_v18 = vld [vmem:[#allocation4 + $0xc0] sm:$0xff] }
 0x449   : > { %v2961_v44 = vld [vmem:[#allocation4 + $0x50] sm:$0xff]  ;;  %3037 = vperm.xlu0 %4174, %v4409_v1   ;;  %v2962_v6 = vld [vmem:[#allocation4 + $0x58] sm:$0xff]  ;;  %2871 = vst.msk [vmem:[#allocation5 + $0x98] sm:$0xff] %vm681_vm1, %v2839_v41  ;;  %v4013_v34 = vpop.f32.mrb[72].mxu0 }
 0x44a   : > { %4420 = vrcp.f32 %v2961_v44  ;;  %2259 = vst.msk [vmem:[#allocation4 + $0x80] sm:$0xff] %vm927_vm2, %v2226_v37  ;;  %3042 = vperm.xlu1 %4175, %v4411_v5   ;;  %2257 = vst.msk [vmem:[#allocation4 + $0x70] sm:$0xff] %vm927_vm2, %v2224_v60  ;;  %v4014_v59 = vpop.f32.mrb[73].mxu0  ;;  %v2170_v47 = vpop.xlane.xlu1 %2169  ;;  %v6584_v41 = vld [vmem:[#allocation64_spill] sm:$0xff]  ;;  %v6585_v60 = vld [vmem:[#allocation65_spill] sm:$0xff] }
 0x44b   : > { %4422 = vrcp.f32 %v2962_v6  ;;  %v4015_v20 = vadd.f32 %v4014_v59, %v4013_v34  ;;  %v2228_v57 = vadd.f32 %v2170_v47, %v2100_v7  ;;  %v4016_v9 = vpop.f32.mrb[74].mxu0  ;;  %v2161_v46 = vpop.xlane.xlu0 %2160  ;;  %v2104_v37 = vmul.f32 %v6584_v41, %v2072_v16  ;;  %v2071_v47 = vld [vmem:[#allocation4 + $0xa8] sm:$0xff] }
 0x44c   : > { %v4413_v43 = vpop.eup %4412  ;;  %v2964_v36 = vld [vmem:[#allocation4 + $0x68] sm:$0xff]  ;;  %v2225_v13 = vadd.f32 %v2161_v46, %v2097_v26  ;;  %v4017_v40 = vpop.f32.mrb[75].mxu0  ;;  %v2101_v6 = vmul.f32 %v6585_v60, %v2069_v23 }
 0x44d   : > { %v4415_v8 = vpop.eup %4414  ;;  %3047 = vperm.xlu0 %4174, %v4413_v43   ;;  %4424 = vrcp.f32 %v2964_v36  ;;  %v2963_v54 = vld [vmem:[#allocation4 + $0x60] sm:$0xff]  ;;  %v2840_v35 = vadd.f32 %v4015_v20, %v2487_v11  ;;  %2261 = vst.msk [vmem:[#allocation4 + $0x90] sm:$0xff] %vm927_vm2, %v2228_v57  ;;  %v4018_v58 = vadd.f32 %v4017_v40, %v4016_v9  ;;  %v2106_v11 = vmul.f32 %v5718_v33, %v2074_v18  ;;  %v2300_v16 = vld [vmem:[#allocation5 + $0xc8] sm:$0xff] }
 0x44e   : > { %3052 = vperm.xlu1 %4175, %v4415_v8   ;;  %4426 = vrcp.f32 %v2963_v54  ;;  %2258 = vst.msk [vmem:[#allocation4 + $0x78] sm:$0xff] %vm927_vm2, %v2225_v13  ;;  %v2176_v4 = vpop.xlane.xlu1 %2175  ;;  %v2490_v20 = vmul.f32 %v5932_v31, %v2298_v39  ;;  %v6586_v8 = vld [vmem:[#allocation7_spill] sm:$0xff]  ;;  %v2076_v13 = vld [vmem:[#allocation4 + $0xd0] sm:$0xff]  ;;  %v2299_v54 = vld [vmem:[#allocation5 + $0xc0] sm:$0xff] }
 0x44f   : > { %v4417_v17 = vpop.eup %4416  ;;  %2872 = vst.msk [vmem:[#allocation5 + $0xa0] sm:$0xff] %vm681_vm1, %v2840_v35  ;;  %v2841_v42 = vadd.f32 %v4018_v58, %v2488_v50  ;;  %v2230_v19 = vadd.f32 %v2176_v4, %v2102_v48  ;;  %v2167_v28 = vpop.xlane.xlu0 %2166  ;;  %v2103_v36 = vmul.f32 %v6586_v8, %v2071_v47  ;;  %v2073_v48 = vld [vmem:[#allocation4 + $0xb8] sm:$0xff]  ;;  %v2108_v49 = vmul.f32 %v5846_v14, %v2076_v13  ;;  %v2075_v41 = vld [vmem:[#allocation4 + $0xc8] sm:$0xff]  ;;  %v2301_v47 = vld [vmem:[#allocation5 + $0xd0] sm:$0xff] }
 0x450   : > { %v4419_v24 = vpop.eup %4418  ;;  %v2227_v0 = vadd.f32 %v2167_v28, %v2099_v21  ;;  %v2078_v21 = vld [vmem:[#allocation4 + $0xe0] sm:$0xff] }
 0x451   : > { %3057 = vperm.xlu0 %4174, %v4417_v17   ;;  %v2965_v61 = vld [vmem:[#allocation4 + $0x70] sm:$0xff]  ;;  %2873 = vst.msk [vmem:[#allocation5 + $0xa8] sm:$0xff] %vm681_vm1, %v2841_v42  ;;  %v4019_v1 = vpop.f32.mrb[76].mxu0  ;;  %v2967_v5 = vld [vmem:[#allocation4 + $0x80] sm:$0xff]  ;;  %v2110_v39 = vmul.f32 %v5870_v30, %v2078_v21 }
 0x452   : > { %2263 = vst.msk [vmem:[#allocation4 + $0xa0] sm:$0xff] %vm927_vm2, %v2230_v19  ;;  %3062 = vperm.xlu1 %4175, %v4419_v24   ;;  %4428 = vrcp.f32 %v2965_v61  ;;  %2260 = vst.msk [vmem:[#allocation4 + $0x88] sm:$0xff] %vm927_vm2, %v2227_v0  ;;  %v4020_v63 = vpop.f32.mrb[77].mxu0  ;;  %v2182_v44 = vpop.xlane.xlu1 %2181  ;;  %v6587_v28 = vld [vmem:[#allocation66_spill] sm:$0xff]  ;;  %v2491_v24 = vmul.f32 %v5947_v15, %v2299_v54 }
 0x453   : > { %v4021_v7 = vadd.f32 %v4020_v63, %v4019_v1  ;;  %v4022_v56 = vpop.f32.mrb[78].mxu0  ;;  %v2232_v51 = vadd.f32 %v2182_v44, %v2104_v37  ;;  %v2173_v59 = vpop.xlane.xlu0 %2172  ;;  %4430 = vrcp.f32 %v2967_v5  ;;  %v2105_v23 = vmul.f32 %v6587_v28, %v2073_v48 }
 0x454   : > { %v4421_v34 = vpop.eup %4420  ;;  %v2229_v26 = vadd.f32 %v2173_v59, %v2101_v6  ;;  %v4023_v43 = vpop.f32.mrb[79].mxu0  ;;  %v2969_v62 = vld [vmem:[#allocation4 + $0x90] sm:$0xff]  ;;  %v2492_v5 = vmul.f32 %v5941_v27, %v2300_v16 }
 0x455   : > { %v4423_v45 = vpop.eup %4422  ;;  %3067 = vperm.xlu0 %4174, %v4421_v34   ;;  %v2966_v57 = vld [vmem:[#allocation4 + $0x78] sm:$0xff]  ;;  %v2842_v9 = vadd.f32 %v4021_v7, %v2489_v53  ;;  %2265 = vst.msk [vmem:[#allocation4 + $0xb0] sm:$0xff] %vm927_vm2, %v2232_v51  ;;  %v4024_v46 = vadd.f32 %v4023_v43, %v4022_v56  ;;  %v6588_v34 = vld [vmem:[#allocation67_spill] sm:$0xff] }
 0x456   : > { %3072 = vperm.xlu1 %4175, %v4423_v45   ;;  %4432 = vrcp.f32 %v2966_v57  ;;  %2262 = vst.msk [vmem:[#allocation4 + $0x98] sm:$0xff] %vm927_vm2, %v2229_v26  ;;  %v2188_v10 = vpop.xlane.xlu1 %2187  ;;  %v2107_v53 = vmul.f32 %v6588_v34, %v2075_v41  ;;  %v2077_v51 = vld [vmem:[#allocation4 + $0xd8] sm:$0xff] }
 0x457   : > { %v4425_v40 = vpop.eup %4424  ;;  %2874 = vst.msk [vmem:[#allocation5 + $0xb0] sm:$0xff] %vm681_vm1, %v2842_v9  ;;  %v2843_v33 = vadd.f32 %v4024_v46, %v2490_v20  ;;  %v2234_v31 = vadd.f32 %v2188_v10, %v2106_v11  ;;  %v2179_v25 = vpop.xlane.xlu0 %2178  ;;  %4434 = vrcp.f32 %v2969_v62  ;;  %v2080_v11 = vld [vmem:[#allocation4 + $0xf0] sm:$0xff]  ;;  %v2302_v20 = vld [vmem:[#allocation5 + $0xd8] sm:$0xff]  ;;  %v2109_v46 = vmul.f32 %v5728_v3, %v2077_v51 }
 0x458   : > { %v4427_v50 = vpop.eup %4426  ;;  %v2231_v35 = vadd.f32 %v2179_v25, %v2103_v36  ;;  %v2493_v10 = vmul.f32 %v5959_v22, %v2301_v47  ;;  %v2112_v48 = vmul.f32 %v5961_v2, %v2080_v11  ;;  %v2306_v11 = vld [vmem:[#allocation5 + $0xf8] sm:$0xff] }
 0x459   : > { %v2968_v58 = vld [vmem:[#allocation4 + $0x88] sm:$0xff]  ;;  %2875 = vst.msk [vmem:[#allocation5 + $0xb8] sm:$0xff] %vm681_vm1, %v2843_v33  ;;  %v4025_v4 = vpop.f32.mrb[80].mxu0  ;;  %3077 = vperm.xlu0 %4174, %v4427_v50   ;;  %v2971_v17 = vld [vmem:[#allocation4 + $0xa0] sm:$0xff]  ;;  %v2494_v50 = vmul.f32 %v5950_v52, %v2302_v20  ;;  %v2081_v52 = vld [vmem:[#allocation4 + $0xf8] sm:$0xff] }
 0x45a   : > { %2267 = vst.msk [vmem:[#allocation4 + $0xc0] sm:$0xff] %vm927_vm2, %v2234_v31  ;;  %3082 = vperm.xlu1 %4175, %v4425_v40   ;;  %4436 = vrcp.f32 %v2968_v58  ;;  %2264 = vst.msk [vmem:[#allocation4 + $0xa8] sm:$0xff] %vm927_vm2, %v2231_v35  ;;  %v4026_v42 = vpop.f32.mrb[81].mxu0  ;;  %v2194_v19 = vpop.xlane.xlu1 %2193  ;;  %v2079_v40 = vld [vmem:[#allocation4 + $0xe8] sm:$0xff] }
 0x45b   : > { %v4027_v29 = vadd.f32 %v4026_v42, %v4025_v4  ;;  %v4028_v0 = vpop.f32.mrb[82].mxu0  ;;  %v2236_v61 = vadd.f32 %v2194_v19, %v2108_v49  ;;  %v2185_v1 = vpop.xlane.xlu0 %2184  ;;  %4438 = vrcp.f32 %v2971_v17  ;;  %v2111_v49 = vmul.f32 %v5864_v32, %v2079_v40  ;;  %v2303_v42 = vld [vmem:[#allocation5 + $0xe0] sm:$0xff] }
 0x45c   : > { %v4429_v37 = vpop.eup %4428  ;;  %v2233_v18 = vadd.f32 %v2185_v1, %v2105_v23  ;;  %v4029_v14 = vpop.f32.mrb[83].mxu0  ;;  %v2973_v15 = vld [vmem:[#allocation4 + $0xb0] sm:$0xff]  ;;  %v2495_v1 = vmul.f32 %v5971_v12, %v2303_v42 }
 0x45d   : > { %v2970_v63 = vld [vmem:[#allocation4 + $0x98] sm:$0xff]  ;;  %v2844_v44 = vadd.f32 %v4027_v29, %v2491_v24  ;;  %2269 = vst.msk [vmem:[#allocation4 + $0xd0] sm:$0xff] %vm927_vm2, %v2236_v61  ;;  %v4030_v60 = vadd.f32 %v4029_v14, %v4028_v0  ;;  %3087 = vperm.xlu0 %4174, %v4429_v37   ;;  %v4431_v7 = vpop.eup %4430  ;;  %v2304_v24 = vld [vmem:[#allocation5 + $0xe8] sm:$0xff]  ;;  %v2113_v0 = vmul.f32 %v5943_v38, %v2081_v52 }
 0x45e   : > { %4440 = vrcp.f32 %v2970_v63  ;;  %2266 = vst.msk [vmem:[#allocation4 + $0xb8] sm:$0xff] %vm927_vm2, %v2233_v18  ;;  %v2200_v6 = vpop.xlane.xlu1 %2199  ;;  %v2496_v63 = vmul.f32 %v5969_v55, %v2304_v24  ;;  %v2925_v24 = vld [vmem:[#allocation5 + $0x30] sm:$0xff] }
 0x45f   : > { %2876 = vst.msk [vmem:[#allocation5 + $0xc0] sm:$0xff] %vm681_vm1, %v2844_v44  ;;  %v2845_v30 = vadd.f32 %v4030_v60, %v2492_v5  ;;  %v2238_v56 = vadd.f32 %v2200_v6, %v2110_v39  ;;  %v2191_v27 = vpop.xlane.xlu0 %2190  ;;  %4442 = vrcp.f32 %v2973_v15 }
 0x460   : > { %v4433_v59 = vpop.eup %4432  ;;  %v2235_v45 = vadd.f32 %v2191_v27, %v2107_v53 }
 0x461   : > { %v2972_v26 = vld [vmem:[#allocation4 + $0xa8] sm:$0xff]  ;;  %2877 = vst.msk [vmem:[#allocation5 + $0xc8] sm:$0xff] %vm681_vm1, %v2845_v30  ;;  %v4031_v43 = vpop.f32.mrb[84].mxu0  ;;  %3097 = vperm.xlu0 %4174, %v4431_v7   ;;  %3092 = vperm.xlu1 %4175, %v4433_v59   ;;  %v2975_v57 = vld [vmem:[#allocation4 + $0xc0] sm:$0xff]  ;;  %v4435_v62 = vpop.eup %4434 }
 0x462   : > { %2271 = vst.msk [vmem:[#allocation4 + $0xe0] sm:$0xff] %vm927_vm2, %v2238_v56  ;;  %4444 = vrcp.f32 %v2972_v26  ;;  %2268 = vst.msk [vmem:[#allocation4 + $0xc8] sm:$0xff] %vm927_vm2, %v2235_v45  ;;  %v4032_v9 = vpop.f32.mrb[85].mxu0  ;;  %v2305_v45 = vld [vmem:[#allocation5 + $0xf0] sm:$0xff] }
 0x463   : > { %v4033_v8 = vadd.f32 %v4032_v9, %v4031_v43  ;;  %v4034_v36 = vpop.f32.mrb[86].mxu0  ;;  %v2197_v13 = vpop.xlane.xlu0 %2196  ;;  %4446 = vrcp.f32 %v2975_v57 }
 0x464   : > { %v4437_v33 = vpop.eup %4436  ;;  %v2237_v31 = vadd.f32 %v2197_v13, %v2109_v46  ;;  %v4035_v25 = vpop.f32.mrb[87].mxu0  ;;  %v2977_v3 = vld [vmem:[#allocation4 + $0xd0] sm:$0xff] }
 0x465   : > { %v2974_v54 = vld [vmem:[#allocation4 + $0xb8] sm:$0xff]  ;;  %v2846_v35 = vadd.f32 %v4033_v8, %v2493_v10  ;;  %v4036_v58 = vadd.f32 %v4035_v25, %v4034_v36  ;;  %v2206_v4 = vpop.xlane.xlu1 %2205  ;;  %3107 = vperm.xlu0 %4174, %v4435_v62   ;;  %3102 = vperm.xlu1 %4175, %v4437_v33   ;;  %v4439_v21 = vpop.eup %4438  ;;  %v2919_v33 = vld [vmem:[#allocation5] sm:$0xff]  ;;  %v2920_v25 = vld [vmem:[#allocation5 + $0x8] sm:$0xff] }
 0x466   : > { %4448 = vrcp.f32 %v2974_v54  ;;  %2270 = vst.msk [vmem:[#allocation4 + $0xd8] sm:$0xff] %vm927_vm2, %v2237_v31  ;;  %v2240_v22 = vadd.f32 %v2206_v4, %v2112_v48 }
 0x467   : > { %2878 = vst.msk [vmem:[#allocation5 + $0xd0] sm:$0xff] %vm681_vm1, %v2846_v35  ;;  %v2847_v2 = vadd.f32 %v4036_v58, %v2494_v50  ;;  %v2203_v16 = vpop.xlane.xlu0 %2202  ;;  %4450 = vrcp.f32 %v2977_v3  ;;  %v2921_v58 = vld [vmem:[#allocation5 + $0x10] sm:$0xff]  ;;  %v2922_v3 = vld [vmem:[#allocation5 + $0x18] sm:$0xff] }
 0x468   : > { %v4441_v17 = vpop.eup %4440  ;;  %2273 = vst.msk [vmem:[#allocation4 + $0xf0] sm:$0xff] %vm927_vm2, %v2240_v22  ;;  %v2239_v19 = vadd.f32 %v2203_v16, %v2111_v49  ;;  %v2923_v16 = vld [vmem:[#allocation5 + $0x20] sm:$0xff] }
 0x469   : > { %v2976_v28 = vld [vmem:[#allocation4 + $0xc8] sm:$0xff]  ;;  %2879 = vst.msk [vmem:[#allocation5 + $0xd8] sm:$0xff] %vm681_vm1, %v2847_v2  ;;  %v4037_v23 = vpop.f32.mrb[88].mxu0  ;;  %3117 = vperm.xlu0 %4174, %v4439_v21   ;;  %3112 = vperm.xlu1 %4175, %v4441_v17   ;;  %v2979_v32 = vld [vmem:[#allocation4 + $0xe0] sm:$0xff]  ;;  %v4443_v61 = vpop.eup %4442 }
 0x46a   : > { %4452 = vrcp.f32 %v2976_v28  ;;  %2272 = vst.msk [vmem:[#allocation4 + $0xe8] sm:$0xff] %vm927_vm2, %v2239_v19  ;;  %v4038_v29 = vpop.f32.mrb[89].mxu0  ;;  %v2465_v20 = vpop.permute.xlu1 %2464  ;;  %v2924_v17 = vld [vmem:[#allocation5 + $0x28] sm:$0xff] }
 0x46b   : > { %v4039_v41 = vadd.f32 %v4038_v29, %v4037_v23  ;;  %v4040_v37 = vpop.f32.mrb[90].mxu0  ;;  %v2209_v18 = vpop.xlane.xlu0 %2208  ;;  %4454 = vrcp.f32 %v2979_v32  ;;  %v2498_v8 = vmul.f32 %v2465_v20, %v2306_v11  ;;  %v2926_v29 = vld [vmem:[#allocation5 + $0x38] sm:$0xff] }
 0x46c   : > { %v4445_v14 = vpop.eup %4444  ;;  %v2241_v39 = vadd.f32 %v2209_v18, %v2113_v0  ;;  %v4041_v5 = vpop.f32.mrb[91].mxu0 }
 0x46d   : > { %v2978_v44 = vld [vmem:[#allocation4 + $0xd8] sm:$0xff]  ;;  %v2848_v60 = vadd.f32 %v4039_v41, %v2495_v1  ;;  %v4042_v15 = vadd.f32 %v4041_v5, %v4040_v37  ;;  %3127 = vperm.xlu0 %4174, %v4443_v61   ;;  %3122 = vperm.xlu1 %4175, %v4445_v14   ;;  %v4447_v38 = vpop.eup %4446  ;;  %v2927_v37 = vld [vmem:[#allocation5 + $0x40] sm:$0xff]  ;;  %v2928_v14 = vld [vmem:[#allocation5 + $0x48] sm:$0xff] }
 0x46e   : > { %4456 = vrcp.f32 %v2978_v44  ;;  %2274 = vst.msk [vmem:[#allocation4 + $0xf8] sm:$0xff] %vm927_vm2, %v2241_v39 }
 0x46f   : > { %v2981_v6 = vld [vmem:[#allocation4 + $0xf0] sm:$0xff]  ;;  %2880 = vst.msk [vmem:[#allocation5 + $0xe0] sm:$0xff] %vm681_vm1, %v2848_v60  ;;  %v2849_v12 = vadd.f32 %v4042_v15, %v2496_v63 }
 0x470   : > { %v4449_v34 = vpop.eup %4448  ;;  %4458 = vrcp.f32 %v2981_v6  ;;  %v2929_v60 = vld [vmem:[#allocation5 + $0x50] sm:$0xff] }
 0x471   : > { %v2980_v53 = vld [vmem:[#allocation4 + $0xe8] sm:$0xff]  ;;  %2881 = vst.msk [vmem:[#allocation5 + $0xe8] sm:$0xff] %vm681_vm1, %v2849_v12  ;;  %3137 = vperm.xlu0 %4174, %v4447_v38   ;;  %3132 = vperm.xlu1 %4175, %v4449_v34   ;;  %v4451_v55 = vpop.eup %4450  ;;  %v2930_v38 = vld [vmem:[#allocation5 + $0x58] sm:$0xff] }
 0x472   : > { %4460 = vrcp.f32 %v2980_v53  ;;  %v2460_v26 = vpop.permute.xlu0 %2459 }
 0x473   : > { %v2497_v9 = vmul.f32 %v2460_v26, %v2305_v45  ;;  %v2933_v45 = vld [vmem:[#allocation5 + $0x70] sm:$0xff]  ;;  %v2934_v26 = vld [vmem:[#allocation5 + $0x78] sm:$0xff] }
 0x474   : > { %v4453_v7 = vpop.eup %4452 }
 0x475   : > { %v2982_v30 = vld [vmem:[#allocation4 + $0xf8] sm:$0xff]  ;;  %3147 = vperm.xlu0 %4174, %v4451_v55   ;;  %3142 = vperm.xlu1 %4175, %v4453_v7   ;;  %v4455_v56 = vpop.eup %4454  ;;  %v2932_v55 = vld [vmem:[#allocation5 + $0x68] sm:$0xff] }
 0x476   : > { %4462 = vrcp.f32 %v2982_v30  ;;  %v2931_v30 = vld [vmem:[#allocation5 + $0x60] sm:$0xff] }
 0x478   : > { %v4457_v27 = vpop.eup %4456 }
 0x479   : > { %3157 = vperm.xlu0 %4174, %v4455_v56   ;;  %3152 = vperm.xlu1 %4175, %v4457_v27  }
 0x47a   : > { %v4459_v51 = vpop.eup %4458 }
 0x47c   : > { %v4461_v59 = vpop.eup %4460 }
 0x47d   : > { %3167 = vperm.xlu0 %4174, %v4459_v51   ;;  %3162 = vperm.xlu1 %4175, %v4461_v59  }
 0x480   : > { %v4463_v47 = vpop.eup %4462 }
 0x481   : > { %3172 = vperm.xlu1 %4175, %v4463_v47  }
 0x4ac   : > { %v4043_v43 = vpop.f32.mrb[92].mxu0 }
 0x4ad   : > { %v4044_v57 = vpop.f32.mrb[93].mxu0 }
 0x4ae   : > { %v4045_v46 = vadd.f32 %v4044_v57, %v4043_v43  ;;  %v4046_v62 = vpop.f32.mrb[94].mxu0 }
 0x4af   : > { %v4047_v10 = vpop.f32.mrb[95].mxu0 }
 0x4b0   : > { %v2850_v36 = vadd.f32 %v4045_v46, %v2497_v9  ;;  %v4048_v13 = vadd.f32 %v4047_v10, %v4046_v62  ;;  %v2935_v46 = vld [vmem:[#allocation5 + $0x80] sm:$0xff]  ;;  %v2936_v62 = vld [vmem:[#allocation5 + $0x88] sm:$0xff] }
 0x4b2   : > { %2882 = vst.msk [vmem:[#allocation5 + $0xf0] sm:$0xff] %vm681_vm1, %v2850_v36  ;;  %v2851_v40 = vadd.f32 %v4048_v13, %v2498_v8 }
 0x4b4   : > { %2883 = vst.msk [vmem:[#allocation5 + $0xf8] sm:$0xff] %vm681_vm1, %v2851_v40 }
 0x4bf   : > { %v3018_v31 = vpop.permute.xlu0 %3017 }
 0x4c0   : > { %v3023_v48 = vpop.permute.xlu1 %3022  ;;  %v3175_v50 = vmul.f32 %v3018_v31, %v2919_v33  ;;  %v2937_v33 = vld [vmem:[#allocation5 + $0x90] sm:$0xff]  ;;  %v2938_v31 = vld [vmem:[#allocation5 + $0x98] sm:$0xff] }
 0x4c1   : > { %v3176_v54 = vmul.f32 %v3023_v48, %v2920_v25 }
 0x4c3   : > { %v3207_v35 = vpack.c.bf16 %v3176_v54, %v3175_v50 }
 0x4c4   : > { %v3028_v4 = vpop.permute.xlu0 %3027 }
 0x4c5   : > { %v3033_v22 = vpop.permute.xlu1 %3032  ;;  %v3177_v49 = vmul.f32 %v3028_v4, %v2921_v58  ;;  %4102 = vmatprep.mubr.msk.bf16.mxu0 %vm681_vm1, %v3207_v35  ;;  %v2939_v58 = vld [vmem:[#allocation5 + $0xa0] sm:$0xff]  ;;  %v2940_v4 = vld [vmem:[#allocation5 + $0xa8] sm:$0xff] }
 0x4c6   : > { %v3178_v21 = vmul.f32 %v3033_v22, %v2922_v3 }
 0x4c8   : > { %v3208_v2 = vpack.c.bf16 %v3178_v21, %v3177_v49  ;;  %v3038_v52 = vpop.permute.xlu0 %3037 }
 0x4c9   : > { %v3043_v42 = vpop.permute.xlu1 %3042  ;;  %v3179_v19 = vmul.f32 %v3038_v52, %v2923_v16  ;;  %v2941_v16 = vld [vmem:[#allocation5 + $0xb0] sm:$0xff]  ;;  %v2942_v52 = vld [vmem:[#allocation5 + $0xb8] sm:$0xff] }
 0x4ca   : > { %v3180_v28 = vmul.f32 %v3043_v42, %v2924_v17  ;;  %4103 = vmatmul.mubr.msk.bf16.vlgmr.msra.gmra.mrb[96].mxu0 %vm681_vm1, %v3208_v2 }
 0x4cc   : > { %v3209_v23 = vpack.c.bf16 %v3180_v28, %v3179_v19  ;;  %v3048_v32 = vpop.permute.xlu0 %3047 }
 0x4cd   : > { %v3053_v0 = vpop.permute.xlu1 %3052  ;;  %v3181_v61 = vmul.f32 %v3048_v32, %v2925_v24  ;;  %v2943_v24 = vld [vmem:[#allocation5 + $0xc0] sm:$0xff]  ;;  %v2944_v32 = vld [vmem:[#allocation5 + $0xc8] sm:$0xff] }
 0x4ce   : > { %v3182_v1 = vmul.f32 %v3053_v0, %v2926_v29  ;;  %4106 = vmatprep.mubr.msk.bf16.mxu0 %vm681_vm1, %v3209_v23 }
 0x4d0   : > { %v3210_v41 = vpack.c.bf16 %v3182_v1, %v3181_v61  ;;  %v3058_v18 = vpop.permute.xlu0 %3057 }
 0x4d1   : > { %v3063_v39 = vpop.permute.xlu1 %3062  ;;  %v3183_v5 = vmul.f32 %v3058_v18, %v2927_v37  ;;  %v2945_v37 = vld [vmem:[#allocation5 + $0xd0] sm:$0xff]  ;;  %v2946_v18 = vld [vmem:[#allocation5 + $0xd8] sm:$0xff] }
 0x4d2   : > { %v3184_v63 = vmul.f32 %v3063_v39, %v2928_v14  ;;  %4107 = vmatmul.mubr.msk.bf16.gmra.mrb[100].mxu0 %vm681_vm1, %v3210_v41 }
 0x4d4   : > { %v3211_v44 = vpack.c.bf16 %v3184_v63, %v3183_v5  ;;  %v3068_v15 = vpop.permute.xlu0 %3067 }
 0x4d5   : > { %v3073_v6 = vpop.permute.xlu1 %3072  ;;  %v3185_v12 = vmul.f32 %v3068_v15, %v2929_v60  ;;  %v2947_v60 = vld [vmem:[#allocation5 + $0xe0] sm:$0xff]  ;;  %v2948_v15 = vld [vmem:[#allocation5 + $0xe8] sm:$0xff] }
 0x4d6   : > { %v3186_v34 = vmul.f32 %v3073_v6, %v2930_v38  ;;  %4110 = vmatprep.mubr.msk.bf16.mxu0 %vm681_vm1, %v3211_v44 }
 0x4d8   : > { %v3212_v53 = vpack.c.bf16 %v3186_v34, %v3185_v12  ;;  %v3078_v56 = vpop.permute.xlu0 %3077 }
 0x4d9   : > { %v3083_v7 = vpop.permute.xlu1 %3082  ;;  %v3187_v51 = vmul.f32 %v3078_v56, %v2931_v30 }
 0x4da   : > { %v3188_v27 = vmul.f32 %v3083_v7, %v2932_v55  ;;  %4111 = vmatmul.mubr.msk.bf16.gmra.mrb[104].mxu0 %vm681_vm1, %v3212_v53  ;;  %v2949_v55 = vld [vmem:[#allocation5 + $0xf0] sm:$0xff]  ;;  %v2950_v7 = vld [vmem:[#allocation5 + $0xf8] sm:$0xff] }
 0x4dc   : > { %v3213_v59 = vpack.c.bf16 %v3188_v27, %v3187_v51  ;;  %v3088_v47 = vpop.permute.xlu0 %3087 }
 0x4dd   : > { %v3189_v20 = vmul.f32 %v3088_v47, %v2933_v45  ;;  %v3446_v45 = vld [vmem:[%s4582_s25 + $0x10] sm:$0xff] }
 0x4de   : > { %4114 = vmatprep.mubr.msk.bf16.mxu1 %vm681_vm1, %v3213_v59  ;;  %v6094_v59 = vld [vmem:[%s6286_s9] ss:$0 sm:$0xff] }
 0x4e0   : > { %v3093_v43 = vpop.permute.xlu1 %3092  ;;  %v3098_v11 = vpop.permute.xlu0 %3097 }
 0x4e1   : > { %v3190_v57 = vmul.f32 %v3093_v43, %v2934_v26  ;;  %v3191_v36 = vmul.f32 %v3098_v11, %v2935_v46  ;;  %v3444_v11 = vld [vmem:[%s4582_s25] sm:$0xff]  ;;  %v3447_v46 = vld [vmem:[%s4582_s25 + $0x18] sm:$0xff] }
 0x4e3   : > { %v3214_v9 = vpack.c.bf16 %v3190_v57, %v3189_v20  ;;  %v3510_v20 = vld [vmem:[%s6100_s29 + $0x10] sm:$0xff] }
 0x4e4   : > { %v3103_v10 = vpop.permute.xlu1 %3102  ;;  %v3108_v8 = vpop.permute.xlu0 %3107 }
 0x4e5   : > { %v3192_v13 = vmul.f32 %v3103_v10, %v2936_v62  ;;  %4115 = vmatmul.mubr.msk.bf16.vlgmr.msra.gmra.mrb[64].mxu1 %vm681_vm1, %v3214_v9  ;;  %v3193_v50 = vmul.f32 %v3108_v8, %v2937_v33  ;;  %v3508_v10 = vld [vmem:[%s6100_s29] sm:$0xff]  ;;  %v3511_v33 = vld [vmem:[%s6100_s29 + $0x18] sm:$0xff] }
 0x4e7   : > { %v3215_v40 = vpack.c.bf16 %v3192_v13, %v3191_v36  ;;  %v3445_v13 = vld [vmem:[%s4582_s25 + $0x8] sm:$0xff] }
 0x4e8   : > { %v3113_v25 = vpop.permute.xlu1 %3112  ;;  %v3118_v48 = vpop.permute.xlu0 %3117 }
 0x4e9   : > { %v3194_v54 = vmul.f32 %v3113_v25, %v2938_v31  ;;  %4118 = vmatprep.mubr.msk.bf16.mxu1 %vm681_vm1, %v3215_v40  ;;  %v3195_v49 = vmul.f32 %v3118_v48, %v2939_v58 }
 0x4eb   : > { %v3216_v35 = vpack.c.bf16 %v3194_v54, %v3193_v50  ;;  %v3509_v50 = vld [vmem:[%s6100_s29 + $0x8] sm:$0xff] }
 0x4ec   : > { %v3123_v3 = vpop.permute.xlu1 %3122  ;;  %v3128_v22 = vpop.permute.xlu0 %3127 }
 0x4ed   : > { %v3196_v21 = vmul.f32 %v3123_v3, %v2940_v4  ;;  %4119 = vmatmul.mubr.msk.bf16.gmra.mrb[68].mxu1 %vm681_vm1, %v3216_v35  ;;  %v3197_v19 = vmul.f32 %v3128_v22, %v2941_v16  ;;  %v3450_v22 = vld [vmem:[%s4582_s25 + $0x30] sm:$0xff] }
 0x4ee   : > { %v3514_v16 = vld [vmem:[%s6100_s29 + $0x30] sm:$0xff] }
 0x4ef   : > { %v3217_v2 = vpack.c.bf16 %v3196_v21, %v3195_v49 }
 0x4f0   : > { %v3133_v17 = vpop.permute.xlu1 %3132  ;;  %v3138_v42 = vpop.permute.xlu0 %3137 }
 0x4f1   : > { %v3198_v28 = vmul.f32 %v3133_v17, %v2942_v52  ;;  %4122 = vmatprep.mubr.msk.bf16.mxu1 %vm681_vm1, %v3217_v2  ;;  %v3199_v61 = vmul.f32 %v3138_v42, %v2943_v24  ;;  %v3448_v2 = vld [vmem:[%s4582_s25 + $0x20] sm:$0xff]  ;;  %v3451_v42 = vld [vmem:[%s4582_s25 + $0x38] sm:$0xff] }
 0x4f3   : > { %v3218_v23 = vpack.c.bf16 %v3198_v28, %v3197_v19  ;;  %v3512_v28 = vld [vmem:[%s6100_s29 + $0x20] sm:$0xff] }
 0x4f4   : > { %v3143_v29 = vpop.permute.xlu1 %3142  ;;  %v3148_v0 = vpop.permute.xlu0 %3147 }
 0x4f5   : > { %v3200_v1 = vmul.f32 %v3143_v29, %v2944_v32  ;;  %4123 = vmatmul.mubr.msk.bf16.gmra.mrb[72].mxu1 %vm681_vm1, %v3218_v23  ;;  %v3201_v5 = vmul.f32 %v3148_v0, %v2945_v37  ;;  %v3449_v32 = vld [vmem:[%s4582_s25 + $0x28] sm:$0xff]  ;;  %v3515_v0 = vld [vmem:[%s6100_s29 + $0x38] sm:$0xff] }
 0x4f6   : > { %v3513_v37 = vld [vmem:[%s6100_s29 + $0x28] sm:$0xff] }
 0x4f7   : > { %v3219_v41 = vpack.c.bf16 %v3200_v1, %v3199_v61 }
 0x4f8   : > { %v3153_v14 = vpop.permute.xlu1 %3152  ;;  %v3158_v39 = vpop.permute.xlu0 %3157 }
 0x4f9   : > { %v3202_v63 = vmul.f32 %v3153_v14, %v2946_v18  ;;  %4126 = vmatprep.mubr.msk.bf16.mxu1 %vm681_vm1, %v3219_v41  ;;  %v3203_v6 = vmul.f32 %v3158_v39, %v2947_v60 }
 0x4fb   : > { %v3220_v44 = vpack.c.bf16 %v3202_v63, %v3201_v5 }
 0x4fc   : > { %v3163_v38 = vpop.permute.xlu1 %3162  ;;  %v3168_v34 = vpop.permute.xlu0 %3167 }
 0x4fd   : > { %v3204_v12 = vmul.f32 %v3163_v38, %v2948_v15  ;;  %4127 = vmatmul.mubr.msk.bf16.gmra.mrb[76].mxu1 %vm681_vm1, %v3220_v44  ;;  %v3205_v56 = vmul.f32 %v3168_v34, %v2949_v55  ;;  %v3454_v44 = vld [vmem:[%s4582_s25 + $0x50] sm:$0xff]  ;;  %v3452_v38 = vld [vmem:[%s4582_s25 + $0x40] sm:$0xff] }
 0x4ff   : > { %v3221_v53 = vpack.c.bf16 %v3204_v12, %v3203_v6  ;;  %v3518_v6 = vld [vmem:[%s6100_s29 + $0x50] sm:$0xff] }
 0x500   : > { %v3173_v30 = vpop.permute.xlu1 %3172 }
 0x501   : > { %v3206_v27 = vmul.f32 %v3173_v30, %v2950_v7  ;;  %4130 = vmatprep.mubr.msk.bf16.mxu1 %vm681_vm1, %v3221_v53  ;;  %v3455_v53 = vld [vmem:[%s4582_s25 + $0x58] sm:$0xff]  ;;  %v3516_v7 = vld [vmem:[%s6100_s29 + $0x40] sm:$0xff] }
 0x503   : > { %v3222_v51 = vpack.c.bf16 %v3206_v27, %v3205_v56  ;;  %v3453_v27 = vld [vmem:[%s4582_s25 + $0x48] sm:$0xff] }
 0x505   : > { %4131 = vmatmul.mubr.msk.bf16.gmra.mrb[80].mxu1 %vm681_vm1, %v3222_v51 }
 0x59d   : > { %v4104_v47 = vpop.f32.mrb[96].mxu0 }
 0x59e   : > { %v3326_v26 = vadd.f32 %v4104_v47, %v6094_v59  ;;  %v3317_v43 = vpop.f32.mrb[97].mxu0  ;;  %v3519_v47 = vld [vmem:[%s6100_s29 + $0x58] sm:$0xff] }
 0x59f   : > { %v3318_v57 = vadd.f32 %v6094_v59, %v3317_v43  ;;  %v4105_v9 = vpop.f32.mrb[98].mxu0 }
 0x5a0   : > { %v3478_v62 = vadd.f32 %v3446_v45, %v3326_v26  ;;  %v3329_v8 = vadd.f32 %v4105_v9, %v6094_v59  ;;  %v3320_v36 = vpop.f32.mrb[99].mxu0 }
 0x5a1   : > { %v3476_v40 = vadd.f32 %v3444_v11, %v3318_v57  ;;  %v3321_v31 = vadd.f32 %v6094_v59, %v3320_v36  ;;  %v3517_v11 = vld [vmem:[%s6100_s29 + $0x48] sm:$0xff] }
 0x5a2   : > { %v3542_v25 = vadd.f32 %v3510_v20, %v3478_v62  ;;  %v3479_v48 = vadd.f32 %v3447_v46, %v3329_v8 }
 0x5a3   : > { %v3540_v54 = vadd.f32 %v3508_v10, %v3476_v40  ;;  %v3477_v35 = vadd.f32 %v3445_v13, %v3321_v31  ;;  %v3458_v10 = vld [vmem:[%s4582_s25 + $0x70] sm:$0xff]  ;;  %v3456_v13 = vld [vmem:[%s4582_s25 + $0x60] sm:$0xff] }
 0x5a4   : > { %3574 = vst.msk [vmem:[%s6115_s12 + $0x10] sm:$0xff] %vm681_vm1, %v3542_v25  ;;  %v3543_v58 = vadd.f32 %v3511_v33, %v3479_v48  ;;  %v3522_v40 = vld [vmem:[%s6100_s29 + $0x70] sm:$0xff]  ;;  %v3459_v25 = vld [vmem:[%s4582_s25 + $0x78] sm:$0xff] }
 0x5a5   : > { %3572 = vst.msk [vmem:[%s6115_s12] sm:$0xff] %vm681_vm1, %v3540_v54  ;;  %v3541_v4 = vadd.f32 %v3509_v50, %v3477_v35  ;;  %v4108_v3 = vpop.f32.mrb[100].mxu0  ;;  %v3520_v50 = vld [vmem:[%s6100_s29 + $0x60] sm:$0xff] }
 0x5a6   : > { %3575 = vst.msk [vmem:[%s6115_s12 + $0x18] sm:$0xff] %vm681_vm1, %v3543_v58  ;;  %v3342_v49 = vadd.f32 %v4108_v3, %v6094_v59  ;;  %v3333_v21 = vpop.f32.mrb[101].mxu0  ;;  %v3457_v58 = vld [vmem:[%s4582_s25 + $0x68] sm:$0xff]  ;;  %v3523_v3 = vld [vmem:[%s6100_s29 + $0x78] sm:$0xff] }
 0x5a7   : > { %3573 = vst.msk [vmem:[%s6115_s12 + $0x8] sm:$0xff] %vm681_vm1, %v3541_v4  ;;  %v3334_v52 = vadd.f32 %v6094_v59, %v3333_v21  ;;  %v4109_v17 = vpop.f32.mrb[102].mxu0 }
 0x5a8   : > { %v3482_v19 = vadd.f32 %v3450_v22, %v3342_v49  ;;  %v3345_v23 = vadd.f32 %v4109_v17, %v6094_v59  ;;  %v3336_v24 = vpop.f32.mrb[103].mxu0 }
 0x5a9   : > { %v3480_v29 = vadd.f32 %v3448_v2, %v3334_v52  ;;  %v3337_v61 = vadd.f32 %v6094_v59, %v3336_v24  ;;  %v3521_v2 = vld [vmem:[%s6100_s29 + $0x68] sm:$0xff] }
 0x5aa   : > { %v3546_v1 = vadd.f32 %v3514_v16, %v3482_v19  ;;  %v3483_v41 = vadd.f32 %v3451_v42, %v3345_v23 }
 0x5ab   : > { %v3544_v18 = vadd.f32 %v3512_v28, %v3480_v29  ;;  %v3481_v14 = vadd.f32 %v3449_v32, %v3337_v61  ;;  %v3462_v28 = vld [vmem:[%s4582_s25 + $0x90] sm:$0xff]  ;;  %v3460_v32 = vld [vmem:[%s4582_s25 + $0x80] sm:$0xff] }
 0x5ac   : > { %3578 = vst.msk [vmem:[%s6115_s12 + $0x30] sm:$0xff] %vm681_vm1, %v3546_v1  ;;  %v3547_v39 = vadd.f32 %v3515_v0, %v3483_v41  ;;  %v3526_v29 = vld [vmem:[%s6100_s29 + $0x90] sm:$0xff]  ;;  %v3463_v1 = vld [vmem:[%s4582_s25 + $0x98] sm:$0xff] }
 0x5ad   : > { %3576 = vst.msk [vmem:[%s6115_s12 + $0x20] sm:$0xff] %vm681_vm1, %v3544_v18  ;;  %v3545_v5 = vadd.f32 %v3513_v37, %v3481_v14  ;;  %v4112_v63 = vpop.f32.mrb[104].mxu0  ;;  %v3524_v37 = vld [vmem:[%s6100_s29 + $0x80] sm:$0xff] }
 0x5ae   : > { %3579 = vst.msk [vmem:[%s6115_s12 + $0x38] sm:$0xff] %vm681_vm1, %v3547_v39  ;;  %v3358_v60 = vadd.f32 %v4112_v63, %v6094_v59  ;;  %v3349_v15 = vpop.f32.mrb[105].mxu0  ;;  %v3461_v39 = vld [vmem:[%s4582_s25 + $0x88] sm:$0xff]  ;;  %v3527_v63 = vld [vmem:[%s6100_s29 + $0x98] sm:$0xff] }
 0x5af   : > { %3577 = vst.msk [vmem:[%s6115_s12 + $0x28] sm:$0xff] %vm681_vm1, %v3545_v5  ;;  %v3350_v12 = vadd.f32 %v6094_v59, %v3349_v15  ;;  %v4113_v34 = vpop.f32.mrb[106].mxu0 }
 0x5b0   : > { %v3486_v55 = vadd.f32 %v3454_v44, %v3358_v60  ;;  %v3361_v30 = vadd.f32 %v4113_v34, %v6094_v59  ;;  %v3352_v56 = vpop.f32.mrb[107].mxu0 }
 0x5b1   : > { %v3484_v51 = vadd.f32 %v3452_v38, %v3350_v12  ;;  %v3353_v45 = vadd.f32 %v6094_v59, %v3352_v56  ;;  %v3525_v38 = vld [vmem:[%s6100_s29 + $0x88] sm:$0xff] }
 0x5b2   : > { %v3550_v26 = vadd.f32 %v3518_v6, %v3486_v55  ;;  %v3487_v43 = vadd.f32 %v3455_v53, %v3361_v30 }
 0x5b3   : > { %v3548_v20 = vadd.f32 %v3516_v7, %v3484_v51  ;;  %v3485_v57 = vadd.f32 %v3453_v27, %v3353_v45  ;;  %v3466_v7 = vld [vmem:[%s4582_s25 + $0xb0] sm:$0xff]  ;;  %v3464_v27 = vld [vmem:[%s4582_s25 + $0xa0] sm:$0xff] }
 0x5b4   : > { %3582 = vst.msk [vmem:[%s6115_s12 + $0x50] sm:$0xff] %vm681_vm1, %v3550_v26  ;;  %v3551_v9 = vadd.f32 %v3519_v47, %v3487_v43  ;;  %v3530_v51 = vld [vmem:[%s6100_s29 + $0xb0] sm:$0xff]  ;;  %v3467_v26 = vld [vmem:[%s4582_s25 + $0xb8] sm:$0xff] }
 0x5b5   : > { %3580 = vst.msk [vmem:[%s6115_s12 + $0x40] sm:$0xff] %vm681_vm1, %v3548_v20  ;;  %v3549_v46 = vadd.f32 %v3517_v11, %v3485_v57  ;;  %v3528_v11 = vld [vmem:[%s6100_s29 + $0xa0] sm:$0xff] }
 0x5b6   : > { %3583 = vst.msk [vmem:[%s6115_s12 + $0x58] sm:$0xff] %vm681_vm1, %v3551_v9  ;;  %v3465_v9 = vld [vmem:[%s4582_s25 + $0xa8] sm:$0xff] }
 0x5b7   : > { %3581 = vst.msk [vmem:[%s6115_s12 + $0x48] sm:$0xff] %vm681_vm1, %v3549_v46 }
 0x5b8   : > { %v4116_v62 = vpop.f32.mrb[64].mxu1 }
 0x5b9   : > { %v3374_v8 = vadd.f32 %v4116_v62, %v6094_v59  ;;  %v3365_v36 = vpop.f32.mrb[65].mxu1  ;;  %v3531_v62 = vld [vmem:[%s6100_s29 + $0xb8] sm:$0xff] }
 0x5ba   : > { %v3366_v33 = vadd.f32 %v6094_v59, %v3365_v36  ;;  %v4117_v31 = vpop.f32.mrb[66].mxu1 }
 0x5bb   : > { %v3490_v48 = vadd.f32 %v3458_v10, %v3374_v8  ;;  %v3377_v54 = vadd.f32 %v4117_v31, %v6094_v59  ;;  %v3368_v35 = vpop.f32.mrb[67].mxu1 }
 0x5bc   : > { %v3488_v4 = vadd.f32 %v3456_v13, %v3366_v33  ;;  %v3369_v22 = vadd.f32 %v6094_v59, %v3368_v35  ;;  %v3529_v13 = vld [vmem:[%s6100_s29 + $0xa8] sm:$0xff] }
 0x5bd   : > { %v3554_v49 = vadd.f32 %v3522_v40, %v3490_v48  ;;  %v3491_v21 = vadd.f32 %v3459_v25, %v3377_v54 }
 0x5be   : > { %v3552_v16 = vadd.f32 %v3520_v50, %v3488_v4  ;;  %v3489_v52 = vadd.f32 %v3457_v58, %v3369_v22  ;;  %v3470_v50 = vld [vmem:[%s4582_s25 + $0xd0] sm:$0xff]  ;;  %v3468_v58 = vld [vmem:[%s4582_s25 + $0xc0] sm:$0xff] }
 0x5bf   : > { %3586 = vst.msk [vmem:[%s6115_s12 + $0x70] sm:$0xff] %vm681_vm1, %v3554_v49  ;;  %v3555_v17 = vadd.f32 %v3523_v3, %v3491_v21  ;;  %v3534_v4 = vld [vmem:[%s6100_s29 + $0xd0] sm:$0xff]  ;;  %v3471_v49 = vld [vmem:[%s4582_s25 + $0xd8] sm:$0xff] }
 0x5c0   : > { %3584 = vst.msk [vmem:[%s6115_s12 + $0x60] sm:$0xff] %vm681_vm1, %v3552_v16  ;;  %v3553_v42 = vadd.f32 %v3521_v2, %v3489_v52  ;;  %v4120_v19 = vpop.f32.mrb[68].mxu1  ;;  %v3532_v2 = vld [vmem:[%s6100_s29 + $0xc0] sm:$0xff] }
 0x5c1   : > { %3587 = vst.msk [vmem:[%s6115_s12 + $0x78] sm:$0xff] %vm681_vm1, %v3555_v17  ;;  %v3390_v23 = vadd.f32 %v4120_v19, %v6094_v59  ;;  %v3381_v24 = vpop.f32.mrb[69].mxu1  ;;  %v3469_v17 = vld [vmem:[%s4582_s25 + $0xc8] sm:$0xff]  ;;  %v3535_v19 = vld [vmem:[%s6100_s29 + $0xd8] sm:$0xff] }
 0x5c2   : > { %3585 = vst.msk [vmem:[%s6115_s12 + $0x68] sm:$0xff] %vm681_vm1, %v3553_v42  ;;  %v3382_v0 = vadd.f32 %v6094_v59, %v3381_v24  ;;  %v4121_v61 = vpop.f32.mrb[70].mxu1 }
 0x5c3   : > { %v3494_v41 = vadd.f32 %v3462_v28, %v3390_v23  ;;  %v3393_v18 = vadd.f32 %v4121_v61, %v6094_v59  ;;  %v3384_v14 = vpop.f32.mrb[71].mxu1 }
 0x5c4   : > { %v3492_v5 = vadd.f32 %v3460_v32, %v3382_v0  ;;  %v3385_v44 = vadd.f32 %v6094_v59, %v3384_v14  ;;  %v3533_v32 = vld [vmem:[%s6100_s29 + $0xc8] sm:$0xff] }
 0x5c5   : > { %v3558_v60 = vadd.f32 %v3526_v29, %v3494_v41  ;;  %v3495_v15 = vadd.f32 %v3463_v1, %v3393_v18 }
 0x5c6   : > { %v3556_v6 = vadd.f32 %v3524_v37, %v3492_v5  ;;  %v3493_v12 = vadd.f32 %v3461_v39, %v3385_v44  ;;  %v3474_v37 = vld [vmem:[%s4582_s25 + $0xf0] sm:$0xff]  ;;  %v3472_v39 = vld [vmem:[%s4582_s25 + $0xe0] sm:$0xff] }
 0x5c7   : > { %3590 = vst.msk [vmem:[%s6115_s12 + $0x90] sm:$0xff] %vm681_vm1, %v3558_v60  ;;  %v3559_v34 = vadd.f32 %v3527_v63, %v3495_v15  ;;  %v3538_v5 = vld [vmem:[%s6100_s29 + $0xf0] sm:$0xff]  ;;  %v3475_v60 = vld [vmem:[%s4582_s25 + $0xf8] sm:$0xff] }
 0x5c8   : > { %3588 = vst.msk [vmem:[%s6115_s12 + $0x80] sm:$0xff] %vm681_vm1, %v3556_v6  ;;  %v3557_v53 = vadd.f32 %v3525_v38, %v3493_v12  ;;  %v4124_v55 = vpop.f32.mrb[72].mxu1  ;;  %v3536_v38 = vld [vmem:[%s6100_s29 + $0xe0] sm:$0xff] }
 0x5c9   : > { %3591 = vst.msk [vmem:[%s6115_s12 + $0x98] sm:$0xff] %vm681_vm1, %v3559_v34  ;;  %v3406_v30 = vadd.f32 %v4124_v55, %v6094_v59  ;;  %v3397_v56 = vpop.f32.mrb[73].mxu1  ;;  %v3473_v34 = vld [vmem:[%s4582_s25 + $0xe8] sm:$0xff]  ;;  %v3539_v55 = vld [vmem:[%s6100_s29 + $0xf8] sm:$0xff] }
 0x5ca   : > { %3589 = vst.msk [vmem:[%s6115_s12 + $0x88] sm:$0xff] %vm681_vm1, %v3557_v53  ;;  %v3398_v47 = vadd.f32 %v6094_v59, %v3397_v56  ;;  %v4125_v45 = vpop.f32.mrb[74].mxu1 }
 0x5cb   : > { %v3498_v43 = vadd.f32 %v3466_v7, %v3406_v30  ;;  %v3409_v20 = vadd.f32 %v4125_v45, %v6094_v59  ;;  %v3400_v57 = vpop.f32.mrb[75].mxu1 }
 0x5cc   : > { %v3496_v46 = vadd.f32 %v3464_v27, %v3398_v47  ;;  %v3401_v10 = vadd.f32 %v6094_v59, %v3400_v57  ;;  %v3537_v27 = vld [vmem:[%s6100_s29 + $0xe8] sm:$0xff] }
 0x5cd   : > { %v3562_v8 = vadd.f32 %v3530_v51, %v3498_v43  ;;  %v3499_v36 = vadd.f32 %v3467_v26, %v3409_v20 }
 0x5ce   : > { %v3560_v40 = vadd.f32 %v3528_v11, %v3496_v46  ;;  %v3497_v33 = vadd.f32 %v3465_v9, %v3401_v10 }
 0x5cf   : > { %3594 = vst.msk [vmem:[%s6115_s12 + $0xb0] sm:$0xff] %vm681_vm1, %v3562_v8  ;;  %v3563_v31 = vadd.f32 %v3531_v62, %v3499_v36 }
 0x5d0   : > { %3592 = vst.msk [vmem:[%s6115_s12 + $0xa0] sm:$0xff] %vm681_vm1, %v3560_v40  ;;  %v3561_v25 = vadd.f32 %v3529_v13, %v3497_v33  ;;  %v4128_v48 = vpop.f32.mrb[76].mxu1 }
 0x5d1   : > { %3595 = vst.msk [vmem:[%s6115_s12 + $0xb8] sm:$0xff] %vm681_vm1, %v3563_v31  ;;  %v3422_v54 = vadd.f32 %v4128_v48, %v6094_v59  ;;  %v3413_v35 = vpop.f32.mrb[77].mxu1 }
 0x5d2   : > { %3593 = vst.msk [vmem:[%s6115_s12 + $0xa8] sm:$0xff] %vm681_vm1, %v3561_v25  ;;  %v3414_v3 = vadd.f32 %v6094_v59, %v3413_v35  ;;  %v4129_v22 = vpop.f32.mrb[78].mxu1 }
 0x5d3   : > { %v3502_v21 = vadd.f32 %v3470_v50, %v3422_v54  ;;  %v3425_v16 = vadd.f32 %v4129_v22, %v6094_v59  ;;  %v3416_v52 = vpop.f32.mrb[79].mxu1 }
 0x5d4   : > { %v3500_v42 = vadd.f32 %v3468_v58, %v3414_v3  ;;  %v3417_v28 = vadd.f32 %v6094_v59, %v3416_v52 }
 0x5d5   : > { %v3566_v23 = vadd.f32 %v3534_v4, %v3502_v21  ;;  %v3503_v24 = vadd.f32 %v3471_v49, %v3425_v16 }
 0x5d6   : > { %v3564_v29 = vadd.f32 %v3532_v2, %v3500_v42  ;;  %v3501_v0 = vadd.f32 %v3469_v17, %v3417_v28 }
 0x5d7   : > { %3598 = vst.msk [vmem:[%s6115_s12 + $0xd0] sm:$0xff] %vm681_vm1, %v3566_v23  ;;  %v3567_v61 = vadd.f32 %v3535_v19, %v3503_v24 }
 0x5d8   : > { %3596 = vst.msk [vmem:[%s6115_s12 + $0xc0] sm:$0xff] %vm681_vm1, %v3564_v29  ;;  %v3565_v1 = vadd.f32 %v3533_v32, %v3501_v0  ;;  %v4132_v41 = vpop.f32.mrb[80].mxu1 }
 0x5d9   : > { %3599 = vst.msk [vmem:[%s6115_s12 + $0xd8] sm:$0xff] %vm681_vm1, %v3567_v61  ;;  %v3438_v18 = vadd.f32 %v4132_v41, %v6094_v59  ;;  %v3429_v14 = vpop.f32.mrb[81].mxu1 }
 0x5da   : > { %3597 = vst.msk [vmem:[%s6115_s12 + $0xc8] sm:$0xff] %vm681_vm1, %v3565_v1  ;;  %v3430_v63 = vadd.f32 %v6094_v59, %v3429_v14  ;;  %v4133_v44 = vpop.f32.mrb[82].mxu1 }
 0x5db   : > { %v3506_v15 = vadd.f32 %v3474_v37, %v3438_v18  ;;  %v3441_v6 = vadd.f32 %v4133_v44, %v6094_v59  ;;  %v3432_v12 = vpop.f32.mrb[83].mxu1 }
 0x5dc   : > { %v3504_v53 = vadd.f32 %v3472_v39, %v3430_v63  ;;  %v3433_v7 = vadd.f32 %v6094_v59, %v3432_v12 }
 0x5dd   : > { %v3570_v30 = vadd.f32 %v3538_v5, %v3506_v15  ;;  %v3507_v56 = vadd.f32 %v3475_v60, %v3441_v6 }
 0x5de   : > { %v3568_v51 = vadd.f32 %v3536_v38, %v3504_v53  ;;  %v3505_v47 = vadd.f32 %v3473_v34, %v3433_v7 }
 0x5df   : > { %3602 = vst.msk [vmem:[%s6115_s12 + $0xf0] sm:$0xff] %vm681_vm1, %v3570_v30  ;;  %v3571_v45 = vadd.f32 %v3539_v55, %v3507_v56 }
 0x5e0   : > { %3600 = vst.msk [vmem:[%s6115_s12 + $0xe0] sm:$0xff] %vm681_vm1, %v3568_v51  ;;  %v3569_v26 = vadd.f32 %v3537_v27, %v3505_v47 }
 0x5e1   : > { %3603 = vst.msk [vmem:[%s6115_s12 + $0xf8] sm:$0xff] %vm681_vm1, %v3571_v45 }
 0x5e2   : > { %3601 = vst.msk [vmem:[%s6115_s12 + $0xe8] sm:$0xff] %vm681_vm1, %v3569_v26 }
 0x5e3 PF: > { %s20_s15 = sadd.s32 1, %s4486_s15   ;;  %s6589_s13 = smov %s4482_s14 }
 0x5e4   : > { %p17_p5 = scmp.ge.s32.totalorder %s20_s15, 4   ;;  %s6590_s14 = smov %s6592_s16 }
 0x5e6   :  { %19 = sbr.rel (!%p17_p5) target bundleno = 2 (0x2), region = 113 }

// kernel: transform_forward.9
= control target key start
LH: loop header
LB: loop body
LE: loop exit
PB: predicated region body
PF: predicated region fallthrough
CT: control target
= control target key end

     0   :  { %s1296_s18 = smov 0   ;;  %s1298_s19 = smov 0   ;;  %s1464_s0 = inlined_call_operand.vmem [shape: bf16[2,18,18,4], index: 0, kind: input, shape index: {}, may-alias: {0,1,2}]   ;;  %s1465_s1 = inlined_call_operand.vmem [shape: bf16[2,18,18,4], index: 1, kind: input, shape index: {}, may-alias: {0,1,2}]   ;;  %s1466_s2 = inlined_call_operand.vmem [shape: bf16[2,18,18,4], index: 2, kind: input, shape index: {}, may-alias: {0,1,2}]   ;;  %s1467_s3 = inlined_call_operand.vmem [shape: bf16[9,4,4], index: 3, kind: input, shape index: {}]   ;;  %s1468_s4 = inlined_call_operand.vmem [shape: f32[1,4], index: 4, kind: input, shape index: {}]   ;;  %s1469_s5 = inlined_call_operand.vmem [shape: f32[2,16,16,4], index: 5, kind: output, shape index: {}]  }
   0x1   :  { %s1300_s20 = smov 0   ;;  %s1302_s21 = smov 0  }
   0x2   :  { %s1304_s22 = smov 0  }
   0x3 LB: > { %s24_s23 = sadd.s32 1, %s1254_s20  ;;  %s27_s24 = sadd.s32 1, %s1258_s21  ;;  %s1262_s22 = sphi %s1304_s22, %s15_s22   ;;  %s1258_s21 = sphi %s1302_s21, %s1473_s21   ;;  %s1254_s20 = sphi %s1300_s20, %s1472_s20   ;;  %s1250_s19 = sphi %s1298_s19, %s1471_s19   ;;  %s1246_s18 = sphi %s1296_s18, %s1470_s18  }
   0x4   : > { %p25_p0 = scmp.ge.s32.totalorder %s24_s23, 16  ;;  %p1057_p1 = scmp.ge.s32.totalorder %s1262_s22, 1 }
   0x5   : > { %p247_p2 = scmp.lt.s32.totalorder %s1262_s22, 33 }
   0x6   : > { %s1475_s23 = smov (%p25_p0, %s24_s23), 0  ;;  %s1477_s24 = smov (!%p25_p0, %s27_s24), %s1258_s21 }
   0x7   : > { %p248_p3 = pnand %p1057_p1, %p247_p2  ;;  %p29_p4 = scmp.ge.s32.totalorder %s1477_s24, 2 }
   0x8   : > { %v1064_v0 = vld [vmem:[%s1467_s3 + $0x2] sm:$0x3] (!%p248_p3)  ;;  %vm375_vm0 = vcmask (!%p248_p3), 1041408   ;;  %v346_v1 = vld [vmem:[%s1467_s3] sm:$0x3] (!%p248_p3)  ;;  %v1264_v2 = vmov (!%p248_p3), 0.0  }
   0x9   : > { %s1479_s24 = smov (%p29_p4, %s1477_s24), 0  ;;  %251 = sbr.rel (%p248_p3) target bundleno = 285 (0x11d), region = 40 }
   0xa   : > { %1113 = vmatprep.subr.bf16.mxu0 (!%p248_p3), %v1264_v2  ;;  %v377_v3 = vsel (!%p248_p3), %vm375_vm0, %v1064_v0, 0  ;;  %1119 = vmatprep.subr.bf16.mxu1 (!%p248_p3), %v1264_v2  ;;  %v423_v4 = vsel (!%p248_p3), %vm375_vm0, %v346_v1, 0  ;;  %p303_p5 = scmp.lt.s32.totalorder (!%p248_p3), %s1250_s19, 1  ;;  %p305_p6 = scmp.lt.s32.totalorder (!%p248_p3), %s1246_s18, 17  ;;  %vm1265_vm1 = vmmov (!%p248_p3), 0   ;;  %vm371_vm2 = vcmask (!%p248_p3), 31744  }
   0xb   : > { %1114 = vmatpush3.bf16.msra.mxu0 (!%p248_p3), %v377_v3  ;;  %1120 = vmatpush3.bf16.msra.mxu1 (!%p248_p3), %v423_v4  ;;  %s312_s6 = sadd.s32 (!%p248_p3), 1, %s1246_s18  ;;  %s323_s8 = sadd.s32 (!%p248_p3), 2, %s1246_s18  ;;  %v1072_v5 = vld [vmem:[%s1467_s3 + $0x6] sm:$0x3] (!%p248_p3)  ;;  %v1069_v15 = vld [vmem:[%s1467_s3 + $0x4] sm:$0x3] (!%p248_p3) }
   0xc   : > { %1115 = vmatprep.mubr.msk.bf16.mxu0 (!%p248_p3), %vm1265_vm1, %v1264_v2  ;;  %1121 = vmatprep.mubr.msk.bf16.mxu1 (!%p248_p3), %vm1265_vm1, %v1264_v2  ;;  %p315_p7 = scmp.lt.s32.totalorder (!%p248_p3), %s312_s6, 17  ;;  %p326_p8 = scmp.lt.s32.totalorder (!%p248_p3), %s323_s8, 17  ;;  %v538_v10 = vsel (!%p248_p3), %vm375_vm0, %v1072_v5, 0  ;;  %v1079_v16 = vld [vmem:[%s1467_s3 + $0xa] sm:$0x3] (!%p248_p3)  ;;  %v480_v21 = vsel (!%p248_p3), %vm375_vm0, %v1069_v15, 0 }
   0xd   : > { %1125 = vmatprep.subr.bf16.mxu0 (!%p248_p3), %v1264_v2  ;;  %1131 = vmatprep.subr.bf16.mxu1 (!%p248_p3), %v1264_v2  ;;  %vm358_vm3 = vsmask.f32 (!%p248_p3), 7424  ;;  %vm472_vm4 = vcmask (!%p248_p3), 1046528   ;;  %v670_v22 = vsel (!%p248_p3), %vm375_vm0, %v1079_v16, 0  ;;  %v1075_v34 = vld [vmem:[%s1467_s3 + $0x8] sm:$0x3] (!%p248_p3) }
   0xe   : > { %v1085_v45 = vld [vmem:[%s1467_s3 + $0xe] sm:$0x3] (!%p248_p3)  ;;  %v612_v47 = vsel (!%p248_p3), %vm375_vm0, %v1075_v34, 0  ;;  %v1082_v55 = vld [vmem:[%s1467_s3 + $0xc] sm:$0x3] (!%p248_p3)  ;;  %p336_p9 = scmp.lt.s32.totalorder (!%p248_p3), %s1246_s18, 15 }
   0xf   : > { %v802_v52 = vsel (!%p248_p3), %vm375_vm0, %v1085_v45, 0  ;;  %v728_v59 = vsel (!%p248_p3), %vm375_vm0, %v1082_v55, 0  ;;  %v1089_v62 = vld [vmem:[%s1467_s3 + $0x10] sm:$0x3] (!%p248_p3) }
  0x10   : > { %s1481_s19 = smov (!%p303_p5, %s1250_s19), 1  ;;  %s1483_s6 = smov (!%p315_p7, %s312_s6), 17  ;;  %v860_v1 = vsel %vm375_vm0, %v1089_v62, 0 }
  0x11   : > { %s306_s29 = scalar_select %p305_p6, %s1246_s18, 17 }
  0x12   : > { %s1353_s30 = smul.u32 54, %s1481_s19  ;;  %s1485_s8 = smov (!%p326_p8, %s323_s8), 17 }
  0x13   : > { %s1167_s7 = smul.u32 3, %s306_s29  ;;  %s1487_s18 = smov (!%p336_p9, %s1246_s18), 15 }
  0x14   : > { %s1169_s16 = smul.u32 3, %s1483_s6 }
  0x15   : > { %s309_s9 = sadd.s32 %s1353_s30, %s1167_s7  ;;  %s1170_s28 = smul.u32 3, %s1485_s8 }
  0x16   : > { %s1058_s10 = sshll.u32 %s309_s9, 2  ;;  %s319_s29 = sadd.s32 %s1169_s16, %s1353_s30 }
  0x17   : > { %s311_s15 = scalar_lea.vmem %s1464_s0, %s1058_s10  ;;  %s1059_s6 = sshll.u32 %s319_s29, 2 }
  0x18   : > { %v344_v6 = vld [vmem:[%s311_s15] sm:$0xf]  ;;  %v345_v7 = vld [vmem:[%s311_s15 + $0x4] sm:$0xf]  ;;  %s330_s7 = sadd.s32 %s1170_s28, %s1353_s30  ;;  %s321_s11 = scalar_lea.vmem %s1465_s1, %s1059_s6 }
  0x19   : > { %v1065_v8 = vcombine.low %v344_v6, %v345_v7  ;;  %v1214_v9 = vld [vmem:[%s311_s15 + $0x8] ss:$0 sps:$4 sm:$0x11]   ;;  %v466_v14 = vld [vmem:[%s311_s15] sm:$0xe]  ;;  %s1060_s8 = sshll.u32 %s330_s7, 2 }
  0x1a   : > { %v367_v13 = vshll.u32 %v1214_v9, 16  ;;  %v1070_v19 = vcombine.low %v466_v14, %v345_v7  ;;  %v474_v23 = vrot.slane %v1214_v9, 1  ;;  %v1216_v24 = vld [vmem:[%s321_s11] sm:$0xff]   ;;  %s1385_s14 = scalar_lea.vmem %s1466_s2, %s1060_s8  ;;  %v1218_v30 = vld [vmem:[%s321_s11 + $0x8] ss:$0 sps:$4 sm:$0x11]  }
  0x1b   : > { %v360_v11 = vshrl.u32 %v1065_v8, 16  ;;  %v362_v12 = vshll.u32 %v1065_v8, 16  ;;  %1122 = vmatmul.mubr.msk.bf16.vlgmr.msra.gmra.mrb[0].mxu1 %vm371_vm2, %v1065_v8  ;;  %v583_v26 = vld [vmem:[%s321_s11] sm:$0xf]  ;;  %v584_v27 = vld [vmem:[%s321_s11 + $0x4] sm:$0xf] }
  0x1c   : > { %1132 = vmatpush3.bf16.msra.mxu1 %v538_v10  ;;  %1133 = vmatprep.mubr.msk.bf16.mxu1 %vm1265_vm1, %v1264_v2  ;;  %v369_v18 = vrot.slane %v367_v13, 1  ;;  %v473_v28 = vrot.slane %v1070_v19, 1  ;;  %v1076_v29 = vcombine.low %v583_v26, %v584_v27  ;;  %v657_v31 = vld [vmem:[%s321_s11] sm:$0xe]  ;;  %v664_v36 = vrot.slane %v1218_v30, 1  ;;  %s1061_s29 = sshll.u32 %s1487_s18, 1 }
  0x1d   : > { %v364_v17 = vrot.slane %v362_v12, 1  ;;  %1143 = vmatprep.subr.bf16.mxu1 %v1264_v2  ;;  %v1080_v32 = vcombine.low %v657_v31, %v584_v27  ;;  %v773_v33 = vld [vmem:[%s1385_s14] sm:$0xf]  ;;  %v774_v37 = vld [vmem:[%s1385_s14 + $0x4] sm:$0xf]  ;;  %v604_v44 = vshll.u32 %v1218_v30, 16 }
  0x1e   : > { %v599_v35 = vshll.u32 %v1076_v29, 16  ;;  %v1086_v39 = vcombine.low %v773_v33, %v774_v37  ;;  %v1222_v40 = vld [vmem:[%s1385_s14 + $0x8] ss:$0 sps:$4 sm:$0x11]   ;;  %v475_v41 = vsel %vm472_vm4, %v473_v28, %v474_v23  ;;  %v597_v42 = vshrl.u32 %v1076_v29, 16  ;;  %v1220_v63 = vld [vmem:[%s1385_s14] sm:$0xff]  }
  0x1f   : > { %v365_v20 = vor.u32 %v364_v17, %v360_v11  ;;  %v663_v38 = vrot.slane %v1080_v32, 1  ;;  %v794_v51 = vshll.u32 %v1222_v40, 16  ;;  %v606_v54 = vrot.slane %v604_v44, 1  ;;  %v847_v61 = vld [vmem:[%s1385_s14] sm:$0xe]  ;;  %s1062_s6 = sshll.u32 %s1481_s19, 5 }
  0x20   : > { %v601_v43 = vrot.slane %v599_v35, 1  ;;  %v789_v46 = vshll.u32 %v1086_v39, 16  ;;  %v787_v49 = vshrl.u32 %v1086_v39, 16  ;;  %v1090_v0 = vcombine.low %v847_v61, %v774_v37  ;;  %s340_s7 = sadd.s32 %s1062_s6, %s1061_s29 }
  0x21   : > { %v370_v25 = vsel %vm358_vm3, %v365_v20, %v369_v18  ;;  %v665_v48 = vsel %vm472_vm4, %v663_v38, %v664_v36  ;;  %v796_v57 = vrot.slane %v794_v51, 1  ;;  %v854_v4 = vrot.slane %v1222_v40, 1  ;;  %s1063_s9 = sshll.u32 %s340_s7, 3 }
  0x22   : > { %1116 = vmatmul.mubr.msk.bf16.vlgmr.msra.gmra.mrb[0].mxu0 %vm371_vm2, %v370_v25  ;;  %v791_v50 = vrot.slane %v789_v46, 1  ;;  %v602_v53 = vor.u32 %v601_v43, %v597_v42  ;;  %v853_v3 = vrot.slane %v1090_v0, 1  ;;  %s342_s13 = scalar_lea.vmem %s1469_s5, %s1063_s9 }
  0x23   : > { %1126 = vmatpush3.bf16.msra.mxu0 %v480_v21  ;;  %1127 = vmatprep.mubr.msk.bf16.mxu0 %vm1265_vm1, %v1264_v2 }
  0x24   : > { %1137 = vmatprep.subr.bf16.mxu0 %v1264_v2  ;;  %1134 = vmatmul.mubr.msk.bf16.vlgmr.msra.gmra.mrb[4].mxu1 %vm371_vm2, %v1216_v24  ;;  %v792_v56 = vor.u32 %v791_v50, %v787_v49  ;;  %v607_v58 = vsel %vm358_vm3, %v602_v53, %v606_v54  ;;  %v855_v5 = vsel %vm472_vm4, %v853_v3, %v854_v4 }
  0x25   : > { %1144 = vmatpush3.bf16.msra.mxu1 %v670_v22  ;;  %1145 = vmatprep.mubr.msk.bf16.mxu1 %vm1265_vm1, %v1264_v2 }
  0x26   : > { %1155 = vmatprep.subr.bf16.mxu1 %v1264_v2  ;;  %v797_v60 = vsel %vm358_vm3, %v792_v56, %v796_v57 }
  0x2a   : > { %1128 = vmatmul.mubr.msk.bf16.vlgmr.msra.gmra.mrb[4].mxu0 %vm371_vm2, %v475_v41 }
  0x2b   : > { %1138 = vmatpush3.bf16.msra.mxu0 %v612_v47  ;;  %1139 = vmatprep.mubr.msk.bf16.mxu0 %vm1265_vm1, %v1264_v2 }
  0x2c   : > { %1149 = vmatprep.subr.bf16.mxu0 %v1264_v2  ;;  %1146 = vmatmul.mubr.msk.bf16.vlgmr.msra.gmra.mrb[8].mxu1 %vm371_vm2, %v665_v48 }
  0x2d   : > { %1156 = vmatpush3.bf16.msra.mxu1 %v802_v52  ;;  %1157 = vmatprep.mubr.msk.bf16.mxu1 %vm1265_vm1, %v1264_v2  ;;  %v1092_v52 = vld [vmem:[%s1468_s4] ss:$0 sm:$0xff] }
  0x32   : > { %1140 = vmatmul.mubr.msk.bf16.vlgmr.msra.gmra.mrb[8].mxu0 %vm371_vm2, %v607_v58 }
  0x33   : > { %1150 = vmatpush3.bf16.msra.mxu0 %v728_v59  ;;  %1151 = vmatprep.mubr.msk.bf16.mxu0 %vm1265_vm1, %v1264_v2 }
  0x34   : > { %1161 = vmatprep.subr.bf16.mxu0 %v1264_v2  ;;  %1158 = vmatmul.mubr.msk.bf16.vlgmr.msra.gmra.mrb[12].mxu1 %vm371_vm2, %v797_v60 }
  0x3a   : > { %1152 = vmatmul.mubr.msk.bf16.vlgmr.msra.gmra.mrb[12].mxu0 %vm371_vm2, %v1220_v63 }
  0x3b   : > { %1162 = vmatpush3.bf16.msra.mxu0 %v860_v1  ;;  %1163 = vmatprep.mubr.msk.bf16.mxu0 %vm1265_vm1, %v1264_v2 }
  0x42   : > { %1164 = vmatmul.mubr.msk.bf16.vlgmr.msra.gmra.mrb[16].mxu0 %vm371_vm2, %v855_v5 }
  0xee   : > { %v459_v6 = vpop.f32.mrb[0].mxu1 }
  0xef   : > { %v1123_v7 = vpop.f32.mrb[1].mxu1 }
  0xf0   : > { %v462_v8 = vpop.f32.mrb[2].mxu1 }
  0xf1   : > { %v1124_v9 = vpop.f32.mrb[3].mxu1 }
  0xf5   : > { %v413_v10 = vpop.f32.mrb[0].mxu0 }
  0xf6   : > { %v460_v11 = vadd.f32 %v459_v6, %v413_v10  ;;  %v1117_v12 = vpop.f32.mrb[1].mxu0 }
  0xf7   : > { %v416_v13 = vpop.f32.mrb[2].mxu0  ;;  %v574_v14 = vpop.f32.mrb[4].mxu1 }
  0xf8   : > { %v463_v15 = vadd.f32 %v462_v8, %v416_v13  ;;  %v1118_v16 = vpop.f32.mrb[3].mxu0  ;;  %v1135_v17 = vpop.f32.mrb[5].mxu1 }
  0xf9   : > { %v577_v18 = vpop.f32.mrb[6].mxu1 }
  0xfa   : > { %v1136_v2 = vpop.f32.mrb[7].mxu1 }
  0xfd   : > { %v516_v19 = vpop.f32.mrb[4].mxu0 }
  0xfe   : > { %v523_v20 = vadd.f32 %v516_v19, %v460_v11  ;;  %v1129_v21 = vpop.f32.mrb[5].mxu0 }
  0xff   : > { %v519_v22 = vpop.f32.mrb[6].mxu0  ;;  %v706_v23 = vpop.f32.mrb[8].mxu1 }
 0x100   : > { %v524_v24 = vadd.f32 %v519_v22, %v463_v15  ;;  %v581_v25 = vadd.f32 %v574_v14, %v523_v20  ;;  %v1130_v26 = vpop.f32.mrb[7].mxu0  ;;  %v1147_v27 = vpop.f32.mrb[9].mxu1 }
 0x101   : > { %v709_v28 = vpop.f32.mrb[10].mxu1 }
 0x102   : > { %v582_v29 = vadd.f32 %v577_v18, %v524_v24  ;;  %v1148_v30 = vpop.f32.mrb[11].mxu1 }
 0x105   : > { %v648_v31 = vpop.f32.mrb[8].mxu0 }
 0x106   : > { %v655_v32 = vadd.f32 %v648_v31, %v581_v25  ;;  %v1141_v33 = vpop.f32.mrb[9].mxu0 }
 0x107   : > { %v651_v34 = vpop.f32.mrb[10].mxu0  ;;  %v838_v35 = vpop.f32.mrb[12].mxu1 }
 0x108   : > { %v656_v36 = vadd.f32 %v651_v34, %v582_v29  ;;  %v713_v37 = vadd.f32 %v706_v23, %v655_v32  ;;  %v1142_v38 = vpop.f32.mrb[11].mxu0  ;;  %v1159_v39 = vpop.f32.mrb[13].mxu1 }
 0x109   : > { %v841_v40 = vpop.f32.mrb[14].mxu1 }
 0x10a   : > { %v714_v41 = vadd.f32 %v709_v28, %v656_v36  ;;  %v1160_v42 = vpop.f32.mrb[15].mxu1 }
 0x10d   : > { %v764_v43 = vpop.f32.mrb[12].mxu0 }
 0x10e   : > { %v771_v44 = vadd.f32 %v764_v43, %v713_v37  ;;  %v1153_v45 = vpop.f32.mrb[13].mxu0 }
 0x10f   : > { %v767_v46 = vpop.f32.mrb[14].mxu0 }
 0x110   : > { %v772_v47 = vadd.f32 %v767_v46, %v714_v41  ;;  %v845_v48 = vadd.f32 %v838_v35, %v771_v44  ;;  %v1154_v49 = vpop.f32.mrb[15].mxu0 }
 0x112   : > { %v846_v50 = vadd.f32 %v841_v40, %v772_v47 }
 0x115   : > { %v896_v51 = vpop.f32.mrb[16].mxu0 }
 0x116   : > { %v903_v53 = vadd.f32 %v896_v51, %v845_v48  ;;  %v1165_v54 = vpop.f32.mrb[17].mxu0 }
 0x117   : > { %v899_v55 = vpop.f32.mrb[18].mxu0 }
 0x118   : > { %v912_v56 = vadd.f32 %v1092_v52, %v903_v53  ;;  %v904_v57 = vadd.f32 %v899_v55, %v846_v50  ;;  %v1166_v58 = vpop.f32.mrb[19].mxu0 }
 0x11a   : > { %914 = vst.msk [vmem:[%s342_s13] sm:$0xff] %vm371_vm2, %v912_v56  ;;  %v913_v59 = vadd.f32 %v1092_v52, %v904_v57 }
 0x11c   : > { %915 = vst.msk [vmem:[%s342_s13 + $0x8] sm:$0xff] %vm371_vm2, %v913_v59 }
 0x11d PF: > { %s15_s22 = sadd.s32 1, %s1262_s22   ;;  %s1470_s18 = smov %s1254_s20 }
 0x11e   : > { %p12_p10 = scmp.ge.s32.totalorder %s15_s22, 34   ;;  %s1471_s19 = smov %s1258_s21 }
 0x11f   : > { %s1472_s20 = smov %s1475_s23  ;;  %s1473_s21 = smov %s1479_s24 }
 0x120   :  { %14 = sbr.rel (!%p12_p10) target bundleno = 3 (0x3), region = 84 }

</bundles_post_ra>
